<compile_context>
chip_gen: v7x
topology: tpu7x:2x2x1
jax: 0.10.0
libtpu: 0.0.40
codegen_flags: <defaults>
</compile_context>

<pallas_src>
import functools

import numpy as np
import jax
import jax.numpy as jnp
from jax.experimental import pallas as pl
from jax.experimental.pallas import tpu as pltpu

# Static geometry from the PyTorch module (28x28 input -> 64*7*7 fc).
IMG = 28
P1, P1_PAD = 14 * 14, 200      # positions after conv1 / conv2 (stride 2 then 1)
P3, P3_PAD = 7 * 7, 56         # positions after conv3 / conv4
NCLS_PAD = 16                  # padded fc output lanes (>= num_classes)


# ----------------------------------------------------------------------------
# Fused decoder kernel
# ----------------------------------------------------------------------------
def _tap_conv(x, g_ref, w_ref, b_ref):
    """One conv layer: gather(im2col)-matmul + 9 tap matmuls + bias + LeakyReLU.

    x:     (S, Cin)      f32 activations of previous layer (padded rows ok)
    g_ref: (9*P, S)      bf16 one-hot gather matrix (tap-major rows)
    w_ref: (9*Cin, Cout) bf16 flattened conv weight (tap-major rows)
    b_ref: (1, Cout)     f32
    returns (P, Cout) f32
    """
    cin = w_ref.shape[0] // 9
    p = g_ref.shape[0] // 9
    # Exact tap selection of bf16-rounded activations via one-hot MXU matmul.
    cols = jnp.dot(g_ref[...], x.astype(jnp.bfloat16),
                   preferred_element_type=jnp.float32)            # (9P, Cin)
    acc = None
    for t in range(9):
        col_t = cols[t * p:(t + 1) * p, :].astype(jnp.bfloat16)   # (P, Cin)
        w_t = w_ref[t * cin:(t + 1) * cin, :]                     # (Cin, Cout)
        y = jnp.dot(col_t, w_t, preferred_element_type=jnp.float32)
        acc = y if acc is None else acc + y
    acc = acc + b_ref[...]
    return jnp.where(acc >= 0.0, acc, 0.2 * acc)                  # LeakyReLU(0.2)


def _decoder_kernel(p1_ref, w1_ref, b1_ref,
                    g2_ref, w2_ref, b2_ref,
                    g3_ref, w3_ref, b3_ref,
                    g4_ref, w4_ref, b4_ref,
                    afc_ref, bfc_ref, o_ref):
    # conv1: patches already im2col'ed by the (jit-fused, cheap) wrapper.
    p1 = p1_ref[0].astype(jnp.bfloat16)                           # (200, 18)
    acc = jnp.dot(p1, w1_ref[...], preferred_element_type=jnp.float32)
    acc = acc + b1_ref[...]
    x = jnp.where(acc >= 0.0, acc, 0.2 * acc)                     # (200, 32)

    x = _tap_conv(x, g2_ref, w2_ref, b2_ref)                      # (200, 32)
    x = _tap_conv(x, g3_ref, w3_ref, b3_ref)                      # (56, 64)
    x = _tap_conv(x, g4_ref, w4_ref, b4_ref)                      # (56, 64)

    # fc: logits[n] = sum_{p,c} x[p,c] * A[n,p,c] + b[n]   (A pre-permuted to
    # PyTorch's NCHW flatten order, zero-padded rows/lanes kill garbage rows).
    prod = afc_ref[...] * x[None, :, :]                           # (16, 56, 64)
    t = jnp.sum(prod, axis=2)                                     # (16, 56)
    logits = jnp.sum(t, axis=1, keepdims=True) + bfc_ref[...]     # (16, 1)
    o_ref[0] = logits


# ----------------------------------------------------------------------------
# Wrapper: layer-1 im2col (plain XLA, fused under jit) + pallas_call
# ----------------------------------------------------------------------------
def _im2col_conv1(z, c):
    """Layer-1 im2col (k=3, stride=2, pad=1); tap-major, channel-minor order."""
    b = z.shape[0]
    x = jnp.concatenate([z, c], axis=1)                 # (B, 2, 28, 28) NCHW
    x = x.transpose(0, 2, 3, 1)                         # (B, 28, 28, 2) NHWC
    xp = jnp.pad(x, ((0, 0), (1, 1), (1, 1), (0, 0)))
    taps = []
    for kh in range(3):
        for kw in range(3):
            taps.append(xp[:, kh:kh + 2 * 14:2, kw:kw + 2 * 14:2, :])  # (B,14,14,2)
    col = jnp.concatenate(taps, axis=-1)                # (B, 14, 14, 18)
    col = col.reshape(b, P1, 18)
    return jnp.pad(col, ((0, 0), (0, P1_PAD - P1), (0, 0)))            # (B, 200, 18)


def _const_index_map(ndim):
    zeros = (0,) * ndim

    def imap(i):
        return zeros

    return imap


def _full_spec(arr):
    return pl.BlockSpec(arr.shape, _const_index_map(arr.ndim))


@functools.partial(jax.jit, static_argnames=("num_classes",))
def decoder_forward(kp, z, c, num_classes=10):
    b = z.shape[0]
    patches1 = _im2col_conv1(z, c)                      # (B, 200, 18) f32
    operands = (patches1,
                kp["w1"], kp["b1"],
                kp["g2"], kp["w2"], kp["b2"],
                kp["g3"], kp["w3"], kp["b3"],
                kp["g4"], kp["w4"], kp["b4"],
                kp["afc"], kp["bfc"])
    in_specs = [pl.BlockSpec((1, P1_PAD, 18), lambda i: (i, 0, 0))]
    in_specs += [_full_spec(o) for o in operands[1:]]

    out = pl.pallas_call(
        _decoder_kernel,
        out_shape=jax.ShapeDtypeStruct((b, NCLS_PAD, 1), jnp.float32),
        grid=(b,),
        in_specs=in_specs,
        out_specs=pl.BlockSpec((1, NCLS_PAD, 1), lambda i: (i, 0, 0)),
        compiler_params=pltpu.CompilerParams(
            dimension_semantics=("parallel",)),
    )(*operands)
    return out[:, :num_classes, 0]                      # (B, num_classes)


# ----------------------------------------------------------------------------
# Parameters: PyTorch-layout init + one-time kernel-layout preparation
# ----------------------------------------------------------------------------
def init_decoder_params(key, num_classes=10):
    """PyTorch-layout parameters (Conv2d OIHW weights, Linear (out,in))."""
    def conv_p(k, cout, cin):
        k1, k2 = jax.random.split(k)
        bound = 1.0 / np.sqrt(cin * 9)
        w = jax.random.uniform(k1, (cout, cin, 3, 3), jnp.float32, -bound, bound)
        bias = jax.random.uniform(k2, (cout,), jnp.float32, -bound, bound)
        return w, bias

    keys = jax.random.split(key, 5)
    params = {
        "conv1": conv_p(keys[0], 32, 2),
        "conv2": conv_p(keys[1], 32, 32),
        "conv3": conv_p(keys[2], 64, 32),
        "conv4": conv_p(keys[3], 64, 64),
    }
    k1, k2 = jax.random.split(keys[4])
    bound = 1.0 / np.sqrt(64 * 7 * 7)
    params["fc_w"] = jax.random.uniform(k1, (num_classes, 64 * 7 * 7),
                                        jnp.float32, -bound, bound)
    params["fc_b"] = jax.random.uniform(k2, (num_classes,),
                                        jnp.float32, -bound, bound)
    return params


def _gather_matrix(h, w, stride, s_pad, p_pad):
    """One-hot im2col selection matrix for a k=3, pad=1 conv (tap-major rows)."""
    ho = (h + 2 - 3) // stride + 1
    wo = (w + 2 - 3) // stride + 1
    g = np.zeros((9 * p_pad, s_pad), np.float32)
    for kh in range(3):
        for kw in range(3):
            t = kh * 3 + kw
            for oh in range(ho):
                ih = stride * oh + kh - 1
                if ih < 0 or ih >= h:
                    continue
                for ow in range(wo):
                    iw = stride * ow + kw - 1
                    if iw < 0 or iw >= w:
                        continue
                    g[t * p_pad + oh * wo + ow, ih * w + iw] = 1.0
    return jnp.asarray(g, jnp.bfloat16)


def _flatten_conv_w(w):
    """(Cout, Cin, 3, 3) OIHW -> (9*Cin, Cout), rows ordered (kh*3+kw)*Cin + cin."""
    cout, cin = w.shape[0], w.shape[1]
    return jnp.transpose(w, (2, 3, 1, 0)).reshape(9 * cin, cout).astype(jnp.bfloat16)


def prepare_decoder_params(params, num_classes=10):
    """One-time conversion to kernel-ready layouts (bf16 weights, gather mats)."""
    kp = {}
    for i, name in enumerate(["conv1", "conv2", "conv3", "conv4"], start=1):
        w, bias = params[name]
        kp[f"w{i}"] = _flatten_conv_w(w)
        kp[f"b{i}"] = bias.reshape(1, -1).astype(jnp.float32)
    kp["g2"] = _gather_matrix(14, 14, 1, P1_PAD, P1_PAD)   # (1800, 200)
    kp["g3"] = _gather_matrix(14, 14, 2, P1_PAD, P3_PAD)   # (504, 200)
    kp["g4"] = _gather_matrix(7, 7, 1, P3_PAD, P3_PAD)     # (504, 56)
    # fc weight re-laid out to A[n, p, c] = fc_w[n, c*49 + p], zero-padded.
    a = jnp.transpose(params["fc_w"].reshape(num_classes, 64, P3), (0, 2, 1))
    afc = jnp.zeros((NCLS_PAD, P3_PAD, 64), jnp.float32)
    kp["afc"] = afc.at[:num_classes, :P3, :].set(a)
    bfc = jnp.zeros((NCLS_PAD, 1), jnp.float32)
    kp["bfc"] = bfc.at[:num_classes, 0].set(params["fc_b"])
    return kp


# ----------------------------------------------------------------------------
# Plain-JAX reference (matches the PyTorch module) for a correctness check
# ----------------------------------------------------------------------------
def reference_forward(params, z, c):
    x = jnp.concatenate([z, c], axis=1)

    def conv(x, wb, stride):
        w, bias = wb
        y = jax.lax.conv_general_dilated(
            x, w, (stride, stride), ((1, 1), (1, 1)),
            dimension_numbers=("NCHW", "OIHW", "NCHW"))
        y = y + bias.reshape(1, -1, 1, 1)
        return jnp.where(y >= 0.0, y, 0.2 * y)

    x = conv(x, params["conv1"], 2)
    x = conv(x, params["conv2"], 1)
    x = conv(x, params["conv3"], 2)
    x = conv(x, params["conv4"], 1)
    x = x.reshape(x.shape[0], -1)                       # PyTorch flatten (C,H,W)
    return x @ params["fc_w"].T + params["fc_b"]


if __name__ == "__main__":
    key = jax.random.PRNGKey(0)
    k_params, k_z = jax.random.split(key)

    B = 2  # img_dim must be 28 so the conv stack produces 64*7*7 for the fc.
    params = init_decoder_params(k_params, num_classes=10)
    kp = prepare_decoder_params(params, num_classes=10)

    z = jax.random.normal(k_z, (B, 1, IMG, IMG), jnp.float32)
    c = jnp.ones((B, 1, IMG, IMG), jnp.float32)         # matches `c = torch.ones(...)`

    out = decoder_forward(kp, z, c)
    out = jax.block_until_ready(out)
    assert out.shape == (B, 10) and out.dtype == jnp.float32

    ref = reference_forward(params, z, c)
    err = float(jnp.max(jnp.abs(out - ref)))
    assert err < 2e-2, f"mismatch vs reference: {err}"
    print("KERNEL_OK")
</pallas_src>

<mosaic_0001>
module attributes {stable_mosaic.version = 11 : i64} {
  func.func @_decoder_kernel(%arg0: i32, %arg1: memref<1x200x18xf32, #tpu.memory_space<vmem>>, %arg2: memref<18x32xbf16, #tpu.memory_space<vmem>>, %arg3: memref<1x32xf32, #tpu.memory_space<vmem>>, %arg4: memref<1800x200xbf16, #tpu.memory_space<vmem>>, %arg5: memref<288x32xbf16, #tpu.memory_space<vmem>>, %arg6: memref<1x32xf32, #tpu.memory_space<vmem>>, %arg7: memref<504x200xbf16, #tpu.memory_space<vmem>>, %arg8: memref<288x64xbf16, #tpu.memory_space<vmem>>, %arg9: memref<1x64xf32, #tpu.memory_space<vmem>>, %arg10: memref<504x56xbf16, #tpu.memory_space<vmem>>, %arg11: memref<576x64xbf16, #tpu.memory_space<vmem>>, %arg12: memref<1x64xf32, #tpu.memory_space<vmem>>, %arg13: memref<16x56x64xf32, #tpu.memory_space<vmem>>, %arg14: memref<16x1xf32, #tpu.memory_space<vmem>>, %arg15: memref<1x16x1xf32, #tpu.memory_space<vmem>>) attributes {dimension_semantics = [#tpu.dimension_semantics<parallel>], iteration_bounds = array<i64: 2>, scalar_prefetch = 0 : i64, scratch_operands = 0 : i64, tpu.core_type = #tpu.core_type<tc>, window_params = [{transform_indices = @transform_0, window_bounds = array<i64: 1, 200, 18>}, {pipeline_mode = #tpu.pipeline_mode<synchronous>, transform_indices = @transform_1, window_bounds = array<i64: 18, 32>}, {pipeline_mode = #tpu.pipeline_mode<synchronous>, transform_indices = @transform_2, window_bounds = array<i64: 1, 32>}, {pipeline_mode = #tpu.pipeline_mode<synchronous>, transform_indices = @transform_3, window_bounds = array<i64: 1800, 200>}, {pipeline_mode = #tpu.pipeline_mode<synchronous>, transform_indices = @transform_4, window_bounds = array<i64: 288, 32>}, {pipeline_mode = #tpu.pipeline_mode<synchronous>, transform_indices = @transform_5, window_bounds = array<i64: 1, 32>}, {pipeline_mode = #tpu.pipeline_mode<synchronous>, transform_indices = @transform_6, window_bounds = array<i64: 504, 200>}, {pipeline_mode = #tpu.pipeline_mode<synchronous>, transform_indices = @transform_7, window_bounds = array<i64: 288, 64>}, {pipeline_mode = #tpu.pipeline_mode<synchronous>, transform_indices = @transform_8, window_bounds = array<i64: 1, 64>}, {pipeline_mode = #tpu.pipeline_mode<synchronous>, transform_indices = @transform_9, window_bounds = array<i64: 504, 56>}, {pipeline_mode = #tpu.pipeline_mode<synchronous>, transform_indices = @transform_10, window_bounds = array<i64: 576, 64>}, {pipeline_mode = #tpu.pipeline_mode<synchronous>, transform_indices = @transform_11, window_bounds = array<i64: 1, 64>}, {pipeline_mode = #tpu.pipeline_mode<synchronous>, transform_indices = @transform_12, window_bounds = array<i64: 16, 56, 64>}, {pipeline_mode = #tpu.pipeline_mode<synchronous>, transform_indices = @transform_13, window_bounds = array<i64: 16, 1>}, {transform_indices = @transform_14, window_bounds = array<i64: 1, 16, 1>}]} {
    %c0 = arith.constant 0 : index
    %c0_0 = arith.constant 0 : index
    %c0_1 = arith.constant 0 : index
    %0 = vector.load %arg1[%c0, %c0_0, %c0_1] : memref<1x200x18xf32, #tpu.memory_space<vmem>>, vector<1x200x18xf32>
    %1 = vector.shape_cast %0 : vector<1x200x18xf32> to vector<200x18xf32>
    %2 = arith.truncf %1 : vector<200x18xf32> to vector<200x18xbf16>
    %c0_2 = arith.constant 0 : index
    %c0_3 = arith.constant 0 : index
    %3 = vector.load %arg2[%c0_2, %c0_3] : memref<18x32xbf16, #tpu.memory_space<vmem>>, vector<18x32xbf16>
    %cst = arith.constant dense<0.000000e+00> : vector<200x32xf32>
    %4 = tpu.matmul %2, %3, %cst {dimension_numbers = #tpu.dot_dimension_numbers<[1], [0], [0], [1], [0, 0, 1, 1], [], []>} : vector<200x18xbf16>, vector<18x32xbf16>, vector<200x32xf32> -> vector<200x32xf32>
    %c0_4 = arith.constant 0 : index
    %c0_5 = arith.constant 0 : index
    %5 = vector.load %arg3[%c0_4, %c0_5] : memref<1x32xf32, #tpu.memory_space<vmem>>, vector<1x32xf32>
    %6 = vector.broadcast %5 : vector<1x32xf32> to vector<200x32xf32>
    %7 = arith.addf %4, %6 : vector<200x32xf32>
    %cst_6 = arith.constant 0.000000e+00 : f32
    %8 = vector.broadcast %cst_6 : f32 to vector<200x32xf32>
    %9 = arith.cmpf oge, %7, %8 : vector<200x32xf32>
    %cst_7 = arith.constant 2.000000e-01 : f32
    %10 = vector.broadcast %cst_7 : f32 to vector<200x32xf32>
    %11 = arith.mulf %10, %7 : vector<200x32xf32>
    %12 = arith.select %9, %7, %11 : vector<200x32xi1>, vector<200x32xf32>
    %c0_8 = arith.constant 0 : index
    %c0_9 = arith.constant 0 : index
    %13 = vector.load %arg4[%c0_8, %c0_9] : memref<1800x200xbf16, #tpu.memory_space<vmem>>, vector<1800x200xbf16>
    %14 = arith.truncf %12 : vector<200x32xf32> to vector<200x32xbf16>
    %cst_10 = arith.constant dense<0.000000e+00> : vector<1800x32xf32>
    %15 = tpu.matmul %13, %14, %cst_10 {dimension_numbers = #tpu.dot_dimension_numbers<[1], [0], [0], [1], [0, 0, 1, 1], [], []>} : vector<1800x200xbf16>, vector<200x32xbf16>, vector<1800x32xf32> -> vector<1800x32xf32>
    %16 = vector.extract_strided_slice %15 {offsets = [0, 0], sizes = [200, 32], strides = [1, 1]} : vector<1800x32xf32> to vector<200x32xf32>
    %17 = arith.truncf %16 : vector<200x32xf32> to vector<200x32xbf16>
    %c0_11 = arith.constant 0 : index
    %c0_12 = arith.constant 0 : index
    %18 = vector.load %arg5[%c0_11, %c0_12] : memref<288x32xbf16, #tpu.memory_space<vmem>>, vector<32x32xbf16>
    %cst_13 = arith.constant dense<0.000000e+00> : vector<200x32xf32>
    %19 = tpu.matmul %17, %18, %cst_13 {dimension_numbers = #tpu.dot_dimension_numbers<[1], [0], [0], [1], [0, 0, 1, 1], [], []>} : vector<200x32xbf16>, vector<32x32xbf16>, vector<200x32xf32> -> vector<200x32xf32>
    %20 = vector.extract_strided_slice %15 {offsets = [200, 0], sizes = [200, 32], strides = [1, 1]} : vector<1800x32xf32> to vector<200x32xf32>
    %21 = arith.truncf %20 : vector<200x32xf32> to vector<200x32xbf16>
    %c32 = arith.constant 32 : index
    %c0_14 = arith.constant 0 : index
    %22 = vector.load %arg5[%c32, %c0_14] : memref<288x32xbf16, #tpu.memory_space<vmem>>, vector<32x32xbf16>
    %cst_15 = arith.constant dense<0.000000e+00> : vector<200x32xf32>
    %23 = tpu.matmul %21, %22, %cst_15 {dimension_numbers = #tpu.dot_dimension_numbers<[1], [0], [0], [1], [0, 0, 1, 1], [], []>} : vector<200x32xbf16>, vector<32x32xbf16>, vector<200x32xf32> -> vector<200x32xf32>
    %24 = arith.addf %19, %23 : vector<200x32xf32>
    %25 = vector.extract_strided_slice %15 {offsets = [400, 0], sizes = [200, 32], strides = [1, 1]} : vector<1800x32xf32> to vector<200x32xf32>
    %26 = arith.truncf %25 : vector<200x32xf32> to vector<200x32xbf16>
    %c64 = arith.constant 64 : index
    %c0_16 = arith.constant 0 : index
    %27 = vector.load %arg5[%c64, %c0_16] : memref<288x32xbf16, #tpu.memory_space<vmem>>, vector<32x32xbf16>
    %cst_17 = arith.constant dense<0.000000e+00> : vector<200x32xf32>
    %28 = tpu.matmul %26, %27, %cst_17 {dimension_numbers = #tpu.dot_dimension_numbers<[1], [0], [0], [1], [0, 0, 1, 1], [], []>} : vector<200x32xbf16>, vector<32x32xbf16>, vector<200x32xf32> -> vector<200x32xf32>
    %29 = arith.addf %24, %28 : vector<200x32xf32>
    %30 = vector.extract_strided_slice %15 {offsets = [600, 0], sizes = [200, 32], strides = [1, 1]} : vector<1800x32xf32> to vector<200x32xf32>
    %31 = arith.truncf %30 : vector<200x32xf32> to vector<200x32xbf16>
    %c96 = arith.constant 96 : index
    %c0_18 = arith.constant 0 : index
    %32 = vector.load %arg5[%c96, %c0_18] : memref<288x32xbf16, #tpu.memory_space<vmem>>, vector<32x32xbf16>
    %cst_19 = arith.constant dense<0.000000e+00> : vector<200x32xf32>
    %33 = tpu.matmul %31, %32, %cst_19 {dimension_numbers = #tpu.dot_dimension_numbers<[1], [0], [0], [1], [0, 0, 1, 1], [], []>} : vector<200x32xbf16>, vector<32x32xbf16>, vector<200x32xf32> -> vector<200x32xf32>
    %34 = arith.addf %29, %33 : vector<200x32xf32>
    %35 = vector.extract_strided_slice %15 {offsets = [800, 0], sizes = [200, 32], strides = [1, 1]} : vector<1800x32xf32> to vector<200x32xf32>
    %36 = arith.truncf %35 : vector<200x32xf32> to vector<200x32xbf16>
    %c128 = arith.constant 128 : index
    %c0_20 = arith.constant 0 : index
    %37 = vector.load %arg5[%c128, %c0_20] : memref<288x32xbf16, #tpu.memory_space<vmem>>, vector<32x32xbf16>
    %cst_21 = arith.constant dense<0.000000e+00> : vector<200x32xf32>
    %38 = tpu.matmul %36, %37, %cst_21 {dimension_numbers = #tpu.dot_dimension_numbers<[1], [0], [0], [1], [0, 0, 1, 1], [], []>} : vector<200x32xbf16>, vector<32x32xbf16>, vector<200x32xf32> -> vector<200x32xf32>
    %39 = arith.addf %34, %38 : vector<200x32xf32>
    %40 = vector.extract_strided_slice %15 {offsets = [1000, 0], sizes = [200, 32], strides = [1, 1]} : vector<1800x32xf32> to vector<200x32xf32>
    %41 = arith.truncf %40 : vector<200x32xf32> to vector<200x32xbf16>
    %c160 = arith.constant 160 : index
    %c0_22 = arith.constant 0 : index
    %42 = vector.load %arg5[%c160, %c0_22] : memref<288x32xbf16, #tpu.memory_space<vmem>>, vector<32x32xbf16>
    %cst_23 = arith.constant dense<0.000000e+00> : vector<200x32xf32>
    %43 = tpu.matmul %41, %42, %cst_23 {dimension_numbers = #tpu.dot_dimension_numbers<[1], [0], [0], [1], [0, 0, 1, 1], [], []>} : vector<200x32xbf16>, vector<32x32xbf16>, vector<200x32xf32> -> vector<200x32xf32>
    %44 = arith.addf %39, %43 : vector<200x32xf32>
    %45 = vector.extract_strided_slice %15 {offsets = [1200, 0], sizes = [200, 32], strides = [1, 1]} : vector<1800x32xf32> to vector<200x32xf32>
    %46 = arith.truncf %45 : vector<200x32xf32> to vector<200x32xbf16>
    %c192 = arith.constant 192 : index
    %c0_24 = arith.constant 0 : index
    %47 = vector.load %arg5[%c192, %c0_24] : memref<288x32xbf16, #tpu.memory_space<vmem>>, vector<32x32xbf16>
    %cst_25 = arith.constant dense<0.000000e+00> : vector<200x32xf32>
    %48 = tpu.matmul %46, %47, %cst_25 {dimension_numbers = #tpu.dot_dimension_numbers<[1], [0], [0], [1], [0, 0, 1, 1], [], []>} : vector<200x32xbf16>, vector<32x32xbf16>, vector<200x32xf32> -> vector<200x32xf32>
    %49 = arith.addf %44, %48 : vector<200x32xf32>
    %50 = vector.extract_strided_slice %15 {offsets = [1400, 0], sizes = [200, 32], strides = [1, 1]} : vector<1800x32xf32> to vector<200x32xf32>
    %51 = arith.truncf %50 : vector<200x32xf32> to vector<200x32xbf16>
    %c224 = arith.constant 224 : index
    %c0_26 = arith.constant 0 : index
    %52 = vector.load %arg5[%c224, %c0_26] : memref<288x32xbf16, #tpu.memory_space<vmem>>, vector<32x32xbf16>
    %cst_27 = arith.constant dense<0.000000e+00> : vector<200x32xf32>
    %53 = tpu.matmul %51, %52, %cst_27 {dimension_numbers = #tpu.dot_dimension_numbers<[1], [0], [0], [1], [0, 0, 1, 1], [], []>} : vector<200x32xbf16>, vector<32x32xbf16>, vector<200x32xf32> -> vector<200x32xf32>
    %54 = arith.addf %49, %53 : vector<200x32xf32>
    %55 = vector.extract_strided_slice %15 {offsets = [1600, 0], sizes = [200, 32], strides = [1, 1]} : vector<1800x32xf32> to vector<200x32xf32>
    %56 = arith.truncf %55 : vector<200x32xf32> to vector<200x32xbf16>
    %c256 = arith.constant 256 : index
    %c0_28 = arith.constant 0 : index
    %57 = vector.load %arg5[%c256, %c0_28] : memref<288x32xbf16, #tpu.memory_space<vmem>>, vector<32x32xbf16>
    %cst_29 = arith.constant dense<0.000000e+00> : vector<200x32xf32>
    %58 = tpu.matmul %56, %57, %cst_29 {dimension_numbers = #tpu.dot_dimension_numbers<[1], [0], [0], [1], [0, 0, 1, 1], [], []>} : vector<200x32xbf16>, vector<32x32xbf16>, vector<200x32xf32> -> vector<200x32xf32>
    %59 = arith.addf %54, %58 : vector<200x32xf32>
    %c0_30 = arith.constant 0 : index
    %c0_31 = arith.constant 0 : index
    %60 = vector.load %arg6[%c0_30, %c0_31] : memref<1x32xf32, #tpu.memory_space<vmem>>, vector<1x32xf32>
    %61 = vector.broadcast %60 : vector<1x32xf32> to vector<200x32xf32>
    %62 = arith.addf %59, %61 : vector<200x32xf32>
    %cst_32 = arith.constant 0.000000e+00 : f32
    %63 = vector.broadcast %cst_32 : f32 to vector<200x32xf32>
    %64 = arith.cmpf oge, %62, %63 : vector<200x32xf32>
    %cst_33 = arith.constant 2.000000e-01 : f32
    %65 = vector.broadcast %cst_33 : f32 to vector<200x32xf32>
    %66 = arith.mulf %65, %62 : vector<200x32xf32>
    %67 = arith.select %64, %62, %66 : vector<200x32xi1>, vector<200x32xf32>
    %c0_34 = arith.constant 0 : index
    %c0_35 = arith.constant 0 : index
    %68 = vector.load %arg7[%c0_34, %c0_35] : memref<504x200xbf16, #tpu.memory_space<vmem>>, vector<504x200xbf16>
    %69 = arith.truncf %67 : vector<200x32xf32> to vector<200x32xbf16>
    %cst_36 = arith.constant dense<0.000000e+00> : vector<504x32xf32>
    %70 = tpu.matmul %68, %69, %cst_36 {dimension_numbers = #tpu.dot_dimension_numbers<[1], [0], [0], [1], [0, 0, 1, 1], [], []>} : vector<504x200xbf16>, vector<200x32xbf16>, vector<504x32xf32> -> vector<504x32xf32>
    %71 = vector.extract_strided_slice %70 {offsets = [0, 0], sizes = [56, 32], strides = [1, 1]} : vector<504x32xf32> to vector<56x32xf32>
    %72 = arith.truncf %71 : vector<56x32xf32> to vector<56x32xbf16>
    %c0_37 = arith.constant 0 : index
    %c0_38 = arith.constant 0 : index
    %73 = vector.load %arg8[%c0_37, %c0_38] : memref<288x64xbf16, #tpu.memory_space<vmem>>, vector<32x64xbf16>
    %cst_39 = arith.constant dense<0.000000e+00> : vector<56x64xf32>
    %74 = tpu.matmul %72, %73, %cst_39 {dimension_numbers = #tpu.dot_dimension_numbers<[1], [0], [0], [1], [0, 0, 1, 1], [], []>} : vector<56x32xbf16>, vector<32x64xbf16>, vector<56x64xf32> -> vector<56x64xf32>
    %75 = vector.extract_strided_slice %70 {offsets = [56, 0], sizes = [56, 32], strides = [1, 1]} : vector<504x32xf32> to vector<56x32xf32>
    %76 = arith.truncf %75 : vector<56x32xf32> to vector<56x32xbf16>
    %c32_40 = arith.constant 32 : index
    %c0_41 = arith.constant 0 : index
    %77 = vector.load %arg8[%c32_40, %c0_41] : memref<288x64xbf16, #tpu.memory_space<vmem>>, vector<32x64xbf16>
    %cst_42 = arith.constant dense<0.000000e+00> : vector<56x64xf32>
    %78 = tpu.matmul %76, %77, %cst_42 {dimension_numbers = #tpu.dot_dimension_numbers<[1], [0], [0], [1], [0, 0, 1, 1], [], []>} : vector<56x32xbf16>, vector<32x64xbf16>, vector<56x64xf32> -> vector<56x64xf32>
    %79 = arith.addf %74, %78 : vector<56x64xf32>
    %80 = vector.extract_strided_slice %70 {offsets = [112, 0], sizes = [56, 32], strides = [1, 1]} : vector<504x32xf32> to vector<56x32xf32>
    %81 = arith.truncf %80 : vector<56x32xf32> to vector<56x32xbf16>
    %c64_43 = arith.constant 64 : index
    %c0_44 = arith.constant 0 : index
    %82 = vector.load %arg8[%c64_43, %c0_44] : memref<288x64xbf16, #tpu.memory_space<vmem>>, vector<32x64xbf16>
    %cst_45 = arith.constant dense<0.000000e+00> : vector<56x64xf32>
    %83 = tpu.matmul %81, %82, %cst_45 {dimension_numbers = #tpu.dot_dimension_numbers<[1], [0], [0], [1], [0, 0, 1, 1], [], []>} : vector<56x32xbf16>, vector<32x64xbf16>, vector<56x64xf32> -> vector<56x64xf32>
    %84 = arith.addf %79, %83 : vector<56x64xf32>
    %85 = vector.extract_strided_slice %70 {offsets = [168, 0], sizes = [56, 32], strides = [1, 1]} : vector<504x32xf32> to vector<56x32xf32>
    %86 = arith.truncf %85 : vector<56x32xf32> to vector<56x32xbf16>
    %c96_46 = arith.constant 96 : index
    %c0_47 = arith.constant 0 : index
    %87 = vector.load %arg8[%c96_46, %c0_47] : memref<288x64xbf16, #tpu.memory_space<vmem>>, vector<32x64xbf16>
    %cst_48 = arith.constant dense<0.000000e+00> : vector<56x64xf32>
    %88 = tpu.matmul %86, %87, %cst_48 {dimension_numbers = #tpu.dot_dimension_numbers<[1], [0], [0], [1], [0, 0, 1, 1], [], []>} : vector<56x32xbf16>, vector<32x64xbf16>, vector<56x64xf32> -> vector<56x64xf32>
    %89 = arith.addf %84, %88 : vector<56x64xf32>
    %90 = vector.extract_strided_slice %70 {offsets = [224, 0], sizes = [56, 32], strides = [1, 1]} : vector<504x32xf32> to vector<56x32xf32>
    %91 = arith.truncf %90 : vector<56x32xf32> to vector<56x32xbf16>
    %c128_49 = arith.constant 128 : index
    %c0_50 = arith.constant 0 : index
    %92 = vector.load %arg8[%c128_49, %c0_50] : memref<288x64xbf16, #tpu.memory_space<vmem>>, vector<32x64xbf16>
    %cst_51 = arith.constant dense<0.000000e+00> : vector<56x64xf32>
    %93 = tpu.matmul %91, %92, %cst_51 {dimension_numbers = #tpu.dot_dimension_numbers<[1], [0], [0], [1], [0, 0, 1, 1], [], []>} : vector<56x32xbf16>, vector<32x64xbf16>, vector<56x64xf32> -> vector<56x64xf32>
    %94 = arith.addf %89, %93 : vector<56x64xf32>
    %95 = vector.extract_strided_slice %70 {offsets = [280, 0], sizes = [56, 32], strides = [1, 1]} : vector<504x32xf32> to vector<56x32xf32>
    %96 = arith.truncf %95 : vector<56x32xf32> to vector<56x32xbf16>
    %c160_52 = arith.constant 160 : index
    %c0_53 = arith.constant 0 : index
    %97 = vector.load %arg8[%c160_52, %c0_53] : memref<288x64xbf16, #tpu.memory_space<vmem>>, vector<32x64xbf16>
    %cst_54 = arith.constant dense<0.000000e+00> : vector<56x64xf32>
    %98 = tpu.matmul %96, %97, %cst_54 {dimension_numbers = #tpu.dot_dimension_numbers<[1], [0], [0], [1], [0, 0, 1, 1], [], []>} : vector<56x32xbf16>, vector<32x64xbf16>, vector<56x64xf32> -> vector<56x64xf32>
    %99 = arith.addf %94, %98 : vector<56x64xf32>
    %100 = vector.extract_strided_slice %70 {offsets = [336, 0], sizes = [56, 32], strides = [1, 1]} : vector<504x32xf32> to vector<56x32xf32>
    %101 = arith.truncf %100 : vector<56x32xf32> to vector<56x32xbf16>
    %c192_55 = arith.constant 192 : index
    %c0_56 = arith.constant 0 : index
    %102 = vector.load %arg8[%c192_55, %c0_56] : memref<288x64xbf16, #tpu.memory_space<vmem>>, vector<32x64xbf16>
    %cst_57 = arith.constant dense<0.000000e+00> : vector<56x64xf32>
    %103 = tpu.matmul %101, %102, %cst_57 {dimension_numbers = #tpu.dot_dimension_numbers<[1], [0], [0], [1], [0, 0, 1, 1], [], []>} : vector<56x32xbf16>, vector<32x64xbf16>, vector<56x64xf32> -> vector<56x64xf32>
    %104 = arith.addf %99, %103 : vector<56x64xf32>
    %105 = vector.extract_strided_slice %70 {offsets = [392, 0], sizes = [56, 32], strides = [1, 1]} : vector<504x32xf32> to vector<56x32xf32>
    %106 = arith.truncf %105 : vector<56x32xf32> to vector<56x32xbf16>
    %c224_58 = arith.constant 224 : index
    %c0_59 = arith.constant 0 : index
    %107 = vector.load %arg8[%c224_58, %c0_59] : memref<288x64xbf16, #tpu.memory_space<vmem>>, vector<32x64xbf16>
    %cst_60 = arith.constant dense<0.000000e+00> : vector<56x64xf32>
    %108 = tpu.matmul %106, %107, %cst_60 {dimension_numbers = #tpu.dot_dimension_numbers<[1], [0], [0], [1], [0, 0, 1, 1], [], []>} : vector<56x32xbf16>, vector<32x64xbf16>, vector<56x64xf32> -> vector<56x64xf32>
    %109 = arith.addf %104, %108 : vector<56x64xf32>
    %110 = vector.extract_strided_slice %70 {offsets = [448, 0], sizes = [56, 32], strides = [1, 1]} : vector<504x32xf32> to vector<56x32xf32>
    %111 = arith.truncf %110 : vector<56x32xf32> to vector<56x32xbf16>
    %c256_61 = arith.constant 256 : index
    %c0_62 = arith.constant 0 : index
    %112 = vector.load %arg8[%c256_61, %c0_62] : memref<288x64xbf16, #tpu.memory_space<vmem>>, vector<32x64xbf16>
    %cst_63 = arith.constant dense<0.000000e+00> : vector<56x64xf32>
    %113 = tpu.matmul %111, %112, %cst_63 {dimension_numbers = #tpu.dot_dimension_numbers<[1], [0], [0], [1], [0, 0, 1, 1], [], []>} : vector<56x32xbf16>, vector<32x64xbf16>, vector<56x64xf32> -> vector<56x64xf32>
    %114 = arith.addf %109, %113 : vector<56x64xf32>
    %c0_64 = arith.constant 0 : index
    %c0_65 = arith.constant 0 : index
    %115 = vector.load %arg9[%c0_64, %c0_65] : memref<1x64xf32, #tpu.memory_space<vmem>>, vector<1x64xf32>
    %116 = vector.broadcast %115 : vector<1x64xf32> to vector<56x64xf32>
    %117 = arith.addf %114, %116 : vector<56x64xf32>
    %cst_66 = arith.constant 0.000000e+00 : f32
    %118 = vector.broadcast %cst_66 : f32 to vector<56x64xf32>
    %119 = arith.cmpf oge, %117, %118 : vector<56x64xf32>
    %cst_67 = arith.constant 2.000000e-01 : f32
    %120 = vector.broadcast %cst_67 : f32 to vector<56x64xf32>
    %121 = arith.mulf %120, %117 : vector<56x64xf32>
    %122 = arith.select %119, %117, %121 : vector<56x64xi1>, vector<56x64xf32>
    %c0_68 = arith.constant 0 : index
    %c0_69 = arith.constant 0 : index
    %123 = vector.load %arg10[%c0_68, %c0_69] : memref<504x56xbf16, #tpu.memory_space<vmem>>, vector<504x56xbf16>
    %124 = arith.truncf %122 : vector<56x64xf32> to vector<56x64xbf16>
    %cst_70 = arith.constant dense<0.000000e+00> : vector<504x64xf32>
    %125 = tpu.matmul %123, %124, %cst_70 {dimension_numbers = #tpu.dot_dimension_numbers<[1], [0], [0], [1], [0, 0, 1, 1], [], []>} : vector<504x56xbf16>, vector<56x64xbf16>, vector<504x64xf32> -> vector<504x64xf32>
    %126 = vector.extract_strided_slice %125 {offsets = [0, 0], sizes = [56, 64], strides = [1, 1]} : vector<504x64xf32> to vector<56x64xf32>
    %127 = arith.truncf %126 : vector<56x64xf32> to vector<56x64xbf16>
    %c0_71 = arith.constant 0 : index
    %c0_72 = arith.constant 0 : index
    %128 = vector.load %arg11[%c0_71, %c0_72] : memref<576x64xbf16, #tpu.memory_space<vmem>>, vector<64x64xbf16>
    %cst_73 = arith.constant dense<0.000000e+00> : vector<56x64xf32>
    %129 = tpu.matmul %127, %128, %cst_73 {dimension_numbers = #tpu.dot_dimension_numbers<[1], [0], [0], [1], [0, 0, 1, 1], [], []>} : vector<56x64xbf16>, vector<64x64xbf16>, vector<56x64xf32> -> vector<56x64xf32>
    %130 = vector.extract_strided_slice %125 {offsets = [56, 0], sizes = [56, 64], strides = [1, 1]} : vector<504x64xf32> to vector<56x64xf32>
    %131 = arith.truncf %130 : vector<56x64xf32> to vector<56x64xbf16>
    %c64_74 = arith.constant 64 : index
    %c0_75 = arith.constant 0 : index
    %132 = vector.load %arg11[%c64_74, %c0_75] : memref<576x64xbf16, #tpu.memory_space<vmem>>, vector<64x64xbf16>
    %cst_76 = arith.constant dense<0.000000e+00> : vector<56x64xf32>
    %133 = tpu.matmul %131, %132, %cst_76 {dimension_numbers = #tpu.dot_dimension_numbers<[1], [0], [0], [1], [0, 0, 1, 1], [], []>} : vector<56x64xbf16>, vector<64x64xbf16>, vector<56x64xf32> -> vector<56x64xf32>
    %134 = arith.addf %129, %133 : vector<56x64xf32>
    %135 = vector.extract_strided_slice %125 {offsets = [112, 0], sizes = [56, 64], strides = [1, 1]} : vector<504x64xf32> to vector<56x64xf32>
    %136 = arith.truncf %135 : vector<56x64xf32> to vector<56x64xbf16>
    %c128_77 = arith.constant 128 : index
    %c0_78 = arith.constant 0 : index
    %137 = vector.load %arg11[%c128_77, %c0_78] : memref<576x64xbf16, #tpu.memory_space<vmem>>, vector<64x64xbf16>
    %cst_79 = arith.constant dense<0.000000e+00> : vector<56x64xf32>
    %138 = tpu.matmul %136, %137, %cst_79 {dimension_numbers = #tpu.dot_dimension_numbers<[1], [0], [0], [1], [0, 0, 1, 1], [], []>} : vector<56x64xbf16>, vector<64x64xbf16>, vector<56x64xf32> -> vector<56x64xf32>
    %139 = arith.addf %134, %138 : vector<56x64xf32>
    %140 = vector.extract_strided_slice %125 {offsets = [168, 0], sizes = [56, 64], strides = [1, 1]} : vector<504x64xf32> to vector<56x64xf32>
    %141 = arith.truncf %140 : vector<56x64xf32> to vector<56x64xbf16>
    %c192_80 = arith.constant 192 : index
    %c0_81 = arith.constant 0 : index
    %142 = vector.load %arg11[%c192_80, %c0_81] : memref<576x64xbf16, #tpu.memory_space<vmem>>, vector<64x64xbf16>
    %cst_82 = arith.constant dense<0.000000e+00> : vector<56x64xf32>
    %143 = tpu.matmul %141, %142, %cst_82 {dimension_numbers = #tpu.dot_dimension_numbers<[1], [0], [0], [1], [0, 0, 1, 1], [], []>} : vector<56x64xbf16>, vector<64x64xbf16>, vector<56x64xf32> -> vector<56x64xf32>
    %144 = arith.addf %139, %143 : vector<56x64xf32>
    %145 = vector.extract_strided_slice %125 {offsets = [224, 0], sizes = [56, 64], strides = [1, 1]} : vector<504x64xf32> to vector<56x64xf32>
    %146 = arith.truncf %145 : vector<56x64xf32> to vector<56x64xbf16>
    %c256_83 = arith.constant 256 : index
    %c0_84 = arith.constant 0 : index
    %147 = vector.load %arg11[%c256_83, %c0_84] : memref<576x64xbf16, #tpu.memory_space<vmem>>, vector<64x64xbf16>
    %cst_85 = arith.constant dense<0.000000e+00> : vector<56x64xf32>
    %148 = tpu.matmul %146, %147, %cst_85 {dimension_numbers = #tpu.dot_dimension_numbers<[1], [0], [0], [1], [0, 0, 1, 1], [], []>} : vector<56x64xbf16>, vector<64x64xbf16>, vector<56x64xf32> -> vector<56x64xf32>
    %149 = arith.addf %144, %148 : vector<56x64xf32>
    %150 = vector.extract_strided_slice %125 {offsets = [280, 0], sizes = [56, 64], strides = [1, 1]} : vector<504x64xf32> to vector<56x64xf32>
    %151 = arith.truncf %150 : vector<56x64xf32> to vector<56x64xbf16>
    %c320 = arith.constant 320 : index
    %c0_86 = arith.constant 0 : index
    %152 = vector.load %arg11[%c320, %c0_86] : memref<576x64xbf16, #tpu.memory_space<vmem>>, vector<64x64xbf16>
    %cst_87 = arith.constant dense<0.000000e+00> : vector<56x64xf32>
    %153 = tpu.matmul %151, %152, %cst_87 {dimension_numbers = #tpu.dot_dimension_numbers<[1], [0], [0], [1], [0, 0, 1, 1], [], []>} : vector<56x64xbf16>, vector<64x64xbf16>, vector<56x64xf32> -> vector<56x64xf32>
    %154 = arith.addf %149, %153 : vector<56x64xf32>
    %155 = vector.extract_strided_slice %125 {offsets = [336, 0], sizes = [56, 64], strides = [1, 1]} : vector<504x64xf32> to vector<56x64xf32>
    %156 = arith.truncf %155 : vector<56x64xf32> to vector<56x64xbf16>
    %c384 = arith.constant 384 : index
    %c0_88 = arith.constant 0 : index
    %157 = vector.load %arg11[%c384, %c0_88] : memref<576x64xbf16, #tpu.memory_space<vmem>>, vector<64x64xbf16>
    %cst_89 = arith.constant dense<0.000000e+00> : vector<56x64xf32>
    %158 = tpu.matmul %156, %157, %cst_89 {dimension_numbers = #tpu.dot_dimension_numbers<[1], [0], [0], [1], [0, 0, 1, 1], [], []>} : vector<56x64xbf16>, vector<64x64xbf16>, vector<56x64xf32> -> vector<56x64xf32>
    %159 = arith.addf %154, %158 : vector<56x64xf32>
    %160 = vector.extract_strided_slice %125 {offsets = [392, 0], sizes = [56, 64], strides = [1, 1]} : vector<504x64xf32> to vector<56x64xf32>
    %161 = arith.truncf %160 : vector<56x64xf32> to vector<56x64xbf16>
    %c448 = arith.constant 448 : index
    %c0_90 = arith.constant 0 : index
    %162 = vector.load %arg11[%c448, %c0_90] : memref<576x64xbf16, #tpu.memory_space<vmem>>, vector<64x64xbf16>
    %cst_91 = arith.constant dense<0.000000e+00> : vector<56x64xf32>
    %163 = tpu.matmul %161, %162, %cst_91 {dimension_numbers = #tpu.dot_dimension_numbers<[1], [0], [0], [1], [0, 0, 1, 1], [], []>} : vector<56x64xbf16>, vector<64x64xbf16>, vector<56x64xf32> -> vector<56x64xf32>
    %164 = arith.addf %159, %163 : vector<56x64xf32>
    %165 = vector.extract_strided_slice %125 {offsets = [448, 0], sizes = [56, 64], strides = [1, 1]} : vector<504x64xf32> to vector<56x64xf32>
    %166 = arith.truncf %165 : vector<56x64xf32> to vector<56x64xbf16>
    %c512 = arith.constant 512 : index
    %c0_92 = arith.constant 0 : index
    %167 = vector.load %arg11[%c512, %c0_92] : memref<576x64xbf16, #tpu.memory_space<vmem>>, vector<64x64xbf16>
    %cst_93 = arith.constant dense<0.000000e+00> : vector<56x64xf32>
    %168 = tpu.matmul %166, %167, %cst_93 {dimension_numbers = #tpu.dot_dimension_numbers<[1], [0], [0], [1], [0, 0, 1, 1], [], []>} : vector<56x64xbf16>, vector<64x64xbf16>, vector<56x64xf32> -> vector<56x64xf32>
    %169 = arith.addf %164, %168 : vector<56x64xf32>
    %c0_94 = arith.constant 0 : index
    %c0_95 = arith.constant 0 : index
    %170 = vector.load %arg12[%c0_94, %c0_95] : memref<1x64xf32, #tpu.memory_space<vmem>>, vector<1x64xf32>
    %171 = vector.broadcast %170 : vector<1x64xf32> to vector<56x64xf32>
    %172 = arith.addf %169, %171 : vector<56x64xf32>
    %cst_96 = arith.constant 0.000000e+00 : f32
    %173 = vector.broadcast %cst_96 : f32 to vector<56x64xf32>
    %174 = arith.cmpf oge, %172, %173 : vector<56x64xf32>
    %cst_97 = arith.constant 2.000000e-01 : f32
    %175 = vector.broadcast %cst_97 : f32 to vector<56x64xf32>
    %176 = arith.mulf %175, %172 : vector<56x64xf32>
    %177 = arith.select %174, %172, %176 : vector<56x64xi1>, vector<56x64xf32>
    %c0_98 = arith.constant 0 : index
    %c0_99 = arith.constant 0 : index
    %c0_100 = arith.constant 0 : index
    %178 = vector.load %arg13[%c0_98, %c0_99, %c0_100] : memref<16x56x64xf32, #tpu.memory_space<vmem>>, vector<16x56x64xf32>
    %179 = vector.shape_cast %177 : vector<56x64xf32> to vector<1x56x64xf32>
    %180 = vector.broadcast %179 : vector<1x56x64xf32> to vector<16x56x64xf32>
    %181 = arith.mulf %178, %180 : vector<16x56x64xf32>
    %cst_101 = arith.constant dense<0.000000e+00> : vector<16x56xf32>
    %182 = vector.multi_reduction <add>, %181, %cst_101 [2] : vector<16x56x64xf32> to vector<16x56xf32>
    %cst_102 = arith.constant dense<0.000000e+00> : vector<16xf32>
    %183 = vector.multi_reduction <add>, %182, %cst_102 [1] : vector<16x56xf32> to vector<16xf32>
    %184 = vector.shape_cast %183 : vector<16xf32> to vector<16x1xf32>
    %c0_103 = arith.constant 0 : index
    %c0_104 = arith.constant 0 : index
    %185 = vector.load %arg14[%c0_103, %c0_104] : memref<16x1xf32, #tpu.memory_space<vmem>>, vector<16x1xf32>
    %186 = arith.addf %184, %185 : vector<16x1xf32>
    %c0_105 = arith.constant 0 : index
    %c0_106 = arith.constant 0 : index
    %c0_107 = arith.constant 0 : index
    %187 = vector.load %arg15[%c0_105, %c0_106, %c0_107] : memref<1x16x1xf32, #tpu.memory_space<vmem>>, vector<1x16x1xf32>
    %188 = vector.shape_cast %187 : vector<1x16x1xf32> to vector<16x1xf32>
    %189 = vector.shape_cast %186 : vector<16x1xf32> to vector<1x16x1xf32>
    tpu.vector_store %arg15[%c0_105, %c0_106, %c0_107], %189 {strides = array<i32>} : memref<1x16x1xf32, #tpu.memory_space<vmem>>, vector<1x16x1xf32>,
    return
  }
  func.func @transform_0(%arg0: i32) -> (i32, i32, i32) {
    %c0_i32 = arith.constant 0 : i32
    %c0_i32_0 = arith.constant 0 : i32
    %c0_i32_1 = arith.constant 0 : i32
    return %arg0, %c0_i32, %c0_i32_0 : i32, i32, i32
  }
  func.func @transform_1(%arg0: i32) -> (i32, i32) {
    %c0_i32 = arith.constant 0 : i32
    %c0_i32_0 = arith.constant 0 : i32
    %c0_i32_1 = arith.constant 0 : i32
    return %c0_i32, %c0_i32_0 : i32, i32
  }
  func.func @transform_2(%arg0: i32) -> (i32, i32) {
    %c0_i32 = arith.constant 0 : i32
    %c0_i32_0 = arith.constant 0 : i32
    %c0_i32_1 = arith.constant 0 : i32
    return %c0_i32, %c0_i32_0 : i32, i32
  }
  func.func @transform_3(%arg0: i32) -> (i32, i32) {
    %c0_i32 = arith.constant 0 : i32
    %c0_i32_0 = arith.constant 0 : i32
    %c0_i32_1 = arith.constant 0 : i32
    return %c0_i32, %c0_i32_0 : i32, i32
  }
  func.func @transform_4(%arg0: i32) -> (i32, i32) {
    %c0_i32 = arith.constant 0 : i32
    %c0_i32_0 = arith.constant 0 : i32
    %c0_i32_1 = arith.constant 0 : i32
    return %c0_i32, %c0_i32_0 : i32, i32
  }
  func.func @transform_5(%arg0: i32) -> (i32, i32) {
    %c0_i32 = arith.constant 0 : i32
    %c0_i32_0 = arith.constant 0 : i32
    %c0_i32_1 = arith.constant 0 : i32
    return %c0_i32, %c0_i32_0 : i32, i32
  }
  func.func @transform_6(%arg0: i32) -> (i32, i32) {
    %c0_i32 = arith.constant 0 : i32
    %c0_i32_0 = arith.constant 0 : i32
    %c0_i32_1 = arith.constant 0 : i32
    return %c0_i32, %c0_i32_0 : i32, i32
  }
  func.func @transform_7(%arg0: i32) -> (i32, i32) {
    %c0_i32 = arith.constant 0 : i32
    %c0_i32_0 = arith.constant 0 : i32
    %c0_i32_1 = arith.constant 0 : i32
    return %c0_i32, %c0_i32_0 : i32, i32
  }
  func.func @transform_8(%arg0: i32) -> (i32, i32) {
    %c0_i32 = arith.constant 0 : i32
    %c0_i32_0 = arith.constant 0 : i32
    %c0_i32_1 = arith.constant 0 : i32
    return %c0_i32, %c0_i32_0 : i32, i32
  }
  func.func @transform_9(%arg0: i32) -> (i32, i32) {
    %c0_i32 = arith.constant 0 : i32
    %c0_i32_0 = arith.constant 0 : i32
    %c0_i32_1 = arith.constant 0 : i32
    return %c0_i32, %c0_i32_0 : i32, i32
  }
  func.func @transform_10(%arg0: i32) -> (i32, i32) {
    %c0_i32 = arith.constant 0 : i32
    %c0_i32_0 = arith.constant 0 : i32
    %c0_i32_1 = arith.constant 0 : i32
    return %c0_i32, %c0_i32_0 : i32, i32
  }
  func.func @transform_11(%arg0: i32) -> (i32, i32) {
    %c0_i32 = arith.constant 0 : i32
    %c0_i32_0 = arith.constant 0 : i32
    %c0_i32_1 = arith.constant 0 : i32
    return %c0_i32, %c0_i32_0 : i32, i32
  }
  func.func @transform_12(%arg0: i32) -> (i32, i32, i32) {
    %c0_i32 = arith.constant 0 : i32
    %c0_i32_0 = arith.constant 0 : i32
    %c0_i32_1 = arith.constant 0 : i32
    %c0_i32_2 = arith.constant 0 : i32
    return %c0_i32, %c0_i32_0, %c0_i32_1 : i32, i32, i32
  }
  func.func @transform_13(%arg0: i32) -> (i32, i32) {
    %c0_i32 = arith.constant 0 : i32
    %c0_i32_0 = arith.constant 0 : i32
    %c0_i32_1 = arith.constant 0 : i32
    return %c0_i32, %c0_i32_0 : i32, i32
  }
  func.func @transform_14(%arg0: i32) -> (i32, i32, i32) {
    %c0_i32 = arith.constant 0 : i32
    %c0_i32_0 = arith.constant 0 : i32
    %c0_i32_1 = arith.constant 0 : i32
    return %arg0, %c0_i32, %c0_i32_0 : i32, i32, i32
  }
}

</mosaic_0001>

<bundles_post_ra>
// kernel: decoder_forward.1
= control target key start
LH: loop header
LB: loop body
LE: loop exit
PB: predicated region body
PF: predicated region fallthrough
CT: control target
= control target key end

     0   :  { %s12869_s29 = smov 0   ;;  %s17515_s0 = inlined_call_operand.vmem [shape: f32[2,200,18], index: 0, kind: input, shape index: {}]   ;;  %s17516_s1 = inlined_call_operand.vmem [shape: bf16[18,32], index: 1, kind: input, shape index: {}]   ;;  %s17517_s2 = inlined_call_operand.vmem [shape: f32[1,32], index: 2, kind: input, shape index: {}]   ;;  %s17518_s3 = inlined_call_operand.vmem [shape: bf16[1800,200], index: 3, kind: input, shape index: {}]   ;;  %s17519_s4 = inlined_call_operand.vmem [shape: bf16[288,32], index: 4, kind: input, shape index: {}]   ;;  %s17520_s5 = inlined_call_operand.vmem [shape: f32[1,32], index: 5, kind: input, shape index: {}]   ;;  %s17521_s6 = inlined_call_operand.vmem [shape: bf16[504,200], index: 6, kind: input, shape index: {}]   ;;  %s17522_s7 = inlined_call_operand.vmem [shape: bf16[288,64], index: 7, kind: input, shape index: {}]   ;;  %s17523_s8 = inlined_call_operand.vmem [shape: f32[1,64], index: 8, kind: input, shape index: {}]   ;;  %s17524_s9 = inlined_call_operand.vmem [shape: bf16[504,56], index: 9, kind: input, shape index: {}]   ;;  %s17525_s10 = inlined_call_operand.vmem [shape: bf16[576,64], index: 10, kind: input, shape index: {}]   ;;  %s17526_s11 = inlined_call_operand.vmem [shape: f32[1,64], index: 11, kind: input, shape index: {}]   ;;  %s17527_s12 = inlined_call_operand.vmem [shape: f32[16,56,64], index: 12, kind: input, shape index: {}]   ;;  %s17528_s13 = inlined_call_operand.vmem [shape: f32[16,1], index: 13, kind: input, shape index: {}]   ;;  %s17529_s14 = inlined_call_operand.vmem [shape: f32[2,16,1], index: 14, kind: output, shape index: {}]  }
   0x1 LB: > { %s10155_s30 = sadd.s32 4294967295, %s12789_s29   ;;  %p10159_p0 = scmp.ge.s32.totalorder %s12789_s29, 1  ;;  %s12789_s29 = sphi %s12869_s29, %s24_s29  }
   0x2   : > { %p412_p1 = scmp.lt.s32.totalorder %s12789_s29, 3 }
   0x4   : > { %p413_p2 = pnand %p10159_p0, %p412_p1 }
   0x6   : > { %416 = sbr.rel (%p413_p2) target bundleno = 3584 (0xe00), region = 76 }
   0xd   : > { %v12244_v0 = vld [vmem:[%s17516_s1] sm:$0xff]   ;;  %v17536_v1 = vmov 0.0   ;;  %v12245_v2 = vld [vmem:[%s17516_s1 + $0x8] ss:$0 sps:$4 sm:$0x11]   ;;  %vm566_vm0 = vcmask 1040384  }
   0xe   : > { %11257 = vmatprep.subr.bf16.mxu0 %v17536_v1  ;;  %p458_p3 = scmp.lt.s32.totalorder %s10155_s30, 1  ;;  %v568_v3 = vsel %vm566_vm0, %v12245_v2, 0  ;;  %vm12792_vm1 = vmmov 0   ;;  %vm526_vm2 = vcmask 146432   ;;  %v17530_v42 = vmov 0  }
   0xf   : > { %11258 = vmatpush3.bf16.msra.mxu0 %v12244_v0  ;;  %11261 = vmatprep.mubr.msk.bf16.mxu0 %vm12792_vm1, %v17536_v1  ;;  %v12248_v43 = vld [vmem:[%s17518_s3 + $0x24] ss:$8 sps:$4 sm:$0xff]   ;;  %vm2033_vm3 = vcmask 588800   ;;  %v12966_v44 = vld [vmem:[%s17517_s2] ss:$0 sm:$0xff] }
  0x10   : > { %11259 = vmatprep.subr.bf16.mxu0 %v17536_v1  ;;  %s17678_s30 = smov (!%p458_p3, %s10155_s30), 1  ;;  %12141 = vmatprep.subr.bf16.mxu1 %v17530_v42 }
  0x11   : > { %s12232_s19 = smul.u32 200, %s17678_s30  ;;  %10407 = vmatprep.mubr.msk.bf16.mxu1 %vm2033_vm3, %v12248_v43  ;;  %s10944_s17 = sshll.u32 %s17678_s30, 4 }
  0x12   : > { %s467_s24 = scalar_lea.vmem %s17529_s14, %s10944_s17 }
  0x13   : > { %11260 = vmatpush3.bf16.msra.mxu0 %v568_v3  ;;  %s12893_s22 = scalar_lea.vmem %s17515_s0, %s12232_s19 }
  0x14   : > { %v469_v4 = vld [vmem:[%s12893_s22] sm:$0xff]  ;;  %v470_v5 = vld [vmem:[%s12893_s22 + $0x8] sm:$0xff]  ;;  %v471_v7 = vld [vmem:[%s12893_s22 + $0x10] sm:$0xff]  ;;  %2377 = vmatprep.subr.bf16.mxu0 %v17530_v42 }
  0x15   : > { %v494_v6 = vpack.c.bf16 %v470_v5, %v469_v4  ;;  %v472_v8 = vld [vmem:[%s12893_s22 + $0x18] sm:$0xff]  ;;  %v473_v10 = vld [vmem:[%s12893_s22 + $0x20] sm:$0xff]  ;;  %v474_v11 = vld [vmem:[%s12893_s22 + $0x28] sm:$0xff] }
  0x16   : > { %v495_v9 = vpack.c.bf16 %v472_v8, %v471_v7  ;;  %v496_v12 = vpack.c.bf16 %v474_v11, %v473_v10  ;;  %v475_v13 = vld [vmem:[%s12893_s22 + $0x30] sm:$0xff]  ;;  %v476_v14 = vld [vmem:[%s12893_s22 + $0x38] sm:$0xff]  ;;  %v477_v16 = vld [vmem:[%s12893_s22 + $0x40] sm:$0xff] }
  0x17   : > { %11262 = vmatmul.mubr.msk.bf16.vlgmr.msra.gmra.mrb[0].mxu0 %vm526_vm2, %v494_v6  ;;  %v497_v15 = vpack.c.bf16 %v476_v14, %v475_v13  ;;  %v478_v17 = vld [vmem:[%s12893_s22 + $0x48] sm:$0xff]  ;;  %v479_v19 = vld [vmem:[%s12893_s22 + $0x50] sm:$0xff]  ;;  %v480_v20 = vld [vmem:[%s12893_s22 + $0x58] sm:$0xff] }
  0x18   : > { %11265 = vmatprep.mubr.msk.bf16.mxu0 %vm12792_vm1, %v17536_v1  ;;  %v498_v18 = vpack.c.bf16 %v478_v17, %v477_v16  ;;  %v499_v21 = vpack.c.bf16 %v480_v20, %v479_v19  ;;  %v481_v22 = vld [vmem:[%s12893_s22 + $0x60] sm:$0xff]  ;;  %v482_v23 = vld [vmem:[%s12893_s22 + $0x68] sm:$0xff]  ;;  %v483_v25 = vld [vmem:[%s12893_s22 + $0x70] sm:$0xff] }
  0x19   : > { %v500_v24 = vpack.c.bf16 %v482_v23, %v481_v22  ;;  %v484_v26 = vld [vmem:[%s12893_s22 + $0x78] sm:$0xff]  ;;  %v485_v28 = vld [vmem:[%s12893_s22 + $0x80] sm:$0xff]  ;;  %v486_v29 = vld [vmem:[%s12893_s22 + $0x88] sm:$0xff] }
  0x1a   : > { %v501_v27 = vpack.c.bf16 %v484_v26, %v483_v25  ;;  %v502_v30 = vpack.c.bf16 %v486_v29, %v485_v28  ;;  %v487_v31 = vld [vmem:[%s12893_s22 + $0x90] sm:$0xff]  ;;  %v488_v32 = vld [vmem:[%s12893_s22 + $0x98] sm:$0xff]  ;;  %v489_v34 = vld [vmem:[%s12893_s22 + $0xa0] sm:$0xff] }
  0x1b   : > { %v503_v33 = vpack.c.bf16 %v488_v32, %v487_v31  ;;  %v490_v35 = vld [vmem:[%s12893_s22 + $0xa8] sm:$0xff]  ;;  %v491_v37 = vld [vmem:[%s12893_s22 + $0xb0] sm:$0xff]  ;;  %v492_v38 = vld [vmem:[%s12893_s22 + $0xb8] sm:$0xff] }
  0x1c   : > { %v504_v36 = vpack.c.bf16 %v490_v35, %v489_v34  ;;  %v505_v39 = vpack.c.bf16 %v492_v38, %v491_v37  ;;  %v493_v40 = vld [vmem:[%s12893_s22 + $0xc0] sm:$0xff] }
  0x1d   : > { %v506_v41 = vpack.c.bf16 %v493_v40, %v493_v40 }
  0x1f   : > { %11266 = vmatmul.mubr.msk.bf16.gmra.mrb[4].mxu0 %vm526_vm2, %v495_v9 }
  0x20   : > { %11269 = vmatprep.mubr.msk.bf16.mxu0 %vm12792_vm1, %v17536_v1 }
  0x27   : > { %11270 = vmatmul.mubr.msk.bf16.gmra.mrb[8].mxu0 %vm526_vm2, %v496_v12 }
  0x28   : > { %11273 = vmatprep.mubr.msk.bf16.mxu0 %vm12792_vm1, %v17536_v1 }
  0x2f   : > { %11274 = vmatmul.mubr.msk.bf16.gmra.mrb[12].mxu0 %vm526_vm2, %v497_v15 }
  0x30   : > { %11277 = vmatprep.mubr.msk.bf16.mxu0 %vm12792_vm1, %v17536_v1 }
  0x37   : > { %11278 = vmatmul.mubr.msk.bf16.gmra.mrb[16].mxu0 %vm526_vm2, %v498_v18 }
  0x38   : > { %11281 = vmatprep.mubr.msk.bf16.mxu0 %vm12792_vm1, %v17536_v1 }
  0x3f   : > { %11282 = vmatmul.mubr.msk.bf16.gmra.mrb[20].mxu0 %vm526_vm2, %v499_v21 }
  0x40   : > { %11285 = vmatprep.mubr.msk.bf16.mxu0 %vm12792_vm1, %v17536_v1 }
  0x47   : > { %11286 = vmatmul.mubr.msk.bf16.gmra.mrb[24].mxu0 %vm526_vm2, %v500_v24 }
  0x48   : > { %11289 = vmatprep.mubr.msk.bf16.mxu0 %vm12792_vm1, %v17536_v1 }
  0x4f   : > { %11290 = vmatmul.mubr.msk.bf16.gmra.mrb[28].mxu0 %vm526_vm2, %v501_v27 }
  0x50   : > { %11293 = vmatprep.mubr.msk.bf16.mxu0 %vm12792_vm1, %v17536_v1 }
  0x57   : > { %11294 = vmatmul.mubr.msk.bf16.gmra.mrb[32].mxu0 %vm526_vm2, %v502_v30 }
  0x58   : > { %11297 = vmatprep.mubr.msk.bf16.mxu0 %vm12792_vm1, %v17536_v1 }
  0x5f   : > { %11298 = vmatmul.mubr.msk.bf16.gmra.mrb[36].mxu0 %vm526_vm2, %v503_v33 }
  0x60   : > { %11301 = vmatprep.mubr.msk.bf16.mxu0 %vm12792_vm1, %v17536_v1 }
  0x67   : > { %11302 = vmatmul.mubr.msk.bf16.gmra.mrb[40].mxu0 %vm526_vm2, %v504_v36 }
  0x68   : > { %11305 = vmatprep.mubr.msk.bf16.mxu0 %vm12792_vm1, %v17536_v1 }
  0x6f   : > { %11306 = vmatmul.mubr.msk.bf16.gmra.mrb[44].mxu0 %vm526_vm2, %v505_v39 }
  0x70   : > { %11309 = vmatprep.mubr.msk.bf16.mxu0 %vm12792_vm1, %v17536_v1 }
  0x77   : > { %11310 = vmatmul.mubr.msk.bf16.gmra.mrb[48].mxu0 %vm526_vm2, %v506_v41 }
  0xea   : > { %v604_v45 = vpop.f32.mrb[0].mxu0 }
  0xeb   : > { %v605_v46 = vadd.f32 %v12966_v44, %v604_v45  ;;  %v11263_v47 = vpop.f32.mrb[1].mxu0 }
  0xec   : > { %v607_v48 = vpop.f32.mrb[2].mxu0 }
  0xed   : > { %v731_v49 = vmul.f32 0.2, %v605_v46  ;;  %v608_v50 = vadd.f32 %v12966_v44, %v607_v48  ;;  %v11264_v51 = vpop.f32.mrb[3].mxu0  ;;  %vm706_vm4 = vcmp.ge.f32.partialorder %v605_v46, 0.0 }
  0xef   : > { %vm707_vm5 = vcmp.ge.f32.partialorder %v608_v50, 0.0  ;;  %v732_v52 = vmul.f32 0.2, %v608_v50  ;;  %v756_v53 = vsel %vm706_vm4, %v605_v46, %v731_v49 }
  0xf1   : > { %v757_v54 = vsel %vm707_vm5, %v608_v50, %v732_v52 }
  0xf2   : > { %v612_v55 = vpop.f32.mrb[4].mxu0  ;;  %v1006_v56 = vpack.c.bf16 %v757_v54, %v756_v53 }
  0xf3   : > { %v613_v57 = vadd.f32 %v12966_v44, %v612_v55  ;;  %v11267_v58 = vpop.f32.mrb[5].mxu0 }
  0xf4   : > { %v615_v59 = vpop.f32.mrb[6].mxu0  ;;  %2378 = vmatpush1.bf16.msra.mxu0 %v1006_v56  ;;  %12154 = vmatpush1.bf16.msra.mxu1 %v1006_v56 }
  0xf5   : > { %v733_v60 = vmul.f32 0.2, %v613_v57  ;;  %v616_v61 = vadd.f32 %v12966_v44, %v615_v59  ;;  %v11268_v62 = vpop.f32.mrb[7].mxu0  ;;  %2379 = vmatprep.subr.bf16.mxu0 %v17530_v42  ;;  %12142 = vmatprep.subr.bf16.mxu1 %v17530_v42  ;;  %vm708_vm6 = vcmp.ge.f32.partialorder %v613_v57, 0.0 }
  0xf7   : > { %vm709_vm7 = vcmp.ge.f32.partialorder %v616_v61, 0.0  ;;  %v734_v63 = vmul.f32 0.2, %v616_v61  ;;  %v758_v0 = vsel %vm708_vm6, %v613_v57, %v733_v60 }
  0xf9   : > { %v759_v2 = vsel %vm709_vm7, %v616_v61, %v734_v63 }
  0xfa   : > { %v620_v3 = vpop.f32.mrb[8].mxu0  ;;  %v1007_v4 = vpack.c.bf16 %v759_v2, %v758_v0 }
  0xfb   : > { %v621_v5 = vadd.f32 %v12966_v44, %v620_v3  ;;  %v11271_v6 = vpop.f32.mrb[9].mxu0 }
  0xfc   : > { %v623_v7 = vpop.f32.mrb[10].mxu0  ;;  %2380 = vmatpush1.bf16.msra.mxu0 %v1007_v4  ;;  %12155 = vmatpush1.bf16.msra.mxu1 %v1007_v4 }
  0xfd   : > { %v735_v8 = vmul.f32 0.2, %v621_v5  ;;  %v624_v9 = vadd.f32 %v12966_v44, %v623_v7  ;;  %v11272_v10 = vpop.f32.mrb[11].mxu0  ;;  %2381 = vmatprep.subr.bf16.mxu0 %v17530_v42  ;;  %12143 = vmatprep.subr.bf16.mxu1 %v17530_v42  ;;  %vm710_vm8 = vcmp.ge.f32.partialorder %v621_v5, 0.0 }
  0xff   : > { %vm711_vm9 = vcmp.ge.f32.partialorder %v624_v9, 0.0  ;;  %v736_v11 = vmul.f32 0.2, %v624_v9  ;;  %v760_v12 = vsel %vm710_vm8, %v621_v5, %v735_v8 }
 0x101   : > { %v761_v13 = vsel %vm711_vm9, %v624_v9, %v736_v11 }
 0x102   : > { %v628_v14 = vpop.f32.mrb[12].mxu0  ;;  %v1008_v15 = vpack.c.bf16 %v761_v13, %v760_v12 }
 0x103   : > { %v629_v16 = vadd.f32 %v12966_v44, %v628_v14  ;;  %v11275_v17 = vpop.f32.mrb[13].mxu0 }
 0x104   : > { %v631_v18 = vpop.f32.mrb[14].mxu0  ;;  %2382 = vmatpush1.bf16.msra.mxu0 %v1008_v15  ;;  %12156 = vmatpush1.bf16.msra.mxu1 %v1008_v15 }
 0x105   : > { %v737_v19 = vmul.f32 0.2, %v629_v16  ;;  %v632_v20 = vadd.f32 %v12966_v44, %v631_v18  ;;  %v11276_v21 = vpop.f32.mrb[15].mxu0  ;;  %2383 = vmatprep.subr.bf16.mxu0 %v17530_v42  ;;  %12144 = vmatprep.subr.bf16.mxu1 %v17530_v42  ;;  %vm712_vm10 = vcmp.ge.f32.partialorder %v629_v16, 0.0 }
 0x107   : > { %vm713_vm11 = vcmp.ge.f32.partialorder %v632_v20, 0.0  ;;  %v738_v22 = vmul.f32 0.2, %v632_v20  ;;  %v762_v23 = vsel %vm712_vm10, %v629_v16, %v737_v19 }
 0x109   : > { %v763_v24 = vsel %vm713_vm11, %v632_v20, %v738_v22 }
 0x10a   : > { %v636_v25 = vpop.f32.mrb[16].mxu0  ;;  %v1009_v26 = vpack.c.bf16 %v763_v24, %v762_v23 }
 0x10b   : > { %v637_v27 = vadd.f32 %v12966_v44, %v636_v25  ;;  %v11279_v28 = vpop.f32.mrb[17].mxu0 }
 0x10c   : > { %v639_v29 = vpop.f32.mrb[18].mxu0  ;;  %2384 = vmatpush1.bf16.msra.mxu0 %v1009_v26  ;;  %12157 = vmatpush1.bf16.msra.mxu1 %v1009_v26 }
 0x10d   : > { %v739_v30 = vmul.f32 0.2, %v637_v27  ;;  %v640_v31 = vadd.f32 %v12966_v44, %v639_v29  ;;  %v11280_v32 = vpop.f32.mrb[19].mxu0  ;;  %2385 = vmatprep.subr.bf16.mxu0 %v17530_v42  ;;  %12145 = vmatprep.subr.bf16.mxu1 %v17530_v42  ;;  %vm714_vm12 = vcmp.ge.f32.partialorder %v637_v27, 0.0 }
 0x10f   : > { %vm715_vm13 = vcmp.ge.f32.partialorder %v640_v31, 0.0  ;;  %v740_v33 = vmul.f32 0.2, %v640_v31  ;;  %v764_v34 = vsel %vm714_vm12, %v637_v27, %v739_v30 }
 0x111   : > { %v765_v35 = vsel %vm715_vm13, %v640_v31, %v740_v33 }
 0x112   : > { %v644_v36 = vpop.f32.mrb[20].mxu0  ;;  %v1010_v37 = vpack.c.bf16 %v765_v35, %v764_v34 }
 0x113   : > { %v645_v38 = vadd.f32 %v12966_v44, %v644_v36  ;;  %v11283_v39 = vpop.f32.mrb[21].mxu0 }
 0x114   : > { %v647_v40 = vpop.f32.mrb[22].mxu0  ;;  %2386 = vmatpush1.bf16.msra.mxu0 %v1010_v37  ;;  %12158 = vmatpush1.bf16.msra.mxu1 %v1010_v37 }
 0x115   : > { %v741_v41 = vmul.f32 0.2, %v645_v38  ;;  %v648_v43 = vadd.f32 %v12966_v44, %v647_v40  ;;  %v11284_v45 = vpop.f32.mrb[23].mxu0  ;;  %2387 = vmatprep.subr.bf16.mxu0 %v17530_v42  ;;  %12146 = vmatprep.subr.bf16.mxu1 %v17530_v42  ;;  %vm716_vm14 = vcmp.ge.f32.partialorder %v645_v38, 0.0 }
 0x117   : > { %vm717_vm15 = vcmp.ge.f32.partialorder %v648_v43, 0.0  ;;  %v742_v46 = vmul.f32 0.2, %v648_v43  ;;  %v766_v47 = vsel %vm716_vm14, %v645_v38, %v741_v41 }
 0x119   : > { %v767_v48 = vsel %vm717_vm15, %v648_v43, %v742_v46  ;;  %vm2373_vm15 = vcmask 1043456  }
 0x11a   : > { %v652_v49 = vpop.f32.mrb[24].mxu0  ;;  %v1011_v50 = vpack.c.bf16 %v767_v48, %v766_v47 }
 0x11b   : > { %v653_v51 = vadd.f32 %v12966_v44, %v652_v49  ;;  %v11287_v52 = vpop.f32.mrb[25].mxu0 }
 0x11c   : > { %v655_v53 = vpop.f32.mrb[26].mxu0  ;;  %2388 = vmatpush1.bf16.msra.mxu0 %v1011_v50  ;;  %12159 = vmatpush1.bf16.msra.mxu1 %v1011_v50 }
 0x11d   : > { %v743_v54 = vmul.f32 0.2, %v653_v51  ;;  %v656_v55 = vadd.f32 %v12966_v44, %v655_v53  ;;  %v11288_v56 = vpop.f32.mrb[27].mxu0  ;;  %2389 = vmatprep.subr.bf16.mxu0 %v17530_v42  ;;  %12147 = vmatprep.subr.bf16.mxu1 %v17530_v42  ;;  %vm718_vm0 = vcmp.ge.f32.partialorder %v653_v51, 0.0 }
 0x11f   : > { %vm719_vm2 = vcmp.ge.f32.partialorder %v656_v55, 0.0  ;;  %v744_v57 = vmul.f32 0.2, %v656_v55  ;;  %v768_v58 = vsel %vm718_vm0, %v653_v51, %v743_v54  ;;  %vm3359_vm0 = vcmask 261120  }
 0x121   : > { %v769_v59 = vsel %vm719_vm2, %v656_v55, %v744_v57 }
 0x122   : > { %v660_v60 = vpop.f32.mrb[28].mxu0  ;;  %v1012_v61 = vpack.c.bf16 %v769_v59, %v768_v58 }
 0x123   : > { %v661_v62 = vadd.f32 %v12966_v44, %v660_v60  ;;  %v11291_v63 = vpop.f32.mrb[29].mxu0 }
 0x124   : > { %v663_v0 = vpop.f32.mrb[30].mxu0  ;;  %2390 = vmatpush1.bf16.msra.mxu0 %v1012_v61  ;;  %12160 = vmatpush1.bf16.msra.mxu1 %v1012_v61 }
 0x125   : > { %v745_v2 = vmul.f32 0.2, %v661_v62  ;;  %v664_v3 = vadd.f32 %v12966_v44, %v663_v0  ;;  %v11292_v4 = vpop.f32.mrb[31].mxu0  ;;  %2391 = vmatprep.subr.bf16.mxu0 %v17530_v42  ;;  %12148 = vmatprep.subr.bf16.mxu1 %v17530_v42  ;;  %vm720_vm4 = vcmp.ge.f32.partialorder %v661_v62, 0.0  ;;  %v12249_v0 = vld [vmem:[%s17518_s3 + $0x34] ss:$8 sps:$4 sm:$0xff]  }
 0x126   : > { %v12254_v4 = vld [vmem:[%s17518_s3 + $0x40] ss:$8 sps:$4 sm:$0xff]  }
 0x127   : > { %vm721_vm5 = vcmp.ge.f32.partialorder %v664_v3, 0.0  ;;  %v746_v5 = vmul.f32 0.2, %v664_v3  ;;  %v770_v6 = vsel %vm720_vm4, %v661_v62, %v745_v2  ;;  %v12251_v2 = vld [vmem:[%s17518_s3 + $0x30] ss:$8 sps:$4 sm:$0xff]  }
 0x129   : > { %v771_v7 = vsel %vm721_vm5, %v664_v3, %v746_v5  ;;  %v12252_v3 = vld [vmem:[%s17518_s3 + $0x44] ss:$8 sps:$4 sm:$0xff]   ;;  %v12255_v5 = vld [vmem:[%s17518_s3 + $0x54] ss:$8 sps:$4 sm:$0xff]  }
 0x12a   : > { %v668_v8 = vpop.f32.mrb[32].mxu0  ;;  %v1013_v9 = vpack.c.bf16 %v771_v7, %v770_v6  ;;  %v12257_v6 = vld [vmem:[%s17518_s3 + $0x50] ss:$8 sps:$4 sm:$0xff]   ;;  %v12258_v7 = vld [vmem:[%s17518_s3 + $0x64] ss:$8 sps:$4 sm:$0xff]  }
 0x12b   : > { %v669_v10 = vadd.f32 %v12966_v44, %v668_v8  ;;  %v11295_v11 = vpop.f32.mrb[33].mxu0  ;;  %v12260_v8 = vld [vmem:[%s17518_s3 + $0x60] ss:$8 sps:$4 sm:$0xff]  }
 0x12c   : > { %v671_v12 = vpop.f32.mrb[34].mxu0  ;;  %2392 = vmatpush1.bf16.msra.mxu0 %v1013_v9  ;;  %12161 = vmatpush1.bf16.msra.mxu1 %v1013_v9  ;;  %v12261_v9 = vld [vmem:[%s17518_s3 + $0x74] ss:$8 sps:$4 sm:$0xff]   ;;  %v12264_v11 = vld [vmem:[%s17518_s3 + $0x84] ss:$8 sps:$4 sm:$0xff]  }
 0x12d   : > { %v747_v13 = vmul.f32 0.2, %v669_v10  ;;  %v672_v14 = vadd.f32 %v12966_v44, %v671_v12  ;;  %v11296_v15 = vpop.f32.mrb[35].mxu0  ;;  %2393 = vmatprep.subr.bf16.mxu0 %v17530_v42  ;;  %12149 = vmatprep.subr.bf16.mxu1 %v17530_v42  ;;  %vm722_vm6 = vcmp.ge.f32.partialorder %v669_v10, 0.0  ;;  %v12266_v12 = vld [vmem:[%s17518_s3 + $0x80] ss:$8 sps:$4 sm:$0xff]  }
 0x12e   : > { %v12317_v15 = vld [vmem:[%s17518_s3 + $0x4] ss:$8 sps:$4 sm:$0xff]  }
 0x12f   : > { %vm723_vm7 = vcmp.ge.f32.partialorder %v672_v14, 0.0  ;;  %v748_v16 = vmul.f32 0.2, %v672_v14  ;;  %v772_v17 = vsel %vm722_vm6, %v669_v10, %v747_v13  ;;  %v12263_v10 = vld [vmem:[%s17518_s3 + $0x70] ss:$8 sps:$4 sm:$0xff]   ;;  %10405 = vmatprep.mubr.msk.bf16.mxu0 %vm2033_vm3, %v12317_v15 }
 0x130   : > { %v12267_v13 = vld [vmem:[%s17518_s3 + $0x94] ss:$8 sps:$4 sm:$0xff]  }
 0x131   : > { %v773_v18 = vsel %vm723_vm7, %v672_v14, %v748_v16  ;;  %v12315_v14 = vld [vmem:[%s17518_s3] ss:$8 sps:$4 sm:$0xff]   ;;  %v12318_v16 = vld [vmem:[%s17518_s3 + $0x14] ss:$8 sps:$4 sm:$0xff]  }
 0x132   : > { %v676_v19 = vpop.f32.mrb[36].mxu0  ;;  %v1014_v20 = vpack.c.bf16 %v773_v18, %v772_v17  ;;  %v12269_v17 = vld [vmem:[%s17518_s3 + $0x90] ss:$8 sps:$4 sm:$0xff]   ;;  %v12270_v18 = vld [vmem:[%s17518_s3 + $0xa4] ss:$8 sps:$4 sm:$0xff]  }
 0x133   : > { %v677_v21 = vadd.f32 %v12966_v44, %v676_v19  ;;  %v11299_v22 = vpop.f32.mrb[37].mxu0  ;;  %v12320_v19 = vld [vmem:[%s17518_s3 + $0x10] ss:$8 sps:$4 sm:$0xff]  }
 0x134   : > { %v679_v23 = vpop.f32.mrb[38].mxu0  ;;  %2394 = vmatpush1.bf16.msra.mxu0 %v1014_v20  ;;  %12162 = vmatpush1.bf16.msra.mxu1 %v1014_v20  ;;  %v12272_v20 = vld [vmem:[%s17518_s3 + $0xa0] ss:$8 sps:$4 sm:$0xff]   ;;  %v12275_v22 = vld [vmem:[%s17518_s3 + $0xb0] ss:$8 sps:$4 sm:$0xff]  }
 0x135   : > { %v749_v24 = vmul.f32 0.2, %v677_v21  ;;  %v680_v25 = vadd.f32 %v12966_v44, %v679_v23  ;;  %v11300_v26 = vpop.f32.mrb[39].mxu0  ;;  %2395 = vmatprep.subr.bf16.mxu0 %v17530_v42  ;;  %12150 = vmatprep.subr.bf16.mxu1 %v17530_v42  ;;  %vm724_vm8 = vcmp.ge.f32.partialorder %v677_v21, 0.0  ;;  %v12276_v23 = vld [vmem:[%s17518_s3 + $0xc4] ss:$8 sps:$4 sm:$0xff]  }
 0x136   : > { %v12281_v26 = vld [vmem:[%s17518_s3 + $0xd0] ss:$8 sps:$4 sm:$0xff]  }
 0x137   : > { %vm725_vm9 = vcmp.ge.f32.partialorder %v680_v25, 0.0  ;;  %v750_v27 = vmul.f32 0.2, %v680_v25  ;;  %v774_v28 = vsel %vm724_vm8, %v677_v21, %v749_v24  ;;  %v12273_v21 = vld [vmem:[%s17518_s3 + $0xb4] ss:$8 sps:$4 sm:$0xff]  }
 0x138   : > { %v12278_v24 = vld [vmem:[%s17518_s3 + $0xc0] ss:$8 sps:$4 sm:$0xff]  }
 0x139   : > { %v775_v29 = vsel %vm725_vm9, %v680_v25, %v750_v27  ;;  %v12279_v25 = vld [vmem:[%s17518_s3 + $0xd4] ss:$8 sps:$4 sm:$0xff]   ;;  %v12282_v27 = vld [vmem:[%s17518_s3 + $0xe4] ss:$8 sps:$4 sm:$0xff]  }
 0x13a   : > { %v684_v30 = vpop.f32.mrb[40].mxu0  ;;  %v1015_v31 = vpack.c.bf16 %v775_v29, %v774_v28  ;;  %v12284_v28 = vld [vmem:[%s17518_s3 + $0xe0] ss:$8 sps:$4 sm:$0xff]   ;;  %v12285_v29 = vld [vmem:[%s17518_s3 + $0xf4] ss:$8 sps:$4 sm:$0xff]  }
 0x13b   : > { %v685_v32 = vadd.f32 %v12966_v44, %v684_v30  ;;  %v11303_v33 = vpop.f32.mrb[41].mxu0  ;;  %v12287_v30 = vld [vmem:[%s17518_s3 + $0xf0] ss:$8 sps:$4 sm:$0xff]  }
 0x13c   : > { %v687_v34 = vpop.f32.mrb[42].mxu0  ;;  %2396 = vmatpush1.bf16.msra.mxu0 %v1015_v31  ;;  %12163 = vmatpush1.bf16.msra.mxu1 %v1015_v31  ;;  %v12288_v31 = vld [vmem:[%s17518_s3 + $0x104] ss:$8 sps:$4 sm:$0xff]   ;;  %v12291_v33 = vld [vmem:[%s17518_s3 + $0x114] ss:$8 sps:$4 sm:$0xff]  }
 0x13d   : > { %v751_v35 = vmul.f32 0.2, %v685_v32  ;;  %v688_v36 = vadd.f32 %v12966_v44, %v687_v34  ;;  %v11304_v37 = vpop.f32.mrb[43].mxu0  ;;  %2397 = vmatprep.subr.bf16.mxu0 %v17530_v42  ;;  %12151 = vmatprep.subr.bf16.mxu1 %v17530_v42  ;;  %vm726_vm10 = vcmp.ge.f32.partialorder %v685_v32, 0.0  ;;  %v12293_v34 = vld [vmem:[%s17518_s3 + $0x110] ss:$8 sps:$4 sm:$0xff]  }
 0x13e   : > { %v12297_v37 = vld [vmem:[%s17518_s3 + $0x134] ss:$8 sps:$4 sm:$0xff]  }
 0x13f   : > { %vm727_vm11 = vcmp.ge.f32.partialorder %v688_v36, 0.0  ;;  %v752_v38 = vmul.f32 0.2, %v688_v36  ;;  %v776_v39 = vsel %vm726_vm10, %v685_v32, %v751_v35  ;;  %v12290_v32 = vld [vmem:[%s17518_s3 + $0x100] ss:$8 sps:$4 sm:$0xff]  }
 0x140   : > { %v12294_v35 = vld [vmem:[%s17518_s3 + $0x124] ss:$8 sps:$4 sm:$0xff]  }
 0x141   : > { %v777_v40 = vsel %vm727_vm11, %v688_v36, %v752_v38  ;;  %v12296_v36 = vld [vmem:[%s17518_s3 + $0x120] ss:$8 sps:$4 sm:$0xff]   ;;  %v12299_v38 = vld [vmem:[%s17518_s3 + $0x130] ss:$8 sps:$4 sm:$0xff]  }
 0x142   : > { %v692_v41 = vpop.f32.mrb[44].mxu0  ;;  %v1016_v43 = vpack.c.bf16 %v777_v40, %v776_v39  ;;  %v12300_v39 = vld [vmem:[%s17518_s3 + $0x144] ss:$8 sps:$4 sm:$0xff]   ;;  %v12302_v40 = vld [vmem:[%s17518_s3 + $0x140] ss:$8 sps:$4 sm:$0xff]  }
 0x143   : > { %v693_v45 = vadd.f32 %v12966_v44, %v692_v41  ;;  %v11307_v46 = vpop.f32.mrb[45].mxu0  ;;  %v12303_v41 = vld [vmem:[%s17518_s3 + $0x154] ss:$8 sps:$4 sm:$0xff]  }
 0x144   : > { %v695_v47 = vpop.f32.mrb[46].mxu0  ;;  %2398 = vmatpush1.bf16.msra.mxu0 %v1016_v43  ;;  %12164 = vmatpush1.bf16.msra.mxu1 %v1016_v43  ;;  %v12305_v43 = vld [vmem:[%s17518_s3 + $0x150] ss:$8 sps:$4 sm:$0xff]   ;;  %v12308_v46 = vld [vmem:[%s17518_s3 + $0x160] ss:$8 sps:$4 sm:$0xff]  }
 0x145   : > { %v753_v48 = vmul.f32 0.2, %v693_v45  ;;  %v696_v49 = vadd.f32 %v12966_v44, %v695_v47  ;;  %v11308_v50 = vpop.f32.mrb[47].mxu0  ;;  %2399 = vmatprep.subr.bf16.mxu0 %v17530_v42  ;;  %12152 = vmatprep.subr.bf16.mxu1 %v17530_v42  ;;  %vm728_vm12 = vcmp.ge.f32.partialorder %v693_v45, 0.0  ;;  %v12309_v47 = vld [vmem:[%s17518_s3 + $0x174] ss:$8 sps:$4 sm:$0xff]  }
 0x146   : > { %v12326_v50 = vld [vmem:[%s17519_s4 + $0x10] sm:$0xff]  }
 0x147   : > { %vm729_vm13 = vcmp.ge.f32.partialorder %v696_v49, 0.0  ;;  %v754_v51 = vmul.f32 0.2, %v696_v49  ;;  %v778_v52 = vsel %vm728_vm12, %v693_v45, %v753_v48  ;;  %v12306_v45 = vld [vmem:[%s17518_s3 + $0x164] ss:$8 sps:$4 sm:$0xff]  }
 0x148   : > { %v12311_v48 = vld [vmem:[%s17518_s3 + $0x170] ss:$8 sps:$4 sm:$0xff]  }
 0x149   : > { %v779_v53 = vsel %vm729_vm13, %v696_v49, %v754_v51  ;;  %v12312_v49 = vld [vmem:[%s17518_s3 + $0x184] ss:$8 sps:$4 sm:$0xff]   ;;  %v12328_v51 = vld [vmem:[%s17519_s4 + $0x18] sm:$0xff]  }
 0x14a   : > { %v700_v54 = vpop.f32.mrb[48].mxu0  ;;  %v1017_v55 = vpack.c.bf16 %v779_v53, %v778_v52  ;;  %v12314_v52 = vld [vmem:[%s17518_s3 + $0x180] ss:$8 sps:$4 sm:$0xff]   ;;  %v12321_v53 = vld [vmem:[%s17518_s3 + $0x194] ss:$8 sps:$4 sm:$0xff]  }
 0x14b   : > { %v701_v56 = vadd.f32 %v12966_v44, %v700_v54  ;;  %v11311_v57 = vpop.f32.mrb[49].mxu0  ;;  %v12246_v44 = vld [vmem:[%s17518_s3 + $0x20] ss:$8 sps:$4 sm:$0xff]   ;;  %v12323_v54 = vld [vmem:[%s17518_s3 + $0x190] ss:$8 sps:$4 sm:$0xff]  }
 0x14c   : > { %v703_v58 = vpop.f32.mrb[50].mxu0  ;;  %2400 = vmatpush1.bf16.msra.mxu0 %v1017_v55  ;;  %12165 = vmatpush1.bf16.msra.mxu1 %v1017_v55  ;;  %v12324_v55 = vld [vmem:[%s17518_s3 + $0x1a4] ss:$8 sps:$4 sm:$0xff]   ;;  %v12329_v57 = vld [vmem:[%s17518_s3 + $0x1b4] ss:$8 sps:$4 sm:$0xff]  }
 0x14d   : > { %v755_v59 = vmul.f32 0.2, %v701_v56  ;;  %v11312_v60 = vpop.f32.mrb[51].mxu0  ;;  %2401 = vmatprep.subr.bf16.mxu0 %v17530_v42  ;;  %12153 = vmatprep.subr.bf16.mxu1 %v17530_v42  ;;  %vm730_vm14 = vcmp.ge.f32.partialorder %v701_v56, 0.0  ;;  %v12331_v58 = vld [vmem:[%s17518_s3 + $0x1b0] ss:$8 sps:$4 sm:$0xff]  }
 0x14e   : > { %v12334_v60 = vld [vmem:[%s17518_s3 + $0x1c0] ss:$8 sps:$4 sm:$0xff]  }
 0x14f   : > { %v780_v61 = vsel %vm730_vm14, %v701_v56, %v755_v59  ;;  %v12327_v56 = vld [vmem:[%s17518_s3 + $0x1a0] ss:$8 sps:$4 sm:$0xff]   ;;  %v12332_v59 = vld [vmem:[%s17518_s3 + $0x1c4] ss:$8 sps:$4 sm:$0xff]  }
 0x150   : > { %v1018_v62 = vpack.c.bf16 %v780_v61, %v780_v61  ;;  %v12335_v61 = vld [vmem:[%s17518_s3 + $0x1d4] ss:$8 sps:$4 sm:$0xff]  }
 0x152   : > { %v2375_v63 = vsel %vm2373_vm15, %v1018_v62, 0 }
 0x153   : > { %2402 = vmatpush1.bf16.msra.mxu0 %v2375_v63  ;;  %12166 = vmatpush1.bf16.msra.mxu1 %v2375_v63 }
 0x154   : > { %11313 = vmatprep.subr.bf16.mxu0 %v17536_v1  ;;  %5892 = vmatprep.subr.bf16.mxu1 %v17530_v42 }
 0x156   : > { %2426 = vmatmul.mubr.bf16.vlgmr.msra.gmra.mrb[0].mxu1 %v12246_v44  ;;  %2410 = vmatmul.mubr.bf16.vlgmr.msra.gmra.mrb[52].mxu0 %v12315_v14  ;;  %v12337_v44 = vld [vmem:[%s17518_s3 + $0x1d0] ss:$8 sps:$4 sm:$0xff]  }
 0x157   : > { %10408 = vmatprep.mubr.msk.bf16.mxu1 %vm2033_vm3, %v12249_v0  ;;  %10406 = vmatprep.mubr.msk.bf16.mxu0 %vm2033_vm3, %v12318_v16  ;;  %v12343_v14 = vld [vmem:[%s17518_s3 + $0x1f0] ss:$8 sps:$4 sm:$0xff]   ;;  %v12344_v16 = vld [vmem:[%s17518_s3 + $0x204] ss:$8 sps:$4 sm:$0xff]  }
 0x158   : > { %11314 = vmatpush3.bf16.msra.mxu0 %v12326_v50 }
 0x159   : > { %11315 = vmatprep.subr.bf16.mxu0 %v17536_v1 }
 0x15c   : > { %11316 = vmatpush3.bf16.msra.mxu0 %v12328_v51 }
 0x15d   : > { %11369 = vmatprep.subr.bf16.mxu0 %v17536_v1 }
 0x15e   : > { %2434 = vmatmul.mubr.bf16.gmra.mrb[4].mxu1 %v12251_v2  ;;  %2418 = vmatmul.mubr.bf16.gmra.mrb[56].mxu0 %v12320_v19  ;;  %v12338_v2 = vld [vmem:[%s17518_s3 + $0x1e4] ss:$8 sps:$4 sm:$0xff]  }
 0x15f   : > { %10409 = vmatprep.mubr.msk.bf16.mxu1 %vm2033_vm3, %v12252_v3  ;;  %11317 = vmatprep.mubr.msk.bf16.mxu0 %vm12792_vm1, %v17536_v1 }
 0x166   : > { %2442 = vmatmul.mubr.bf16.gmra.mrb[8].mxu1 %v12254_v4 }
 0x167   : > { %10410 = vmatprep.mubr.msk.bf16.mxu1 %vm2033_vm3, %v12255_v5 }
 0x16e   : > { %2450 = vmatmul.mubr.bf16.gmra.mrb[12].mxu1 %v12257_v6 }
 0x16f   : > { %10411 = vmatprep.mubr.msk.bf16.mxu1 %vm2033_vm3, %v12258_v7  ;;  %v12340_v7 = vld [vmem:[%s17518_s3 + $0x1e0] ss:$8 sps:$4 sm:$0xff]  }
 0x176   : > { %2458 = vmatmul.mubr.bf16.gmra.mrb[16].mxu1 %v12260_v8 }
 0x177   : > { %10412 = vmatprep.mubr.msk.bf16.mxu1 %vm2033_vm3, %v12261_v9  ;;  %v12341_v9 = vld [vmem:[%s17518_s3 + $0x1f4] ss:$8 sps:$4 sm:$0xff]  }
 0x17e   : > { %2466 = vmatmul.mubr.bf16.gmra.mrb[20].mxu1 %v12263_v10 }
 0x17f   : > { %10413 = vmatprep.mubr.msk.bf16.mxu1 %vm2033_vm3, %v12264_v11 }
 0x186   : > { %2474 = vmatmul.mubr.bf16.gmra.mrb[24].mxu1 %v12266_v12 }
 0x187   : > { %10414 = vmatprep.mubr.msk.bf16.mxu1 %vm2033_vm3, %v12267_v13 }
 0x18e   : > { %2482 = vmatmul.mubr.bf16.gmra.mrb[28].mxu1 %v12269_v17 }
 0x18f   : > { %10415 = vmatprep.mubr.msk.bf16.mxu1 %vm2033_vm3, %v12270_v18 }
 0x196   : > { %2490 = vmatmul.mubr.bf16.gmra.mrb[32].mxu1 %v12272_v20 }
 0x197   : > { %10416 = vmatprep.mubr.msk.bf16.mxu1 %vm2033_vm3, %v12273_v21  ;;  %v12346_v21 = vld [vmem:[%s17518_s3 + $0x200] ss:$8 sps:$4 sm:$0xff]  }
 0x19e   : > { %2498 = vmatmul.mubr.bf16.gmra.mrb[36].mxu1 %v12275_v22 }
 0x19f   : > { %10417 = vmatprep.mubr.msk.bf16.mxu1 %vm2033_vm3, %v12276_v23  ;;  %v12347_v23 = vld [vmem:[%s17518_s3 + $0x214] ss:$8 sps:$4 sm:$0xff]  }
 0x1a6   : > { %2506 = vmatmul.mubr.bf16.gmra.mrb[40].mxu1 %v12278_v24 }
 0x1a7   : > { %10418 = vmatprep.mubr.msk.bf16.mxu1 %vm2033_vm3, %v12279_v25 }
 0x1ae   : > { %2514 = vmatmul.mubr.bf16.gmra.mrb[44].mxu1 %v12281_v26 }
 0x1af   : > { %10419 = vmatprep.mubr.msk.bf16.mxu1 %vm2033_vm3, %v12282_v27 }
 0x1b6   : > { %2522 = vmatmul.mubr.bf16.gmra.mrb[48].mxu1 %v12284_v28  ;;  %v12349_v28 = vld [vmem:[%s17518_s3 + $0x210] ss:$8 sps:$4 sm:$0xff]  }
 0x1b7   : > { %10420 = vmatprep.mubr.msk.bf16.mxu1 %vm2033_vm3, %v12285_v29 }
 0x1be   : > { %2530 = vmatmul.mubr.bf16.gmra.mrb[52].mxu1 %v12287_v30  ;;  %v12350_v30 = vld [vmem:[%s17518_s3 + $0x224] ss:$8 sps:$4 sm:$0xff]  }
 0x1bf   : > { %10421 = vmatprep.mubr.msk.bf16.mxu1 %vm2033_vm3, %v12288_v31 }
 0x1c6   : > { %2538 = vmatmul.mubr.bf16.gmra.mrb[56].mxu1 %v12290_v32 }
 0x1c7   : > { %10422 = vmatprep.mubr.msk.bf16.mxu1 %vm2033_vm3, %v12291_v33 }
 0x1ce   : > { %2546 = vmatmul.mubr.bf16.gmra.mrb[60].mxu1 %v12293_v34 }
 0x1cf   : > { %10423 = vmatprep.mubr.msk.bf16.mxu1 %vm2033_vm3, %v12294_v35  ;;  %v12352_v35 = vld [vmem:[%s17518_s3 + $0x220] ss:$8 sps:$4 sm:$0xff]  }
 0x1d6   : > { %2554 = vmatmul.mubr.bf16.gmra.mrb[64].mxu1 %v12296_v36 }
 0x1d7   : > { %10424 = vmatprep.mubr.msk.bf16.mxu1 %vm2033_vm3, %v12297_v37  ;;  %v12353_v37 = vld [vmem:[%s17518_s3 + $0x234] ss:$8 sps:$4 sm:$0xff]  }
 0x1de   : > { %2562 = vmatmul.mubr.bf16.gmra.mrb[68].mxu1 %v12299_v38 }
 0x1df   : > { %10425 = vmatprep.mubr.msk.bf16.mxu1 %vm2033_vm3, %v12300_v39 }
 0x1e6   : > { %2570 = vmatmul.mubr.bf16.gmra.mrb[72].mxu1 %v12302_v40 }
 0x1e7   : > { %10426 = vmatprep.mubr.msk.bf16.mxu1 %vm2033_vm3, %v12303_v41 }
 0x1ee   : > { %2578 = vmatmul.mubr.bf16.gmra.mrb[76].mxu1 %v12305_v43  ;;  %v12355_v43 = vld [vmem:[%s17518_s3 + $0x230] ss:$8 sps:$4 sm:$0xff]  }
 0x1ef   : > { %10427 = vmatprep.mubr.msk.bf16.mxu1 %vm2033_vm3, %v12306_v45 }
 0x1f6   : > { %2586 = vmatmul.mubr.bf16.gmra.mrb[80].mxu1 %v12308_v46  ;;  %v12356_v46 = vld [vmem:[%s17518_s3 + $0x244] ss:$8 sps:$4 sm:$0xff]  }
 0x1f7   : > { %10428 = vmatprep.mubr.msk.bf16.mxu1 %vm2033_vm3, %v12309_v47 }
 0x1fe   : > { %2594 = vmatmul.mubr.bf16.gmra.mrb[84].mxu1 %v12311_v48 }
 0x1ff   : > { %10429 = vmatprep.mubr.msk.bf16.mxu1 %vm2033_vm3, %v12312_v49 }
 0x206   : > { %2602 = vmatmul.mubr.bf16.gmra.mrb[88].mxu1 %v12314_v52 }
 0x207   : > { %10430 = vmatprep.mubr.msk.bf16.mxu1 %vm2033_vm3, %v12321_v53  ;;  %v12358_v53 = vld [vmem:[%s17518_s3 + $0x240] ss:$8 sps:$4 sm:$0xff]  }
 0x20e   : > { %2610 = vmatmul.mubr.bf16.gmra.mrb[92].mxu1 %v12323_v54 }
 0x20f   : > { %10431 = vmatprep.mubr.msk.bf16.mxu1 %vm2033_vm3, %v12324_v55  ;;  %v12359_v55 = vld [vmem:[%s17518_s3 + $0x254] ss:$8 sps:$4 sm:$0xff]  }
 0x216   : > { %2618 = vmatmul.mubr.bf16.gmra.mrb[96].mxu1 %v12327_v56 }
 0x217   : > { %10432 = vmatprep.mubr.msk.bf16.mxu1 %vm2033_vm3, %v12329_v57 }
 0x21e   : > { %2626 = vmatmul.mubr.bf16.gmra.mrb[100].mxu1 %v12331_v58 }
 0x21f   : > { %10433 = vmatprep.mubr.msk.bf16.mxu1 %vm2033_vm3, %v12332_v59 }
 0x226   : > { %2634 = vmatmul.mubr.bf16.gmra.mrb[104].mxu1 %v12334_v60 }
 0x227   : > { %10434 = vmatprep.mubr.msk.bf16.mxu1 %vm2033_vm3, %v12335_v61 }
 0x229   : > { %v13233_v62 = vpop.f32.mrb[0].mxu1  ;;  %v13323_v49 = vpop.f32.mrb[52].mxu0 }
 0x22a   : > { %v2429_v63 = vpop.f32.mrb[1].mxu1  ;;  %v2413_v50 = vpop.f32.mrb[53].mxu0 }
 0x22b   : > { %v13238_v0 = vpop.f32.mrb[2].mxu1  ;;  %v13338_v58 = vpop.f32.mrb[54].mxu0  ;;  %v12372_v50 = vld [vmem:[%s17518_s3 + $0x280] ss:$8 sps:$4 sm:$0xff]  }
 0x22c   : > { %v3315_v3 = vpack.c.bf16 %v13238_v0, %v13233_v62  ;;  %v2432_v4 = vpop.f32.mrb[3].mxu1  ;;  %v3313_v59 = vpack.c.bf16 %v13338_v58, %v13323_v49  ;;  %v2416_v60 = vpop.f32.mrb[55].mxu0  ;;  %v12423_v0 = vld [vmem:[%s17518_s3 + $0x394] ss:$8 sps:$4 sm:$0xff]  }
 0x22d   : > { %v12361_v4 = vld [vmem:[%s17518_s3 + $0x250] ss:$8 sps:$4 sm:$0xff]  }
 0x22e   : > { %2642 = vmatmul.mubr.bf16.gmra.mrb[108].mxu1 %v12337_v44 }
 0x22f   : > { %10435 = vmatprep.mubr.msk.bf16.mxu1 %vm2033_vm3, %v12338_v2 }
 0x231   : > { %v13246_v5 = vpop.f32.mrb[4].mxu1  ;;  %v13342_v61 = vpop.f32.mrb[56].mxu0 }
 0x232   : > { %v2437_v6 = vpop.f32.mrb[5].mxu1  ;;  %v2421_v63 = vpop.f32.mrb[57].mxu0 }
 0x233   : > { %v13251_v8 = vpop.f32.mrb[6].mxu1 }
 0x234   : > { %v3316_v10 = vpack.c.bf16 %v13251_v8, %v13246_v5  ;;  %v2440_v11 = vpop.f32.mrb[7].mxu1  ;;  %v12426_v8 = vld [vmem:[%s17518_s3 + $0x3a4] ss:$8 sps:$4 sm:$0xff]  }
 0x236   : > { %2650 = vmatmul.mubr.bf16.gmra.mrb[112].mxu1 %v12340_v7  ;;  %v12362_v7 = vld [vmem:[%s17518_s3 + $0x264] ss:$8 sps:$4 sm:$0xff]  }
 0x237   : > { %10436 = vmatprep.mubr.msk.bf16.mxu1 %vm2033_vm3, %v12341_v9 }
 0x239   : > { %v13259_v12 = vpop.f32.mrb[8].mxu1 }
 0x23a   : > { %v2445_v13 = vpop.f32.mrb[9].mxu1 }
 0x23b   : > { %v13264_v15 = vpop.f32.mrb[10].mxu1  ;;  %v13357_v13 = vpop.f32.mrb[58].mxu0 }
 0x23c   : > { %v3317_v17 = vpack.c.bf16 %v13264_v15, %v13259_v12  ;;  %v2448_v18 = vpop.f32.mrb[11].mxu1  ;;  %v12429_v15 = vld [vmem:[%s17518_s3 + $0x3b4] ss:$8 sps:$4 sm:$0xff]  }
 0x23e   : > { %2658 = vmatmul.mubr.bf16.gmra.mrb[116].mxu1 %v12343_v14  ;;  %v3314_v14 = vpack.c.bf16 %v13357_v13, %v13342_v61  ;;  %v12420_v13 = vld [vmem:[%s17518_s3 + $0x384] ss:$8 sps:$4 sm:$0xff]  }
 0x23f   : > { %10437 = vmatprep.mubr.msk.bf16.mxu1 %vm2033_vm3, %v12344_v16  ;;  %v2424_v16 = vpop.f32.mrb[59].mxu0 }
 0x241   : > { %v13272_v19 = vpop.f32.mrb[12].mxu1 }
 0x242   : > { %v2453_v20 = vpop.f32.mrb[13].mxu1 }
 0x243   : > { %v13277_v22 = vpop.f32.mrb[14].mxu1 }
 0x244   : > { %v3318_v24 = vpack.c.bf16 %v13277_v22, %v13272_v19  ;;  %v2456_v25 = vpop.f32.mrb[15].mxu1  ;;  %v12432_v22 = vld [vmem:[%s17518_s3 + $0x3c4] ss:$8 sps:$4 sm:$0xff]  }
 0x245   : > { %v12365_v25 = vld [vmem:[%s17518_s3 + $0x274] ss:$8 sps:$4 sm:$0xff]  }
 0x246   : > { %2666 = vmatmul.mubr.bf16.gmra.mrb[120].mxu1 %v12346_v21  ;;  %v12364_v21 = vld [vmem:[%s17518_s3 + $0x260] ss:$8 sps:$4 sm:$0xff]  }
 0x247   : > { %10438 = vmatprep.mubr.msk.bf16.mxu1 %vm2033_vm3, %v12347_v23 }
 0x249   : > { %v13285_v26 = vpop.f32.mrb[16].mxu1 }
 0x24a   : > { %v2461_v27 = vpop.f32.mrb[17].mxu1 }
 0x24b   : > { %v13290_v29 = vpop.f32.mrb[18].mxu1 }
 0x24c   : > { %v3319_v31 = vpack.c.bf16 %v13290_v29, %v13285_v26  ;;  %v2464_v32 = vpop.f32.mrb[19].mxu1  ;;  %v12435_v29 = vld [vmem:[%s17518_s3 + $0x3d4] ss:$8 sps:$4 sm:$0xff]  }
 0x24e   : > { %2674 = vmatmul.mubr.bf16.gmra.mrb[124].mxu1 %v12349_v28 }
 0x24f   : > { %10439 = vmatprep.mubr.msk.bf16.mxu1 %vm2033_vm3, %v12350_v30 }
 0x251   : > { %v13298_v33 = vpop.f32.mrb[20].mxu1 }
 0x252   : > { %v2469_v34 = vpop.f32.mrb[21].mxu1 }
 0x253   : > { %v13303_v36 = vpop.f32.mrb[22].mxu1  ;;  %v12368_v34 = vld [vmem:[%s17518_s3 + $0x270] ss:$8 sps:$4 sm:$0xff]  }
 0x254   : > { %v3320_v38 = vpack.c.bf16 %v13303_v36, %v13298_v33  ;;  %v2472_v39 = vpop.f32.mrb[23].mxu1  ;;  %v12438_v36 = vld [vmem:[%s17518_s3 + $0x3e4] ss:$8 sps:$4 sm:$0xff]  }
 0x256   : > { %2682 = vmatmul.mubr.bf16.gmra.mrb[128].mxu1 %v12352_v35 }
 0x257   : > { %10440 = vmatprep.mubr.msk.bf16.mxu1 %vm2033_vm3, %v12353_v37  ;;  %v12370_v37 = vld [vmem:[%s17518_s3 + $0x284] ss:$8 sps:$4 sm:$0xff]  }
 0x259   : > { %v13311_v40 = vpop.f32.mrb[24].mxu1 }
 0x25a   : > { %v2477_v41 = vpop.f32.mrb[25].mxu1 }
 0x25b   : > { %v13316_v45 = vpop.f32.mrb[26].mxu1 }
 0x25c   : > { %v3321_v47 = vpack.c.bf16 %v13316_v45, %v13311_v40  ;;  %v2480_v48 = vpop.f32.mrb[27].mxu1  ;;  %v12441_v45 = vld [vmem:[%s17518_s3 + $0x3f4] ss:$8 sps:$4 sm:$0xff]  }
 0x25e   : > { %2690 = vmatmul.mubr.bf16.gmra.mrb[132].mxu1 %v12355_v43  ;;  %v12367_v43 = vld [vmem:[%s17519_s4] sm:$0xff]  }
 0x25f   : > { %10441 = vmatprep.mubr.msk.bf16.mxu1 %vm2033_vm3, %v12356_v46 }
 0x261   : > { %v13326_v51 = vpop.f32.mrb[28].mxu1 }
 0x262   : > { %v2485_v52 = vpop.f32.mrb[29].mxu1 }
 0x263   : > { %v13331_v54 = vpop.f32.mrb[30].mxu1 }
 0x264   : > { %v3322_v56 = vpack.c.bf16 %v13331_v54, %v13326_v51  ;;  %v2488_v57 = vpop.f32.mrb[31].mxu1  ;;  %v12444_v54 = vld [vmem:[%s17518_s3 + $0x404] ss:$8 sps:$4 sm:$0xff]  }
 0x265   : > { %v12369_v57 = vld [vmem:[%s17519_s4 + $0x8] sm:$0xff]  }
 0x266   : > { %2698 = vmatmul.mubr.bf16.gmra.mrb[136].mxu1 %v12358_v53  ;;  %v12373_v53 = vld [vmem:[%s17518_s3 + $0x294] ss:$8 sps:$4 sm:$0xff]  }
 0x267   : > { %10442 = vmatprep.mubr.msk.bf16.mxu1 %vm2033_vm3, %v12359_v55 }
 0x269   : > { %v13345_v44 = vpop.f32.mrb[32].mxu1 }
 0x26a   : > { %v2493_v2 = vpop.f32.mrb[33].mxu1 }
 0x26b   : > { %v13350_v6 = vpop.f32.mrb[34].mxu1 }
 0x26c   : > { %v3323_v9 = vpack.c.bf16 %v13350_v6, %v13345_v44  ;;  %v2496_v11 = vpop.f32.mrb[35].mxu1  ;;  %v12449_v6 = vld [vmem:[%s17518_s3 + $0x414] ss:$8 sps:$4 sm:$0xff]  }
 0x26d   : > { %v12376_v11 = vld [vmem:[%s17518_s3 + $0x2a4] ss:$8 sps:$4 sm:$0xff]  }
 0x26e   : > { %2706 = vmatmul.mubr.bf16.gmra.mrb[140].mxu1 %v12361_v4  ;;  %v12375_v4 = vld [vmem:[%s17518_s3 + $0x290] ss:$8 sps:$4 sm:$0xff]  }
 0x26f   : > { %10443 = vmatprep.mubr.msk.bf16.mxu1 %vm2033_vm3, %v12362_v7 }
 0x271   : > { %v13362_v18 = vpop.f32.mrb[36].mxu1 }
 0x272   : > { %v2501_v20 = vpop.f32.mrb[37].mxu1 }
 0x273   : > { %v13367_v23 = vpop.f32.mrb[38].mxu1 }
 0x274   : > { %v3324_v27 = vpack.c.bf16 %v13367_v23, %v13362_v18  ;;  %v2504_v28 = vpop.f32.mrb[39].mxu1  ;;  %v12451_v18 = vld [vmem:[%s17518_s3 + $0x410] ss:$8 sps:$4 sm:$0xff]  }
 0x275   : > { %v12378_v28 = vld [vmem:[%s17518_s3 + $0x2a0] ss:$8 sps:$4 sm:$0xff]  }
 0x276   : > { %2714 = vmatmul.mubr.bf16.gmra.mrb[144].mxu1 %v12364_v21 }
 0x277   : > { %10444 = vmatprep.mubr.msk.bf16.mxu1 %vm2033_vm3, %v12365_v25 }
 0x279   : > { %v13375_v30 = vpop.f32.mrb[40].mxu1 }
 0x27a   : > { %v2509_v32 = vpop.f32.mrb[41].mxu1 }
 0x27b   : > { %v2510_v35 = vpop.f32.mrb[42].mxu1 }
 0x27c   : > { %v2512_v39 = vpop.f32.mrb[43].mxu1 }
 0x27e   : > { %2722 = vmatmul.mubr.bf16.gmra.mrb[148].mxu1 %v12368_v34  ;;  %v12379_v34 = vld [vmem:[%s17518_s3 + $0x2b4] ss:$8 sps:$4 sm:$0xff]  }
 0x27f   : > { %10445 = vmatprep.mubr.msk.bf16.mxu1 %vm2033_vm3, %v12370_v37 }
 0x281   : > { %v2515_v41 = vpop.f32.mrb[44].mxu1 }
 0x282   : > { %v3330_v46 = vpack.c.bf16 %v2515_v41, %v2510_v35  ;;  %v2517_v48 = vpop.f32.mrb[45].mxu1 }
 0x283   : > { %v2518_v52 = vpop.f32.mrb[46].mxu1  ;;  %v12382_v48 = vld [vmem:[%s17518_s3 + $0x2c4] ss:$8 sps:$4 sm:$0xff]  }
 0x284   : > { %v2520_v55 = vpop.f32.mrb[47].mxu1  ;;  %11318 = vmatmul.mubr.msk.bf16.vlgmr.msra.gmra.mrb[60].mxu0 %vm3359_vm0, %v3330_v46 }
 0x285   : > { %11321 = vmatprep.mubr.msk.bf16.mxu0 %vm12792_vm1, %v17536_v1  ;;  %11370 = vmatpush3.bf16.msra.mxu0 %v12367_v43  ;;  %v12381_v43 = vld [vmem:[%s17518_s3 + $0x2b0] ss:$8 sps:$4 sm:$0xff]  }
 0x286   : > { %11371 = vmatprep.subr.bf16.mxu0 %v17536_v1  ;;  %2730 = vmatmul.mubr.bf16.gmra.mrb[152].mxu1 %v12372_v50 }
 0x287   : > { %10446 = vmatprep.mubr.msk.bf16.mxu1 %vm2033_vm3, %v12373_v53 }
 0x289   : > { %v2523_v60 = vpop.f32.mrb[48].mxu1  ;;  %11372 = vmatpush3.bf16.msra.mxu0 %v12369_v57  ;;  %v12384_v57 = vld [vmem:[%s17518_s3 + $0x2c0] ss:$8 sps:$4 sm:$0xff]  }
 0x28a   : > { %v3331_v63 = vpack.c.bf16 %v2523_v60, %v2518_v52  ;;  %v2525_v2 = vpop.f32.mrb[49].mxu1  ;;  %11425 = vmatprep.subr.bf16.mxu0 %v17536_v1 }
 0x28b   : > { %v2526_v7 = vpop.f32.mrb[50].mxu1 }
 0x28c   : > { %v2528_v16 = vpop.f32.mrb[51].mxu1  ;;  %11322 = vmatmul.mubr.msk.bf16.gmra.mrb[64].mxu0 %vm3359_vm0, %v3331_v63  ;;  %v12385_v63 = vld [vmem:[%s17518_s3 + $0x2d4] ss:$8 sps:$4 sm:$0xff]  }
 0x28d   : > { %11325 = vmatprep.mubr.msk.bf16.mxu0 %vm12792_vm1, %v17536_v1  ;;  %v12387_v16 = vld [vmem:[%s17518_s3 + $0x2d0] ss:$8 sps:$4 sm:$0xff]  }
 0x28e   : > { %2738 = vmatmul.mubr.bf16.gmra.mrb[156].mxu1 %v12375_v4 }
 0x28f   : > { %10447 = vmatprep.mubr.msk.bf16.mxu1 %vm2033_vm3, %v12376_v11 }
 0x291   : > { %v2531_v20 = vpop.f32.mrb[52].mxu1 }
 0x292   : > { %v3332_v21 = vpack.c.bf16 %v2531_v20, %v2526_v7  ;;  %v2533_v25 = vpop.f32.mrb[53].mxu1 }
 0x293   : > { %v2534_v32 = vpop.f32.mrb[54].mxu1 }
 0x294   : > { %v2536_v35 = vpop.f32.mrb[55].mxu1  ;;  %11326 = vmatmul.mubr.msk.bf16.gmra.mrb[68].mxu0 %vm3359_vm0, %v3332_v21  ;;  %v12388_v21 = vld [vmem:[%s17518_s3 + $0x2e4] ss:$8 sps:$4 sm:$0xff]  }
 0x295   : > { %11329 = vmatprep.mubr.msk.bf16.mxu0 %vm12792_vm1, %v17536_v1  ;;  %v12390_v35 = vld [vmem:[%s17518_s3 + $0x2e0] ss:$8 sps:$4 sm:$0xff]  }
 0x296   : > { %2746 = vmatmul.mubr.bf16.gmra.mrb[160].mxu1 %v12378_v28 }
 0x297   : > { %10448 = vmatprep.mubr.msk.bf16.mxu1 %vm2033_vm3, %v12379_v34 }
 0x299   : > { %v2539_v37 = vpop.f32.mrb[56].mxu1 }
 0x29a   : > { %v3333_v39 = vpack.c.bf16 %v2539_v37, %v2534_v32  ;;  %v2541_v41 = vpop.f32.mrb[57].mxu1 }
 0x29b   : > { %v2542_v46 = vpop.f32.mrb[58].mxu1 }
 0x29c   : > { %v2544_v50 = vpop.f32.mrb[59].mxu1  ;;  %11330 = vmatmul.mubr.msk.bf16.gmra.mrb[72].mxu0 %vm3359_vm0, %v3333_v39  ;;  %v12391_v39 = vld [vmem:[%s17518_s3 + $0x2f4] ss:$8 sps:$4 sm:$0xff]  }
 0x29d   : > { %11333 = vmatprep.mubr.msk.bf16.mxu0 %vm12792_vm1, %v17536_v1  ;;  %v12393_v50 = vld [vmem:[%s17518_s3 + $0x2f0] ss:$8 sps:$4 sm:$0xff]  }
 0x29e   : > { %2754 = vmatmul.mubr.bf16.gmra.mrb[164].mxu1 %v12381_v43 }
 0x29f   : > { %10449 = vmatprep.mubr.msk.bf16.mxu1 %vm2033_vm3, %v12382_v48 }
 0x2a1   : > { %v2547_v52 = vpop.f32.mrb[60].mxu1 }
 0x2a2   : > { %v3334_v53 = vpack.c.bf16 %v2547_v52, %v2542_v46  ;;  %v2549_v55 = vpop.f32.mrb[61].mxu1 }
 0x2a3   : > { %v2550_v60 = vpop.f32.mrb[62].mxu1 }
 0x2a4   : > { %v2552_v2 = vpop.f32.mrb[63].mxu1  ;;  %11334 = vmatmul.mubr.msk.bf16.gmra.mrb[76].mxu0 %vm3359_vm0, %v3334_v53  ;;  %v12394_v53 = vld [vmem:[%s17518_s3 + $0x304] ss:$8 sps:$4 sm:$0xff]  }
 0x2a5   : > { %11337 = vmatprep.mubr.msk.bf16.mxu0 %vm12792_vm1, %v17536_v1  ;;  %v12396_v2 = vld [vmem:[%s17518_s3 + $0x300] ss:$8 sps:$4 sm:$0xff]  }
 0x2a6   : > { %2762 = vmatmul.mubr.bf16.gmra.mrb[168].mxu1 %v12384_v57 }
 0x2a7   : > { %10450 = vmatprep.mubr.msk.bf16.mxu1 %vm2033_vm3, %v12385_v63 }
 0x2a9   : > { %v2555_v4 = vpop.f32.mrb[64].mxu1 }
 0x2aa   : > { %v3335_v7 = vpack.c.bf16 %v2555_v4, %v2550_v60  ;;  %v2557_v11 = vpop.f32.mrb[65].mxu1 }
 0x2ab   : > { %v2558_v20 = vpop.f32.mrb[66].mxu1 }
 0x2ac   : > { %v2560_v25 = vpop.f32.mrb[67].mxu1  ;;  %11338 = vmatmul.mubr.msk.bf16.gmra.mrb[80].mxu0 %vm3359_vm0, %v3335_v7  ;;  %v12397_v7 = vld [vmem:[%s17518_s3 + $0x314] ss:$8 sps:$4 sm:$0xff]  }
 0x2ad   : > { %11341 = vmatprep.mubr.msk.bf16.mxu0 %vm12792_vm1, %v17536_v1  ;;  %v12399_v25 = vld [vmem:[%s17518_s3 + $0x310] ss:$8 sps:$4 sm:$0xff]  }
 0x2ae   : > { %2770 = vmatmul.mubr.bf16.gmra.mrb[172].mxu1 %v12387_v16 }
 0x2af   : > { %10451 = vmatprep.mubr.msk.bf16.mxu1 %vm2033_vm3, %v12388_v21 }
 0x2b1   : > { %v2563_v28 = vpop.f32.mrb[68].mxu1 }
 0x2b2   : > { %v3336_v32 = vpack.c.bf16 %v2563_v28, %v2558_v20  ;;  %v2565_v34 = vpop.f32.mrb[69].mxu1 }
 0x2b3   : > { %v2566_v37 = vpop.f32.mrb[70].mxu1 }
 0x2b4   : > { %v2568_v41 = vpop.f32.mrb[71].mxu1  ;;  %11342 = vmatmul.mubr.msk.bf16.gmra.mrb[84].mxu0 %vm3359_vm0, %v3336_v32  ;;  %v12400_v32 = vld [vmem:[%s17518_s3 + $0x324] ss:$8 sps:$4 sm:$0xff]  }
 0x2b5   : > { %11345 = vmatprep.mubr.msk.bf16.mxu0 %vm12792_vm1, %v17536_v1  ;;  %v12402_v41 = vld [vmem:[%s17518_s3 + $0x320] ss:$8 sps:$4 sm:$0xff]  }
 0x2b6   : > { %2778 = vmatmul.mubr.bf16.gmra.mrb[176].mxu1 %v12390_v35 }
 0x2b7   : > { %10452 = vmatprep.mubr.msk.bf16.mxu1 %vm2033_vm3, %v12391_v39 }
 0x2b9   : > { %v2571_v43 = vpop.f32.mrb[72].mxu1 }
 0x2ba   : > { %v3337_v46 = vpack.c.bf16 %v2571_v43, %v2566_v37  ;;  %v2573_v48 = vpop.f32.mrb[73].mxu1 }
 0x2bb   : > { %v2574_v52 = vpop.f32.mrb[74].mxu1 }
 0x2bc   : > { %v2576_v55 = vpop.f32.mrb[75].mxu1  ;;  %11346 = vmatmul.mubr.msk.bf16.gmra.mrb[88].mxu0 %vm3359_vm0, %v3337_v46  ;;  %v12403_v46 = vld [vmem:[%s17518_s3 + $0x334] ss:$8 sps:$4 sm:$0xff]  }
 0x2bd   : > { %11349 = vmatprep.mubr.msk.bf16.mxu0 %vm12792_vm1, %v17536_v1  ;;  %v12406_v55 = vld [vmem:[%s17518_s3 + $0x330] ss:$8 sps:$4 sm:$0xff]  }
 0x2be   : > { %2786 = vmatmul.mubr.bf16.gmra.mrb[180].mxu1 %v12393_v50 }
 0x2bf   : > { %10453 = vmatprep.mubr.msk.bf16.mxu1 %vm2033_vm3, %v12394_v53 }
 0x2c1   : > { %v2579_v57 = vpop.f32.mrb[76].mxu1 }
 0x2c2   : > { %v3338_v60 = vpack.c.bf16 %v2579_v57, %v2574_v52  ;;  %v2581_v63 = vpop.f32.mrb[77].mxu1 }
 0x2c3   : > { %v2582_v4 = vpop.f32.mrb[78].mxu1 }
 0x2c4   : > { %v2584_v11 = vpop.f32.mrb[79].mxu1  ;;  %11350 = vmatmul.mubr.msk.bf16.gmra.mrb[92].mxu0 %vm3359_vm0, %v3338_v60  ;;  %v12408_v60 = vld [vmem:[%s17518_s3 + $0x344] ss:$8 sps:$4 sm:$0xff]  }
 0x2c5   : > { %11353 = vmatprep.mubr.msk.bf16.mxu0 %vm12792_vm1, %v17536_v1  ;;  %v12410_v11 = vld [vmem:[%s17518_s3 + $0x340] ss:$8 sps:$4 sm:$0xff]  }
 0x2c6   : > { %2794 = vmatmul.mubr.bf16.gmra.mrb[184].mxu1 %v12396_v2 }
 0x2c7   : > { %10454 = vmatprep.mubr.msk.bf16.mxu1 %vm2033_vm3, %v12397_v7 }
 0x2c9   : > { %v2587_v16 = vpop.f32.mrb[80].mxu1 }
 0x2ca   : > { %v3339_v20 = vpack.c.bf16 %v2587_v16, %v2582_v4  ;;  %v2589_v21 = vpop.f32.mrb[81].mxu1 }
 0x2cb   : > { %v2590_v28 = vpop.f32.mrb[82].mxu1 }
 0x2cc   : > { %v2592_v34 = vpop.f32.mrb[83].mxu1  ;;  %11354 = vmatmul.mubr.msk.bf16.gmra.mrb[96].mxu0 %vm3359_vm0, %v3339_v20  ;;  %v12411_v20 = vld [vmem:[%s17518_s3 + $0x354] ss:$8 sps:$4 sm:$0xff]  }
 0x2cd   : > { %11357 = vmatprep.mubr.msk.bf16.mxu0 %vm12792_vm1, %v17536_v1 }
 0x2ce   : > { %2802 = vmatmul.mubr.bf16.gmra.mrb[188].mxu1 %v12399_v25 }
 0x2cf   : > { %10455 = vmatprep.mubr.msk.bf16.mxu1 %vm2033_vm3, %v12400_v32 }
 0x2d1   : > { %v2595_v35 = vpop.f32.mrb[84].mxu1 }
 0x2d2   : > { %v3340_v37 = vpack.c.bf16 %v2595_v35, %v2590_v28  ;;  %v2597_v39 = vpop.f32.mrb[85].mxu1  ;;  %v12405_v28 = vld [vmem:[%s17519_s4 + $0x20] sm:$0xff]   ;;  %v12413_v35 = vld [vmem:[%s17518_s3 + $0x350] ss:$8 sps:$4 sm:$0xff]  }
 0x2d3   : > { %v2598_v43 = vpop.f32.mrb[86].mxu1  ;;  %v12414_v39 = vld [vmem:[%s17518_s3 + $0x364] ss:$8 sps:$4 sm:$0xff]  }
 0x2d4   : > { %v2600_v48 = vpop.f32.mrb[87].mxu1  ;;  %11358 = vmatmul.mubr.msk.bf16.gmra.mrb[100].mxu0 %vm3359_vm0, %v3340_v37 }
 0x2d5   : > { %11361 = vmatprep.mubr.msk.bf16.mxu0 %vm12792_vm1, %v17536_v1 }
 0x2d6   : > { %2810 = vmatmul.mubr.bf16.gmra.mrb[192].mxu1 %v12402_v41 }
 0x2d7   : > { %10456 = vmatprep.mubr.msk.bf16.mxu1 %vm2033_vm3, %v12403_v46  ;;  %v12407_v46 = vld [vmem:[%s17519_s4 + $0x28] sm:$0xff]  }
 0x2d9   : > { %v2603_v50 = vpop.f32.mrb[88].mxu1 }
 0x2da   : > { %v3341_v52 = vpack.c.bf16 %v2603_v50, %v2598_v43  ;;  %v2605_v53 = vpop.f32.mrb[89].mxu1  ;;  %v12417_v50 = vld [vmem:[%s17518_s3 + $0x374] ss:$8 sps:$4 sm:$0xff]  }
 0x2db   : > { %v2606_v57 = vpop.f32.mrb[90].mxu1 }
 0x2dc   : > { %v2608_v63 = vpop.f32.mrb[91].mxu1  ;;  %11362 = vmatmul.mubr.msk.bf16.gmra.mrb[104].mxu0 %vm3359_vm0, %v3341_v52  ;;  %v3342_v4 = vpack.c.bf16 %v2606_v57, %v2606_v57 }
 0x2dd   : > { %11365 = vmatprep.mubr.msk.bf16.mxu0 %vm12792_vm1, %v17536_v1 }
 0x2de   : > { %2818 = vmatmul.mubr.bf16.gmra.mrb[196].mxu1 %v12406_v55 }
 0x2df   : > { %10457 = vmatprep.mubr.msk.bf16.mxu1 %vm2033_vm3, %v12408_v60  ;;  %v12419_v60 = vld [vmem:[%s17518_s3 + $0x370] ss:$8 sps:$4 sm:$0xff]  }
 0x2e1   : > { %v13512_v2 = vpop.f32.mrb[92].mxu1 }
 0x2e2   : > { %v2613_v7 = vpop.f32.mrb[93].mxu1 }
 0x2e3   : > { %v13517_v16 = vpop.f32.mrb[94].mxu1 }
 0x2e4   : > { %11366 = vmatmul.mubr.msk.bf16.gmra.mrb[108].mxu0 %vm3359_vm0, %v3342_v4  ;;  %v3722_v21 = vpack.c.bf16 %v13517_v16, %v13512_v2  ;;  %v2616_v25 = vpop.f32.mrb[95].mxu1 }
 0x2e5   : > { %11373 = vmatprep.mubr.msk.bf16.mxu0 %vm12792_vm1, %v17536_v1 }
 0x2e6   : > { %2826 = vmatmul.mubr.bf16.gmra.mrb[200].mxu1 %v12410_v11  ;;  %v12422_v11 = vld [vmem:[%s17518_s3 + $0x380] ss:$8 sps:$4 sm:$0xff]  }
 0x2e7   : > { %10458 = vmatprep.mubr.msk.bf16.mxu1 %vm2033_vm3, %v12411_v20 }
 0x2e9   : > { %v13531_v32 = vpop.f32.mrb[96].mxu1 }
 0x2ea   : > { %v2621_v34 = vpop.f32.mrb[97].mxu1 }
 0x2eb   : > { %v13536_v37 = vpop.f32.mrb[98].mxu1  ;;  %v12425_v34 = vld [vmem:[%s17518_s3 + $0x390] ss:$8 sps:$4 sm:$0xff]  }
 0x2ec   : > { %11374 = vmatmul.mubr.msk.bf16.vlgmr.msra.gmra.mrb[112].mxu0 %vm3359_vm0, %v3313_v59  ;;  %v3723_v41 = vpack.c.bf16 %v13536_v37, %v13531_v32  ;;  %v2624_v43 = vpop.f32.mrb[99].mxu1  ;;  %v12416_v59 = vld [vmem:[%s17518_s3 + $0x360] ss:$8 sps:$4 sm:$0xff]  }
 0x2ed   : > { %11377 = vmatprep.mubr.msk.bf16.mxu0 %vm12792_vm1, %v17536_v1  ;;  %11426 = vmatpush3.bf16.msra.mxu0 %v12405_v28 }
 0x2ee   : > { %11427 = vmatprep.subr.bf16.mxu0 %v17536_v1  ;;  %2834 = vmatmul.mubr.bf16.gmra.mrb[204].mxu1 %v12413_v35 }
 0x2ef   : > { %10459 = vmatprep.mubr.msk.bf16.mxu1 %vm2033_vm3, %v12414_v39 }
 0x2f1   : > { %11428 = vmatpush3.bf16.msra.mxu0 %v12407_v46  ;;  %v13554_v49 = vpop.f32.mrb[100].mxu1  ;;  %v12428_v46 = vld [vmem:[%s17518_s3 + $0x3a0] ss:$8 sps:$4 sm:$0xff]  }
 0x2f2   : > { %v2629_v58 = vpop.f32.mrb[101].mxu1  ;;  %11481 = vmatprep.subr.bf16.mxu0 %v17536_v1 }
 0x2f3   : > { %v13560_v48 = vpop.f32.mrb[102].mxu1 }
 0x2f4   : > { %11378 = vmatmul.mubr.msk.bf16.gmra.mrb[116].mxu0 %vm3359_vm0, %v3314_v14  ;;  %v3724_v52 = vpack.c.bf16 %v13560_v48, %v13554_v49  ;;  %v2632_v53 = vpop.f32.mrb[103].mxu1 }
 0x2f5   : > { %11381 = vmatprep.mubr.msk.bf16.mxu0 %vm12792_vm1, %v17536_v1  ;;  %v12431_v53 = vld [vmem:[%s17518_s3 + $0x3b0] ss:$8 sps:$4 sm:$0xff]  }
 0x2f6   : > { %2842 = vmatmul.mubr.bf16.gmra.mrb[208].mxu1 %v12416_v59 }
 0x2f7   : > { %10460 = vmatprep.mubr.msk.bf16.mxu1 %vm2033_vm3, %v12417_v50 }
 0x2f9   : > { %v13574_v55 = vpop.f32.mrb[104].mxu1 }
 0x2fa   : > { %v2637_v57 = vpop.f32.mrb[105].mxu1 }
 0x2fb   : > { %v13579_v61 = vpop.f32.mrb[106].mxu1 }
 0x2fc   : > { %11382 = vmatmul.mubr.msk.bf16.gmra.mrb[120].mxu0 %vm3359_vm0, %v3315_v3  ;;  %v3725_v14 = vpack.c.bf16 %v13579_v61, %v13574_v55  ;;  %v2640_v63 = vpop.f32.mrb[107].mxu1 }
 0x2fd   : > { %11385 = vmatprep.mubr.msk.bf16.mxu0 %vm12792_vm1, %v17536_v1  ;;  %v12434_v63 = vld [vmem:[%s17518_s3 + $0x3c0] ss:$8 sps:$4 sm:$0xff]  }
 0x2fe   : > { %2850 = vmatmul.mubr.bf16.gmra.mrb[212].mxu1 %v12419_v60 }
 0x2ff   : > { %10461 = vmatprep.mubr.msk.bf16.mxu1 %vm2033_vm3, %v12420_v13 }
 0x301   : > { %v13593_v4 = vpop.f32.mrb[108].mxu1 }
 0x302   : > { %v2645_v7 = vpop.f32.mrb[109].mxu1 }
 0x303   : > { %v13598_v62 = vpop.f32.mrb[110].mxu1 }
 0x304   : > { %11386 = vmatmul.mubr.msk.bf16.gmra.mrb[124].mxu0 %vm3359_vm0, %v3316_v10  ;;  %v3726_v3 = vpack.c.bf16 %v13598_v62, %v13593_v4  ;;  %v2648_v20 = vpop.f32.mrb[111].mxu1 }
 0x305   : > { %11389 = vmatprep.mubr.msk.bf16.mxu0 %vm12792_vm1, %v17536_v1  ;;  %v12437_v20 = vld [vmem:[%s17518_s3 + $0x3d0] ss:$8 sps:$4 sm:$0xff]  }
 0x306   : > { %2858 = vmatmul.mubr.bf16.gmra.mrb[216].mxu1 %v12422_v11 }
 0x307   : > { %10462 = vmatprep.mubr.msk.bf16.mxu1 %vm2033_vm3, %v12423_v0 }
 0x309   : > { %v13612_v25 = vpop.f32.mrb[112].mxu1 }
 0x30a   : > { %v2653_v28 = vpop.f32.mrb[113].mxu1 }
 0x30b   : > { %v13617_v5 = vpop.f32.mrb[114].mxu1 }
 0x30c   : > { %11390 = vmatmul.mubr.msk.bf16.gmra.mrb[128].mxu0 %vm3359_vm0, %v3317_v17  ;;  %v3727_v10 = vpack.c.bf16 %v13617_v5, %v13612_v25  ;;  %v2656_v35 = vpop.f32.mrb[115].mxu1 }
 0x30d   : > { %11393 = vmatprep.mubr.msk.bf16.mxu0 %vm12792_vm1, %v17536_v1  ;;  %v12440_v35 = vld [vmem:[%s17518_s3 + $0x3e0] ss:$8 sps:$4 sm:$0xff]  }
 0x30e   : > { %2866 = vmatmul.mubr.bf16.gmra.mrb[220].mxu1 %v12425_v34 }
 0x30f   : > { %10463 = vmatprep.mubr.msk.bf16.mxu1 %vm2033_vm3, %v12426_v8 }
 0x311   : > { %v13631_v39 = vpop.f32.mrb[116].mxu1 }
 0x312   : > { %v2661_v43 = vpop.f32.mrb[117].mxu1 }
 0x313   : > { %v13636_v12 = vpop.f32.mrb[118].mxu1 }
 0x314   : > { %11394 = vmatmul.mubr.msk.bf16.gmra.mrb[132].mxu0 %vm3359_vm0, %v3318_v24  ;;  %v3728_v17 = vpack.c.bf16 %v13636_v12, %v13631_v39  ;;  %v2664_v58 = vpop.f32.mrb[119].mxu1 }
 0x315   : > { %11397 = vmatprep.mubr.msk.bf16.mxu0 %vm12792_vm1, %v17536_v1  ;;  %v12443_v58 = vld [vmem:[%s17518_s3 + $0x3f0] ss:$8 sps:$4 sm:$0xff]  }
 0x316   : > { %2874 = vmatmul.mubr.bf16.gmra.mrb[224].mxu1 %v12428_v46 }
 0x317   : > { %10464 = vmatprep.mubr.msk.bf16.mxu1 %vm2033_vm3, %v12429_v15 }
 0x319   : > { %v13650_v59 = vpop.f32.mrb[120].mxu1 }
 0x31a   : > { %v2669_v50 = vpop.f32.mrb[121].mxu1 }
 0x31b   : > { %v13655_v19 = vpop.f32.mrb[122].mxu1 }
 0x31c   : > { %11398 = vmatmul.mubr.msk.bf16.gmra.mrb[136].mxu0 %vm3359_vm0, %v3319_v31  ;;  %v3729_v24 = vpack.c.bf16 %v13655_v19, %v13650_v59  ;;  %v2672_v57 = vpop.f32.mrb[123].mxu1 }
 0x31d   : > { %11401 = vmatprep.mubr.msk.bf16.mxu0 %vm12792_vm1, %v17536_v1  ;;  %v12447_v57 = vld [vmem:[%s17518_s3 + $0x400] ss:$8 sps:$4 sm:$0xff]  }
 0x31e   : > { %2882 = vmatmul.mubr.bf16.gmra.mrb[228].mxu1 %v12431_v53 }
 0x31f   : > { %10465 = vmatprep.mubr.msk.bf16.mxu1 %vm2033_vm3, %v12432_v22 }
 0x321   : > { %v13669_v60 = vpop.f32.mrb[124].mxu1 }
 0x322   : > { %v2677_v13 = vpop.f32.mrb[125].mxu1 }
 0x323   : > { %v13674_v26 = vpop.f32.mrb[126].mxu1 }
 0x324   : > { %11402 = vmatmul.mubr.msk.bf16.gmra.mrb[140].mxu0 %vm3359_vm0, %v3320_v38  ;;  %v3730_v31 = vpack.c.bf16 %v13674_v26, %v13669_v60  ;;  %v2680_v7 = vpop.f32.mrb[127].mxu1 }
 0x325   : > { %11405 = vmatprep.mubr.msk.bf16.mxu0 %vm12792_vm1, %v17536_v1 }
 0x326   : > { %2890 = vmatmul.mubr.bf16.gmra.mrb[232].mxu1 %v12434_v63  ;;  %v3325_v63 = vpack.c.bf16 %v13375_v30, %v13375_v30  ;;  %v12446_v30 = vld [vmem:[%s17519_s4 + $0x30] sm:$0xff]  }
 0x327   : > { %10466 = vmatprep.mubr.msk.bf16.mxu1 %vm2033_vm3, %v12435_v29 }
 0x329   : > { %v13688_v11 = vpop.f32.mrb[128].mxu1 }
 0x32a   : > { %v2685_v0 = vpop.f32.mrb[129].mxu1 }
 0x32b   : > { %v13693_v33 = vpop.f32.mrb[130].mxu1 }
 0x32c   : > { %11406 = vmatmul.mubr.msk.bf16.gmra.mrb[144].mxu0 %vm3359_vm0, %v3321_v47  ;;  %v3731_v38 = vpack.c.bf16 %v13693_v33, %v13688_v11  ;;  %v2688_v28 = vpop.f32.mrb[131].mxu1 }
 0x32d   : > { %11409 = vmatprep.mubr.msk.bf16.mxu0 %vm12792_vm1, %v17536_v1 }
 0x32e   : > { %2898 = vmatmul.mubr.bf16.gmra.mrb[236].mxu1 %v12437_v20 }
 0x32f   : > { %10467 = vmatprep.mubr.msk.bf16.mxu1 %vm2033_vm3, %v12438_v36  ;;  %v12485_v36 = vld [vmem:[%s17519_s4 + $0x40] sm:$0xff]  }
 0x331   : > { %v13707_v34 = vpop.f32.mrb[132].mxu1 }
 0x332   : > { %v2693_v8 = vpop.f32.mrb[133].mxu1 }
 0x333   : > { %v13712_v40 = vpop.f32.mrb[134].mxu1  ;;  %v12452_v8 = vld [vmem:[%s17518_s3 + $0x420] ss:$8 sps:$4 sm:$0xff]  }
 0x334   : > { %11410 = vmatmul.mubr.msk.bf16.gmra.mrb[148].mxu0 %vm3359_vm0, %v3322_v56  ;;  %v3732_v47 = vpack.c.bf16 %v13712_v40, %v13707_v34  ;;  %v2696_v43 = vpop.f32.mrb[135].mxu1  ;;  %v12487_v34 = vld [vmem:[%s17518_s3 + $0x4d0] ss:$8 sps:$4 sm:$0xff]  }
 0x335   : > { %11413 = vmatprep.mubr.msk.bf16.mxu0 %vm12792_vm1, %v17536_v1 }
 0x336   : > { %2906 = vmatmul.mubr.bf16.gmra.mrb[240].mxu1 %v12440_v35 }
 0x337   : > { %10468 = vmatprep.mubr.msk.bf16.mxu1 %vm2033_vm3, %v12441_v45  ;;  %v12457_v45 = vld [vmem:[%s17518_s3 + $0x434] ss:$8 sps:$4 sm:$0xff]  }
 0x339   : > { %v13726_v46 = vpop.f32.mrb[136].mxu1 }
 0x33a   : > { %v2701_v15 = vpop.f32.mrb[137].mxu1 }
 0x33b   : > { %v13731_v51 = vpop.f32.mrb[138].mxu1  ;;  %v12448_v15 = vld [vmem:[%s17519_s4 + $0x38] sm:$0xff]  }
 0x33c   : > { %11414 = vmatmul.mubr.msk.bf16.gmra.mrb[152].mxu0 %vm3359_vm0, %v3323_v9  ;;  %v3733_v56 = vpack.c.bf16 %v13731_v51, %v13726_v46  ;;  %v2704_v50 = vpop.f32.mrb[139].mxu1 }
 0x33d   : > { %11417 = vmatprep.mubr.msk.bf16.mxu0 %vm12792_vm1, %v17536_v1 }
 0x33e   : > { %2914 = vmatmul.mubr.bf16.gmra.mrb[244].mxu1 %v12443_v58 }
 0x33f   : > { %10469 = vmatprep.mubr.msk.bf16.mxu1 %vm2033_vm3, %v12444_v54 }
 0x341   : > { %v13745_v53 = vpop.f32.mrb[140].mxu1 }
 0x342   : > { %v2709_v22 = vpop.f32.mrb[141].mxu1 }
 0x343   : > { %v13750_v44 = vpop.f32.mrb[142].mxu1 }
 0x344   : > { %11418 = vmatmul.mubr.msk.bf16.gmra.mrb[156].mxu0 %vm3359_vm0, %v3324_v27  ;;  %v2712_v9 = vpop.f32.mrb[143].mxu1  ;;  %v12454_v27 = vld [vmem:[%s17518_s3 + $0x424] ss:$8 sps:$4 sm:$0xff]  }
 0x345   : > { %11421 = vmatprep.mubr.msk.bf16.mxu0 %vm12792_vm1, %v17536_v1  ;;  %v12460_v9 = vld [vmem:[%s17518_s3 + $0x444] ss:$8 sps:$4 sm:$0xff]  }
 0x346   : > { %2922 = vmatmul.mubr.bf16.gmra.mrb[248].mxu1 %v12447_v57  ;;  %v12455_v57 = vld [vmem:[%s17518_s3 + $0x430] ss:$8 sps:$4 sm:$0xff]  }
 0x347   : > { %10470 = vmatprep.mubr.msk.bf16.mxu1 %vm2033_vm3, %v12449_v6 }
 0x349   : > { %v13762_v13 = vpop.f32.mrb[144].mxu1 }
 0x34a   : > { %v2717_v7 = vpop.f32.mrb[145].mxu1 }
 0x34b   : > { %v13771_v23 = vpop.f32.mrb[146].mxu1 }
 0x34c   : > { %11422 = vmatmul.mubr.msk.bf16.gmra.mrb[160].mxu0 %vm3359_vm0, %v3325_v63  ;;  %v2720_v0 = vpop.f32.mrb[147].mxu1 }
 0x34d   : > { %11429 = vmatprep.mubr.msk.bf16.mxu0 %vm12792_vm1, %v17536_v1 }
 0x34e   : > { %2930 = vmatmul.mubr.bf16.gmra.mrb[252].mxu1 %v12451_v18 }
 0x34f   : > { %10471 = vmatprep.mubr.msk.bf16.mxu1 %vm2033_vm3, %v12454_v27 }
 0x351   : > { %v13783_v20 = vpop.f32.mrb[148].mxu1 }
 0x352   : > { %v2725_v28 = vpop.f32.mrb[149].mxu1 }
 0x353   : > { %v13790_v35 = vpop.f32.mrb[150].mxu1 }
 0x354   : > { %11430 = vmatmul.mubr.msk.bf16.vlgmr.msra.gmra.mrb[164].mxu0 %vm3359_vm0, %v3722_v21  ;;  %v2728_v43 = vpop.f32.mrb[151].mxu1 }
 0x355   : > { %11433 = vmatprep.mubr.msk.bf16.mxu0 %vm12792_vm1, %v17536_v1  ;;  %11482 = vmatpush3.bf16.msra.mxu0 %v12446_v30 }
 0x356   : > { %11483 = vmatprep.subr.bf16.mxu0 %v17536_v1  ;;  %2938 = vmatmul.mubr.bf16.gmra.mrb[0].mxu1 %v12452_v8  ;;  %v12463_v8 = vld [vmem:[%s17518_s3 + $0x454] ss:$8 sps:$4 sm:$0xff]  }
 0x357   : > { %v13805_v58 = vpop.f32.mrb[60].mxu0  ;;  %10472 = vmatprep.mubr.msk.bf16.mxu1 %vm2033_vm3, %v12457_v45 }
 0x358   : > { %v11319_v54 = vpop.f32.mrb[61].mxu0 }
 0x359   : > { %v13808_v2 = vpop.f32.mrb[62].mxu0  ;;  %11484 = vmatpush3.bf16.msra.mxu0 %v12448_v15  ;;  %v13810_v16 = vpop.f32.mrb[152].mxu1 }
 0x35a   : > { %v11320_v21 = vpop.f32.mrb[63].mxu0  ;;  %v2733_v22 = vpop.f32.mrb[153].mxu1  ;;  %11537 = vmatprep.subr.bf16.mxu0 %v17536_v1 }
 0x35b   : > { %v13818_v6 = vpop.f32.mrb[154].mxu1 }
 0x35c   : > { %11434 = vmatmul.mubr.msk.bf16.gmra.mrb[168].mxu0 %vm3359_vm0, %v3723_v41  ;;  %v2736_v63 = vpop.f32.mrb[155].mxu1  ;;  %v12458_v41 = vld [vmem:[%s17518_s3 + $0x440] ss:$8 sps:$4 sm:$0xff]  }
 0x35d   : > { %11437 = vmatprep.mubr.msk.bf16.mxu0 %vm12792_vm1, %v17536_v1 }
 0x35e   : > { %2946 = vmatmul.mubr.bf16.gmra.mrb[4].mxu1 %v12455_v57 }
 0x35f   : > { %v13829_v7 = vpop.f32.mrb[64].mxu0  ;;  %10473 = vmatprep.mubr.msk.bf16.mxu1 %vm2033_vm3, %v12460_v9  ;;  %v12466_v9 = vld [vmem:[%s17518_s3 + $0x464] ss:$8 sps:$4 sm:$0xff]  }
 0x360   : > { %v11323_v18 = vpop.f32.mrb[65].mxu0 }
 0x361   : > { %v13832_v27 = vpop.f32.mrb[66].mxu0  ;;  %v13834_v0 = vpop.f32.mrb[156].mxu1 }
 0x362   : > { %v11324_v30 = vpop.f32.mrb[67].mxu0  ;;  %v2741_v37 = vpop.f32.mrb[157].mxu1 }
 0x363   : > { %v13841_v28 = vpop.f32.mrb[158].mxu1 }
 0x364   : > { %11438 = vmatmul.mubr.msk.bf16.gmra.mrb[172].mxu0 %vm3359_vm0, %v3724_v52  ;;  %v2744_v45 = vpop.f32.mrb[159].mxu1  ;;  %v12461_v52 = vld [vmem:[%s17518_s3 + $0x450] ss:$8 sps:$4 sm:$0xff]  }
 0x365   : > { %11441 = vmatprep.mubr.msk.bf16.mxu0 %vm12792_vm1, %v17536_v1 }
 0x366   : > { %2954 = vmatmul.mubr.bf16.gmra.mrb[8].mxu1 %v12458_v41 }
 0x367   : > { %v13852_v43 = vpop.f32.mrb[68].mxu0  ;;  %10474 = vmatprep.mubr.msk.bf16.mxu1 %vm2033_vm3, %v12463_v8 }
 0x368   : > { %v11327_v15 = vpop.f32.mrb[69].mxu0 }
 0x369   : > { %v13855_v54 = vpop.f32.mrb[70].mxu0  ;;  %v13857_v21 = vpop.f32.mrb[160].mxu1  ;;  %v12469_v15 = vld [vmem:[%s17518_s3 + $0x474] ss:$8 sps:$4 sm:$0xff]  }
 0x36a   : > { %v11328_v22 = vpop.f32.mrb[71].mxu0  ;;  %v2749_v48 = vpop.f32.mrb[161].mxu1 }
 0x36b   : > { %v13864_v57 = vpop.f32.mrb[162].mxu1 }
 0x36c   : > { %11442 = vmatmul.mubr.msk.bf16.gmra.mrb[176].mxu0 %vm3359_vm0, %v3725_v14  ;;  %v2752_v63 = vpop.f32.mrb[163].mxu1  ;;  %v12464_v14 = vld [vmem:[%s17518_s3 + $0x460] ss:$8 sps:$4 sm:$0xff]  }
 0x36d   : > { %11445 = vmatprep.mubr.msk.bf16.mxu0 %vm12792_vm1, %v17536_v1 }
 0x36e   : > { %2962 = vmatmul.mubr.bf16.gmra.mrb[12].mxu1 %v12461_v52 }
 0x36f   : > { %v13875_v18 = vpop.f32.mrb[72].mxu0  ;;  %10475 = vmatprep.mubr.msk.bf16.mxu1 %vm2033_vm3, %v12466_v9 }
 0x370   : > { %v11331_v30 = vpop.f32.mrb[73].mxu0 }
 0x371   : > { %v13878_v37 = vpop.f32.mrb[74].mxu0  ;;  %v13880_v41 = vpop.f32.mrb[164].mxu1 }
 0x372   : > { %v11332_v8 = vpop.f32.mrb[75].mxu0  ;;  %v2757_v61 = vpop.f32.mrb[165].mxu1 }
 0x373   : > { %v13887_v45 = vpop.f32.mrb[166].mxu1  ;;  %v12472_v61 = vld [vmem:[%s17518_s3 + $0x484] ss:$8 sps:$4 sm:$0xff]  }
 0x374   : > { %11446 = vmatmul.mubr.msk.bf16.gmra.mrb[180].mxu0 %vm3359_vm0, %v3726_v3  ;;  %v2760_v22 = vpop.f32.mrb[167].mxu1  ;;  %v12467_v3 = vld [vmem:[%s17518_s3 + $0x470] ss:$8 sps:$4 sm:$0xff]  }
 0x375   : > { %11449 = vmatprep.mubr.msk.bf16.mxu0 %vm12792_vm1, %v17536_v1 }
 0x376   : > { %2970 = vmatmul.mubr.bf16.gmra.mrb[16].mxu1 %v12464_v14 }
 0x377   : > { %v13898_v48 = vpop.f32.mrb[76].mxu0  ;;  %10476 = vmatprep.mubr.msk.bf16.mxu1 %vm2033_vm3, %v12469_v15 }
 0x378   : > { %v11335_v52 = vpop.f32.mrb[77].mxu0 }
 0x379   : > { %v13901_v9 = vpop.f32.mrb[78].mxu0  ;;  %v13903_v63 = vpop.f32.mrb[168].mxu1 }
 0x37a   : > { %v11336_v30 = vpop.f32.mrb[79].mxu0  ;;  %v2765_v62 = vpop.f32.mrb[169].mxu1 }
 0x37b   : > { %v13910_v8 = vpop.f32.mrb[170].mxu1 }
 0x37c   : > { %11450 = vmatmul.mubr.msk.bf16.gmra.mrb[184].mxu0 %vm3359_vm0, %v3727_v10  ;;  %v2768_v14 = vpop.f32.mrb[171].mxu1  ;;  %v12470_v10 = vld [vmem:[%s17518_s3 + $0x480] ss:$8 sps:$4 sm:$0xff]  }
 0x37d   : > { %11453 = vmatprep.mubr.msk.bf16.mxu0 %vm12792_vm1, %v17536_v1 }
 0x37e   : > { %2978 = vmatmul.mubr.bf16.gmra.mrb[20].mxu1 %v12467_v3  ;;  %v12475_v3 = vld [vmem:[%s17518_s3 + $0x494] ss:$8 sps:$4 sm:$0xff]  }
 0x37f   : > { %v13921_v15 = vpop.f32.mrb[80].mxu0  ;;  %10477 = vmatprep.mubr.msk.bf16.mxu1 %vm2033_vm3, %v12472_v61 }
 0x380   : > { %v11339_v22 = vpop.f32.mrb[81].mxu0 }
 0x381   : > { %v13924_v52 = vpop.f32.mrb[82].mxu0  ;;  %v13926_v30 = vpop.f32.mrb[172].mxu1 }
 0x382   : > { %v11340_v62 = vpop.f32.mrb[83].mxu0  ;;  %v2773_v5 = vpop.f32.mrb[173].mxu1 }
 0x383   : > { %v13933_v14 = vpop.f32.mrb[174].mxu1 }
 0x384   : > { %11454 = vmatmul.mubr.msk.bf16.gmra.mrb[188].mxu0 %vm3359_vm0, %v3728_v17  ;;  %v2776_v61 = vpop.f32.mrb[175].mxu1  ;;  %v12473_v17 = vld [vmem:[%s17518_s3 + $0x490] ss:$8 sps:$4 sm:$0xff]  }
 0x385   : > { %11457 = vmatprep.mubr.msk.bf16.mxu0 %vm12792_vm1, %v17536_v1 }
 0x386   : > { %2986 = vmatmul.mubr.bf16.gmra.mrb[24].mxu1 %v12470_v10  ;;  %v12478_v10 = vld [vmem:[%s17518_s3 + $0x4a4] ss:$8 sps:$4 sm:$0xff]  }
 0x387   : > { %v13944_v22 = vpop.f32.mrb[84].mxu0  ;;  %10478 = vmatprep.mubr.msk.bf16.mxu1 %vm2033_vm3, %v12475_v3 }
 0x388   : > { %v11343_v62 = vpop.f32.mrb[85].mxu0 }
 0x389   : > { %v13947_v5 = vpop.f32.mrb[86].mxu0  ;;  %v13949_v42 = vpop.f32.mrb[176].mxu1 }
 0x38a   : > { %v11344_v25 = vpop.f32.mrb[87].mxu0  ;;  %v2781_v12 = vpop.f32.mrb[177].mxu1 }
 0x38b   : > { %v13956_v61 = vpop.f32.mrb[178].mxu1 }
 0x38c   : > { %11458 = vmatmul.mubr.msk.bf16.gmra.mrb[192].mxu0 %vm3359_vm0, %v3729_v24  ;;  %v2784_v25 = vpop.f32.mrb[179].mxu1  ;;  %v12476_v24 = vld [vmem:[%s17518_s3 + $0x4a0] ss:$8 sps:$4 sm:$0xff]  }
 0x38d   : > { %11461 = vmatprep.mubr.msk.bf16.mxu0 %vm12792_vm1, %v17536_v1 }
 0x38e   : > { %2994 = vmatmul.mubr.bf16.gmra.mrb[28].mxu1 %v12473_v17  ;;  %v12481_v17 = vld [vmem:[%s17518_s3 + $0x4b4] ss:$8 sps:$4 sm:$0xff]  }
 0x38f   : > { %v13967_v3 = vpop.f32.mrb[88].mxu0  ;;  %10479 = vmatprep.mubr.msk.bf16.mxu1 %vm2033_vm3, %v12478_v10 }
 0x390   : > { %v11347_v62 = vpop.f32.mrb[89].mxu0 }
 0x391   : > { %v13970_v12 = vpop.f32.mrb[90].mxu0  ;;  %v13972_v39 = vpop.f32.mrb[180].mxu1 }
 0x392   : > { %v11348_v4 = vpop.f32.mrb[91].mxu0  ;;  %v2789_v19 = vpop.f32.mrb[181].mxu1 }
 0x393   : > { %v13979_v25 = vpop.f32.mrb[182].mxu1 }
 0x394   : > { %11462 = vmatmul.mubr.msk.bf16.gmra.mrb[196].mxu0 %vm3359_vm0, %v3730_v31  ;;  %v2792_v4 = vpop.f32.mrb[183].mxu1  ;;  %v12479_v31 = vld [vmem:[%s17518_s3 + $0x4b0] ss:$8 sps:$4 sm:$0xff]  }
 0x395   : > { %11465 = vmatprep.mubr.msk.bf16.mxu0 %vm12792_vm1, %v17536_v1 }
 0x396   : > { %3002 = vmatmul.mubr.bf16.gmra.mrb[32].mxu1 %v12476_v24  ;;  %v12484_v24 = vld [vmem:[%s17518_s3 + $0x4c4] ss:$8 sps:$4 sm:$0xff]  }
 0x397   : > { %v13990_v10 = vpop.f32.mrb[92].mxu0  ;;  %10480 = vmatprep.mubr.msk.bf16.mxu1 %vm2033_vm3, %v12481_v17 }
 0x398   : > { %v11351_v62 = vpop.f32.mrb[93].mxu0 }
 0x399   : > { %v13993_v19 = vpop.f32.mrb[94].mxu0  ;;  %v13995_v59 = vpop.f32.mrb[184].mxu1 }
 0x39a   : > { %v11352_v55 = vpop.f32.mrb[95].mxu0  ;;  %v2797_v26 = vpop.f32.mrb[185].mxu1 }
 0x39b   : > { %v14002_v4 = vpop.f32.mrb[186].mxu1 }
 0x39c   : > { %11466 = vmatmul.mubr.msk.bf16.gmra.mrb[200].mxu0 %vm3359_vm0, %v3731_v38  ;;  %v2800_v55 = vpop.f32.mrb[187].mxu1  ;;  %v12482_v38 = vld [vmem:[%s17518_s3 + $0x4c0] ss:$8 sps:$4 sm:$0xff]  }
 0x39d   : > { %11469 = vmatprep.mubr.msk.bf16.mxu0 %vm12792_vm1, %v17536_v1 }
 0x39e   : > { %3010 = vmatmul.mubr.bf16.gmra.mrb[36].mxu1 %v12479_v31  ;;  %v12489_v31 = vld [vmem:[%s17518_s3 + $0x4d4] ss:$8 sps:$4 sm:$0xff]  }
 0x39f   : > { %v14013_v17 = vpop.f32.mrb[96].mxu0  ;;  %10481 = vmatprep.mubr.msk.bf16.mxu1 %vm2033_vm3, %v12484_v24 }
 0x3a0   : > { %v11355_v62 = vpop.f32.mrb[97].mxu0 }
 0x3a1   : > { %v14016_v26 = vpop.f32.mrb[98].mxu0  ;;  %v14018_v60 = vpop.f32.mrb[188].mxu1 }
 0x3a2   : > { %v11356_v49 = vpop.f32.mrb[99].mxu0  ;;  %v2805_v33 = vpop.f32.mrb[189].mxu1 }
 0x3a3   : > { %v14025_v55 = vpop.f32.mrb[190].mxu1 }
 0x3a4   : > { %11470 = vmatmul.mubr.msk.bf16.gmra.mrb[204].mxu0 %vm3359_vm0, %v3732_v47  ;;  %v2808_v49 = vpop.f32.mrb[191].mxu1  ;;  %v12492_v47 = vld [vmem:[%s17518_s3 + $0x4e4] ss:$8 sps:$4 sm:$0xff]  }
 0x3a5   : > { %11473 = vmatprep.mubr.msk.bf16.mxu0 %vm12792_vm1, %v17536_v1 }
 0x3a6   : > { %3018 = vmatmul.mubr.bf16.gmra.mrb[40].mxu1 %v12482_v38 }
 0x3a7   : > { %v14036_v24 = vpop.f32.mrb[100].mxu0  ;;  %10482 = vmatprep.mubr.msk.bf16.mxu1 %vm2033_vm3, %v12489_v31  ;;  %v3734_v31 = vpack.c.bf16 %v13745_v53, %v13745_v53 }
 0x3a8   : > { %v11359_v62 = vpop.f32.mrb[101].mxu0 }
 0x3a9   : > { %v14039_v33 = vpop.f32.mrb[102].mxu0  ;;  %v14041_v11 = vpop.f32.mrb[192].mxu1 }
 0x3aa   : > { %17557 = vst [vmem:[#allocation2_spill] sm:$0xff] %v14041_v11  ;;  %v11360_v32 = vpop.f32.mrb[103].mxu0  ;;  %v2813_v50 = vpop.f32.mrb[193].mxu1 }
 0x3ab   : > { %v14046_v40 = vpop.f32.mrb[194].mxu1 }
 0x3ac   : > { %11474 = vmatmul.mubr.msk.bf16.gmra.mrb[208].mxu0 %vm3359_vm0, %v3733_v56  ;;  %v2816_v32 = vpop.f32.mrb[195].mxu1 }
 0x3ad   : > { %11477 = vmatprep.mubr.msk.bf16.mxu0 %vm12792_vm1, %v17536_v1  ;;  %v12490_v32 = vld [vmem:[%s17518_s3 + $0x4e0] ss:$8 sps:$4 sm:$0xff]  }
 0x3ae   : > { %3026 = vmatmul.mubr.bf16.gmra.mrb[44].mxu1 %v12487_v34  ;;  %v12495_v34 = vld [vmem:[%s17518_s3 + $0x4f4] ss:$8 sps:$4 sm:$0xff]  }
 0x3af   : > { %v14059_v50 = vpop.f32.mrb[104].mxu0  ;;  %10483 = vmatprep.mubr.msk.bf16.mxu1 %vm2033_vm3, %v12492_v47 }
 0x3b0   : > { %v11363_v49 = vpop.f32.mrb[105].mxu0 }
 0x3b1   : > { %v14064_v62 = vpop.f32.mrb[106].mxu0  ;;  %v14066_v46 = vpop.f32.mrb[196].mxu1 }
 0x3b2   : > { %v11364_v51 = vpop.f32.mrb[107].mxu0  ;;  %v2821_v56 = vpop.f32.mrb[197].mxu1 }
 0x3b3   : > { %v14071_v38 = vpop.f32.mrb[198].mxu1 }
 0x3b4   : > { %11478 = vmatmul.mubr.msk.bf16.gmra.mrb[212].mxu0 %vm3359_vm0, %v3734_v31  ;;  %v2824_v47 = vpop.f32.mrb[199].mxu1 }
 0x3b5   : > { %11485 = vmatprep.mubr.msk.bf16.mxu0 %vm12792_vm1, %v17536_v1  ;;  %v12493_v47 = vld [vmem:[%s17518_s3 + $0x4f0] ss:$8 sps:$4 sm:$0xff]  }
 0x3b6   : > { %3034 = vmatmul.mubr.bf16.gmra.mrb[48].mxu1 %v12490_v32  ;;  %v12498_v32 = vld [vmem:[%s17518_s3 + $0x504] ss:$8 sps:$4 sm:$0xff]  }
 0x3b7   : > { %v14081_v49 = vpop.f32.mrb[108].mxu0  ;;  %10484 = vmatprep.mubr.msk.bf16.mxu1 %vm2033_vm3, %v12495_v34  ;;  %v17560_v34 = vpack.c.bf16 %v13762_v13, %v13750_v44 }
 0x3b8   : > { %v11367_v51 = vpop.f32.mrb[109].mxu0 }
 0x3b9   : > { %v3532_v56 = vpop.f32.mrb[110].mxu0  ;;  %v14087_v29 = vpop.f32.mrb[200].mxu1 }
 0x3ba   : > { %17558 = vst [vmem:[#allocation3_spill] sm:$0xff] %v14087_v29  ;;  %v11368_v31 = vpop.f32.mrb[111].mxu0  ;;  %v2829_v11 = vpop.f32.mrb[201].mxu1 }
 0x3bb   : > { %v14092_v53 = vpop.f32.mrb[202].mxu1  ;;  %v12486_v11 = vld [vmem:[%s17519_s4 + $0x48] sm:$0xff]  }
 0x3bc   : > { %17559 = vst [vmem:[#allocation4_spill] sm:$0xff] %v14092_v53  ;;  %11486 = vmatmul.mubr.msk.bf16.vlgmr.msra.gmra.mrb[216].mxu0 %vm3359_vm0, %v17560_v34  ;;  %v2832_v56 = vpop.f32.mrb[203].mxu1 }
 0x3bd   : > { %11489 = vmatprep.mubr.msk.bf16.mxu0 %vm12792_vm1, %v17536_v1  ;;  %11538 = vmatpush3.bf16.msra.mxu0 %v12485_v36 }
 0x3be   : > { %11539 = vmatprep.subr.bf16.mxu0 %v17536_v1  ;;  %3042 = vmatmul.mubr.bf16.gmra.mrb[52].mxu1 %v12493_v47  ;;  %v12496_v47 = vld [vmem:[%s17518_s3 + $0x500] ss:$8 sps:$4 sm:$0xff]  }
 0x3bf   : > { %v3620_v31 = vpop.f32.mrb[112].mxu0  ;;  %10485 = vmatprep.mubr.msk.bf16.mxu1 %vm2033_vm3, %v12498_v32 }
 0x3c0   : > { %v14111_v44 = vadd.f32 %v3620_v31, %v13805_v58  ;;  %v11375_v13 = vpop.f32.mrb[113].mxu0  ;;  %v12501_v58 = vld [vmem:[%s17518_s3 + $0x514] ss:$8 sps:$4 sm:$0xff]  }
 0x3c1   : > { %v3623_v34 = vpop.f32.mrb[114].mxu0  ;;  %11540 = vmatpush3.bf16.msra.mxu0 %v12486_v11  ;;  %v14113_v56 = vpop.f32.mrb[204].mxu1  ;;  %v17561_v11 = vpack.c.bf16 %v13783_v20, %v13771_v23 }
 0x3c2   : > { %v14116_v36 = vadd.f32 %v3623_v34, %v13808_v2  ;;  %v11376_v51 = vpop.f32.mrb[115].mxu0  ;;  %v2837_v29 = vpop.f32.mrb[205].mxu1  ;;  %11593 = vmatprep.subr.bf16.mxu0 %v17536_v1 }
 0x3c3   : > { %v14122_v32 = vpop.f32.mrb[206].mxu1 }
 0x3c4   : > { %11490 = vmatmul.mubr.msk.bf16.gmra.mrb[220].mxu0 %vm3359_vm0, %v17561_v11  ;;  %v2840_v2 = vpop.f32.mrb[207].mxu1 }
 0x3c5   : > { %11493 = vmatprep.mubr.msk.bf16.mxu0 %vm12792_vm1, %v17536_v1  ;;  %v12499_v2 = vld [vmem:[%s17518_s3 + $0x510] ss:$8 sps:$4 sm:$0xff]  }
 0x3c6   : > { %3050 = vmatmul.mubr.bf16.gmra.mrb[56].mxu1 %v12496_v47 }
 0x3c7   : > { %v3628_v51 = vpop.f32.mrb[116].mxu0  ;;  %10486 = vmatprep.mubr.msk.bf16.mxu1 %vm2033_vm3, %v12501_v58  ;;  %v17562_v58 = vpack.c.bf16 %v13810_v16, %v13790_v35 }
 0x3c8   : > { %v14137_v31 = vadd.f32 %v3628_v51, %v13829_v7  ;;  %v11379_v13 = vpop.f32.mrb[117].mxu0  ;;  %v12504_v7 = vld [vmem:[%s17518_s3 + $0x524] ss:$8 sps:$4 sm:$0xff]  }
 0x3c9   : > { %v3631_v34 = vpop.f32.mrb[118].mxu0  ;;  %v14139_v53 = vpop.f32.mrb[208].mxu1 }
 0x3ca   : > { %v14142_v23 = vadd.f32 %v3631_v34, %v13832_v27  ;;  %v11380_v20 = vpop.f32.mrb[119].mxu0  ;;  %v2845_v11 = vpop.f32.mrb[209].mxu1 }
 0x3cb   : > { %v14147_v47 = vpop.f32.mrb[210].mxu1 }
 0x3cc   : > { %11494 = vmatmul.mubr.msk.bf16.gmra.mrb[224].mxu0 %vm3359_vm0, %v17562_v58  ;;  %v2848_v51 = vpop.f32.mrb[211].mxu1 }
 0x3cd   : > { %11497 = vmatprep.mubr.msk.bf16.mxu0 %vm12792_vm1, %v17536_v1  ;;  %v12502_v51 = vld [vmem:[%s17518_s3 + $0x520] ss:$8 sps:$4 sm:$0xff]  }
 0x3ce   : > { %3058 = vmatmul.mubr.bf16.gmra.mrb[60].mxu1 %v12499_v2 }
 0x3cf   : > { %v3636_v13 = vpop.f32.mrb[120].mxu0  ;;  %10487 = vmatprep.mubr.msk.bf16.mxu1 %vm2033_vm3, %v12504_v7  ;;  %v17563_v7 = vpack.c.bf16 %v13834_v0, %v13818_v6 }
 0x3d0   : > { %v14162_v34 = vadd.f32 %v3636_v13, %v13852_v43  ;;  %v11383_v20 = vpop.f32.mrb[121].mxu0  ;;  %v12507_v43 = vld [vmem:[%s17518_s3 + $0x534] ss:$8 sps:$4 sm:$0xff]  }
 0x3d1   : > { %v3639_v11 = vpop.f32.mrb[122].mxu0  ;;  %v14164_v29 = vpop.f32.mrb[212].mxu1 }
 0x3d2   : > { %v14167_v35 = vadd.f32 %v3639_v11, %v13855_v54  ;;  %v11384_v16 = vpop.f32.mrb[123].mxu0  ;;  %v2853_v58 = vpop.f32.mrb[213].mxu1 }
 0x3d3   : > { %v14172_v2 = vpop.f32.mrb[214].mxu1 }
 0x3d4   : > { %11498 = vmatmul.mubr.msk.bf16.gmra.mrb[228].mxu0 %vm3359_vm0, %v17563_v7  ;;  %v2856_v13 = vpop.f32.mrb[215].mxu1 }
 0x3d5   : > { %11501 = vmatprep.mubr.msk.bf16.mxu0 %vm12792_vm1, %v17536_v1  ;;  %v12505_v13 = vld [vmem:[%s17518_s3 + $0x530] ss:$8 sps:$4 sm:$0xff]  }
 0x3d6   : > { %3066 = vmatmul.mubr.bf16.gmra.mrb[64].mxu1 %v12502_v51 }
 0x3d7   : > { %v3644_v20 = vpop.f32.mrb[124].mxu0  ;;  %10488 = vmatprep.mubr.msk.bf16.mxu1 %vm2033_vm3, %v12507_v43  ;;  %v17564_v43 = vpack.c.bf16 %v13857_v21, %v13841_v28 }
 0x3d8   : > { %v14187_v11 = vadd.f32 %v3644_v20, %v13875_v18  ;;  %v11387_v16 = vpop.f32.mrb[125].mxu0  ;;  %v12510_v18 = vld [vmem:[%s17518_s3 + $0x544] ss:$8 sps:$4 sm:$0xff]  }
 0x3d9   : > { %v3647_v58 = vpop.f32.mrb[126].mxu0  ;;  %v14189_v27 = vpop.f32.mrb[216].mxu1 }
 0x3da   : > { %v14192_v6 = vadd.f32 %v3647_v58, %v13878_v37  ;;  %v11388_v0 = vpop.f32.mrb[127].mxu0  ;;  %v2861_v7 = vpop.f32.mrb[217].mxu1 }
 0x3db   : > { %v14197_v51 = vpop.f32.mrb[218].mxu1 }
 0x3dc   : > { %11502 = vmatmul.mubr.msk.bf16.gmra.mrb[232].mxu0 %vm3359_vm0, %v17564_v43  ;;  %v2864_v20 = vpop.f32.mrb[219].mxu1 }
 0x3dd   : > { %11505 = vmatprep.mubr.msk.bf16.mxu0 %vm12792_vm1, %v17536_v1  ;;  %v12508_v20 = vld [vmem:[%s17518_s3 + $0x540] ss:$8 sps:$4 sm:$0xff]  }
 0x3de   : > { %3074 = vmatmul.mubr.bf16.gmra.mrb[68].mxu1 %v12505_v13 }
 0x3df   : > { %v3652_v16 = vpop.f32.mrb[128].mxu0  ;;  %10489 = vmatprep.mubr.msk.bf16.mxu1 %vm2033_vm3, %v12510_v18  ;;  %v17565_v18 = vpack.c.bf16 %v13880_v41, %v13864_v57 }
 0x3e0   : > { %v14212_v58 = vadd.f32 %v3652_v16, %v13898_v48  ;;  %v11391_v0 = vpop.f32.mrb[129].mxu0  ;;  %v12513_v48 = vld [vmem:[%s17518_s3 + $0x554] ss:$8 sps:$4 sm:$0xff]  }
 0x3e1   : > { %v3655_v7 = vpop.f32.mrb[130].mxu0  ;;  %v14214_v54 = vpop.f32.mrb[220].mxu1 }
 0x3e2   : > { %v14217_v28 = vadd.f32 %v3655_v7, %v13901_v9  ;;  %v11392_v21 = vpop.f32.mrb[131].mxu0  ;;  %v2869_v43 = vpop.f32.mrb[221].mxu1 }
 0x3e3   : > { %v14222_v13 = vpop.f32.mrb[222].mxu1 }
 0x3e4   : > { %11506 = vmatmul.mubr.msk.bf16.gmra.mrb[236].mxu0 %vm3359_vm0, %v17565_v18  ;;  %v2872_v16 = vpop.f32.mrb[223].mxu1 }
 0x3e5   : > { %11509 = vmatprep.mubr.msk.bf16.mxu0 %vm12792_vm1, %v17536_v1  ;;  %v12511_v16 = vld [vmem:[%s17518_s3 + $0x550] ss:$8 sps:$4 sm:$0xff]  }
 0x3e6   : > { %3082 = vmatmul.mubr.bf16.gmra.mrb[72].mxu1 %v12508_v20 }
 0x3e7   : > { %v3660_v0 = vpop.f32.mrb[132].mxu0  ;;  %10490 = vmatprep.mubr.msk.bf16.mxu1 %vm2033_vm3, %v12513_v48  ;;  %v17566_v48 = vpack.c.bf16 %v13903_v63, %v13887_v45 }
 0x3e8   : > { %v14237_v7 = vadd.f32 %v3660_v0, %v13921_v15  ;;  %v11395_v21 = vpop.f32.mrb[133].mxu0  ;;  %v12516_v15 = vld [vmem:[%s17518_s3 + $0x564] ss:$8 sps:$4 sm:$0xff]  }
 0x3e9   : > { %v3663_v43 = vpop.f32.mrb[134].mxu0  ;;  %v14239_v37 = vpop.f32.mrb[224].mxu1 }
 0x3ea   : > { %v14242_v57 = vadd.f32 %v3663_v43, %v13924_v52  ;;  %v11396_v41 = vpop.f32.mrb[135].mxu0  ;;  %v2877_v18 = vpop.f32.mrb[225].mxu1 }
 0x3eb   : > { %v14247_v20 = vpop.f32.mrb[226].mxu1 }
 0x3ec   : > { %11510 = vmatmul.mubr.msk.bf16.gmra.mrb[240].mxu0 %vm3359_vm0, %v17566_v48  ;;  %v2880_v0 = vpop.f32.mrb[227].mxu1 }
 0x3ed   : > { %11513 = vmatprep.mubr.msk.bf16.mxu0 %vm12792_vm1, %v17536_v1  ;;  %v12514_v0 = vld [vmem:[%s17518_s3 + $0x560] ss:$8 sps:$4 sm:$0xff]  }
 0x3ee   : > { %3090 = vmatmul.mubr.bf16.gmra.mrb[76].mxu1 %v12511_v16 }
 0x3ef   : > { %v3668_v21 = vpop.f32.mrb[136].mxu0  ;;  %10491 = vmatprep.mubr.msk.bf16.mxu1 %vm2033_vm3, %v12516_v15  ;;  %v17567_v15 = vpack.c.bf16 %v13926_v30, %v13910_v8 }
 0x3f0   : > { %v14262_v43 = vadd.f32 %v3668_v21, %v13944_v22  ;;  %v11399_v41 = vpop.f32.mrb[137].mxu0  ;;  %v12519_v22 = vld [vmem:[%s17518_s3 + $0x574] ss:$8 sps:$4 sm:$0xff]  }
 0x3f1   : > { %v3671_v18 = vpop.f32.mrb[138].mxu0  ;;  %v14264_v9 = vpop.f32.mrb[228].mxu1 }
 0x3f2   : > { %v14267_v45 = vadd.f32 %v3671_v18, %v13947_v5  ;;  %v11400_v63 = vpop.f32.mrb[139].mxu0  ;;  %v2885_v48 = vpop.f32.mrb[229].mxu1 }
 0x3f3   : > { %v14272_v16 = vpop.f32.mrb[230].mxu1 }
 0x3f4   : > { %11514 = vmatmul.mubr.msk.bf16.gmra.mrb[244].mxu0 %vm3359_vm0, %v17567_v15  ;;  %v2888_v21 = vpop.f32.mrb[231].mxu1 }
 0x3f5   : > { %11517 = vmatprep.mubr.msk.bf16.mxu0 %vm12792_vm1, %v17536_v1  ;;  %v12517_v21 = vld [vmem:[%s17518_s3 + $0x570] ss:$8 sps:$4 sm:$0xff]  }
 0x3f6   : > { %3098 = vmatmul.mubr.bf16.gmra.mrb[80].mxu1 %v12514_v0 }
 0x3f7   : > { %v3676_v41 = vpop.f32.mrb[140].mxu0  ;;  %10492 = vmatprep.mubr.msk.bf16.mxu1 %vm2033_vm3, %v12519_v22  ;;  %v17568_v22 = vpack.c.bf16 %v13949_v42, %v13933_v14 }
 0x3f8   : > { %v14287_v18 = vadd.f32 %v3676_v41, %v13967_v3  ;;  %v11403_v63 = vpop.f32.mrb[141].mxu0  ;;  %v12522_v3 = vld [vmem:[%s17518_s3 + $0x584] ss:$8 sps:$4 sm:$0xff]  }
 0x3f9   : > { %v3679_v48 = vpop.f32.mrb[142].mxu0  ;;  %v14289_v52 = vpop.f32.mrb[232].mxu1 }
 0x3fa   : > { %v14292_v8 = vadd.f32 %v3679_v48, %v13970_v12  ;;  %v11404_v30 = vpop.f32.mrb[143].mxu0  ;;  %v2893_v15 = vpop.f32.mrb[233].mxu1 }
 0x3fb   : > { %v14297_v0 = vpop.f32.mrb[234].mxu1 }
 0x3fc   : > { %11518 = vmatmul.mubr.msk.bf16.gmra.mrb[248].mxu0 %vm3359_vm0, %v17568_v22  ;;  %v2896_v41 = vpop.f32.mrb[235].mxu1 }
 0x3fd   : > { %11521 = vmatprep.mubr.msk.bf16.mxu0 %vm12792_vm1, %v17536_v1  ;;  %v12520_v41 = vld [vmem:[%s17518_s3 + $0x580] ss:$8 sps:$4 sm:$0xff]  }
 0x3fe   : > { %3106 = vmatmul.mubr.bf16.gmra.mrb[84].mxu1 %v12517_v21 }
 0x3ff   : > { %v3684_v63 = vpop.f32.mrb[144].mxu0  ;;  %10493 = vmatprep.mubr.msk.bf16.mxu1 %vm2033_vm3, %v12522_v3  ;;  %v17569_v3 = vpack.c.bf16 %v13972_v39, %v13956_v61 }
 0x400   : > { %v14312_v48 = vadd.f32 %v3684_v63, %v13990_v10  ;;  %v11407_v30 = vpop.f32.mrb[145].mxu0  ;;  %v12525_v10 = vld [vmem:[%s17518_s3 + $0x594] ss:$8 sps:$4 sm:$0xff]  }
 0x401   : > { %v3687_v15 = vpop.f32.mrb[146].mxu0  ;;  %v14314_v5 = vpop.f32.mrb[236].mxu1 }
 0x402   : > { %v14317_v42 = vadd.f32 %v3687_v15, %v13993_v19  ;;  %v11408_v14 = vpop.f32.mrb[147].mxu0  ;;  %v2901_v22 = vpop.f32.mrb[237].mxu1 }
 0x403   : > { %v14322_v21 = vpop.f32.mrb[238].mxu1 }
 0x404   : > { %11522 = vmatmul.mubr.msk.bf16.gmra.mrb[252].mxu0 %vm3359_vm0, %v17569_v3  ;;  %v2904_v63 = vpop.f32.mrb[239].mxu1 }
 0x405   : > { %11525 = vmatprep.mubr.msk.bf16.mxu0 %vm12792_vm1, %v17536_v1  ;;  %v12523_v63 = vld [vmem:[%s17518_s3 + $0x590] ss:$8 sps:$4 sm:$0xff]  }
 0x406   : > { %3114 = vmatmul.mubr.bf16.gmra.mrb[88].mxu1 %v12520_v41 }
 0x407   : > { %v3692_v30 = vpop.f32.mrb[148].mxu0  ;;  %10494 = vmatprep.mubr.msk.bf16.mxu1 %vm2033_vm3, %v12525_v10  ;;  %v17570_v10 = vpack.c.bf16 %v13995_v59, %v13979_v25 }
 0x408   : > { %v14337_v15 = vadd.f32 %v3692_v30, %v14013_v17  ;;  %v11411_v14 = vpop.f32.mrb[149].mxu0  ;;  %v12530_v17 = vld [vmem:[%s17518_s3 + $0x5a4] ss:$8 sps:$4 sm:$0xff]  }
 0x409   : > { %v3695_v22 = vpop.f32.mrb[150].mxu0  ;;  %v14339_v12 = vpop.f32.mrb[240].mxu1 }
 0x40a   : > { %v14342_v39 = vadd.f32 %v3695_v22, %v14016_v26  ;;  %v11412_v61 = vpop.f32.mrb[151].mxu0  ;;  %v2909_v3 = vpop.f32.mrb[241].mxu1 }
 0x40b   : > { %v14347_v41 = vpop.f32.mrb[242].mxu1 }
 0x40c   : > { %11526 = vmatmul.mubr.msk.bf16.gmra.mrb[0].mxu0 %vm3359_vm0, %v17570_v10  ;;  %v2912_v30 = vpop.f32.mrb[243].mxu1 }
 0x40d   : > { %11529 = vmatprep.mubr.msk.bf16.mxu0 %vm12792_vm1, %v17536_v1  ;;  %v17571_v30 = vpack.c.bf16 %v14018_v60, %v14002_v4  ;;  %v3963_v60 = vpack.c.bf16 %v14025_v55, %v14025_v55 }
 0x40e   : > { %3122 = vmatmul.mubr.bf16.gmra.mrb[92].mxu1 %v12523_v63  ;;  %v12528_v63 = vld [vmem:[%s17518_s3 + $0x5a0] ss:$8 sps:$4 sm:$0xff]  }
 0x40f   : > { %v3700_v26 = vpop.f32.mrb[152].mxu0  ;;  %10495 = vmatprep.mubr.msk.bf16.mxu1 %vm2033_vm3, %v12530_v17 }
 0x410   : > { %v14360_v14 = vadd.f32 %v3700_v26, %v14036_v24  ;;  %v11415_v22 = vpop.f32.mrb[153].mxu0  ;;  %v12533_v24 = vld [vmem:[%s17518_s3 + $0x5b4] ss:$8 sps:$4 sm:$0xff]  }
 0x411   : > { %v3703_v61 = vpop.f32.mrb[154].mxu0  ;;  %v14362_v3 = vpop.f32.mrb[244].mxu1 }
 0x412   : > { %v14365_v19 = vadd.f32 %v3703_v61, %v14039_v33  ;;  %v11416_v59 = vpop.f32.mrb[155].mxu0  ;;  %v2917_v10 = vpop.f32.mrb[245].mxu1 }
 0x413   : > { %v14372_v17 = vpop.f32.mrb[246].mxu1 }
 0x414   : > { %11530 = vmatmul.mubr.msk.bf16.gmra.mrb[4].mxu0 %vm3359_vm0, %v17571_v30  ;;  %v2920_v33 = vpop.f32.mrb[247].mxu1 }
 0x415   : > { %11533 = vmatprep.mubr.msk.bf16.mxu0 %vm12792_vm1, %v17536_v1 }
 0x416   : > { %3130 = vmatmul.mubr.bf16.gmra.mrb[96].mxu1 %v12528_v63 }
 0x417   : > { %v3708_v26 = vpop.f32.mrb[156].mxu0  ;;  %10496 = vmatprep.mubr.msk.bf16.mxu1 %vm2033_vm3, %v12533_v24 }
 0x418   : > { %v14385_v22 = vadd.f32 %v3708_v26, %v14059_v50  ;;  %v11419_v61 = vpop.f32.mrb[157].mxu0  ;;  %v12531_v50 = vld [vmem:[%s17518_s3 + $0x5b0] ss:$8 sps:$4 sm:$0xff]   ;;  %v12536_v26 = vld [vmem:[%s17518_s3 + $0x5c4] ss:$8 sps:$4 sm:$0xff]  }
 0x419   : > { %v3711_v59 = vpop.f32.mrb[158].mxu0  ;;  %v14387_v10 = vpop.f32.mrb[248].mxu1 }
 0x41a   : > { %v14392_v4 = vadd.f32 %v3711_v59, %v14064_v62  ;;  %v11420_v30 = vpop.f32.mrb[159].mxu0  ;;  %v2925_v33 = vpop.f32.mrb[249].mxu1 }
 0x41b   : > { %v14399_v24 = vpop.f32.mrb[250].mxu1  ;;  %v12526_v33 = vld [vmem:[%s17519_s4 + $0x50] sm:$0xff]  }
 0x41c   : > { %17572 = vst [vmem:[#allocation5_spill] sm:$0xff] %v14399_v24  ;;  %11534 = vmatmul.mubr.msk.bf16.gmra.mrb[8].mxu0 %vm3359_vm0, %v3963_v60  ;;  %v2928_v55 = vpop.f32.mrb[251].mxu1 }
 0x41d   : > { %11541 = vmatprep.mubr.msk.bf16.mxu0 %vm12792_vm1, %v17536_v1 }
 0x41e   : > { %3138 = vmatmul.mubr.bf16.gmra.mrb[100].mxu1 %v12531_v50  ;;  %v12534_v50 = vld [vmem:[%s17518_s3 + $0x5c0] ss:$8 sps:$4 sm:$0xff]  }
 0x41f   : > { %v3716_v62 = vpop.f32.mrb[160].mxu0  ;;  %10497 = vmatprep.mubr.msk.bf16.mxu1 %vm2033_vm3, %v12536_v26 }
 0x420   : > { %v14409_v61 = vadd.f32 %v3716_v62, %v14081_v49  ;;  %v11423_v59 = vpop.f32.mrb[161].mxu0  ;;  %v12539_v49 = vld [vmem:[%s17518_s3 + $0x5d4] ss:$8 sps:$4 sm:$0xff]   ;;  %v17574_v62 = vld [vmem:[#allocation2_spill] sm:$0xff] }
 0x421   : > { %v3719_v30 = vpop.f32.mrb[162].mxu0  ;;  %v14414_v63 = vpop.f32.mrb[252].mxu1  ;;  %v17575_v59 = vpack.c.bf16 %v14046_v40, %v17574_v62 }
 0x422   : > { %v11424_v60 = vpop.f32.mrb[163].mxu0  ;;  %v2933_v25 = vpop.f32.mrb[253].mxu1 }
 0x423   : > { %v14421_v26 = vpop.f32.mrb[254].mxu1  ;;  %v12527_v25 = vld [vmem:[%s17519_s4 + $0x58] sm:$0xff]  }
 0x424   : > { %17573 = vst [vmem:[#allocation6_spill] sm:$0xff] %v14421_v26  ;;  %11542 = vmatmul.mubr.msk.bf16.vlgmr.msra.gmra.mrb[12].mxu0 %vm3359_vm0, %v17575_v59  ;;  %v2936_v30 = vpop.f32.mrb[255].mxu1 }
 0x425   : > { %11545 = vmatprep.mubr.msk.bf16.mxu0 %vm12792_vm1, %v17536_v1  ;;  %11594 = vmatpush3.bf16.msra.mxu0 %v12526_v33 }
 0x426   : > { %11595 = vmatprep.subr.bf16.mxu0 %v17536_v1  ;;  %3146 = vmatmul.mubr.bf16.gmra.mrb[104].mxu1 %v12534_v50  ;;  %v12537_v50 = vld [vmem:[%s17518_s3 + $0x5d0] ss:$8 sps:$4 sm:$0xff]  }
 0x427   : > { %v3824_v60 = vpop.f32.mrb[164].mxu0  ;;  %10498 = vmatprep.mubr.msk.bf16.mxu1 %vm2033_vm3, %v12539_v49  ;;  %v17576_v49 = vmov 0.0  }
 0x428   : > { %v14438_v55 = vadd.f32 %v3824_v60, %v14111_v44  ;;  %v11431_v40 = vpop.f32.mrb[165].mxu0 }
 0x429   : > { %v3827_v62 = vpop.f32.mrb[166].mxu0  ;;  %11596 = vmatpush3.bf16.msra.mxu0 %v12527_v25  ;;  %v14440_v59 = vpop.f32.mrb[0].mxu1  ;;  %v12542_v25 = vld [vmem:[%s17518_s3 + $0x5e4] ss:$8 sps:$4 sm:$0xff]  }
 0x42a   : > { %v14443_v33 = vadd.f32 %v3827_v62, %v14116_v36  ;;  %v11432_v30 = vpop.f32.mrb[167].mxu0  ;;  %v2941_v1 = vpop.f32.mrb[1].mxu1  ;;  %11649 = vmatprep.subr.bf16.mxu0 %v17576_v49  ;;  %v17578_v36 = vpack.c.bf16 %v14071_v38, %v14066_v46 }
 0x42b   : > { %v14451_v44 = vpop.f32.mrb[2].mxu1 }
 0x42c   : > { %17577 = vst [vmem:[#allocation2_spill] sm:$0xff] %v14451_v44  ;;  %11546 = vmatmul.mubr.msk.bf16.gmra.mrb[16].mxu0 %vm3359_vm0, %v17578_v36  ;;  %v2944_v60 = vpop.f32.mrb[3].mxu1 }
 0x42d   : > { %11549 = vmatprep.mubr.msk.bf16.mxu0 %vm12792_vm1, %v17576_v49  ;;  %v17580_v60 = vld [vmem:[#allocation4_spill] sm:$0xff] }
 0x42e   : > { %3154 = vmatmul.mubr.bf16.gmra.mrb[108].mxu1 %v12537_v50  ;;  %v12540_v50 = vld [vmem:[%s17518_s3 + $0x5e0] ss:$8 sps:$4 sm:$0xff]  }
 0x42f   : > { %v3832_v1 = vpop.f32.mrb[168].mxu0  ;;  %10499 = vmatprep.mubr.msk.bf16.mxu1 %vm2033_vm3, %v12542_v25 }
 0x430   : > { %v14464_v40 = vadd.f32 %v3832_v1, %v14137_v31  ;;  %v11435_v62 = vpop.f32.mrb[169].mxu0  ;;  %v12545_v31 = vld [vmem:[%s17518_s3 + $0x5f4] ss:$8 sps:$4 sm:$0xff]   ;;  %v17581_v1 = vld [vmem:[#allocation3_spill] sm:$0xff] }
 0x431   : > { %v3835_v30 = vpop.f32.mrb[170].mxu0  ;;  %v14466_v24 = vpop.f32.mrb[4].mxu1  ;;  %v17582_v62 = vpack.c.bf16 %v17580_v60, %v17581_v1 }
 0x432   : > { %17579 = vst [vmem:[#allocation7_spill] sm:$0xff] %v14466_v24  ;;  %v14469_v26 = vadd.f32 %v3835_v30, %v14142_v23  ;;  %v11436_v38 = vpop.f32.mrb[171].mxu0  ;;  %v2949_v36 = vpop.f32.mrb[5].mxu1 }
 0x433   : > { %v14476_v25 = vpop.f32.mrb[6].mxu1 }
 0x434   : > { %11550 = vmatmul.mubr.msk.bf16.gmra.mrb[20].mxu0 %vm3359_vm0, %v17582_v62  ;;  %v2952_v23 = vpop.f32.mrb[7].mxu1 }
 0x435   : > { %11553 = vmatprep.mubr.msk.bf16.mxu0 %vm12792_vm1, %v17576_v49  ;;  %v17583_v23 = vpack.c.bf16 %v14122_v32, %v14113_v56 }
 0x436   : > { %3162 = vmatmul.mubr.bf16.gmra.mrb[112].mxu1 %v12540_v50  ;;  %v12543_v50 = vld [vmem:[%s17518_s3 + $0x5f0] ss:$8 sps:$4 sm:$0xff]  }
 0x437   : > { %v3840_v30 = vpop.f32.mrb[172].mxu0  ;;  %10500 = vmatprep.mubr.msk.bf16.mxu1 %vm2033_vm3, %v12545_v31 }
 0x438   : > { %v14489_v38 = vadd.f32 %v3840_v30, %v14162_v34  ;;  %v11439_v36 = vpop.f32.mrb[173].mxu0  ;;  %v12548_v34 = vld [vmem:[%s17518_s3 + $0x604] ss:$8 sps:$4 sm:$0xff]  }
 0x439   : > { %v3843_v46 = vpop.f32.mrb[174].mxu0  ;;  %v14491_v44 = vpop.f32.mrb[8].mxu1 }
 0x43a   : > { %v14494_v24 = vadd.f32 %v3843_v46, %v14167_v35  ;;  %v11440_v60 = vpop.f32.mrb[175].mxu0  ;;  %v2957_v62 = vpop.f32.mrb[9].mxu1 }
 0x43b   : > { %v14501_v31 = vpop.f32.mrb[10].mxu1 }
 0x43c   : > { %11554 = vmatmul.mubr.msk.bf16.gmra.mrb[24].mxu0 %vm3359_vm0, %v17583_v23  ;;  %v2960_v35 = vpop.f32.mrb[11].mxu1 }
 0x43d   : > { %11557 = vmatprep.mubr.msk.bf16.mxu0 %vm12792_vm1, %v17576_v49  ;;  %v17584_v35 = vpack.c.bf16 %v14147_v47, %v14139_v53 }
 0x43e   : > { %3170 = vmatmul.mubr.bf16.gmra.mrb[116].mxu1 %v12543_v50  ;;  %v12546_v50 = vld [vmem:[%s17518_s3 + $0x600] ss:$8 sps:$4 sm:$0xff]  }
 0x43f   : > { %v3848_v46 = vpop.f32.mrb[176].mxu0  ;;  %10501 = vmatprep.mubr.msk.bf16.mxu1 %vm2033_vm3, %v12548_v34 }
 0x440   : > { %v14514_v30 = vadd.f32 %v3848_v46, %v14187_v11  ;;  %v11443_v36 = vpop.f32.mrb[177].mxu0  ;;  %v12551_v11 = vld [vmem:[%s17518_s3 + $0x614] ss:$8 sps:$4 sm:$0xff]  }
 0x441   : > { %v3851_v60 = vpop.f32.mrb[178].mxu0  ;;  %v14516_v62 = vpop.f32.mrb[12].mxu1 }
 0x442   : > { %v14519_v1 = vadd.f32 %v3851_v60, %v14192_v6  ;;  %v11444_v56 = vpop.f32.mrb[179].mxu0  ;;  %v2965_v23 = vpop.f32.mrb[13].mxu1 }
 0x443   : > { %v14526_v34 = vpop.f32.mrb[14].mxu1 }
 0x444   : > { %11558 = vmatmul.mubr.msk.bf16.gmra.mrb[28].mxu0 %vm3359_vm0, %v17584_v35  ;;  %v2968_v6 = vpop.f32.mrb[15].mxu1 }
 0x445   : > { %11561 = vmatprep.mubr.msk.bf16.mxu0 %vm12792_vm1, %v17576_v49  ;;  %v17585_v6 = vpack.c.bf16 %v14172_v2, %v14164_v29 }
 0x446   : > { %3178 = vmatmul.mubr.bf16.gmra.mrb[120].mxu1 %v12546_v50  ;;  %v12549_v50 = vld [vmem:[%s17518_s3 + $0x610] ss:$8 sps:$4 sm:$0xff]  }
 0x447   : > { %v3856_v46 = vpop.f32.mrb[180].mxu0  ;;  %10502 = vmatprep.mubr.msk.bf16.mxu1 %vm2033_vm3, %v12551_v11 }
 0x448   : > { %v14539_v36 = vadd.f32 %v3856_v46, %v14212_v58  ;;  %v11447_v60 = vpop.f32.mrb[181].mxu0  ;;  %v12554_v58 = vld [vmem:[%s17518_s3 + $0x624] ss:$8 sps:$4 sm:$0xff]  }
 0x449   : > { %v3859_v56 = vpop.f32.mrb[182].mxu0  ;;  %v14541_v23 = vpop.f32.mrb[16].mxu1 }
 0x44a   : > { %v14544_v32 = vadd.f32 %v3859_v56, %v14217_v28  ;;  %v11448_v53 = vpop.f32.mrb[183].mxu0  ;;  %v2973_v35 = vpop.f32.mrb[17].mxu1 }
 0x44b   : > { %v14551_v11 = vpop.f32.mrb[18].mxu1 }
 0x44c   : > { %11562 = vmatmul.mubr.msk.bf16.gmra.mrb[32].mxu0 %vm3359_vm0, %v17585_v6  ;;  %v2976_v28 = vpop.f32.mrb[19].mxu1 }
 0x44d   : > { %11565 = vmatprep.mubr.msk.bf16.mxu0 %vm12792_vm1, %v17576_v49  ;;  %v17586_v28 = vpack.c.bf16 %v14197_v51, %v14189_v27 }
 0x44e   : > { %3186 = vmatmul.mubr.bf16.gmra.mrb[124].mxu1 %v12549_v50  ;;  %v12552_v50 = vld [vmem:[%s17518_s3 + $0x620] ss:$8 sps:$4 sm:$0xff]  }
 0x44f   : > { %v3864_v46 = vpop.f32.mrb[184].mxu0  ;;  %10503 = vmatprep.mubr.msk.bf16.mxu1 %vm2033_vm3, %v12554_v58 }
 0x450   : > { %v14564_v60 = vadd.f32 %v3864_v46, %v14237_v7  ;;  %v11451_v56 = vpop.f32.mrb[185].mxu0  ;;  %v12557_v7 = vld [vmem:[%s17518_s3 + $0x634] ss:$8 sps:$4 sm:$0xff]  }
 0x451   : > { %v3867_v53 = vpop.f32.mrb[186].mxu0  ;;  %v14566_v35 = vpop.f32.mrb[20].mxu1 }
 0x452   : > { %v14569_v47 = vadd.f32 %v3867_v53, %v14242_v57  ;;  %v11452_v29 = vpop.f32.mrb[187].mxu0  ;;  %v2981_v6 = vpop.f32.mrb[21].mxu1 }
 0x453   : > { %v14576_v58 = vpop.f32.mrb[22].mxu1 }
 0x454   : > { %11566 = vmatmul.mubr.msk.bf16.gmra.mrb[36].mxu0 %vm3359_vm0, %v17586_v28  ;;  %v2984_v57 = vpop.f32.mrb[23].mxu1 }
 0x455   : > { %11569 = vmatprep.mubr.msk.bf16.mxu0 %vm12792_vm1, %v17576_v49 }
 0x456   : > { %3194 = vmatmul.mubr.bf16.gmra.mrb[128].mxu1 %v12552_v50  ;;  %v12555_v50 = vld [vmem:[%s17518_s3 + $0x630] ss:$8 sps:$4 sm:$0xff]  }
 0x457   : > { %v3872_v46 = vpop.f32.mrb[188].mxu0  ;;  %10504 = vmatprep.mubr.msk.bf16.mxu1 %vm2033_vm3, %v12557_v7 }
 0x458   : > { %v14589_v56 = vadd.f32 %v3872_v46, %v14262_v43  ;;  %v11455_v53 = vpop.f32.mrb[189].mxu0  ;;  %v17587_v43 = vpack.c.bf16 %v14222_v13, %v14214_v54 }
 0x459   : > { %v3875_v29 = vpop.f32.mrb[190].mxu0  ;;  %v14591_v6 = vpop.f32.mrb[24].mxu1 }
 0x45a   : > { %v14594_v2 = vadd.f32 %v3875_v29, %v14267_v45  ;;  %v11456_v27 = vpop.f32.mrb[191].mxu0  ;;  %v2989_v28 = vpop.f32.mrb[25].mxu1 }
 0x45b   : > { %v14601_v7 = vpop.f32.mrb[26].mxu1 }
 0x45c   : > { %11570 = vmatmul.mubr.msk.bf16.gmra.mrb[40].mxu0 %vm3359_vm0, %v17587_v43  ;;  %v2992_v57 = vpop.f32.mrb[27].mxu1 }
 0x45d   : > { %11573 = vmatprep.mubr.msk.bf16.mxu0 %vm12792_vm1, %v17576_v49  ;;  %v12558_v57 = vld [vmem:[%s17518_s3 + $0x640] ss:$8 sps:$4 sm:$0xff]  }
 0x45e   : > { %3202 = vmatmul.mubr.bf16.gmra.mrb[132].mxu1 %v12555_v50  ;;  %v17588_v50 = vpack.c.bf16 %v14247_v20, %v14239_v37 }
 0x45f   : > { %v3880_v45 = vpop.f32.mrb[192].mxu0 }
 0x460   : > { %v14610_v46 = vadd.f32 %v3880_v45, %v14287_v18  ;;  %v11459_v53 = vpop.f32.mrb[193].mxu0 }
 0x461   : > { %v3883_v29 = vpop.f32.mrb[194].mxu0  ;;  %v14612_v27 = vpop.f32.mrb[28].mxu1 }
 0x462   : > { %v14615_v28 = vadd.f32 %v3883_v29, %v14292_v8  ;;  %v11460_v51 = vpop.f32.mrb[195].mxu0  ;;  %v2997_v13 = vpop.f32.mrb[29].mxu1  ;;  %v12560_v8 = vld [vmem:[%s17518_s3 + $0x644] ss:$8 sps:$4 sm:$0xff]  }
 0x463   : > { %v14619_v43 = vpop.f32.mrb[30].mxu1  ;;  %10505 = vmatprep.mubr.msk.bf16.mxu1 %vm2033_vm3, %v12560_v8 }
 0x464   : > { %11574 = vmatmul.mubr.msk.bf16.gmra.mrb[44].mxu0 %vm3359_vm0, %v17588_v50  ;;  %v3000_v18 = vpop.f32.mrb[31].mxu1  ;;  %v17590_v50 = vpack.c.bf16 %v14297_v0, %v14289_v52 }
 0x465   : > { %11577 = vmatprep.mubr.msk.bf16.mxu0 %vm12792_vm1, %v17576_v49 }
 0x466   : > { %3210 = vmatmul.mubr.bf16.gmra.mrb[136].mxu1 %v12558_v57  ;;  %v12563_v57 = vld [vmem:[%s17518_s3 + $0x650] ss:$8 sps:$4 sm:$0xff]  }
 0x467   : > { %v3888_v51 = vpop.f32.mrb[196].mxu0 }
 0x468   : > { %v14634_v45 = vadd.f32 %v3888_v51, %v14312_v48  ;;  %v11463_v53 = vpop.f32.mrb[197].mxu0  ;;  %v17589_v48 = vpack.c.bf16 %v14272_v16, %v14264_v9 }
 0x469   : > { %v3891_v37 = vpop.f32.mrb[198].mxu0  ;;  %v14637_v20 = vpop.f32.mrb[32].mxu1 }
 0x46a   : > { %v14640_v29 = vadd.f32 %v3891_v37, %v14317_v42  ;;  %v11464_v13 = vpop.f32.mrb[199].mxu0  ;;  %v3005_v18 = vpop.f32.mrb[33].mxu1  ;;  %v12565_v42 = vld [vmem:[%s17518_s3 + $0x654] ss:$8 sps:$4 sm:$0xff]  }
 0x46b   : > { %v14644_v54 = vpop.f32.mrb[34].mxu1  ;;  %10506 = vmatprep.mubr.msk.bf16.mxu1 %vm2033_vm3, %v12565_v42 }
 0x46c   : > { %11578 = vmatmul.mubr.msk.bf16.gmra.mrb[48].mxu0 %vm3359_vm0, %v17589_v48  ;;  %v3008_v8 = vpop.f32.mrb[35].mxu1 }
 0x46d   : > { %11581 = vmatprep.mubr.msk.bf16.mxu0 %vm12792_vm1, %v17576_v49 }
 0x46e   : > { %3218 = vmatmul.mubr.bf16.gmra.mrb[140].mxu1 %v12563_v57  ;;  %v12566_v57 = vld [vmem:[%s17518_s3 + $0x660] ss:$8 sps:$4 sm:$0xff]  }
 0x46f   : > { %v3896_v51 = vpop.f32.mrb[200].mxu0 }
 0x470   : > { %v14659_v53 = vadd.f32 %v3896_v51, %v14337_v15  ;;  %v11467_v37 = vpop.f32.mrb[201].mxu0  ;;  %v17591_v15 = vpack.c.bf16 %v14322_v21, %v14314_v5  ;;  %v4192_v5 = vpack.c.bf16 %v14339_v12, %v14339_v12 }
 0x471   : > { %v3899_v9 = vpop.f32.mrb[202].mxu0  ;;  %v14662_v16 = vpop.f32.mrb[36].mxu1 }
 0x472   : > { %v14665_v13 = vadd.f32 %v3899_v9, %v14342_v39  ;;  %v11468_v18 = vpop.f32.mrb[203].mxu0  ;;  %v3013_v48 = vpop.f32.mrb[37].mxu1  ;;  %v12568_v39 = vld [vmem:[%s17518_s3 + $0x664] ss:$8 sps:$4 sm:$0xff]  }
 0x473   : > { %v14667_v8 = vpop.f32.mrb[38].mxu1  ;;  %10507 = vmatprep.mubr.msk.bf16.mxu1 %vm2033_vm3, %v12568_v39 }
 0x474   : > { %11582 = vmatmul.mubr.msk.bf16.gmra.mrb[52].mxu0 %vm3359_vm0, %v17590_v50  ;;  %v3016_v42 = vpop.f32.mrb[39].mxu1 }
 0x475   : > { %11585 = vmatprep.mubr.msk.bf16.mxu0 %vm12792_vm1, %v17576_v49 }
 0x476   : > { %3226 = vmatmul.mubr.bf16.gmra.mrb[144].mxu1 %v12566_v57  ;;  %v12569_v57 = vld [vmem:[%s17518_s3 + $0x670] ss:$8 sps:$4 sm:$0xff]  }
 0x477   : > { %v3904_v51 = vpop.f32.mrb[204].mxu0 }
 0x478   : > { %v14684_v52 = vadd.f32 %v3904_v51, %v14360_v14  ;;  %v11471_v0 = vpop.f32.mrb[205].mxu0 }
 0x479   : > { %v3907_v50 = vpop.f32.mrb[206].mxu0  ;;  %v14687_v37 = vpop.f32.mrb[40].mxu1 }
 0x47a   : > { %v14690_v9 = vadd.f32 %v3907_v50, %v14365_v19  ;;  %v11472_v18 = vpop.f32.mrb[207].mxu0  ;;  %v3021_v48 = vpop.f32.mrb[41].mxu1  ;;  %v12571_v19 = vld [vmem:[%s17518_s3 + $0x674] ss:$8 sps:$4 sm:$0xff]  }
 0x47b   : > { %v14692_v42 = vpop.f32.mrb[42].mxu1  ;;  %10508 = vmatprep.mubr.msk.bf16.mxu1 %vm2033_vm3, %v12571_v19  ;;  %v12574_v19 = vld [vmem:[%s17518_s3 + $0x684] ss:$8 sps:$4 sm:$0xff]  }
 0x47c   : > { %11586 = vmatmul.mubr.msk.bf16.gmra.mrb[56].mxu0 %vm3359_vm0, %v17591_v15  ;;  %v3024_v39 = vpop.f32.mrb[43].mxu1 }
 0x47d   : > { %11589 = vmatprep.mubr.msk.bf16.mxu0 %vm12792_vm1, %v17576_v49 }
 0x47e   : > { %3234 = vmatmul.mubr.bf16.gmra.mrb[148].mxu1 %v12569_v57 }
 0x47f   : > { %v3912_v51 = vpop.f32.mrb[208].mxu0  ;;  %10509 = vmatprep.mubr.msk.bf16.mxu1 %vm2033_vm3, %v12574_v19 }
 0x480   : > { %v14711_v21 = vadd.f32 %v3912_v51, %v14385_v22  ;;  %v11475_v15 = vpop.f32.mrb[209].mxu0 }
 0x481   : > { %v3915_v0 = vpop.f32.mrb[210].mxu0  ;;  %v14714_v50 = vpop.f32.mrb[44].mxu1 }
 0x482   : > { %17592 = vst [vmem:[#allocation4_spill] sm:$0xff] %v14714_v50  ;;  %v14717_v18 = vadd.f32 %v3915_v0, %v14392_v4  ;;  %v11476_v48 = vpop.f32.mrb[211].mxu0  ;;  %v3029_v39 = vpop.f32.mrb[45].mxu1  ;;  %v12572_v4 = vld [vmem:[%s17518_s3 + $0x680] ss:$8 sps:$4 sm:$0xff]   ;;  %v17593_v50 = vpack.c.bf16 %v14362_v3, %v14347_v41 }
 0x483   : > { %v14719_v14 = vpop.f32.mrb[46].mxu1  ;;  %v12561_v0 = vld [vmem:[%s17519_s4 + $0x60] sm:$0xff]   ;;  %v12577_v41 = vld [vmem:[%s17518_s3 + $0x694] ss:$8 sps:$4 sm:$0xff]  }
 0x484   : > { %11590 = vmatmul.mubr.msk.bf16.gmra.mrb[60].mxu0 %vm3359_vm0, %v4192_v5  ;;  %v3032_v22 = vpop.f32.mrb[47].mxu1 }
 0x485   : > { %11597 = vmatprep.mubr.msk.bf16.mxu0 %vm12792_vm1, %v17576_v49 }
 0x486   : > { %3242 = vmatmul.mubr.bf16.gmra.mrb[152].mxu1 %v12572_v4 }
 0x487   : > { %v3920_v51 = vpop.f32.mrb[212].mxu0  ;;  %10510 = vmatprep.mubr.msk.bf16.mxu1 %vm2033_vm3, %v12577_v41 }
 0x488   : > { %v14733_v57 = vadd.f32 %v3920_v51, %v14409_v61  ;;  %v11479_v5 = vpop.f32.mrb[213].mxu0  ;;  %v12562_v51 = vld [vmem:[%s17519_s4 + $0x68] sm:$0xff]  }
 0x489   : > { %v3923_v15 = vpop.f32.mrb[214].mxu0  ;;  %v14739_v48 = vpop.f32.mrb[48].mxu1 }
 0x48a   : > { %v11480_v39 = vpop.f32.mrb[215].mxu0  ;;  %v3037_v22 = vpop.f32.mrb[49].mxu1 }
 0x48b   : > { %v14741_v12 = vpop.f32.mrb[50].mxu1 }
 0x48c   : > { %11598 = vmatmul.mubr.msk.bf16.vlgmr.msra.gmra.mrb[64].mxu0 %vm3359_vm0, %v17593_v50  ;;  %v3040_v19 = vpop.f32.mrb[51].mxu1  ;;  %v12575_v50 = vld [vmem:[%s17518_s3 + $0x690] ss:$8 sps:$4 sm:$0xff]  }
 0x48d   : > { %11601 = vmatprep.mubr.msk.bf16.mxu0 %vm12792_vm1, %v17576_v49  ;;  %11650 = vmatpush3.bf16.msra.mxu0 %v12561_v0 }
 0x48e   : > { %11651 = vmatprep.subr.bf16.mxu0 %v17576_v49  ;;  %3250 = vmatmul.mubr.bf16.gmra.mrb[156].mxu1 %v12575_v50  ;;  %v12578_v50 = vld [vmem:[%s17518_s3 + $0x6a0] ss:$8 sps:$4 sm:$0xff]  }
 0x48f   : > { %v4053_v3 = vpop.f32.mrb[216].mxu0 }
 0x490   : > { %v14762_v4 = vadd.f32 %v4053_v3, %v14438_v55  ;;  %v11487_v5 = vpop.f32.mrb[217].mxu0  ;;  %v17595_v55 = vpack.c.bf16 %v14387_v10, %v14372_v17 }
 0x491   : > { %v4056_v15 = vpop.f32.mrb[218].mxu0  ;;  %11652 = vmatpush3.bf16.msra.mxu0 %v12562_v51  ;;  %v14765_v0 = vpop.f32.mrb[52].mxu1  ;;  %v17597_v51 = vld [vmem:[#allocation5_spill] sm:$0xff] }
 0x492   : > { %17594 = vst [vmem:[#allocation3_spill] sm:$0xff] %v14765_v0  ;;  %v14768_v39 = vadd.f32 %v4056_v15, %v14443_v33  ;;  %v11488_v22 = vpop.f32.mrb[219].mxu0  ;;  %v3045_v19 = vpop.f32.mrb[53].mxu1  ;;  %11705 = vmatprep.subr.bf16.mxu0 %v17576_v49  ;;  %v12580_v33 = vld [vmem:[%s17518_s3 + $0x6a4] ss:$8 sps:$4 sm:$0xff]   ;;  %v17598_v0 = vpack.c.bf16 %v14414_v63, %v17597_v51 }
 0x493   : > { %v14771_v61 = vpop.f32.mrb[54].mxu1  ;;  %10511 = vmatprep.mubr.msk.bf16.mxu1 %vm2033_vm3, %v12580_v33 }
 0x494   : > { %11602 = vmatmul.mubr.msk.bf16.gmra.mrb[68].mxu0 %vm3359_vm0, %v17595_v55  ;;  %v3048_v41 = vpop.f32.mrb[55].mxu1 }
 0x495   : > { %11605 = vmatprep.mubr.msk.bf16.mxu0 %vm12792_vm1, %v17576_v49 }
 0x496   : > { %3258 = vmatmul.mubr.bf16.gmra.mrb[160].mxu1 %v12578_v50  ;;  %v12581_v50 = vld [vmem:[%s17518_s3 + $0x6b0] ss:$8 sps:$4 sm:$0xff]  }
 0x497   : > { %v4061_v3 = vpop.f32.mrb[220].mxu0 }
 0x498   : > { %v14788_v17 = vadd.f32 %v4061_v3, %v14464_v40  ;;  %v11491_v10 = vpop.f32.mrb[221].mxu0  ;;  %v17601_v40 = vld [vmem:[#allocation6_spill] sm:$0xff] }
 0x499   : > { %v4064_v5 = vpop.f32.mrb[222].mxu0  ;;  %v14791_v15 = vpop.f32.mrb[56].mxu1 }
 0x49a   : > { %17596 = vst [vmem:[#allocation8_spill] sm:$0xff] %v14791_v15  ;;  %v14794_v22 = vadd.f32 %v4064_v5, %v14469_v26  ;;  %v11492_v19 = vpop.f32.mrb[223].mxu0  ;;  %v3053_v55 = vpop.f32.mrb[57].mxu1  ;;  %v12583_v26 = vld [vmem:[%s17518_s3 + $0x6b4] ss:$8 sps:$4 sm:$0xff]   ;;  %v17602_v15 = vpack.c.bf16 %v14440_v59, %v17601_v40 }
 0x49b   : > { %v14796_v41 = vpop.f32.mrb[58].mxu1  ;;  %10512 = vmatprep.mubr.msk.bf16.mxu1 %vm2033_vm3, %v12583_v26  ;;  %v17603_v26 = vld [vmem:[#allocation7_spill] sm:$0xff] }
 0x49c   : > { %11606 = vmatmul.mubr.msk.bf16.gmra.mrb[72].mxu0 %vm3359_vm0, %v17598_v0  ;;  %v3056_v33 = vpop.f32.mrb[59].mxu1 }
 0x49d   : > { %11609 = vmatprep.mubr.msk.bf16.mxu0 %vm12792_vm1, %v17576_v49 }
 0x49e   : > { %3266 = vmatmul.mubr.bf16.gmra.mrb[164].mxu1 %v12581_v50  ;;  %v12584_v50 = vld [vmem:[%s17518_s3 + $0x6c0] ss:$8 sps:$4 sm:$0xff]  }
 0x49f   : > { %v4069_v3 = vpop.f32.mrb[224].mxu0 }
 0x4a0   : > { %v14813_v63 = vadd.f32 %v4069_v3, %v14489_v38  ;;  %v11495_v0 = vpop.f32.mrb[225].mxu0 }
 0x4a1   : > { %v4072_v51 = vpop.f32.mrb[226].mxu0  ;;  %v14816_v10 = vpop.f32.mrb[60].mxu1 }
 0x4a2   : > { %17599 = vst [vmem:[#allocation5_spill] sm:$0xff] %v14816_v10  ;;  %v14819_v5 = vadd.f32 %v4072_v51, %v14494_v24  ;;  %v11496_v19 = vpop.f32.mrb[227].mxu0  ;;  %v3061_v55 = vpop.f32.mrb[61].mxu1  ;;  %v12586_v24 = vld [vmem:[%s17518_s3 + $0x6c4] ss:$8 sps:$4 sm:$0xff]  }
 0x4a3   : > { %v14821_v33 = vpop.f32.mrb[62].mxu1  ;;  %10513 = vmatprep.mubr.msk.bf16.mxu1 %vm2033_vm3, %v12586_v24  ;;  %v17604_v10 = vld [vmem:[#allocation2_spill] sm:$0xff] }
 0x4a4   : > { %17600 = vst [vmem:[#allocation9_spill] sm:$0xff] %v14821_v33  ;;  %11610 = vmatmul.mubr.msk.bf16.gmra.mrb[76].mxu0 %vm3359_vm0, %v17602_v15  ;;  %v3064_v38 = vpop.f32.mrb[63].mxu1  ;;  %v17605_v33 = vpack.c.bf16 %v17603_v26, %v17604_v10 }
 0x4a5   : > { %11613 = vmatprep.mubr.msk.bf16.mxu0 %vm12792_vm1, %v17576_v49 }
 0x4a6   : > { %3274 = vmatmul.mubr.bf16.gmra.mrb[168].mxu1 %v12584_v50  ;;  %v12587_v50 = vld [vmem:[%s17518_s3 + $0x6d0] ss:$8 sps:$4 sm:$0xff]  }
 0x4a7   : > { %v4077_v3 = vpop.f32.mrb[228].mxu0 }
 0x4a8   : > { %v14838_v59 = vadd.f32 %v4077_v3, %v14514_v30  ;;  %v11499_v15 = vpop.f32.mrb[229].mxu0  ;;  %v17606_v30 = vpack.c.bf16 %v14491_v44, %v14476_v25 }
 0x4a9   : > { %v4080_v40 = vpop.f32.mrb[230].mxu0  ;;  %v14841_v0 = vpop.f32.mrb[64].mxu1 }
 0x4aa   : > { %v14844_v51 = vadd.f32 %v4080_v40, %v14519_v1  ;;  %v11500_v19 = vpop.f32.mrb[231].mxu0  ;;  %v3069_v55 = vpop.f32.mrb[65].mxu1  ;;  %v12589_v1 = vld [vmem:[%s17518_s3 + $0x6d4] ss:$8 sps:$4 sm:$0xff]  }
 0x4ab   : > { %v14846_v38 = vpop.f32.mrb[66].mxu1  ;;  %10514 = vmatprep.mubr.msk.bf16.mxu1 %vm2033_vm3, %v12589_v1 }
 0x4ac   : > { %11614 = vmatmul.mubr.msk.bf16.gmra.mrb[80].mxu0 %vm3359_vm0, %v17605_v33  ;;  %v3072_v24 = vpop.f32.mrb[67].mxu1 }
 0x4ad   : > { %11617 = vmatprep.mubr.msk.bf16.mxu0 %vm12792_vm1, %v17576_v49 }
 0x4ae   : > { %3282 = vmatmul.mubr.bf16.gmra.mrb[172].mxu1 %v12587_v50  ;;  %v12590_v50 = vld [vmem:[%s17518_s3 + $0x6e0] ss:$8 sps:$4 sm:$0xff]  }
 0x4af   : > { %v4085_v3 = vpop.f32.mrb[232].mxu0 }
 0x4b0   : > { %v14863_v10 = vadd.f32 %v4085_v3, %v14539_v36  ;;  %v11503_v33 = vpop.f32.mrb[233].mxu0  ;;  %v17607_v36 = vpack.c.bf16 %v14516_v62, %v14501_v31 }
 0x4b1   : > { %v4088_v26 = vpop.f32.mrb[234].mxu0  ;;  %v14866_v15 = vpop.f32.mrb[68].mxu1 }
 0x4b2   : > { %v14869_v40 = vadd.f32 %v4088_v26, %v14544_v32  ;;  %v11504_v19 = vpop.f32.mrb[235].mxu0  ;;  %v3077_v55 = vpop.f32.mrb[69].mxu1  ;;  %v12592_v32 = vld [vmem:[%s17518_s3 + $0x6e4] ss:$8 sps:$4 sm:$0xff]  }
 0x4b3   : > { %v14871_v24 = vpop.f32.mrb[70].mxu1  ;;  %10515 = vmatprep.mubr.msk.bf16.mxu1 %vm2033_vm3, %v12592_v32 }
 0x4b4   : > { %11618 = vmatmul.mubr.msk.bf16.gmra.mrb[84].mxu0 %vm3359_vm0, %v17606_v30  ;;  %v3080_v1 = vpop.f32.mrb[71].mxu1 }
 0x4b5   : > { %11621 = vmatprep.mubr.msk.bf16.mxu0 %vm12792_vm1, %v17576_v49 }
 0x4b6   : > { %3290 = vmatmul.mubr.bf16.gmra.mrb[176].mxu1 %v12590_v50  ;;  %v12593_v50 = vld [vmem:[%s17518_s3 + $0x6f0] ss:$8 sps:$4 sm:$0xff]  }
 0x4b7   : > { %v4093_v3 = vpop.f32.mrb[236].mxu0 }
 0x4b8   : > { %v14888_v44 = vadd.f32 %v4093_v3, %v14564_v60  ;;  %v11507_v25 = vpop.f32.mrb[237].mxu0  ;;  %v17608_v60 = vpack.c.bf16 %v14541_v23, %v14526_v34 }
 0x4b9   : > { %v4096_v30 = vpop.f32.mrb[238].mxu0  ;;  %v14891_v33 = vpop.f32.mrb[72].mxu1 }
 0x4ba   : > { %v14894_v26 = vadd.f32 %v4096_v30, %v14569_v47  ;;  %v11508_v19 = vpop.f32.mrb[239].mxu0  ;;  %v3085_v55 = vpop.f32.mrb[73].mxu1  ;;  %v12595_v47 = vld [vmem:[%s17518_s3 + $0x6f4] ss:$8 sps:$4 sm:$0xff]  }
 0x4bb   : > { %v14896_v1 = vpop.f32.mrb[74].mxu1  ;;  %10516 = vmatprep.mubr.msk.bf16.mxu1 %vm2033_vm3, %v12595_v47 }
 0x4bc   : > { %11622 = vmatmul.mubr.msk.bf16.gmra.mrb[88].mxu0 %vm3359_vm0, %v17607_v36  ;;  %v3088_v32 = vpop.f32.mrb[75].mxu1 }
 0x4bd   : > { %11625 = vmatprep.mubr.msk.bf16.mxu0 %vm12792_vm1, %v17576_v49 }
 0x4be   : > { %3298 = vmatmul.mubr.bf16.gmra.mrb[180].mxu1 %v12593_v50 }
 0x4bf   : > { %v4101_v3 = vpop.f32.mrb[240].mxu0 }
 0x4c0   : > { %v14913_v31 = vadd.f32 %v4101_v3, %v14589_v56  ;;  %v11511_v62 = vpop.f32.mrb[241].mxu0 }
 0x4c1   : > { %v4104_v36 = vpop.f32.mrb[242].mxu0  ;;  %v14916_v25 = vpop.f32.mrb[76].mxu1 }
 0x4c2   : > { %v14919_v30 = vadd.f32 %v4104_v36, %v14594_v2  ;;  %v11512_v19 = vpop.f32.mrb[243].mxu0  ;;  %v3093_v55 = vpop.f32.mrb[77].mxu1  ;;  %v1005_v2 = vld [vmem:[%s17518_s3 + $0x700] sm:$0xff] }
 0x4c3   : > { %v14921_v32 = vpop.f32.mrb[78].mxu1  ;;  %v10404_v36 = vcombine.high %v1005_v2, %v1005_v2 }
 0x4c4   : > { %11626 = vmatmul.mubr.msk.bf16.gmra.mrb[92].mxu0 %vm3359_vm0, %v17608_v60  ;;  %v3096_v47 = vpop.f32.mrb[79].mxu1  ;;  %v10403_v60 = vcombine.low %v1005_v2, %v1005_v2 }
 0x4c5   : > { %11629 = vmatprep.mubr.msk.bf16.mxu0 %vm12792_vm1, %v17576_v49  ;;  %10517 = vmatprep.mubr.msk.bf16.mxu1 %vm2033_vm3, %v10404_v36 }
 0x4c6   : > { %3306 = vmatmul.mubr.bf16.gmra.mrb[184].mxu1 %v10403_v60 }
 0x4c7   : > { %v4109_v3 = vpop.f32.mrb[244].mxu0 }
 0x4c8   : > { %v14935_v50 = vadd.f32 %v4109_v3, %v14610_v46  ;;  %v11515_v62 = vpop.f32.mrb[245].mxu0  ;;  %v17609_v46 = vpack.c.bf16 %v14566_v35, %v14551_v11  ;;  %v17614_v3 = vpack.c.bf16 %v14667_v8, %v14662_v16 }
 0x4c9   : > { %v4112_v34 = vpop.f32.mrb[246].mxu0  ;;  %v14937_v23 = vpop.f32.mrb[80].mxu1 }
 0x4ca   : > { %v14940_v19 = vadd.f32 %v4112_v34, %v14615_v28  ;;  %v11516_v55 = vpop.f32.mrb[247].mxu0  ;;  %v3101_v47 = vpop.f32.mrb[81].mxu1 }
 0x4cb   : > { %v14943_v56 = vpop.f32.mrb[82].mxu1 }
 0x4cc   : > { %11630 = vmatmul.mubr.msk.bf16.gmra.mrb[96].mxu0 %vm3359_vm0, %v17609_v46  ;;  %v3104_v62 = vpop.f32.mrb[83].mxu1  ;;  %v17610_v46 = vpack.c.bf16 %v14591_v6, %v14576_v58 }
 0x4cd   : > { %11633 = vmatprep.mubr.msk.bf16.mxu0 %vm12792_vm1, %v17576_v49 }
 0x4cf   : > { %v4117_v28 = vpop.f32.mrb[248].mxu0 }
 0x4d0   : > { %v14954_v2 = vadd.f32 %v4117_v28, %v14634_v45  ;;  %v11519_v36 = vpop.f32.mrb[249].mxu0 }
 0x4d1   : > { %v4120_v34 = vpop.f32.mrb[250].mxu0  ;;  %v14956_v55 = vpop.f32.mrb[84].mxu1 }
 0x4d2   : > { %v14959_v60 = vadd.f32 %v4120_v34, %v14640_v29  ;;  %v11520_v11 = vpop.f32.mrb[251].mxu0  ;;  %v3109_v35 = vpop.f32.mrb[85].mxu1 }
 0x4d3   : > { %v14961_v47 = vpop.f32.mrb[86].mxu1 }
 0x4d4   : > { %11634 = vmatmul.mubr.msk.bf16.gmra.mrb[100].mxu0 %vm3359_vm0, %v17610_v46  ;;  %v3112_v62 = vpop.f32.mrb[87].mxu1 }
 0x4d5   : > { %11637 = vmatprep.mubr.msk.bf16.mxu0 %vm12792_vm1, %v17576_v49  ;;  %v17611_v62 = vpack.c.bf16 %v14612_v27, %v14601_v7 }
 0x4d7   : > { %v4125_v45 = vpop.f32.mrb[252].mxu0 }
 0x4d8   : > { %v14970_v28 = vadd.f32 %v4125_v45, %v14659_v53  ;;  %v11523_v36 = vpop.f32.mrb[253].mxu0 }
 0x4d9   : > { %v4128_v29 = vpop.f32.mrb[254].mxu0  ;;  %v14972_v34 = vpop.f32.mrb[88].mxu1 }
 0x4da   : > { %v14975_v11 = vadd.f32 %v4128_v29, %v14665_v13  ;;  %v11524_v35 = vpop.f32.mrb[255].mxu0  ;;  %v3117_v6 = vpop.f32.mrb[89].mxu1 }
 0x4db   : > { %v14979_v46 = vpop.f32.mrb[90].mxu1 }
 0x4dc   : > { %11638 = vmatmul.mubr.msk.bf16.gmra.mrb[104].mxu0 %vm3359_vm0, %v17611_v62  ;;  %v3120_v53 = vpop.f32.mrb[91].mxu1 }
 0x4dd   : > { %11641 = vmatprep.mubr.msk.bf16.mxu0 %vm12792_vm1, %v17576_v49  ;;  %v17612_v53 = vpack.c.bf16 %v14637_v20, %v14619_v43 }
 0x4df   : > { %v4133_v45 = vpop.f32.mrb[0].mxu0 }
 0x4e0   : > { %v14988_v13 = vadd.f32 %v4133_v45, %v14684_v52  ;;  %v11527_v36 = vpop.f32.mrb[1].mxu0 }
 0x4e1   : > { %v4136_v29 = vpop.f32.mrb[2].mxu0  ;;  %v14990_v35 = vpop.f32.mrb[92].mxu1 }
 0x4e2   : > { %v14993_v6 = vadd.f32 %v4136_v29, %v14690_v9  ;;  %v11528_v58 = vpop.f32.mrb[3].mxu0  ;;  %v3125_v27 = vpop.f32.mrb[93].mxu1 }
 0x4e3   : > { %v14997_v62 = vpop.f32.mrb[94].mxu1  ;;  %v4421_v27 = vpack.c.bf16 %v14644_v54, %v14644_v54 }
 0x4e4   : > { %11642 = vmatmul.mubr.msk.bf16.gmra.mrb[108].mxu0 %vm3359_vm0, %v17612_v53  ;;  %v3128_v52 = vpop.f32.mrb[95].mxu1 }
 0x4e5   : > { %11645 = vmatprep.mubr.msk.bf16.mxu0 %vm12792_vm1, %v17576_v49 }
 0x4e7   : > { %v4141_v45 = vpop.f32.mrb[4].mxu0 }
 0x4e8   : > { %v15006_v9 = vadd.f32 %v4141_v45, %v14711_v21  ;;  %v11531_v58 = vpop.f32.mrb[5].mxu0 }
 0x4e9   : > { %v4144_v36 = vpop.f32.mrb[6].mxu0  ;;  %v15008_v29 = vpop.f32.mrb[96].mxu1 }
 0x4ea   : > { %v15013_v7 = vadd.f32 %v4144_v36, %v14717_v18  ;;  %v11532_v43 = vpop.f32.mrb[7].mxu0  ;;  %v3133_v53 = vpop.f32.mrb[97].mxu1  ;;  %v12598_v36 = vld [vmem:[%s17519_s4 + $0x70] sm:$0xff]  }
 0x4eb   : > { %v15017_v52 = vpop.f32.mrb[98].mxu1 }
 0x4ec   : > { %11646 = vmatmul.mubr.msk.bf16.gmra.mrb[112].mxu0 %vm3359_vm0, %v4421_v27  ;;  %v3136_v21 = vpop.f32.mrb[99].mxu1 }
 0x4ed   : > { %11653 = vmatprep.mubr.msk.bf16.mxu0 %vm12792_vm1, %v17576_v49 }
 0x4ef   : > { %v4149_v45 = vpop.f32.mrb[8].mxu0 }
 0x4f0   : > { %v15023_v58 = vadd.f32 %v4149_v45, %v14733_v57  ;;  %v11535_v54 = vpop.f32.mrb[9].mxu0  ;;  %v12599_v45 = vld [vmem:[%s17519_s4 + $0x78] sm:$0xff]  }
 0x4f1   : > { %v4152_v18 = vpop.f32.mrb[10].mxu0  ;;  %v15028_v43 = vpop.f32.mrb[100].mxu1 }
 0x4f2   : > { %v11536_v53 = vpop.f32.mrb[11].mxu0  ;;  %v3141_v21 = vpop.f32.mrb[101].mxu1 }
 0x4f3   : > { %v15032_v20 = vpop.f32.mrb[102].mxu1 }
 0x4f4   : > { %17613 = vst [vmem:[#allocation6_spill] sm:$0xff] %v15032_v20  ;;  %11654 = vmatmul.mubr.msk.bf16.vlgmr.msra.gmra.mrb[116].mxu0 %vm3359_vm0, %v17614_v3  ;;  %v3144_v57 = vpop.f32.mrb[103].mxu1 }
 0x4f5   : > { %11657 = vmatprep.mubr.msk.bf16.mxu0 %vm12792_vm1, %v17576_v49  ;;  %11706 = vmatpush3.bf16.msra.mxu0 %v12598_v36 }
 0x4f6   : > { %11707 = vmatprep.subr.bf16.mxu0 %v17576_v49 }
 0x4f7   : > { %v4282_v54 = vpop.f32.mrb[12].mxu0 }
 0x4f8   : > { %v15045_v18 = vadd.f32 %v4282_v54, %v14762_v4  ;;  %v11543_v53 = vpop.f32.mrb[13].mxu0  ;;  %v17615_v4 = vpack.c.bf16 %v14692_v42, %v14687_v37 }
 0x4f9   : > { %v4285_v21 = vpop.f32.mrb[14].mxu0  ;;  %11708 = vmatpush3.bf16.msra.mxu0 %v12599_v45  ;;  %v15047_v16 = vpop.f32.mrb[104].mxu1 }
 0x4fa   : > { %v15050_v8 = vadd.f32 %v4285_v21, %v14768_v39  ;;  %v11544_v3 = vpop.f32.mrb[15].mxu0  ;;  %v3149_v57 = vpop.f32.mrb[105].mxu1  ;;  %11761 = vmatprep.subr.bf16.mxu0 %v17576_v49 }
 0x4fb   : > { %v15055_v27 = vpop.f32.mrb[106].mxu1 }
 0x4fc   : > { %11658 = vmatmul.mubr.msk.bf16.gmra.mrb[120].mxu0 %vm3359_vm0, %v17615_v4  ;;  %v3152_v45 = vpop.f32.mrb[107].mxu1  ;;  %v17617_v4 = vld [vmem:[#allocation4_spill] sm:$0xff] }
 0x4fd   : > { %11661 = vmatprep.mubr.msk.bf16.mxu0 %vm12792_vm1, %v17576_v49  ;;  %v17618_v45 = vpack.c.bf16 %v14719_v14, %v17617_v4 }
 0x4ff   : > { %v4290_v39 = vpop.f32.mrb[16].mxu0 }
 0x500   : > { %v11547_v54 = vpop.f32.mrb[17].mxu0  ;;  %v15064_v53 = vadd.f32 %v4290_v39, %v14788_v17 }
 0x501   : > { %v4293_v21 = vpop.f32.mrb[18].mxu0  ;;  %v15066_v3 = vpop.f32.mrb[108].mxu1 }
 0x502   : > { %v11548_v57 = vpop.f32.mrb[19].mxu0  ;;  %v3157_v20 = vpop.f32.mrb[109].mxu1  ;;  %v15071_v37 = vadd.f32 %v4293_v21, %v14794_v22 }
 0x503   : > { %v15073_v42 = vpop.f32.mrb[110].mxu1 }
 0x504   : > { %17616 = vst [vmem:[#allocation7_spill] sm:$0xff] %v15073_v42  ;;  %11662 = vmatmul.mubr.msk.bf16.gmra.mrb[124].mxu0 %vm3359_vm0, %v17618_v45  ;;  %v3160_v17 = vpop.f32.mrb[111].mxu1 }
 0x505   : > { %11665 = vmatprep.mubr.msk.bf16.mxu0 %vm12792_vm1, %v17576_v49  ;;  %v17620_v17 = vpack.c.bf16 %v14741_v12, %v14739_v48 }
 0x507   : > { %v4298_v39 = vpop.f32.mrb[20].mxu0 }
 0x508   : > { %v15082_v54 = vadd.f32 %v4298_v39, %v14813_v63  ;;  %v11551_v57 = vpop.f32.mrb[21].mxu0 }
 0x509   : > { %v4301_v20 = vpop.f32.mrb[22].mxu0  ;;  %v15084_v36 = vpop.f32.mrb[112].mxu1 }
 0x50a   : > { %v15087_v22 = vadd.f32 %v4301_v20, %v14819_v5  ;;  %v11552_v21 = vpop.f32.mrb[23].mxu0  ;;  %v3165_v4 = vpop.f32.mrb[113].mxu1 }
 0x50b   : > { %v15091_v45 = vpop.f32.mrb[114].mxu1 }
 0x50c   : > { %17619 = vst [vmem:[#allocation2_spill] sm:$0xff] %v15091_v45  ;;  %11666 = vmatmul.mubr.msk.bf16.gmra.mrb[128].mxu0 %vm3359_vm0, %v17620_v17  ;;  %v3168_v63 = vpop.f32.mrb[115].mxu1 }
 0x50d   : > { %11669 = vmatprep.mubr.msk.bf16.mxu0 %vm12792_vm1, %v17576_v49  ;;  %v17622_v63 = vld [vmem:[#allocation3_spill] sm:$0xff] }
 0x50e   : > { %v17623_v42 = vpack.c.bf16 %v14771_v61, %v17622_v63 }
 0x50f   : > { %v4306_v39 = vpop.f32.mrb[24].mxu0 }
 0x510   : > { %v15100_v5 = vadd.f32 %v4306_v39, %v14838_v59  ;;  %v11555_v57 = vpop.f32.mrb[25].mxu0 }
 0x511   : > { %v4309_v20 = vpop.f32.mrb[26].mxu0  ;;  %v15102_v21 = vpop.f32.mrb[116].mxu1 }
 0x512   : > { %v15105_v4 = vadd.f32 %v4309_v20, %v14844_v51  ;;  %v11556_v14 = vpop.f32.mrb[27].mxu0  ;;  %v3173_v48 = vpop.f32.mrb[117].mxu1 }
 0x513   : > { %v15109_v17 = vpop.f32.mrb[118].mxu1 }
 0x514   : > { %17621 = vst [vmem:[#allocation4_spill] sm:$0xff] %v15109_v17  ;;  %11670 = vmatmul.mubr.msk.bf16.gmra.mrb[132].mxu0 %vm3359_vm0, %v17623_v42  ;;  %v3176_v59 = vpop.f32.mrb[119].mxu1  ;;  %v17628_v17 = vld [vmem:[#allocation5_spill] sm:$0xff] }
 0x515   : > { %11673 = vmatprep.mubr.msk.bf16.mxu0 %vm12792_vm1, %v17576_v49  ;;  %v17625_v59 = vld [vmem:[#allocation8_spill] sm:$0xff] }
 0x516   : > { %v17626_v45 = vpack.c.bf16 %v14796_v41, %v17625_v59 }
 0x517   : > { %v4314_v39 = vpop.f32.mrb[28].mxu0 }
 0x518   : > { %v15118_v51 = vadd.f32 %v4314_v39, %v14863_v10  ;;  %v11559_v14 = vpop.f32.mrb[29].mxu0 }
 0x519   : > { %v4317_v57 = vpop.f32.mrb[30].mxu0  ;;  %v15120_v20 = vpop.f32.mrb[120].mxu1 }
 0x51a   : > { %17624 = vst [vmem:[#allocation3_spill] sm:$0xff] %v15120_v20  ;;  %v15123_v48 = vadd.f32 %v4317_v57, %v14869_v40  ;;  %v11560_v12 = vpop.f32.mrb[31].mxu0  ;;  %v3181_v42 = vpop.f32.mrb[121].mxu1 }
 0x51b   : > { %v15127_v63 = vpop.f32.mrb[122].mxu1 }
 0x51c   : > { %11674 = vmatmul.mubr.msk.bf16.gmra.mrb[136].mxu0 %vm3359_vm0, %v17626_v45  ;;  %v3184_v10 = vpop.f32.mrb[123].mxu1 }
 0x51d   : > { %11677 = vmatprep.mubr.msk.bf16.mxu0 %vm12792_vm1, %v17576_v49  ;;  %v17627_v10 = vld [vmem:[#allocation9_spill] sm:$0xff] }
 0x51e   : > { %v17629_v20 = vpack.c.bf16 %v17627_v10, %v17628_v17 }
 0x51f   : > { %v4322_v39 = vpop.f32.mrb[32].mxu0 }
 0x520   : > { %v15136_v40 = vadd.f32 %v4322_v39, %v14888_v44  ;;  %v11563_v12 = vpop.f32.mrb[33].mxu0 }
 0x521   : > { %v4325_v14 = vpop.f32.mrb[34].mxu0  ;;  %v15138_v57 = vpop.f32.mrb[124].mxu1 }
 0x522   : > { %v15141_v42 = vadd.f32 %v4325_v14, %v14894_v26  ;;  %v11564_v61 = vpop.f32.mrb[35].mxu0  ;;  %v3189_v45 = vpop.f32.mrb[125].mxu1 }
 0x523   : > { %v15145_v59 = vpop.f32.mrb[126].mxu1 }
 0x524   : > { %11678 = vmatmul.mubr.msk.bf16.gmra.mrb[140].mxu0 %vm3359_vm0, %v17629_v20  ;;  %v3192_v44 = vpop.f32.mrb[127].mxu1 }
 0x525   : > { %11681 = vmatprep.mubr.msk.bf16.mxu0 %vm12792_vm1, %v17576_v49  ;;  %v17630_v44 = vpack.c.bf16 %v14846_v38, %v14841_v0  ;;  %v17632_v0 = vpack.c.bf16 %v14896_v1, %v14891_v33 }
 0x527   : > { %v4330_v39 = vpop.f32.mrb[36].mxu0 }
 0x528   : > { %v15154_v26 = vadd.f32 %v4330_v39, %v14913_v31  ;;  %v11567_v61 = vpop.f32.mrb[37].mxu0 }
 0x529   : > { %v4333_v12 = vpop.f32.mrb[38].mxu0  ;;  %v15156_v14 = vpop.f32.mrb[128].mxu1 }
 0x52a   : > { %v15159_v45 = vadd.f32 %v4333_v12, %v14919_v30  ;;  %v11568_v41 = vpop.f32.mrb[39].mxu0  ;;  %v3197_v20 = vpop.f32.mrb[129].mxu1 }
 0x52b   : > { %v15163_v10 = vpop.f32.mrb[130].mxu1 }
 0x52c   : > { %11682 = vmatmul.mubr.msk.bf16.gmra.mrb[144].mxu0 %vm3359_vm0, %v17630_v44  ;;  %v3200_v31 = vpop.f32.mrb[131].mxu1 }
 0x52d   : > { %11685 = vmatprep.mubr.msk.bf16.mxu0 %vm12792_vm1, %v17576_v49  ;;  %v17631_v31 = vpack.c.bf16 %v14871_v24, %v14866_v15 }
 0x52f   : > { %v4338_v39 = vpop.f32.mrb[40].mxu0 }
 0x530   : > { %v15172_v30 = vadd.f32 %v4338_v39, %v14935_v50  ;;  %v11571_v41 = vpop.f32.mrb[41].mxu0 }
 0x531   : > { %v4341_v61 = vpop.f32.mrb[42].mxu0  ;;  %v15174_v12 = vpop.f32.mrb[132].mxu1 }
 0x532   : > { %v15177_v20 = vadd.f32 %v4341_v61, %v14940_v19  ;;  %v11572_v17 = vpop.f32.mrb[43].mxu0  ;;  %v3205_v38 = vpop.f32.mrb[133].mxu1 }
 0x533   : > { %v15181_v44 = vpop.f32.mrb[134].mxu1 }
 0x534   : > { %11686 = vmatmul.mubr.msk.bf16.gmra.mrb[148].mxu0 %vm3359_vm0, %v17631_v31  ;;  %v3208_v50 = vpop.f32.mrb[135].mxu1 }
 0x535   : > { %11689 = vmatprep.mubr.msk.bf16.mxu0 %vm12792_vm1, %v17576_v49 }
 0x537   : > { %v4346_v39 = vpop.f32.mrb[44].mxu0 }
 0x538   : > { %v15190_v19 = vadd.f32 %v4346_v39, %v14954_v2  ;;  %v11575_v17 = vpop.f32.mrb[45].mxu0 }
 0x539   : > { %v4349_v41 = vpop.f32.mrb[46].mxu0  ;;  %v15199_v15 = vpop.f32.mrb[136].mxu1 }
 0x53a   : > { %v15193_v61 = vadd.f32 %v4349_v41, %v14959_v60  ;;  %v11576_v38 = vpop.f32.mrb[47].mxu0  ;;  %v3213_v24 = vpop.f32.mrb[137].mxu1  ;;  %v17633_v41 = vpack.c.bf16 %v14921_v32, %v14916_v25 }
 0x53b   : > { %v15203_v31 = vpop.f32.mrb[138].mxu1 }
 0x53c   : > { %11690 = vmatmul.mubr.msk.bf16.gmra.mrb[152].mxu0 %vm3359_vm0, %v17632_v0  ;;  %v3216_v60 = vpop.f32.mrb[139].mxu1 }
 0x53d   : > { %11693 = vmatprep.mubr.msk.bf16.mxu0 %vm12792_vm1, %v17576_v49 }
 0x53f   : > { %v4354_v2 = vpop.f32.mrb[48].mxu0 }
 0x540   : > { %v15208_v39 = vadd.f32 %v4354_v2, %v14970_v28  ;;  %v11579_v17 = vpop.f32.mrb[49].mxu0 }
 0x541   : > { %v4357_v33 = vpop.f32.mrb[50].mxu0  ;;  %v15217_v38 = vpop.f32.mrb[140].mxu1 }
 0x542   : > { %v15211_v1 = vadd.f32 %v4357_v33, %v14975_v11  ;;  %v11580_v0 = vpop.f32.mrb[51].mxu0  ;;  %v3221_v24 = vpop.f32.mrb[141].mxu1 }
 0x543   : > { %v15221_v60 = vpop.f32.mrb[142].mxu1 }
 0x544   : > { %11694 = vmatmul.mubr.msk.bf16.gmra.mrb[156].mxu0 %vm3359_vm0, %v17633_v41  ;;  %v3224_v2 = vpop.f32.mrb[143].mxu1  ;;  %v17634_v41 = vpack.c.bf16 %v14943_v56, %v14937_v23 }
 0x545   : > { %11697 = vmatprep.mubr.msk.bf16.mxu0 %vm12792_vm1, %v17576_v49 }
 0x547   : > { %v4362_v28 = vpop.f32.mrb[52].mxu0 }
 0x548   : > { %v15224_v17 = vadd.f32 %v4362_v28, %v14988_v13  ;;  %v11583_v11 = vpop.f32.mrb[53].mxu0 }
 0x549   : > { %v4365_v25 = vpop.f32.mrb[54].mxu0  ;;  %v15235_v24 = vpop.f32.mrb[144].mxu1 }
 0x54a   : > { %v15229_v32 = vadd.f32 %v4365_v25, %v14993_v6  ;;  %v11584_v0 = vpop.f32.mrb[55].mxu0  ;;  %v3229_v13 = vpop.f32.mrb[145].mxu1  ;;  %v4650_v6 = vpack.c.bf16 %v14956_v55, %v14956_v55 }
 0x54b   : > { %v15239_v28 = vpop.f32.mrb[146].mxu1 }
 0x54c   : > { %11698 = vmatmul.mubr.msk.bf16.gmra.mrb[160].mxu0 %vm3359_vm0, %v17634_v41  ;;  %v3232_v11 = vpop.f32.mrb[147].mxu1 }
 0x54d   : > { %11701 = vmatprep.mubr.msk.bf16.mxu0 %vm12792_vm1, %v17576_v49 }
 0x54f   : > { %v4370_v2 = vpop.f32.mrb[56].mxu0 }
 0x550   : > { %v15244_v25 = vadd.f32 %v4370_v2, %v15006_v9  ;;  %v11587_v0 = vpop.f32.mrb[57].mxu0 }
 0x551   : > { %v4373_v23 = vpop.f32.mrb[58].mxu0  ;;  %v15252_v13 = vpop.f32.mrb[148].mxu1 }
 0x552   : > { %v15249_v41 = vadd.f32 %v4373_v23, %v15013_v7  ;;  %v11588_v33 = vpop.f32.mrb[59].mxu0  ;;  %17635 = vst [vmem:[#allocation8_spill] sm:$0xff] %v15252_v13  ;;  %v3237_v55 = vpop.f32.mrb[149].mxu1 }
 0x553   : > { %v15256_v11 = vpop.f32.mrb[150].mxu1  ;;  %v17636_v55 = vpack.c.bf16 %v14972_v34, %v14961_v47 }
 0x554   : > { %11702 = vmatmul.mubr.msk.bf16.gmra.mrb[164].mxu0 %vm3359_vm0, %v4650_v6  ;;  %v3240_v2 = vpop.f32.mrb[151].mxu1  ;;  %v12600_v6 = vld [vmem:[%s17519_s4 + $0x80] sm:$0xff]  }
 0x555   : > { %11709 = vmatprep.mubr.msk.bf16.mxu0 %vm12792_vm1, %v17576_v49 }
 0x557   : > { %v4378_v9 = vpop.f32.mrb[60].mxu0 }
 0x558   : > { %v15259_v0 = vadd.f32 %v4378_v9, %v15023_v58  ;;  %v11591_v56 = vpop.f32.mrb[61].mxu0  ;;  %v12601_v58 = vld [vmem:[%s17519_s4 + $0x88] sm:$0xff]  }
 0x559   : > { %v4381_v33 = vpop.f32.mrb[62].mxu0  ;;  %v15270_v50 = vpop.f32.mrb[152].mxu1 }
 0x55a   : > { %v11592_v23 = vpop.f32.mrb[63].mxu0  ;;  %v3245_v56 = vpop.f32.mrb[153].mxu1 }
 0x55b   : > { %v15278_v9 = vpop.f32.mrb[154].mxu1  ;;  %v17637_v56 = vpack.c.bf16 %v14990_v35, %v14979_v46 }
 0x55c   : > { %11710 = vmatmul.mubr.msk.bf16.vlgmr.msra.gmra.mrb[168].mxu0 %vm3359_vm0, %v17636_v55  ;;  %v3248_v33 = vpop.f32.mrb[155].mxu1 }
 0x55d   : > { %11713 = vmatprep.mubr.msk.bf16.mxu0 %vm12792_vm1, %v17576_v49  ;;  %11762 = vmatpush3.bf16.msra.mxu0 %v12600_v6 }
 0x55e   : > { %11763 = vmatprep.subr.bf16.mxu0 %v17576_v49 }
 0x55f   : > { %v4511_v2 = vpop.f32.mrb[64].mxu0 }
 0x560   : > { %v15281_v47 = vadd.f32 %v4511_v2, %v15045_v18  ;;  %v11599_v34 = vpop.f32.mrb[65].mxu0 }
 0x561   : > { %v4514_v55 = vpop.f32.mrb[66].mxu0  ;;  %11764 = vmatpush3.bf16.msra.mxu0 %v12601_v58  ;;  %v15292_v13 = vpop.f32.mrb[156].mxu1 }
 0x562   : > { %v15286_v6 = vadd.f32 %v4514_v55, %v15050_v8  ;;  %v11600_v7 = vpop.f32.mrb[67].mxu0  ;;  %v3253_v18 = vpop.f32.mrb[157].mxu1 }
 0x563   : > { %v15296_v2 = vpop.f32.mrb[158].mxu1 }
 0x564   : > { %11714 = vmatmul.mubr.msk.bf16.gmra.mrb[172].mxu0 %vm3359_vm0, %v17637_v56  ;;  %v3256_v34 = vpop.f32.mrb[159].mxu1  ;;  %v17638_v56 = vpack.c.bf16 %v15008_v29, %v14997_v62 }
 0x565   : > { %11717 = vmatprep.mubr.msk.bf16.mxu0 %vm12792_vm1, %v17576_v49 }
 0x567   : > { %v4519_v33 = vpop.f32.mrb[68].mxu0 }
 0x568   : > { %v11603_v58 = vpop.f32.mrb[69].mxu0  ;;  %v15299_v8 = vadd.f32 %v4519_v33, %v15064_v53 }
 0x569   : > { %v4522_v46 = vpop.f32.mrb[70].mxu0  ;;  %v15310_v18 = vpop.f32.mrb[160].mxu1 }
 0x56a   : > { %v11604_v35 = vpop.f32.mrb[71].mxu0  ;;  %v15304_v55 = vadd.f32 %v4522_v46, %v15071_v37  ;;  %v3261_v53 = vpop.f32.mrb[161].mxu1 }
 0x56b   : > { %v15314_v33 = vpop.f32.mrb[162].mxu1 }
 0x56c   : > { %11718 = vmatmul.mubr.msk.bf16.gmra.mrb[176].mxu0 %vm3359_vm0, %v17638_v56  ;;  %v3264_v58 = vpop.f32.mrb[163].mxu1  ;;  %v17639_v56 = vpack.c.bf16 %v15028_v43, %v15017_v52 }
 0x56d   : > { %11721 = vmatprep.mubr.msk.bf16.mxu0 %vm12792_vm1, %v17576_v49 }
 0x56f   : > { %v4527_v34 = vpop.f32.mrb[72].mxu0 }
 0x570   : > { %v11607_v7 = vpop.f32.mrb[73].mxu0  ;;  %v15317_v35 = vadd.f32 %v4527_v34, %v15082_v54 }
 0x571   : > { %v4530_v62 = vpop.f32.mrb[74].mxu0  ;;  %v15328_v53 = vpop.f32.mrb[164].mxu1 }
 0x572   : > { %v11608_v29 = vpop.f32.mrb[75].mxu0  ;;  %v15322_v46 = vadd.f32 %v4530_v62, %v15087_v22  ;;  %v3269_v54 = vpop.f32.mrb[165].mxu1 }
 0x573   : > { %v15332_v7 = vpop.f32.mrb[166].mxu1 }
 0x574   : > { %11722 = vmatmul.mubr.msk.bf16.gmra.mrb[180].mxu0 %vm3359_vm0, %v17639_v56  ;;  %v3272_v58 = vpop.f32.mrb[167].mxu1  ;;  %v17640_v56 = vld [vmem:[#allocation6_spill] sm:$0xff] }
 0x575   : > { %11725 = vmatprep.mubr.msk.bf16.mxu0 %vm12792_vm1, %v17576_v49  ;;  %v17641_v23 = vpack.c.bf16 %v15047_v16, %v17640_v56  ;;  %v17643_v56 = vpack.c.bf16 %v15066_v3, %v15055_v27 }
 0x577   : > { %v4535_v34 = vpop.f32.mrb[76].mxu0 }
 0x578   : > { %v11611_v37 = vpop.f32.mrb[77].mxu0  ;;  %v15335_v29 = vadd.f32 %v4535_v34, %v15100_v5 }
 0x579   : > { %v4538_v52 = vpop.f32.mrb[78].mxu0  ;;  %v15346_v54 = vpop.f32.mrb[168].mxu1 }
 0x57a   : > { %v11612_v43 = vpop.f32.mrb[79].mxu0  ;;  %v15340_v62 = vadd.f32 %v4538_v52, %v15105_v4  ;;  %17642 = vst [vmem:[#allocation9_spill] sm:$0xff] %v15346_v54  ;;  %v3277_v5 = vpop.f32.mrb[169].mxu1 }
 0x57b   : > { %v15350_v37 = vpop.f32.mrb[170].mxu1 }
 0x57c   : > { %11726 = vmatmul.mubr.msk.bf16.gmra.mrb[184].mxu0 %vm3359_vm0, %v17641_v23  ;;  %v3280_v58 = vpop.f32.mrb[171].mxu1 }
 0x57d   : > { %11729 = vmatprep.mubr.msk.bf16.mxu0 %vm12792_vm1, %v17576_v49 }
 0x57f   : > { %v4543_v34 = vpop.f32.mrb[80].mxu0 }
 0x580   : > { %v11615_v22 = vpop.f32.mrb[81].mxu0  ;;  %v15353_v43 = vadd.f32 %v4543_v34, %v15118_v51 }
 0x581   : > { %v4546_v16 = vpop.f32.mrb[82].mxu0  ;;  %v15364_v5 = vpop.f32.mrb[172].mxu1 }
 0x582   : > { %v11616_v52 = vpop.f32.mrb[83].mxu0  ;;  %v15358_v23 = vadd.f32 %v4546_v16, %v15123_v48  ;;  %17644 = vst [vmem:[#allocation5_spill] sm:$0xff] %v15364_v5  ;;  %v3285_v51 = vpop.f32.mrb[173].mxu1 }
 0x583   : > { %v15368_v22 = vpop.f32.mrb[174].mxu1 }
 0x584   : > { %11730 = vmatmul.mubr.msk.bf16.gmra.mrb[188].mxu0 %vm3359_vm0, %v17643_v56  ;;  %v3288_v58 = vpop.f32.mrb[175].mxu1  ;;  %v17645_v56 = vld [vmem:[#allocation7_spill] sm:$0xff] }
 0x585   : > { %11733 = vmatprep.mubr.msk.bf16.mxu0 %vm12792_vm1, %v17576_v49  ;;  %v17646_v54 = vpack.c.bf16 %v15084_v36, %v17645_v56  ;;  %v17649_v56 = vld [vmem:[#allocation2_spill] sm:$0xff] }
 0x586   : > { %v17650_v5 = vpack.c.bf16 %v15102_v21, %v17649_v56  ;;  %v17652_v56 = vld [vmem:[#allocation3_spill] sm:$0xff] }
 0x587   : > { %v4551_v34 = vpop.f32.mrb[84].mxu0 }
 0x588   : > { %v11619_v4 = vpop.f32.mrb[85].mxu0  ;;  %v15371_v52 = vadd.f32 %v4551_v34, %v15136_v40 }
 0x589   : > { %v4554_v27 = vpop.f32.mrb[86].mxu0  ;;  %v15382_v51 = vpop.f32.mrb[176].mxu1 }
 0x58a   : > { %v11620_v3 = vpop.f32.mrb[87].mxu0  ;;  %v15376_v16 = vadd.f32 %v4554_v27, %v15141_v42  ;;  %17647 = vst [vmem:[#allocation6_spill] sm:$0xff] %v15382_v51  ;;  %v3293_v40 = vpop.f32.mrb[177].mxu1  ;;  %v17653_v51 = vld [vmem:[#allocation4_spill] sm:$0xff] }
 0x58b   : > { %v15386_v4 = vpop.f32.mrb[178].mxu1 }
 0x58c   : > { %11734 = vmatmul.mubr.msk.bf16.gmra.mrb[192].mxu0 %vm3359_vm0, %v17646_v54  ;;  %17648 = vst [vmem:[#allocation7_spill] sm:$0xff] %v15386_v4  ;;  %v3296_v58 = vpop.f32.mrb[179].mxu1  ;;  %v17654_v4 = vpack.c.bf16 %v17652_v56, %v17653_v51  ;;  %v17655_v51 = vpack.c.bf16 %v15138_v57, %v15127_v63 }
 0x58d   : > { %11737 = vmatprep.mubr.msk.bf16.mxu0 %vm12792_vm1, %v17576_v49 }
 0x58f   : > { %v4559_v34 = vpop.f32.mrb[88].mxu0 }
 0x590   : > { %v11623_v48 = vpop.f32.mrb[89].mxu0  ;;  %v15389_v3 = vadd.f32 %v4559_v34, %v15154_v26 }
 0x591   : > { %v4562_v36 = vpop.f32.mrb[90].mxu0  ;;  %v15400_v40 = vpop.f32.mrb[180].mxu1 }
 0x592   : > { %v11624_v27 = vpop.f32.mrb[91].mxu0  ;;  %v15394_v54 = vadd.f32 %v4562_v36, %v15159_v45  ;;  %17651 = vst [vmem:[#allocation2_spill] sm:$0xff] %v15400_v40  ;;  %v3301_v26 = vpop.f32.mrb[181].mxu1 }
 0x593   : > { %v15404_v48 = vpop.f32.mrb[182].mxu1 }
 0x594   : > { %11738 = vmatmul.mubr.msk.bf16.gmra.mrb[196].mxu0 %vm3359_vm0, %v17650_v5  ;;  %v3304_v58 = vpop.f32.mrb[183].mxu1 }
 0x595   : > { %11741 = vmatprep.mubr.msk.bf16.mxu0 %vm12792_vm1, %v17576_v49 }
 0x597   : > { %v4567_v34 = vpop.f32.mrb[92].mxu0 }
 0x598   : > { %v11627_v42 = vpop.f32.mrb[93].mxu0  ;;  %v15407_v27 = vadd.f32 %v4567_v34, %v15172_v30 }
 0x599   : > { %v4570_v21 = vpop.f32.mrb[94].mxu0  ;;  %v15420_v42 = vpop.f32.mrb[184].mxu1 }
 0x59a   : > { %v11628_v36 = vpop.f32.mrb[95].mxu0  ;;  %v15412_v5 = vadd.f32 %v4570_v21, %v15177_v20  ;;  %v3309_v26 = vpop.f32.mrb[185].mxu1 }
 0x59b   : > { %v3310_v36 = vpop.f32.mrb[186].mxu1 }
 0x59c   : > { %11742 = vmatmul.mubr.msk.bf16.gmra.mrb[200].mxu0 %vm3359_vm0, %v17654_v4  ;;  %v3311_v20 = vpop.f32.mrb[187].mxu1 }
 0x59d   : > { %11745 = vmatprep.mubr.msk.bf16.mxu0 %vm12792_vm1, %v17576_v49 }
 0x59f   : > { %v4575_v30 = vpop.f32.mrb[96].mxu0 }
 0x5a0   : > { %v11631_v34 = vpop.f32.mrb[97].mxu0  ;;  %v15423_v58 = vadd.f32 %v4575_v30, %v15190_v19 }
 0x5a1   : > { %v4578_v45 = vpop.f32.mrb[98].mxu0 }
 0x5a2   : > { %v11632_v21 = vpop.f32.mrb[99].mxu0  ;;  %v15426_v40 = vadd.f32 %v4578_v45, %v15193_v61  ;;  %v17656_v61 = vpack.c.bf16 %v15156_v14, %v15145_v59 }
 0x5a4   : > { %11746 = vmatmul.mubr.msk.bf16.gmra.mrb[204].mxu0 %vm3359_vm0, %v17655_v51  ;;  %v4879_v51 = vpack.c.bf16 %v15181_v44, %v15181_v44 }
 0x5a5   : > { %11749 = vmatprep.mubr.msk.bf16.mxu0 %vm12792_vm1, %v17576_v49 }
 0x5a7   : > { %v4583_v4 = vpop.f32.mrb[100].mxu0 }
 0x5a8   : > { %v11635_v56 = vpop.f32.mrb[101].mxu0  ;;  %v15435_v19 = vadd.f32 %v4583_v4, %v15208_v39 }
 0x5a9   : > { %v4586_v30 = vpop.f32.mrb[102].mxu0 }
 0x5aa   : > { %v11636_v26 = vpop.f32.mrb[103].mxu0  ;;  %v15438_v34 = vadd.f32 %v4586_v30, %v15211_v1  ;;  %v17657_v1 = vpack.c.bf16 %v15174_v12, %v15163_v10 }
 0x5ab   : > { %v17658_v26 = vpack.c.bf16 %v15203_v31, %v15199_v15 }
 0x5ac   : > { %11750 = vmatmul.mubr.msk.bf16.gmra.mrb[208].mxu0 %vm3359_vm0, %v17656_v61 }
 0x5ad   : > { %11753 = vmatprep.mubr.msk.bf16.mxu0 %vm12792_vm1, %v17576_v49 }
 0x5af   : > { %v4591_v63 = vpop.f32.mrb[104].mxu0 }
 0x5b0   : > { %v11639_v57 = vpop.f32.mrb[105].mxu0  ;;  %v15447_v45 = vadd.f32 %v4591_v63, %v15224_v17 }
 0x5b1   : > { %v4594_v39 = vpop.f32.mrb[106].mxu0 }
 0x5b2   : > { %v11640_v36 = vpop.f32.mrb[107].mxu0  ;;  %v15450_v20 = vadd.f32 %v4594_v39, %v15229_v32  ;;  %v17659_v39 = vpack.c.bf16 %v15221_v60, %v15217_v38 }
 0x5b4   : > { %11754 = vmatmul.mubr.msk.bf16.gmra.mrb[212].mxu0 %vm3359_vm0, %v17657_v1 }
 0x5b5   : > { %11757 = vmatprep.mubr.msk.bf16.mxu0 %vm12792_vm1, %v17576_v49 }
 0x5b7   : > { %v4599_v59 = vpop.f32.mrb[108].mxu0 }
 0x5b8   : > { %v11643_v14 = vpop.f32.mrb[109].mxu0  ;;  %v15459_v21 = vadd.f32 %v4599_v59, %v15244_v25 }
 0x5b9   : > { %v4602_v17 = vpop.f32.mrb[110].mxu0 }
 0x5ba   : > { %v11644_v4 = vpop.f32.mrb[111].mxu0  ;;  %v15464_v32 = vadd.f32 %v4602_v17, %v15249_v41 }
 0x5bc   : > { %11758 = vmatmul.mubr.msk.bf16.gmra.mrb[216].mxu0 %vm3359_vm0, %v4879_v51  ;;  %v17661_v51 = vld [vmem:[#allocation8_spill] sm:$0xff] }
 0x5bd   : > { %11765 = vmatprep.mubr.msk.bf16.mxu0 %vm12792_vm1, %v17576_v49  ;;  %v17662_v4 = vpack.c.bf16 %v15256_v11, %v17661_v51  ;;  %v17669_v51 = vld [vmem:[#allocation5_spill] sm:$0xff] }
 0x5bf   : > { %v4607_v10 = vpop.f32.mrb[112].mxu0 }
 0x5c0   : > { %v11647_v12 = vpop.f32.mrb[113].mxu0  ;;  %v15470_v56 = vadd.f32 %v4607_v10, %v15259_v0 }
 0x5c1   : > { %v4610_v25 = vpop.f32.mrb[114].mxu0 }
 0x5c2   : > { %v11648_v30 = vpop.f32.mrb[115].mxu0  ;;  %v17663_v25 = vpack.c.bf16 %v15278_v9, %v15270_v50 }
 0x5c4   : > { %11766 = vmatmul.mubr.msk.bf16.vlgmr.msra.gmra.mrb[220].mxu0 %vm3359_vm0, %v17658_v26 }
 0x5c5   : > { %11769 = vmatprep.mubr.msk.bf16.mxu0 %vm12792_vm1, %v17576_v49 }
 0x5c7   : > { %v4740_v44 = vpop.f32.mrb[116].mxu0 }
 0x5c8   : > { %v11655_v41 = vpop.f32.mrb[117].mxu0  ;;  %v15479_v61 = vadd.f32 %v4740_v44, %v15281_v47 }
 0x5c9   : > { %v4743_v63 = vpop.f32.mrb[118].mxu0  ;;  %v17664_v41 = vpack.c.bf16 %v15296_v2, %v15292_v13 }
 0x5ca   : > { %v11656_v57 = vpop.f32.mrb[119].mxu0  ;;  %v15482_v0 = vadd.f32 %v4743_v63, %v15286_v6  ;;  %v17660_v6 = vpack.c.bf16 %v15239_v28, %v15235_v24 }
 0x5cc   : > { %11770 = vmatmul.mubr.msk.bf16.gmra.mrb[224].mxu0 %vm3359_vm0, %v17659_v39  ;;  %v17665_v39 = vpack.c.bf16 %v15314_v33, %v15310_v18 }
 0x5cd   : > { %11773 = vmatprep.mubr.msk.bf16.mxu0 %vm12792_vm1, %v17576_v49 }
 0x5cf   : > { %v4748_v15 = vpop.f32.mrb[120].mxu0 }
 0x5d0   : > { %v15491_v31 = vadd.f32 %v4748_v15, %v15299_v8  ;;  %v11659_v36 = vpop.f32.mrb[121].mxu0 }
 0x5d1   : > { %v4751_v47 = vpop.f32.mrb[122].mxu0 }
 0x5d2   : > { %v15494_v1 = vadd.f32 %v4751_v47, %v15304_v55  ;;  %v11660_v59 = vpop.f32.mrb[123].mxu0  ;;  %v17666_v47 = vpack.c.bf16 %v15332_v7, %v15328_v53 }
 0x5d4   : > { %11774 = vmatmul.mubr.msk.bf16.gmra.mrb[228].mxu0 %vm3359_vm0, %v17660_v6 }
 0x5d5   : > { %11777 = vmatprep.mubr.msk.bf16.mxu0 %vm12792_vm1, %v17576_v49 }
 0x5d7   : > { %v4756_v38 = vpop.f32.mrb[124].mxu0 }
 0x5d8   : > { %v15503_v60 = vadd.f32 %v4756_v38, %v15317_v35  ;;  %v11663_v8 = vpop.f32.mrb[125].mxu0  ;;  %v17667_v38 = vld [vmem:[#allocation9_spill] sm:$0xff] }
 0x5d9   : > { %v4759_v14 = vpop.f32.mrb[126].mxu0  ;;  %v17668_v8 = vpack.c.bf16 %v15350_v37, %v17667_v38 }
 0x5da   : > { %v15506_v17 = vadd.f32 %v4759_v14, %v15322_v46  ;;  %v11664_v55 = vpop.f32.mrb[127].mxu0 }
 0x5dc   : > { %11778 = vmatmul.mubr.msk.bf16.gmra.mrb[232].mxu0 %vm3359_vm0, %v17662_v4  ;;  %v17670_v4 = vpack.c.bf16 %v15368_v22, %v17669_v51 }
 0x5dd   : > { %11781 = vmatprep.mubr.msk.bf16.mxu0 %vm12792_vm1, %v17576_v49 }
 0x5df   : > { %v4764_v24 = vpop.f32.mrb[128].mxu0 }
 0x5e0   : > { %v15515_v28 = vadd.f32 %v4764_v24, %v15335_v29  ;;  %v11667_v35 = vpop.f32.mrb[129].mxu0 }
 0x5e1   : > { %v4767_v10 = vpop.f32.mrb[130].mxu0 }
 0x5e2   : > { %v15518_v12 = vadd.f32 %v4767_v10, %v15340_v62  ;;  %v11668_v46 = vpop.f32.mrb[131].mxu0 }
 0x5e3   : > { %v17671_v46 = vld [vmem:[#allocation7_spill] sm:$0xff] }
 0x5e4   : > { %11782 = vmatmul.mubr.msk.bf16.gmra.mrb[236].mxu0 %vm3359_vm0, %v17663_v25  ;;  %v17672_v25 = vld [vmem:[#allocation6_spill] sm:$0xff] }
 0x5e5   : > { %11785 = vmatprep.mubr.msk.bf16.mxu0 %vm12792_vm1, %v17576_v49 }
 0x5e7   : > { %v4772_v11 = vpop.f32.mrb[132].mxu0 }
 0x5e8   : > { %v15527_v30 = vadd.f32 %v4772_v11, %v15353_v43  ;;  %v11671_v29 = vpop.f32.mrb[133].mxu0  ;;  %v17673_v11 = vpack.c.bf16 %v17671_v46, %v17672_v25 }
 0x5e9   : > { %v4775_v26 = vpop.f32.mrb[134].mxu0 }
 0x5ea   : > { %v15530_v44 = vadd.f32 %v4775_v26, %v15358_v23  ;;  %v11672_v62 = vpop.f32.mrb[135].mxu0 }
 0x5ec   : > { %11786 = vmatmul.mubr.msk.bf16.gmra.mrb[240].mxu0 %vm3359_vm0, %v17664_v41  ;;  %v17674_v41 = vld [vmem:[#allocation2_spill] sm:$0xff] }
 0x5ed   : > { %11789 = vmatprep.mubr.msk.bf16.mxu0 %vm12792_vm1, %v17576_v49 }
 0x5ef   : > { %v4780_v50 = vpop.f32.mrb[136].mxu0 }
 0x5f0   : > { %v15539_v9 = vadd.f32 %v4780_v50, %v15371_v52  ;;  %v11675_v43 = vpop.f32.mrb[137].mxu0  ;;  %v17675_v50 = vpack.c.bf16 %v15404_v48, %v17674_v41 }
 0x5f1   : > { %v4783_v63 = vpop.f32.mrb[138].mxu0 }
 0x5f2   : > { %v15542_v57 = vadd.f32 %v4783_v63, %v15376_v16  ;;  %v11676_v23 = vpop.f32.mrb[139].mxu0 }
 0x5f3   : > { %v5108_v23 = vpack.c.bf16 %v15420_v42, %v15420_v42 }
 0x5f4   : > { %11790 = vmatmul.mubr.msk.bf16.gmra.mrb[244].mxu0 %vm3359_vm0, %v17665_v39 }
 0x5f5   : > { %11793 = vmatprep.mubr.msk.bf16.mxu0 %vm12792_vm1, %v17576_v49 }
 0x5f7   : > { %v4788_v13 = vpop.f32.mrb[140].mxu0 }
 0x5f8   : > { %v15551_v2 = vadd.f32 %v4788_v13, %v15389_v3  ;;  %v11679_v52 = vpop.f32.mrb[141].mxu0 }
 0x5f9   : > { %v4791_v15 = vpop.f32.mrb[142].mxu0 }
 0x5fa   : > { %v15554_v36 = vadd.f32 %v4791_v15, %v15394_v54  ;;  %v11680_v16 = vpop.f32.mrb[143].mxu0 }
 0x5fc   : > { %11794 = vmatmul.mubr.msk.bf16.gmra.mrb[248].mxu0 %vm3359_vm0, %v17666_v47 }
 0x5fd   : > { %11797 = vmatprep.mubr.msk.bf16.mxu0 %vm12792_vm1, %v17576_v49 }
 0x5ff   : > { %v4796_v18 = vpop.f32.mrb[144].mxu0 }
 0x600   : > { %v15563_v33 = vadd.f32 %v4796_v18, %v15407_v27  ;;  %v11683_v3 = vpop.f32.mrb[145].mxu0 }
 0x601   : > { %v4799_v59 = vpop.f32.mrb[146].mxu0 }
 0x602   : > { %v15566_v6 = vadd.f32 %v4799_v59, %v15412_v5  ;;  %v11684_v54 = vpop.f32.mrb[147].mxu0 }
 0x604   : > { %11798 = vmatmul.mubr.msk.bf16.gmra.mrb[252].mxu0 %vm3359_vm0, %v17668_v8 }
 0x605   : > { %11801 = vmatprep.mubr.msk.bf16.mxu0 %vm12792_vm1, %v17576_v49 }
 0x607   : > { %v4804_v53 = vpop.f32.mrb[148].mxu0 }
 0x608   : > { %v15575_v7 = vadd.f32 %v4804_v53, %v15423_v58  ;;  %v11687_v27 = vpop.f32.mrb[149].mxu0 }
 0x609   : > { %v4807_v14 = vpop.f32.mrb[150].mxu0 }
 0x60a   : > { %v15578_v55 = vadd.f32 %v4807_v14, %v15426_v40  ;;  %v11688_v5 = vpop.f32.mrb[151].mxu0 }
 0x60c   : > { %11802 = vmatmul.mubr.msk.bf16.gmra.mrb[0].mxu0 %vm3359_vm0, %v17670_v4 }
 0x60d   : > { %11805 = vmatprep.mubr.msk.bf16.mxu0 %vm12792_vm1, %v17576_v49 }
 0x60f   : > { %v4812_v37 = vpop.f32.mrb[152].mxu0 }
 0x610   : > { %v15587_v24 = vadd.f32 %v4812_v37, %v15435_v19  ;;  %v11691_v58 = vpop.f32.mrb[153].mxu0 }
 0x611   : > { %v4815_v35 = vpop.f32.mrb[154].mxu0 }
 0x612   : > { %v15590_v10 = vadd.f32 %v4815_v35, %v15438_v34  ;;  %v11692_v40 = vpop.f32.mrb[155].mxu0 }
 0x614   : > { %11806 = vmatmul.mubr.msk.bf16.gmra.mrb[4].mxu0 %vm3359_vm0, %v17673_v11 }
 0x615   : > { %11809 = vmatprep.mubr.msk.bf16.mxu0 %vm12792_vm1, %v17576_v49 }
 0x617   : > { %v4820_v22 = vpop.f32.mrb[156].mxu0 }
 0x618   : > { %v15599_v29 = vadd.f32 %v4820_v22, %v15447_v45  ;;  %v11695_v19 = vpop.f32.mrb[157].mxu0 }
 0x619   : > { %v4823_v26 = vpop.f32.mrb[158].mxu0 }
 0x61a   : > { %v15602_v62 = vadd.f32 %v4823_v26, %v15450_v20  ;;  %v11696_v34 = vpop.f32.mrb[159].mxu0 }
 0x61c   : > { %11810 = vmatmul.mubr.msk.bf16.gmra.mrb[8].mxu0 %vm3359_vm0, %v17675_v50 }
 0x61d   : > { %11813 = vmatprep.mubr.msk.bf16.mxu0 %vm12792_vm1, %v17576_v49 }
 0x61f   : > { %v4828_v43 = vpop.f32.mrb[160].mxu0 }
 0x620   : > { %v15611_v63 = vadd.f32 %v4828_v43, %v15459_v21  ;;  %v11699_v45 = vpop.f32.mrb[161].mxu0 }
 0x621   : > { %v4831_v39 = vpop.f32.mrb[162].mxu0 }
 0x622   : > { %v15616_v20 = vadd.f32 %v4831_v39, %v15464_v32  ;;  %v11700_v13 = vpop.f32.mrb[163].mxu0 }
 0x624   : > { %11814 = vmatmul.mubr.msk.bf16.gmra.mrb[12].mxu0 %vm3359_vm0, %v5108_v23 }
 0x627   : > { %v4836_v48 = vpop.f32.mrb[164].mxu0 }
 0x628   : > { %v15620_v52 = vadd.f32 %v4836_v48, %v15470_v56  ;;  %v11703_v49 = vpop.f32.mrb[165].mxu0 }
 0x629   : > { %v4839_v15 = vpop.f32.mrb[166].mxu0 }
 0x62a   : > { %v11704_v16 = vpop.f32.mrb[167].mxu0 }
 0x62f   : > { %v4969_v21 = vpop.f32.mrb[168].mxu0 }
 0x630   : > { %v15623_v47 = vadd.f32 %v4969_v21, %v15479_v61  ;;  %v11711_v18 = vpop.f32.mrb[169].mxu0 }
 0x631   : > { %v4972_v42 = vpop.f32.mrb[170].mxu0 }
 0x632   : > { %v15626_v3 = vadd.f32 %v4972_v42, %v15482_v0  ;;  %v11712_v32 = vpop.f32.mrb[171].mxu0 }
 0x637   : > { %v4977_v59 = vpop.f32.mrb[172].mxu0 }
 0x638   : > { %v15629_v54 = vadd.f32 %v4977_v59, %v15491_v31  ;;  %v11715_v38 = vpop.f32.mrb[173].mxu0 }
 0x639   : > { %v4980_v56 = vpop.f32.mrb[174].mxu0 }
 0x63a   : > { %v15632_v8 = vadd.f32 %v4980_v56, %v15494_v1  ;;  %v11716_v53 = vpop.f32.mrb[175].mxu0 }
 0x63f   : > { %v4985_v27 = vpop.f32.mrb[176].mxu0 }
 0x640   : > { %v15635_v61 = vadd.f32 %v4985_v27, %v15503_v60  ;;  %v11719_v14 = vpop.f32.mrb[177].mxu0 }
 0x641   : > { %v4988_v5 = vpop.f32.mrb[178].mxu0 }
 0x642   : > { %v15638_v0 = vadd.f32 %v4988_v5, %v15506_v17  ;;  %v11720_v51 = vpop.f32.mrb[179].mxu0 }
 0x647   : > { %v4993_v4 = vpop.f32.mrb[180].mxu0 }
 0x648   : > { %v15641_v31 = vadd.f32 %v4993_v4, %v15515_v28  ;;  %v11723_v37 = vpop.f32.mrb[181].mxu0 }
 0x649   : > { %v4996_v58 = vpop.f32.mrb[182].mxu0 }
 0x64a   : > { %v15644_v1 = vadd.f32 %v4996_v58, %v15518_v12  ;;  %v11724_v35 = vpop.f32.mrb[183].mxu0 }
 0x64f   : > { %v5001_v40 = vpop.f32.mrb[184].mxu0 }
 0x650   : > { %v15647_v60 = vadd.f32 %v5001_v40, %v15527_v30  ;;  %v11727_v46 = vpop.f32.mrb[185].mxu0 }
 0x651   : > { %v5004_v25 = vpop.f32.mrb[186].mxu0 }
 0x652   : > { %v15650_v17 = vadd.f32 %v5004_v25, %v15530_v44  ;;  %v11728_v11 = vpop.f32.mrb[187].mxu0  ;;  %v15704_v25 = vld [vmem:[%s17520_s5] ss:$0 sm:$0xff] }
 0x657   : > { %v5009_v22 = vpop.f32.mrb[188].mxu0 }
 0x658   : > { %v15653_v28 = vadd.f32 %v5009_v22, %v15539_v9  ;;  %v11731_v19 = vpop.f32.mrb[189].mxu0 }
 0x659   : > { %v5012_v26 = vpop.f32.mrb[190].mxu0 }
 0x65a   : > { %v15656_v12 = vadd.f32 %v5012_v26, %v15542_v57  ;;  %v11732_v34 = vpop.f32.mrb[191].mxu0 }
 0x65f   : > { %v5017_v41 = vpop.f32.mrb[192].mxu0 }
 0x660   : > { %v15659_v30 = vadd.f32 %v5017_v41, %v15551_v2  ;;  %v11735_v50 = vpop.f32.mrb[193].mxu0 }
 0x661   : > { %v5020_v43 = vpop.f32.mrb[194].mxu0 }
 0x662   : > { %v15662_v44 = vadd.f32 %v5020_v43, %v15554_v36  ;;  %v11736_v45 = vpop.f32.mrb[195].mxu0 }
 0x667   : > { %v5025_v23 = vpop.f32.mrb[196].mxu0 }
 0x668   : > { %v15665_v9 = vadd.f32 %v5025_v23, %v15563_v33  ;;  %v11739_v39 = vpop.f32.mrb[197].mxu0 }
 0x669   : > { %v5028_v13 = vpop.f32.mrb[198].mxu0 }
 0x66a   : > { %v15668_v57 = vadd.f32 %v5028_v13, %v15566_v6  ;;  %v11740_v48 = vpop.f32.mrb[199].mxu0 }
 0x66f   : > { %v5033_v49 = vpop.f32.mrb[200].mxu0 }
 0x670   : > { %v15671_v2 = vadd.f32 %v5033_v49, %v15575_v7  ;;  %v11743_v15 = vpop.f32.mrb[201].mxu0 }
 0x671   : > { %v5036_v16 = vpop.f32.mrb[202].mxu0 }
 0x672   : > { %v15674_v36 = vadd.f32 %v5036_v16, %v15578_v55  ;;  %v11744_v21 = vpop.f32.mrb[203].mxu0 }
 0x673   : > { %v17676_v21 = vmov 0  }
 0x677   : > { %v5041_v18 = vpop.f32.mrb[204].mxu0 }
 0x678   : > { %v15677_v33 = vadd.f32 %v5041_v18, %v15587_v24  ;;  %v11747_v42 = vpop.f32.mrb[205].mxu0  ;;  %v12604_v24 = vld [vmem:[%s17521_s6 + $0x4] ss:$8 sps:$4 sm:$0xff]  }
 0x679   : > { %v5044_v32 = vpop.f32.mrb[206].mxu0  ;;  %10718 = vmatprep.mubr.msk.bf16.mxu1 %vm2033_vm3, %v12604_v24 }
 0x67a   : > { %v15680_v6 = vadd.f32 %v5044_v32, %v15590_v10  ;;  %v11748_v59 = vpop.f32.mrb[207].mxu0 }
 0x67f   : > { %v5049_v38 = vpop.f32.mrb[208].mxu0 }
 0x680   : > { %v15683_v7 = vadd.f32 %v5049_v38, %v15599_v29  ;;  %v11751_v56 = vpop.f32.mrb[209].mxu0 }
 0x681   : > { %v5052_v53 = vpop.f32.mrb[210].mxu0 }
 0x682   : > { %v15686_v55 = vadd.f32 %v5052_v53, %v15602_v62  ;;  %v11752_v27 = vpop.f32.mrb[211].mxu0 }
 0x687   : > { %v5057_v14 = vpop.f32.mrb[212].mxu0 }
 0x688   : > { %v15693_v10 = vadd.f32 %v5057_v14, %v15611_v63  ;;  %v11755_v5 = vpop.f32.mrb[213].mxu0 }
 0x689   : > { %v5060_v51 = vpop.f32.mrb[214].mxu0 }
 0x68a   : > { %v15696_v29 = vadd.f32 %v5060_v51, %v15616_v20  ;;  %v11756_v4 = vpop.f32.mrb[215].mxu0 }
 0x68f   : > { %v5065_v37 = vpop.f32.mrb[216].mxu0 }
 0x690   : > { %v15699_v62 = vadd.f32 %v5065_v37, %v15620_v52  ;;  %v11759_v58 = vpop.f32.mrb[217].mxu0 }
 0x691   : > { %v5068_v35 = vpop.f32.mrb[218].mxu0 }
 0x692   : > { %v11760_v40 = vpop.f32.mrb[219].mxu0 }
 0x697   : > { %v5198_v46 = vpop.f32.mrb[220].mxu0 }
 0x698   : > { %v5300_v63 = vadd.f32 %v5198_v46, %v15623_v47  ;;  %v11767_v11 = vpop.f32.mrb[221].mxu0 }
 0x699   : > { %v5201_v22 = vpop.f32.mrb[222].mxu0 }
 0x69a   : > { %v5332_v20 = vadd.f32 %v15704_v25, %v5300_v63  ;;  %v5301_v19 = vadd.f32 %v5201_v22, %v15626_v3  ;;  %v11768_v26 = vpop.f32.mrb[223].mxu0 }
 0x69c   : > { %v5382_v52 = vmul.f32 0.2, %v5332_v20  ;;  %v5333_v34 = vadd.f32 %v15704_v25, %v5301_v19  ;;  %vm5357_vm1 = vcmp.ge.f32.partialorder %v5332_v20, 0.0 }
 0x69e   : > { %vm5358_vm2 = vcmp.ge.f32.partialorder %v5333_v34, 0.0  ;;  %v5383_v41 = vmul.f32 0.2, %v5333_v34  ;;  %v5407_v43 = vsel %vm5357_vm1, %v5332_v20, %v5382_v52 }
 0x69f   : > { %v5206_v50 = vpop.f32.mrb[224].mxu0 }
 0x6a0   : > { %v5408_v45 = vsel %vm5358_vm2, %v5333_v34, %v5383_v41  ;;  %v5302_v23 = vadd.f32 %v5206_v50, %v15629_v54  ;;  %v11771_v39 = vpop.f32.mrb[225].mxu0 }
 0x6a1   : > { %v5209_v47 = vpop.f32.mrb[226].mxu0  ;;  %v5495_v13 = vpack.c.bf16 %v5408_v45, %v5407_v43 }
 0x6a2   : > { %v5334_v48 = vadd.f32 %v15704_v25, %v5302_v23  ;;  %v5303_v49 = vadd.f32 %v5209_v47, %v15632_v8  ;;  %v11772_v3 = vpop.f32.mrb[227].mxu0 }
 0x6a3   : > { %5893 = vmatpush1.bf16.msra.mxu1 %v5495_v13 }
 0x6a4   : > { %v5384_v15 = vmul.f32 0.2, %v5334_v48  ;;  %v5335_v16 = vadd.f32 %v15704_v25, %v5303_v49  ;;  %5894 = vmatprep.subr.bf16.mxu1 %v17676_v21  ;;  %vm5359_vm4 = vcmp.ge.f32.partialorder %v5334_v48, 0.0 }
 0x6a6   : > { %vm5360_vm5 = vcmp.ge.f32.partialorder %v5335_v16, 0.0  ;;  %v5385_v18 = vmul.f32 0.2, %v5335_v16  ;;  %v5409_v32 = vsel %vm5359_vm4, %v5334_v48, %v5384_v15 }
 0x6a7   : > { %v5214_v42 = vpop.f32.mrb[228].mxu0 }
 0x6a8   : > { %v5410_v54 = vsel %vm5360_vm5, %v5335_v16, %v5385_v18  ;;  %v5304_v59 = vadd.f32 %v5214_v42, %v15635_v61  ;;  %v11775_v38 = vpop.f32.mrb[229].mxu0 }
 0x6a9   : > { %v5217_v56 = vpop.f32.mrb[230].mxu0  ;;  %v5496_v53 = vpack.c.bf16 %v5410_v54, %v5409_v32 }
 0x6aa   : > { %v5336_v8 = vadd.f32 %v15704_v25, %v5304_v59  ;;  %v5305_v27 = vadd.f32 %v5217_v56, %v15638_v0  ;;  %v11776_v24 = vpop.f32.mrb[231].mxu0 }
 0x6ab   : > { %5895 = vmatpush1.bf16.msra.mxu1 %v5496_v53 }
 0x6ac   : > { %v5386_v14 = vmul.f32 0.2, %v5336_v8  ;;  %v5337_v5 = vadd.f32 %v15704_v25, %v5305_v27  ;;  %5896 = vmatprep.subr.bf16.mxu1 %v17676_v21  ;;  %vm5361_vm6 = vcmp.ge.f32.partialorder %v5336_v8, 0.0 }
 0x6ae   : > { %vm5362_vm7 = vcmp.ge.f32.partialorder %v5337_v5, 0.0  ;;  %v5387_v51 = vmul.f32 0.2, %v5337_v5  ;;  %v5411_v37 = vsel %vm5361_vm6, %v5336_v8, %v5386_v14 }
 0x6af   : > { %v5222_v4 = vpop.f32.mrb[232].mxu0 }
 0x6b0   : > { %v5412_v61 = vsel %vm5362_vm7, %v5337_v5, %v5387_v51  ;;  %v5306_v58 = vadd.f32 %v5222_v4, %v15641_v31  ;;  %v11779_v35 = vpop.f32.mrb[233].mxu0 }
 0x6b1   : > { %v5225_v40 = vpop.f32.mrb[234].mxu0  ;;  %v5497_v46 = vpack.c.bf16 %v5412_v61, %v5411_v37 }
 0x6b2   : > { %v5338_v0 = vadd.f32 %v15704_v25, %v5306_v58  ;;  %v5307_v63 = vadd.f32 %v5225_v40, %v15644_v1  ;;  %v11780_v11 = vpop.f32.mrb[235].mxu0 }
 0x6b3   : > { %5897 = vmatpush1.bf16.msra.mxu1 %v5497_v46 }
 0x6b4   : > { %v5388_v22 = vmul.f32 0.2, %v5338_v0  ;;  %v5339_v20 = vadd.f32 %v15704_v25, %v5307_v63  ;;  %5898 = vmatprep.subr.bf16.mxu1 %v17676_v21  ;;  %vm5363_vm8 = vcmp.ge.f32.partialorder %v5338_v0, 0.0 }
 0x6b6   : > { %vm5364_vm9 = vcmp.ge.f32.partialorder %v5339_v20, 0.0  ;;  %v5389_v19 = vmul.f32 0.2, %v5339_v20  ;;  %v5413_v52 = vsel %vm5363_vm8, %v5338_v0, %v5388_v22 }
 0x6b7   : > { %v5230_v26 = vpop.f32.mrb[236].mxu0 }
 0x6b8   : > { %v5414_v31 = vsel %vm5364_vm9, %v5339_v20, %v5389_v19  ;;  %v5308_v34 = vadd.f32 %v5230_v26, %v15647_v60  ;;  %v11783_v41 = vpop.f32.mrb[237].mxu0 }
 0x6b9   : > { %v5233_v50 = vpop.f32.mrb[238].mxu0  ;;  %v5498_v43 = vpack.c.bf16 %v5414_v31, %v5413_v52 }
 0x6ba   : > { %v5340_v1 = vadd.f32 %v15704_v25, %v5308_v34  ;;  %v5309_v45 = vadd.f32 %v5233_v50, %v15650_v17  ;;  %v11784_v23 = vpop.f32.mrb[239].mxu0 }
 0x6bb   : > { %5899 = vmatpush1.bf16.msra.mxu1 %v5498_v43 }
 0x6bc   : > { %v5390_v39 = vmul.f32 0.2, %v5340_v1  ;;  %v5341_v47 = vadd.f32 %v15704_v25, %v5309_v45  ;;  %5900 = vmatprep.subr.bf16.mxu1 %v17676_v21  ;;  %vm5365_vm10 = vcmp.ge.f32.partialorder %v5340_v1, 0.0 }
 0x6be   : > { %vm5366_vm11 = vcmp.ge.f32.partialorder %v5341_v47, 0.0  ;;  %v5391_v13 = vmul.f32 0.2, %v5341_v47  ;;  %v5415_v49 = vsel %vm5365_vm10, %v5340_v1, %v5390_v39 }
 0x6bf   : > { %v5238_v48 = vpop.f32.mrb[240].mxu0 }
 0x6c0   : > { %v5416_v60 = vsel %vm5366_vm11, %v5341_v47, %v5391_v13  ;;  %v5310_v3 = vadd.f32 %v5238_v48, %v15653_v28  ;;  %v11787_v15 = vpop.f32.mrb[241].mxu0 }
 0x6c1   : > { %v5241_v16 = vpop.f32.mrb[242].mxu0  ;;  %v5499_v18 = vpack.c.bf16 %v5416_v60, %v5415_v49 }
 0x6c2   : > { %v5342_v17 = vadd.f32 %v15704_v25, %v5310_v3  ;;  %v5311_v42 = vadd.f32 %v5241_v16, %v15656_v12  ;;  %v11788_v32 = vpop.f32.mrb[243].mxu0 }
 0x6c3   : > { %5901 = vmatpush1.bf16.msra.mxu1 %v5499_v18 }
 0x6c4   : > { %v5392_v54 = vmul.f32 0.2, %v5342_v17  ;;  %v5343_v59 = vadd.f32 %v15704_v25, %v5311_v42  ;;  %5902 = vmatprep.subr.bf16.mxu1 %v17676_v21  ;;  %vm5367_vm12 = vcmp.ge.f32.partialorder %v5342_v17, 0.0 }
 0x6c6   : > { %vm5368_vm13 = vcmp.ge.f32.partialorder %v5343_v59, 0.0  ;;  %v5393_v38 = vmul.f32 0.2, %v5343_v59  ;;  %v5417_v53 = vsel %vm5367_vm12, %v5342_v17, %v5392_v54 }
 0x6c7   : > { %v5246_v56 = vpop.f32.mrb[244].mxu0 }
 0x6c8   : > { %v5418_v28 = vsel %vm5368_vm13, %v5343_v59, %v5393_v38  ;;  %v5312_v8 = vadd.f32 %v5246_v56, %v15659_v30  ;;  %v11791_v27 = vpop.f32.mrb[245].mxu0 }
 0x6c9   : > { %v5249_v24 = vpop.f32.mrb[246].mxu0  ;;  %v5500_v14 = vpack.c.bf16 %v5418_v28, %v5417_v53 }
 0x6ca   : > { %v5344_v12 = vadd.f32 %v15704_v25, %v5312_v8  ;;  %v5313_v5 = vadd.f32 %v5249_v24, %v15662_v44  ;;  %v11792_v51 = vpop.f32.mrb[247].mxu0 }
 0x6cb   : > { %5903 = vmatpush1.bf16.msra.mxu1 %v5500_v14 }
 0x6cc   : > { %v5394_v4 = vmul.f32 0.2, %v5344_v12  ;;  %v5345_v37 = vadd.f32 %v15704_v25, %v5313_v5  ;;  %5904 = vmatprep.subr.bf16.mxu1 %v17676_v21  ;;  %vm5369_vm14 = vcmp.ge.f32.partialorder %v5344_v12, 0.0 }
 0x6ce   : > { %vm5370_vm1 = vcmp.ge.f32.partialorder %v5345_v37, 0.0  ;;  %v5395_v61 = vmul.f32 0.2, %v5345_v37  ;;  %v5419_v35 = vsel %vm5369_vm14, %v5344_v12, %v5394_v4 }
 0x6cf   : > { %v5254_v58 = vpop.f32.mrb[248].mxu0 }
 0x6d0   : > { %v5420_v30 = vsel %vm5370_vm1, %v5345_v37, %v5395_v61  ;;  %v5314_v40 = vadd.f32 %v5254_v58, %v15665_v9  ;;  %v11795_v46 = vpop.f32.mrb[249].mxu0 }
 0x6d1   : > { %v5257_v0 = vpop.f32.mrb[250].mxu0  ;;  %v5501_v63 = vpack.c.bf16 %v5420_v30, %v5419_v35 }
 0x6d2   : > { %v5346_v44 = vadd.f32 %v15704_v25, %v5314_v40  ;;  %v5315_v11 = vadd.f32 %v5257_v0, %v15668_v57  ;;  %v11796_v22 = vpop.f32.mrb[251].mxu0 }
 0x6d3   : > { %5905 = vmatpush1.bf16.msra.mxu1 %v5501_v63 }
 0x6d4   : > { %v5396_v20 = vmul.f32 0.2, %v5346_v44  ;;  %v5347_v19 = vadd.f32 %v15704_v25, %v5315_v11  ;;  %5906 = vmatprep.subr.bf16.mxu1 %v17676_v21  ;;  %vm5371_vm2 = vcmp.ge.f32.partialorder %v5346_v44, 0.0 }
 0x6d6   : > { %vm5372_vm4 = vcmp.ge.f32.partialorder %v5347_v19, 0.0  ;;  %v5397_v26 = vmul.f32 0.2, %v5347_v19  ;;  %v5421_v31 = vsel %vm5371_vm2, %v5346_v44, %v5396_v20 }
 0x6d7   : > { %v5262_v52 = vpop.f32.mrb[252].mxu0 }
 0x6d8   : > { %v5422_v9 = vsel %vm5372_vm4, %v5347_v19, %v5397_v26  ;;  %v5316_v34 = vadd.f32 %v5262_v52, %v15671_v2  ;;  %v11799_v41 = vpop.f32.mrb[253].mxu0 }
 0x6d9   : > { %v5265_v50 = vpop.f32.mrb[254].mxu0  ;;  %v5502_v43 = vpack.c.bf16 %v5422_v9, %v5421_v31  ;;  %v12602_v41 = vld [vmem:[%s17521_s6] ss:$8 sps:$4 sm:$0xff]  }
 0x6da   : > { %v5348_v57 = vadd.f32 %v15704_v25, %v5316_v34  ;;  %v5317_v1 = vadd.f32 %v5265_v50, %v15674_v36  ;;  %v11800_v45 = vpop.f32.mrb[255].mxu0  ;;  %v12608_v50 = vld [vmem:[%s17521_s6 + $0x20] ss:$8 sps:$4 sm:$0xff]  }
 0x6db   : > { %5907 = vmatpush1.bf16.msra.mxu1 %v5502_v43  ;;  %v12613_v43 = vld [vmem:[%s17521_s6 + $0x34] ss:$8 sps:$4 sm:$0xff]   ;;  %v12614_v45 = vld [vmem:[%s17521_s6 + $0x40] ss:$8 sps:$4 sm:$0xff]  }
 0x6dc   : > { %v5398_v23 = vmul.f32 0.2, %v5348_v57  ;;  %v5349_v39 = vadd.f32 %v15704_v25, %v5317_v1  ;;  %5908 = vmatprep.subr.bf16.mxu1 %v17676_v21  ;;  %vm5373_vm5 = vcmp.ge.f32.partialorder %v5348_v57, 0.0  ;;  %v12616_v1 = vld [vmem:[%s17521_s6 + $0x44] ss:$8 sps:$4 sm:$0xff]  }
 0x6de   : > { %vm5374_vm6 = vcmp.ge.f32.partialorder %v5349_v39, 0.0  ;;  %v5399_v47 = vmul.f32 0.2, %v5349_v39  ;;  %v5423_v48 = vsel %vm5373_vm5, %v5348_v57, %v5398_v23  ;;  %v12611_v57 = vld [vmem:[%s17521_s6 + $0x30] ss:$8 sps:$4 sm:$0xff]  }
 0x6df   : > { %v5270_v13 = vpop.f32.mrb[0].mxu0  ;;  %v12619_v23 = vld [vmem:[%s17521_s6 + $0x54] ss:$8 sps:$4 sm:$0xff]  }
 0x6e0   : > { %v5424_v2 = vsel %vm5374_vm6, %v5349_v39, %v5399_v47  ;;  %v5318_v49 = vadd.f32 %v5270_v13, %v15677_v33  ;;  %v11803_v60 = vpop.f32.mrb[1].mxu0  ;;  %v12617_v39 = vld [vmem:[%s17521_s6 + $0x50] ss:$8 sps:$4 sm:$0xff]   ;;  %v12622_v47 = vld [vmem:[%s17521_s6 + $0x64] ss:$8 sps:$4 sm:$0xff]  }
 0x6e1   : > { %v5273_v3 = vpop.f32.mrb[2].mxu0  ;;  %v5503_v15 = vpack.c.bf16 %v5424_v2, %v5423_v48  ;;  %v12620_v13 = vld [vmem:[%s17521_s6 + $0x60] ss:$8 sps:$4 sm:$0xff]   ;;  %v12625_v48 = vld [vmem:[%s17521_s6 + $0x74] ss:$8 sps:$4 sm:$0xff]  }
 0x6e2   : > { %v5350_v36 = vadd.f32 %v15704_v25, %v5318_v49  ;;  %v5319_v16 = vadd.f32 %v5273_v3, %v15680_v6  ;;  %v11804_v18 = vpop.f32.mrb[3].mxu0  ;;  %v12623_v2 = vld [vmem:[%s17521_s6 + $0x70] ss:$8 sps:$4 sm:$0xff]   ;;  %v12628_v49 = vld [vmem:[%s17521_s6 + $0x84] ss:$8 sps:$4 sm:$0xff]  }
 0x6e3   : > { %5909 = vmatpush1.bf16.msra.mxu1 %v5503_v15  ;;  %v12626_v60 = vld [vmem:[%s17521_s6 + $0x80] ss:$8 sps:$4 sm:$0xff]   ;;  %v12631_v3 = vld [vmem:[%s17521_s6 + $0x94] ss:$8 sps:$4 sm:$0xff]   ;;  %v12629_v15 = vld [vmem:[%s17521_s6 + $0x90] ss:$8 sps:$4 sm:$0xff]  }
 0x6e4   : > { %v5400_v17 = vmul.f32 0.2, %v5350_v36  ;;  %v5351_v42 = vadd.f32 %v15704_v25, %v5319_v16  ;;  %5910 = vmatprep.subr.bf16.mxu1 %v17676_v21  ;;  %vm5375_vm7 = vcmp.ge.f32.partialorder %v5350_v36, 0.0  ;;  %v12632_v16 = vld [vmem:[%s17521_s6 + $0xa0] ss:$8 sps:$4 sm:$0xff]  }
 0x6e5   : > { %v12637_v18 = vld [vmem:[%s17521_s6 + $0xb4] ss:$8 sps:$4 sm:$0xff]  }
 0x6e6   : > { %vm5376_vm8 = vcmp.ge.f32.partialorder %v5351_v42, 0.0  ;;  %v5401_v32 = vmul.f32 0.2, %v5351_v42  ;;  %v5425_v59 = vsel %vm5375_vm7, %v5350_v36, %v5400_v17  ;;  %v12634_v36 = vld [vmem:[%s17521_s6 + $0xa4] ss:$8 sps:$4 sm:$0xff]  }
 0x6e7   : > { %v5278_v54 = vpop.f32.mrb[4].mxu0  ;;  %v12635_v17 = vld [vmem:[%s17521_s6 + $0xb0] ss:$8 sps:$4 sm:$0xff]  }
 0x6e8   : > { %v5426_v33 = vsel %vm5376_vm8, %v5351_v42, %v5401_v32  ;;  %v5320_v38 = vadd.f32 %v5278_v54, %v15683_v7  ;;  %v11807_v56 = vpop.f32.mrb[5].mxu0  ;;  %v12640_v42 = vld [vmem:[%s17521_s6 + $0xc4] ss:$8 sps:$4 sm:$0xff]   ;;  %v12638_v32 = vld [vmem:[%s17521_s6 + $0xc0] ss:$8 sps:$4 sm:$0xff]  }
 0x6e9   : > { %v5281_v53 = vpop.f32.mrb[6].mxu0  ;;  %v5504_v28 = vpack.c.bf16 %v5426_v33, %v5425_v59  ;;  %v12643_v54 = vld [vmem:[%s17521_s6 + $0xd4] ss:$8 sps:$4 sm:$0xff]   ;;  %v12641_v59 = vld [vmem:[%s17521_s6 + $0xd0] ss:$8 sps:$4 sm:$0xff]  }
 0x6ea   : > { %v5352_v6 = vadd.f32 %v15704_v25, %v5320_v38  ;;  %v5321_v8 = vadd.f32 %v5281_v53, %v15686_v55  ;;  %v11808_v27 = vpop.f32.mrb[7].mxu0  ;;  %v12646_v33 = vld [vmem:[%s17521_s6 + $0xe4] ss:$8 sps:$4 sm:$0xff]   ;;  %v12644_v38 = vld [vmem:[%s17521_s6 + $0xe0] ss:$8 sps:$4 sm:$0xff]  }
 0x6eb   : > { %5911 = vmatpush1.bf16.msra.mxu1 %v5504_v28  ;;  %v12649_v56 = vld [vmem:[%s17521_s6 + $0xf4] ss:$8 sps:$4 sm:$0xff]   ;;  %v12647_v53 = vld [vmem:[%s17521_s6 + $0xf0] ss:$8 sps:$4 sm:$0xff]   ;;  %v12650_v27 = vld [vmem:[%s17521_s6 + $0x100] ss:$8 sps:$4 sm:$0xff]  }
 0x6ec   : > { %v5402_v24 = vmul.f32 0.2, %v5352_v6  ;;  %v5353_v14 = vadd.f32 %v15704_v25, %v5321_v8  ;;  %5912 = vmatprep.subr.bf16.mxu1 %v17676_v21  ;;  %vm5377_vm9 = vcmp.ge.f32.partialorder %v5352_v6, 0.0  ;;  %v12697_v28 = vld [vmem:[%s17522_s7 + $0x10] sm:$0xff]   ;;  %v12698_v8 = vld [vmem:[%s17522_s7 + $0x18] sm:$0xff]  }
 0x6ed   : > { %11817 = vmatprep.subr.bf16.mxu0 %v12697_v28 }
 0x6ee   : > { %vm5378_vm10 = vcmp.ge.f32.partialorder %v5353_v14, 0.0  ;;  %v5403_v12 = vmul.f32 0.2, %v5353_v14  ;;  %v5427_v51 = vsel %vm5377_vm9, %v5352_v6, %v5402_v24  ;;  %v12652_v6 = vld [vmem:[%s17521_s6 + $0x104] ss:$8 sps:$4 sm:$0xff]   ;;  %11818 = vmatpush3.bf16.msra.mxu0 %v12697_v28 }
 0x6ef   : > { %v5286_v5 = vpop.f32.mrb[8].mxu0  ;;  %11819 = vmatprep.subr.bf16.mxu0 %v12698_v8  ;;  %v12655_v24 = vld [vmem:[%s17521_s6 + $0x114] ss:$8 sps:$4 sm:$0xff]  }
 0x6f0   : > { %v5428_v7 = vsel %vm5378_vm10, %v5353_v14, %v5403_v12  ;;  %v5322_v4 = vadd.f32 %v5286_v5, %v15693_v10  ;;  %v11811_v37 = vpop.f32.mrb[9].mxu0  ;;  %v12653_v14 = vld [vmem:[%s17521_s6 + $0x110] ss:$8 sps:$4 sm:$0xff]   ;;  %v12658_v12 = vld [vmem:[%s17521_s6 + $0x124] ss:$8 sps:$4 sm:$0xff]  }
 0x6f1   : > { %v5289_v61 = vpop.f32.mrb[10].mxu0  ;;  %v5505_v58 = vpack.c.bf16 %v5428_v7, %v5427_v51  ;;  %v15903_v5 = vld [vmem:[%s17522_s7] sm:$0xff]   ;;  %v12661_v7 = vld [vmem:[%s17521_s6 + $0x134] ss:$8 sps:$4 sm:$0xff]  }
 0x6f2   : > { %v5354_v55 = vadd.f32 %v15704_v25, %v5322_v4  ;;  %v5323_v35 = vadd.f32 %v5289_v61, %v15696_v29  ;;  %v11812_v30 = vpop.f32.mrb[11].mxu0  ;;  %11820 = vmatpush3.bf16.msra.mxu0 %v12698_v8  ;;  %v12656_v51 = vld [vmem:[%s17521_s6 + $0x120] ss:$8 sps:$4 sm:$0xff]   ;;  %v12659_v4 = vld [vmem:[%s17521_s6 + $0x130] ss:$8 sps:$4 sm:$0xff]  }
 0x6f3   : > { %5913 = vmatpush1.bf16.msra.mxu1 %v5505_v58  ;;  %11829 = vmatprep.subr.bf16.mxu0 %v15903_v5  ;;  %v12664_v37 = vld [vmem:[%s17521_s6 + $0x144] ss:$8 sps:$4 sm:$0xff]   ;;  %v12662_v61 = vld [vmem:[%s17521_s6 + $0x140] ss:$8 sps:$4 sm:$0xff]   ;;  %v12667_v58 = vld [vmem:[%s17521_s6 + $0x154] ss:$8 sps:$4 sm:$0xff]  }
 0x6f4   : > { %v5404_v40 = vmul.f32 0.2, %v5354_v55  ;;  %v5355_v46 = vadd.f32 %v15704_v25, %v5323_v35  ;;  %5914 = vmatprep.subr.bf16.mxu1 %v17676_v21  ;;  %vm5379_vm11 = vcmp.ge.f32.partialorder %v5354_v55, 0.0  ;;  %v12670_v35 = vld [vmem:[%s17521_s6 + $0x164] ss:$8 sps:$4 sm:$0xff]  }
 0x6f5   : > { %v12668_v30 = vld [vmem:[%s17521_s6 + $0x160] ss:$8 sps:$4 sm:$0xff]  }
 0x6f6   : > { %vm5380_vm12 = vcmp.ge.f32.partialorder %v5355_v46, 0.0  ;;  %v5405_v0 = vmul.f32 0.2, %v5355_v46  ;;  %v5429_v44 = vsel %vm5379_vm11, %v5354_v55, %v5404_v40  ;;  %v12665_v55 = vld [vmem:[%s17521_s6 + $0x150] ss:$8 sps:$4 sm:$0xff]   ;;  %v12701_v8 = vld [vmem:[%s17522_s7 + $0x20] sm:$0xff]  }
 0x6f7   : > { %v5294_v63 = vpop.f32.mrb[12].mxu0  ;;  %v12673_v40 = vld [vmem:[%s17521_s6 + $0x174] ss:$8 sps:$4 sm:$0xff]  }
 0x6f8   : > { %v5430_v10 = vsel %vm5380_vm12, %v5355_v46, %v5405_v0  ;;  %v5324_v11 = vadd.f32 %v5294_v63, %v15699_v62  ;;  %v11815_v22 = vpop.f32.mrb[13].mxu0  ;;  %v12607_v62 = vld [vmem:[%s17521_s6 + $0x14] ss:$8 sps:$4 sm:$0xff]   ;;  %v12671_v46 = vld [vmem:[%s17521_s6 + $0x170] ss:$8 sps:$4 sm:$0xff]  }
 0x6f9   : > { %v5506_v20 = vpack.c.bf16 %v5430_v10, %v5429_v44  ;;  %v5297_v19 = vpop.f32.mrb[14].mxu0  ;;  %v12676_v0 = vld [vmem:[%s17521_s6 + $0x184] ss:$8 sps:$4 sm:$0xff]   ;;  %v12674_v63 = vld [vmem:[%s17521_s6 + $0x180] ss:$8 sps:$4 sm:$0xff]  }
 0x6fa   : > { %v5356_v29 = vadd.f32 %v15704_v25, %v5324_v11  ;;  %v11816_v26 = vpop.f32.mrb[15].mxu0  ;;  %v12605_v25 = vld [vmem:[%s17521_s6 + $0x10] ss:$8 sps:$4 sm:$0xff]   ;;  %v12679_v44 = vld [vmem:[%s17521_s6 + $0x194] ss:$8 sps:$4 sm:$0xff]  }
 0x6fb   : > { %5915 = vmatpush1.bf16.msra.mxu1 %v5506_v20  ;;  %v12677_v10 = vld [vmem:[%s17521_s6 + $0x190] ss:$8 sps:$4 sm:$0xff]   ;;  %v12682_v11 = vld [vmem:[%s17521_s6 + $0x1a4] ss:$8 sps:$4 sm:$0xff]   ;;  %v12680_v22 = vld [vmem:[%s17521_s6 + $0x1a0] ss:$8 sps:$4 sm:$0xff]  }
 0x6fc   : > { %vm5381_vm13 = vcmp.ge.f32.partialorder %v5356_v29, 0.0  ;;  %v5406_v52 = vmul.f32 0.2, %v5356_v29  ;;  %5916 = vmatprep.subr.bf16.mxu1 %v17676_v21  ;;  %v12610_v21 = vld [vmem:[%s17521_s6 + $0x24] ss:$8 sps:$4 sm:$0xff]  }
 0x6fd   : > { %v12685_v20 = vld [vmem:[%s17521_s6 + $0x1b4] ss:$8 sps:$4 sm:$0xff]  }
 0x6fe   : > { %v5431_v31 = vsel %vm5381_vm13, %v5356_v29, %v5406_v52  ;;  %v12683_v29 = vld [vmem:[%s17521_s6 + $0x1b0] ss:$8 sps:$4 sm:$0xff]   ;;  %v12688_v52 = vld [vmem:[%s17521_s6 + $0x1c4] ss:$8 sps:$4 sm:$0xff]  }
 0x6ff   : > { %v5507_v9 = vpack.c.bf16 %v5431_v31, %v5431_v31 }
 0x701   : > { %v5890_v34 = vsel %vm2373_vm15, %v5507_v9, 0 }
 0x702   : > { %5917 = vmatpush1.bf16.msra.mxu1 %v5890_v34 }
 0x705   : > { %5925 = vmatmul.mubr.bf16.vlgmr.msra.gmra.mrb[188].mxu1 %v12602_v41 }
 0x706   : > { %10719 = vmatprep.mubr.msk.bf16.mxu1 %vm2033_vm3, %v12607_v62  ;;  %v12686_v62 = vld [vmem:[%s17521_s6 + $0x1c0] ss:$8 sps:$4 sm:$0xff]  }
 0x70d   : > { %5933 = vmatmul.mubr.bf16.gmra.mrb[192].mxu1 %v12605_v25 }
 0x70e   : > { %10720 = vmatprep.mubr.msk.bf16.mxu1 %vm2033_vm3, %v12610_v21  ;;  %v12691_v21 = vld [vmem:[%s17521_s6 + $0x1d4] ss:$8 sps:$4 sm:$0xff]  }
 0x715   : > { %5941 = vmatmul.mubr.bf16.gmra.mrb[196].mxu1 %v12608_v50 }
 0x716   : > { %10721 = vmatprep.mubr.msk.bf16.mxu1 %vm2033_vm3, %v12613_v43 }
 0x71d   : > { %5949 = vmatmul.mubr.bf16.gmra.mrb[200].mxu1 %v12611_v57 }
 0x71e   : > { %10722 = vmatprep.mubr.msk.bf16.mxu1 %vm2033_vm3, %v12616_v1 }
 0x725   : > { %5957 = vmatmul.mubr.bf16.gmra.mrb[204].mxu1 %v12614_v45  ;;  %v12689_v45 = vld [vmem:[%s17521_s6 + $0x1d0] ss:$8 sps:$4 sm:$0xff]  }
 0x726   : > { %10723 = vmatprep.mubr.msk.bf16.mxu1 %vm2033_vm3, %v12619_v23 }
 0x72d   : > { %5965 = vmatmul.mubr.bf16.gmra.mrb[208].mxu1 %v12617_v39  ;;  %v12694_v39 = vld [vmem:[%s17521_s6 + $0x1e4] ss:$8 sps:$4 sm:$0xff]  }
 0x72e   : > { %10724 = vmatprep.mubr.msk.bf16.mxu1 %vm2033_vm3, %v12622_v47 }
 0x735   : > { %5973 = vmatmul.mubr.bf16.gmra.mrb[212].mxu1 %v12620_v13 }
 0x736   : > { %10725 = vmatprep.mubr.msk.bf16.mxu1 %vm2033_vm3, %v12625_v48 }
 0x73d   : > { %5981 = vmatmul.mubr.bf16.gmra.mrb[216].mxu1 %v12623_v2  ;;  %v5494_v2 = vld [vmem:[%s17521_s6 + $0x1f0] sm:$0xff] }
 0x73e   : > { %10726 = vmatprep.mubr.msk.bf16.mxu1 %vm2033_vm3, %v12628_v49 }
 0x745   : > { %5989 = vmatmul.mubr.bf16.gmra.mrb[220].mxu1 %v12626_v60  ;;  %v12692_v60 = vld [vmem:[%s17521_s6 + $0x1e0] ss:$8 sps:$4 sm:$0xff]  }
 0x746   : > { %10727 = vmatprep.mubr.msk.bf16.mxu1 %vm2033_vm3, %v12631_v3 }
 0x74d   : > { %5997 = vmatmul.mubr.bf16.gmra.mrb[224].mxu1 %v12629_v15  ;;  %v10717_v15 = vcombine.high %v5494_v2, %v5494_v2 }
 0x74e   : > { %10728 = vmatprep.mubr.msk.bf16.mxu1 %vm2033_vm3, %v12634_v36 }
 0x755   : > { %6005 = vmatmul.mubr.bf16.gmra.mrb[228].mxu1 %v12632_v16 }
 0x756   : > { %10729 = vmatprep.mubr.msk.bf16.mxu1 %vm2033_vm3, %v12637_v18 }
 0x75d   : > { %6013 = vmatmul.mubr.bf16.gmra.mrb[232].mxu1 %v12635_v17  ;;  %v10716_v17 = vcombine.low %v5494_v2, %v5494_v2 }
 0x75e   : > { %10730 = vmatprep.mubr.msk.bf16.mxu1 %vm2033_vm3, %v12640_v42 }
 0x765   : > { %6021 = vmatmul.mubr.bf16.gmra.mrb[236].mxu1 %v12638_v32 }
 0x766   : > { %10731 = vmatprep.mubr.msk.bf16.mxu1 %vm2033_vm3, %v12643_v54 }
 0x76d   : > { %6029 = vmatmul.mubr.bf16.gmra.mrb[240].mxu1 %v12641_v59 }
 0x76e   : > { %10732 = vmatprep.mubr.msk.bf16.mxu1 %vm2033_vm3, %v12646_v33 }
 0x775   : > { %6037 = vmatmul.mubr.bf16.gmra.mrb[244].mxu1 %v12644_v38 }
 0x776   : > { %10733 = vmatprep.mubr.msk.bf16.mxu1 %vm2033_vm3, %v12649_v56 }
 0x77d   : > { %6045 = vmatmul.mubr.bf16.gmra.mrb[248].mxu1 %v12647_v53  ;;  %v12700_v53 = vld [vmem:[%s17522_s7 + $0x8] sm:$0xff]  }
 0x77e   : > { %10734 = vmatprep.mubr.msk.bf16.mxu1 %vm2033_vm3, %v12652_v6 }
 0x785   : > { %6053 = vmatmul.mubr.bf16.gmra.mrb[252].mxu1 %v12650_v27 }
 0x786   : > { %10735 = vmatprep.mubr.msk.bf16.mxu1 %vm2033_vm3, %v12655_v24 }
 0x78d   : > { %6061 = vmatmul.mubr.bf16.gmra.mrb[0].mxu1 %v12653_v14 }
 0x78e   : > { %10736 = vmatprep.mubr.msk.bf16.mxu1 %vm2033_vm3, %v12658_v12 }
 0x795   : > { %6069 = vmatmul.mubr.bf16.gmra.mrb[4].mxu1 %v12656_v51 }
 0x796   : > { %10737 = vmatprep.mubr.msk.bf16.mxu1 %vm2033_vm3, %v12661_v7 }
 0x79d   : > { %6077 = vmatmul.mubr.bf16.gmra.mrb[8].mxu1 %v12659_v4 }
 0x79e   : > { %10738 = vmatprep.mubr.msk.bf16.mxu1 %vm2033_vm3, %v12664_v37 }
 0x7a5   : > { %6085 = vmatmul.mubr.bf16.gmra.mrb[12].mxu1 %v12662_v61 }
 0x7a6   : > { %10739 = vmatprep.mubr.msk.bf16.mxu1 %vm2033_vm3, %v12667_v58 }
 0x7ad   : > { %6093 = vmatmul.mubr.bf16.gmra.mrb[16].mxu1 %v12665_v55  ;;  %v12702_v55 = vld [vmem:[%s17522_s7 + $0x28] sm:$0xff]  }
 0x7ae   : > { %10740 = vmatprep.mubr.msk.bf16.mxu1 %vm2033_vm3, %v12670_v35  ;;  %v12703_v35 = vld [vmem:[%s17522_s7 + $0x30] sm:$0xff]  }
 0x7b5   : > { %6101 = vmatmul.mubr.bf16.gmra.mrb[20].mxu1 %v12668_v30 }
 0x7b6   : > { %10741 = vmatprep.mubr.msk.bf16.mxu1 %vm2033_vm3, %v12673_v40 }
 0x7bd   : > { %6109 = vmatmul.mubr.bf16.gmra.mrb[24].mxu1 %v12671_v46 }
 0x7be   : > { %10742 = vmatprep.mubr.msk.bf16.mxu1 %vm2033_vm3, %v12676_v0 }
 0x7c5   : > { %6117 = vmatmul.mubr.bf16.gmra.mrb[28].mxu1 %v12674_v63 }
 0x7c6   : > { %10743 = vmatprep.mubr.msk.bf16.mxu1 %vm2033_vm3, %v12679_v44 }
 0x7cd   : > { %6125 = vmatmul.mubr.bf16.gmra.mrb[32].mxu1 %v12677_v10 }
 0x7ce   : > { %10744 = vmatprep.mubr.msk.bf16.mxu1 %vm2033_vm3, %v12682_v11 }
 0x7d5   : > { %6133 = vmatmul.mubr.bf16.gmra.mrb[36].mxu1 %v12680_v22 }
 0x7d6   : > { %10745 = vmatprep.mubr.msk.bf16.mxu1 %vm2033_vm3, %v12685_v20 }
 0x7d8   : > { %v15970_v19 = vpop.f32.mrb[188].mxu1 }
 0x7d9   : > { %v5928_v26 = vpop.f32.mrb[189].mxu1 }
 0x7da   : > { %v5929_v31 = vpop.f32.mrb[190].mxu1  ;;  %v12705_v26 = vld [vmem:[%s17522_s7 + $0x40] sm:$0xff]  }
 0x7db   : > { %v6180_v9 = vpack.c.bf16 %v5929_v31, %v15970_v19  ;;  %v5931_v34 = vpop.f32.mrb[191].mxu1 }
 0x7dd   : > { %6141 = vmatmul.mubr.bf16.gmra.mrb[40].mxu1 %v12683_v29  ;;  %v12704_v29 = vld [vmem:[%s17522_s7 + $0x38] sm:$0xff]  }
 0x7de   : > { %10746 = vmatprep.mubr.msk.bf16.mxu1 %vm2033_vm3, %v12688_v52 }
 0x7e0   : > { %v15980_v41 = vpop.f32.mrb[192].mxu1 }
 0x7e1   : > { %v5936_v25 = vpop.f32.mrb[193].mxu1 }
 0x7e2   : > { %v5937_v50 = vpop.f32.mrb[194].mxu1 }
 0x7e3   : > { %v6181_v43 = vpack.c.bf16 %v5937_v50, %v15980_v41  ;;  %v5939_v57 = vpop.f32.mrb[195].mxu1 }
 0x7e5   : > { %6149 = vmatmul.mubr.bf16.gmra.mrb[44].mxu1 %v12686_v62 }
 0x7e6   : > { %10747 = vmatprep.mubr.msk.bf16.mxu1 %vm2033_vm3, %v12691_v21 }
 0x7e8   : > { %v5942_v1 = vpop.f32.mrb[196].mxu1 }
 0x7e9   : > { %v5944_v23 = vpop.f32.mrb[197].mxu1 }
 0x7ea   : > { %v5945_v47 = vpop.f32.mrb[198].mxu1  ;;  %v12706_v23 = vld [vmem:[%s17522_s7 + $0x48] sm:$0xff]  }
 0x7eb   : > { %v6182_v13 = vpack.c.bf16 %v5945_v47, %v5942_v1  ;;  %v5947_v48 = vpop.f32.mrb[199].mxu1 }
 0x7ed   : > { %6157 = vmatmul.mubr.bf16.gmra.mrb[48].mxu1 %v12689_v45 }
 0x7ee   : > { %10748 = vmatprep.mubr.msk.bf16.mxu1 %vm2033_vm3, %v12694_v39 }
 0x7f0   : > { %v5950_v49 = vpop.f32.mrb[200].mxu1 }
 0x7f1   : > { %v5952_v3 = vpop.f32.mrb[201].mxu1  ;;  %v6183_v0 = vpack.c.bf16 %v5950_v49, %v5950_v49 }
 0x7f2   : > { %v5953_v36 = vpop.f32.mrb[202].mxu1 }
 0x7f3   : > { %v5955_v16 = vpop.f32.mrb[203].mxu1 }
 0x7f5   : > { %6165 = vmatmul.mubr.bf16.gmra.mrb[52].mxu1 %v12692_v60 }
 0x7f6   : > { %10749 = vmatprep.mubr.msk.bf16.mxu1 %vm2033_vm3, %v10717_v15  ;;  %vm7353_vm3 = vcmask 457728  }
 0x7f8   : > { %v5958_v18 = vpop.f32.mrb[204].mxu1 }
 0x7f9   : > { %v6188_v42 = vpack.c.bf16 %v5958_v18, %v5953_v36  ;;  %v5960_v32 = vpop.f32.mrb[205].mxu1 }
 0x7fa   : > { %v5961_v54 = vpop.f32.mrb[206].mxu1 }
 0x7fb   : > { %v5963_v59 = vpop.f32.mrb[207].mxu1  ;;  %11821 = vmatprep.mubr.msk.bf16.mxu0 %vm3359_vm0, %v6188_v42 }
 0x7fd   : > { %6173 = vmatmul.mubr.bf16.gmra.mrb[56].mxu1 %v10716_v17 }
 0x800   : > { %v5966_v33 = vpop.f32.mrb[208].mxu1 }
 0x801   : > { %v6189_v38 = vpack.c.bf16 %v5966_v33, %v5961_v54  ;;  %v5968_v56 = vpop.f32.mrb[209].mxu1 }
 0x802   : > { %v5969_v28 = vpop.f32.mrb[210].mxu1  ;;  %v12708_v56 = vld [vmem:[%s17522_s7 + $0x58] sm:$0xff]  }
 0x803   : > { %11822 = vmatmul.mubr.msk.bf16.vlgmr.msra.gmra.mrb[16].mxu0 %vm3359_vm0, %v6189_v38  ;;  %v5971_v6 = vpop.f32.mrb[211].mxu1 }
 0x804   : > { %11830 = vmatpush3.bf16.msra.mxu0 %v15903_v5 }
 0x805   : > { %11831 = vmatprep.subr.bf16.mxu0 %v12700_v53 }
 0x808   : > { %v5974_v27 = vpop.f32.mrb[212].mxu1  ;;  %11832 = vmatpush3.bf16.msra.mxu0 %v12700_v53  ;;  %v12709_v53 = vld [vmem:[%s17522_s7 + $0x60] sm:$0xff]  }
 0x809   : > { %v6190_v24 = vpack.c.bf16 %v5974_v27, %v5969_v28  ;;  %v5976_v14 = vpop.f32.mrb[213].mxu1  ;;  %11841 = vmatprep.subr.bf16.mxu0 %v12701_v8 }
 0x80a   : > { %v5977_v12 = vpop.f32.mrb[214].mxu1 }
 0x80b   : > { %v6191_v51 = vpack.c.bf16 %v5977_v12, %v5977_v12  ;;  %11825 = vmatprep.mubr.msk.bf16.mxu0 %vm3359_vm0, %v6190_v24  ;;  %v5979_v7 = vpop.f32.mrb[215].mxu1 }
 0x80d   : > { %11826 = vmatmul.mubr.msk.bf16.gmra.mrb[20].mxu0 %vm3359_vm0, %v6191_v51 }
 0x80e   : > { %11833 = vmatprep.mubr.msk.bf16.mxu0 %vm3359_vm0, %v6180_v9 }
 0x810   : > { %v5982_v5 = vpop.f32.mrb[216].mxu1 }
 0x811   : > { %v5984_v4 = vpop.f32.mrb[217].mxu1 }
 0x812   : > { %v5985_v37 = vpop.f32.mrb[218].mxu1 }
 0x813   : > { %v6372_v61 = vpack.c.bf16 %v5985_v37, %v5982_v5  ;;  %v5987_v58 = vpop.f32.mrb[219].mxu1 }
 0x815   : > { %11834 = vmatmul.mubr.msk.bf16.vlgmr.msra.gmra.mrb[16].mxu0 %vm3359_vm0, %v6181_v43 }
 0x816   : > { %11837 = vmatprep.mubr.msk.bf16.mxu0 %vm3359_vm0, %v6182_v13  ;;  %11842 = vmatpush3.bf16.msra.mxu0 %v12701_v8  ;;  %v12707_v13 = vld [vmem:[%s17522_s7 + $0x50] sm:$0xff]  }
 0x817   : > { %11843 = vmatprep.subr.bf16.mxu0 %v12702_v55 }
 0x818   : > { %v5990_v30 = vpop.f32.mrb[220].mxu1 }
 0x819   : > { %v5992_v40 = vpop.f32.mrb[221].mxu1 }
 0x81a   : > { %v5993_v46 = vpop.f32.mrb[222].mxu1  ;;  %11844 = vmatpush3.bf16.msra.mxu0 %v12702_v55 }
 0x81b   : > { %v6373_v63 = vpack.c.bf16 %v5993_v46, %v5990_v30  ;;  %v5995_v44 = vpop.f32.mrb[223].mxu1  ;;  %11853 = vmatprep.subr.bf16.mxu0 %v12703_v35  ;;  %v12710_v46 = vld [vmem:[%s17522_s7 + $0x68] sm:$0xff]  }
 0x81c   : > { %v12711_v44 = vld [vmem:[%s17522_s7 + $0x70] sm:$0xff]  }
 0x81d   : > { %11838 = vmatmul.mubr.msk.bf16.gmra.mrb[24].mxu0 %vm3359_vm0, %v6183_v0 }
 0x81e   : > { %11845 = vmatprep.mubr.msk.bf16.mxu0 %vm3359_vm0, %v6372_v61 }
 0x820   : > { %v5998_v10 = vpop.f32.mrb[224].mxu1 }
 0x821   : > { %v6000_v11 = vpop.f32.mrb[225].mxu1 }
 0x822   : > { %v6001_v22 = vpop.f32.mrb[226].mxu1 }
 0x823   : > { %v6374_v20 = vpack.c.bf16 %v6001_v22, %v5998_v10  ;;  %v6003_v19 = vpop.f32.mrb[227].mxu1 }
 0x825   : > { %11846 = vmatmul.mubr.msk.bf16.vlgmr.msra.gmra.mrb[16].mxu0 %vm3359_vm0, %v6373_v63 }
 0x826   : > { %11849 = vmatprep.mubr.msk.bf16.mxu0 %vm3359_vm0, %v6374_v20  ;;  %11854 = vmatpush3.bf16.msra.mxu0 %v12703_v35 }
 0x827   : > { %11855 = vmatprep.subr.bf16.mxu0 %v12704_v29 }
 0x828   : > { %v6006_v52 = vpop.f32.mrb[228].mxu1 }
 0x829   : > { %v6008_v31 = vpop.f32.mrb[229].mxu1  ;;  %v6375_v34 = vpack.c.bf16 %v6006_v52, %v6006_v52 }
 0x82a   : > { %v6009_v9 = vpop.f32.mrb[230].mxu1  ;;  %11856 = vmatpush3.bf16.msra.mxu0 %v12704_v29 }
 0x82b   : > { %v6011_v41 = vpop.f32.mrb[231].mxu1  ;;  %11865 = vmatprep.subr.bf16.mxu0 %v12705_v26 }
 0x82d   : > { %11850 = vmatmul.mubr.msk.bf16.gmra.mrb[28].mxu0 %vm3359_vm0, %v6375_v34 }
 0x830   : > { %v6014_v62 = vpop.f32.mrb[232].mxu1 }
 0x831   : > { %v6475_v25 = vpack.c.bf16 %v6014_v62, %v6009_v9  ;;  %v6016_v21 = vpop.f32.mrb[233].mxu1 }
 0x832   : > { %v6017_v50 = vpop.f32.mrb[234].mxu1 }
 0x833   : > { %v6019_v43 = vpop.f32.mrb[235].mxu1  ;;  %11857 = vmatprep.mubr.msk.bf16.mxu0 %vm3359_vm0, %v6475_v25 }
 0x834   : > { %v12712_v43 = vld [vmem:[%s17522_s7 + $0x78] sm:$0xff]  }
 0x838   : > { %v6022_v57 = vpop.f32.mrb[236].mxu1 }
 0x839   : > { %v6476_v1 = vpack.c.bf16 %v6022_v57, %v6017_v50  ;;  %v6024_v45 = vpop.f32.mrb[237].mxu1  ;;  %v12713_v57 = vld [vmem:[%s17522_s7 + $0x80] sm:$0xff]  }
 0x83a   : > { %v6025_v39 = vpop.f32.mrb[238].mxu1 }
 0x83b   : > { %11858 = vmatmul.mubr.msk.bf16.vlgmr.msra.gmra.mrb[16].mxu0 %vm3359_vm0, %v6476_v1  ;;  %v6027_v47 = vpop.f32.mrb[239].mxu1 }
 0x83c   : > { %11866 = vmatpush3.bf16.msra.mxu0 %v12705_v26 }
 0x83d   : > { %11867 = vmatprep.subr.bf16.mxu0 %v12706_v23 }
 0x840   : > { %v6030_v48 = vpop.f32.mrb[240].mxu1  ;;  %11868 = vmatpush3.bf16.msra.mxu0 %v12706_v23 }
 0x841   : > { %v6477_v2 = vpack.c.bf16 %v6030_v48, %v6025_v39  ;;  %v6032_v49 = vpop.f32.mrb[241].mxu1  ;;  %11877 = vmatprep.subr.bf16.mxu0 %v12707_v13 }
 0x842   : > { %v6033_v60 = vpop.f32.mrb[242].mxu1 }
 0x843   : > { %v6478_v3 = vpack.c.bf16 %v6033_v60, %v6033_v60  ;;  %v6035_v15 = vpop.f32.mrb[243].mxu1  ;;  %11861 = vmatprep.mubr.msk.bf16.mxu0 %vm3359_vm0, %v6477_v2 }
 0x845   : > { %11862 = vmatmul.mubr.msk.bf16.gmra.mrb[32].mxu0 %vm3359_vm0, %v6478_v3 }
 0x848   : > { %v6038_v36 = vpop.f32.mrb[244].mxu1 }
 0x849   : > { %v6040_v16 = vpop.f32.mrb[245].mxu1 }
 0x84a   : > { %v6041_v18 = vpop.f32.mrb[246].mxu1 }
 0x84b   : > { %v6578_v17 = vpack.c.bf16 %v6041_v18, %v6038_v36  ;;  %v6043_v42 = vpop.f32.mrb[247].mxu1 }
 0x84d   : > { %11869 = vmatprep.mubr.msk.bf16.mxu0 %vm3359_vm0, %v6578_v17 }
 0x850   : > { %v6046_v32 = vpop.f32.mrb[248].mxu1 }
 0x851   : > { %v6048_v54 = vpop.f32.mrb[249].mxu1 }
 0x852   : > { %v6049_v59 = vpop.f32.mrb[250].mxu1  ;;  %v12714_v54 = vld [vmem:[%s17522_s7 + $0x88] sm:$0xff]  }
 0x853   : > { %v6579_v33 = vpack.c.bf16 %v6049_v59, %v6046_v32  ;;  %v6051_v38 = vpop.f32.mrb[251].mxu1 }
 0x855   : > { %11870 = vmatmul.mubr.msk.bf16.vlgmr.msra.gmra.mrb[16].mxu0 %vm3359_vm0, %v6579_v33 }
 0x856   : > { %11878 = vmatpush3.bf16.msra.mxu0 %v12707_v13 }
 0x857   : > { %11879 = vmatprep.subr.bf16.mxu0 %v12708_v56 }
 0x858   : > { %v6054_v28 = vpop.f32.mrb[252].mxu1 }
 0x859   : > { %v6056_v6 = vpop.f32.mrb[253].mxu1 }
 0x85a   : > { %v6057_v8 = vpop.f32.mrb[254].mxu1  ;;  %11880 = vmatpush3.bf16.msra.mxu0 %v12708_v56 }
 0x85b   : > { %v6580_v27 = vpack.c.bf16 %v6057_v8, %v6054_v28  ;;  %v6059_v24 = vpop.f32.mrb[255].mxu1  ;;  %11889 = vmatprep.subr.bf16.mxu0 %v12709_v53 }
 0x85d   : > { %11873 = vmatprep.mubr.msk.bf16.mxu0 %vm3359_vm0, %v6580_v27 }
 0x860   : > { %v6062_v14 = vpop.f32.mrb[0].mxu1 }
 0x861   : > { %v6581_v12 = vpack.c.bf16 %v6062_v14, %v6062_v14  ;;  %v6064_v51 = vpop.f32.mrb[1].mxu1 }
 0x862   : > { %v6065_v7 = vpop.f32.mrb[2].mxu1 }
 0x863   : > { %v6067_v5 = vpop.f32.mrb[3].mxu1  ;;  %11874 = vmatmul.mubr.msk.bf16.gmra.mrb[36].mxu0 %vm3359_vm0, %v6581_v12 }
 0x868   : > { %v6070_v4 = vpop.f32.mrb[4].mxu1 }
 0x869   : > { %v6681_v37 = vpack.c.bf16 %v6070_v4, %v6065_v7  ;;  %v6072_v61 = vpop.f32.mrb[5].mxu1 }
 0x86a   : > { %v6073_v58 = vpop.f32.mrb[6].mxu1 }
 0x86b   : > { %v6075_v55 = vpop.f32.mrb[7].mxu1  ;;  %11881 = vmatprep.mubr.msk.bf16.mxu0 %vm3359_vm0, %v6681_v37 }
 0x870   : > { %v6078_v35 = vpop.f32.mrb[8].mxu1 }
 0x871   : > { %v6682_v30 = vpack.c.bf16 %v6078_v35, %v6073_v58  ;;  %v6080_v40 = vpop.f32.mrb[9].mxu1 }
 0x872   : > { %v6081_v0 = vpop.f32.mrb[10].mxu1 }
 0x873   : > { %11882 = vmatmul.mubr.msk.bf16.vlgmr.msra.gmra.mrb[16].mxu0 %vm3359_vm0, %v6682_v30  ;;  %v6083_v63 = vpop.f32.mrb[11].mxu1 }
 0x874   : > { %11890 = vmatpush3.bf16.msra.mxu0 %v12709_v53 }
 0x875   : > { %11891 = vmatprep.subr.bf16.mxu0 %v12710_v46 }
 0x878   : > { %v6086_v10 = vpop.f32.mrb[12].mxu1  ;;  %11892 = vmatpush3.bf16.msra.mxu0 %v12710_v46 }
 0x879   : > { %v6683_v11 = vpack.c.bf16 %v6086_v10, %v6081_v0  ;;  %v6088_v22 = vpop.f32.mrb[13].mxu1  ;;  %11901 = vmatprep.subr.bf16.mxu0 %v12711_v44 }
 0x87a   : > { %v6089_v20 = vpop.f32.mrb[14].mxu1 }
 0x87b   : > { %v6684_v19 = vpack.c.bf16 %v6089_v20, %v6089_v20  ;;  %v6091_v29 = vpop.f32.mrb[15].mxu1  ;;  %11885 = vmatprep.mubr.msk.bf16.mxu0 %vm3359_vm0, %v6683_v11 }
 0x87d   : > { %11886 = vmatmul.mubr.msk.bf16.gmra.mrb[40].mxu0 %vm3359_vm0, %v6684_v19 }
 0x880   : > { %v6094_v26 = vpop.f32.mrb[16].mxu1 }
 0x881   : > { %v6096_v52 = vpop.f32.mrb[17].mxu1 }
 0x882   : > { %v6097_v31 = vpop.f32.mrb[18].mxu1 }
 0x883   : > { %v6784_v9 = vpack.c.bf16 %v6097_v31, %v6094_v26  ;;  %v6099_v34 = vpop.f32.mrb[19].mxu1 }
 0x885   : > { %11893 = vmatprep.mubr.msk.bf16.mxu0 %vm3359_vm0, %v6784_v9 }
 0x888   : > { %v6102_v41 = vpop.f32.mrb[20].mxu1 }
 0x889   : > { %v6104_v62 = vpop.f32.mrb[21].mxu1 }
 0x88a   : > { %v6105_v25 = vpop.f32.mrb[22].mxu1 }
 0x88b   : > { %v6785_v21 = vpack.c.bf16 %v6105_v25, %v6102_v41  ;;  %v6107_v50 = vpop.f32.mrb[23].mxu1 }
 0x88d   : > { %11894 = vmatmul.mubr.msk.bf16.vlgmr.msra.gmra.mrb[16].mxu0 %vm3359_vm0, %v6785_v21 }
 0x88e   : > { %11902 = vmatpush3.bf16.msra.mxu0 %v12711_v44 }
 0x88f   : > { %11903 = vmatprep.subr.bf16.mxu0 %v12712_v43 }
 0x890   : > { %v6110_v1 = vpop.f32.mrb[24].mxu1 }
 0x891   : > { %v6112_v45 = vpop.f32.mrb[25].mxu1 }
 0x892   : > { %v6113_v23 = vpop.f32.mrb[26].mxu1  ;;  %11904 = vmatpush3.bf16.msra.mxu0 %v12712_v43 }
 0x893   : > { %v6786_v39 = vpack.c.bf16 %v6113_v23, %v6110_v1  ;;  %v6115_v47 = vpop.f32.mrb[27].mxu1  ;;  %11913 = vmatprep.subr.bf16.mxu0 %v12713_v57 }
 0x895   : > { %11897 = vmatprep.mubr.msk.bf16.mxu0 %vm3359_vm0, %v6786_v39 }
 0x898   : > { %v6118_v13 = vpop.f32.mrb[28].mxu1 }
 0x899   : > { %v6787_v48 = vpack.c.bf16 %v6118_v13, %v6118_v13  ;;  %v6120_v2 = vpop.f32.mrb[29].mxu1 }
 0x89a   : > { %v6121_v49 = vpop.f32.mrb[30].mxu1 }
 0x89b   : > { %v6123_v60 = vpop.f32.mrb[31].mxu1  ;;  %11898 = vmatmul.mubr.msk.bf16.gmra.mrb[44].mxu0 %vm3359_vm0, %v6787_v48 }
 0x8a0   : > { %v6126_v3 = vpop.f32.mrb[32].mxu1 }
 0x8a1   : > { %v6887_v15 = vpack.c.bf16 %v6126_v3, %v6121_v49  ;;  %v6128_v36 = vpop.f32.mrb[33].mxu1 }
 0x8a2   : > { %v6129_v16 = vpop.f32.mrb[34].mxu1 }
 0x8a3   : > { %v6131_v18 = vpop.f32.mrb[35].mxu1  ;;  %11905 = vmatprep.mubr.msk.bf16.mxu0 %vm3359_vm0, %v6887_v15 }
 0x8a8   : > { %v6134_v17 = vpop.f32.mrb[36].mxu1 }
 0x8a9   : > { %v6888_v42 = vpack.c.bf16 %v6134_v17, %v6129_v16  ;;  %v6136_v32 = vpop.f32.mrb[37].mxu1  ;;  %v12715_v16 = vld [vmem:[%s17524_s9] sm:$0xff]  }
 0x8aa   : > { %v6137_v59 = vpop.f32.mrb[38].mxu1 }
 0x8ab   : > { %11906 = vmatmul.mubr.msk.bf16.vlgmr.msra.gmra.mrb[16].mxu0 %vm3359_vm0, %v6888_v42  ;;  %v6139_v33 = vpop.f32.mrb[39].mxu1 }
 0x8ac   : > { %11914 = vmatpush3.bf16.msra.mxu0 %v12713_v57 }
 0x8ad   : > { %11915 = vmatprep.subr.bf16.mxu0 %v12714_v54 }
 0x8b0   : > { %v6142_v38 = vpop.f32.mrb[40].mxu1  ;;  %11916 = vmatpush3.bf16.msra.mxu0 %v12714_v54 }
 0x8b1   : > { %v6889_v56 = vpack.c.bf16 %v6142_v38, %v6137_v59  ;;  %v6144_v53 = vpop.f32.mrb[41].mxu1 }
 0x8b2   : > { %v6145_v28 = vpop.f32.mrb[42].mxu1 }
 0x8b3   : > { %v6890_v6 = vpack.c.bf16 %v6145_v28, %v6145_v28  ;;  %v6147_v8 = vpop.f32.mrb[43].mxu1  ;;  %11909 = vmatprep.mubr.msk.bf16.mxu0 %vm3359_vm0, %v6889_v56 }
 0x8b5   : > { %11910 = vmatmul.mubr.msk.bf16.gmra.mrb[48].mxu0 %vm3359_vm0, %v6890_v6 }
 0x8b8   : > { %v6150_v27 = vpop.f32.mrb[44].mxu1 }
 0x8b9   : > { %v6152_v24 = vpop.f32.mrb[45].mxu1 }
 0x8ba   : > { %v6153_v14 = vpop.f32.mrb[46].mxu1 }
 0x8bb   : > { %v6990_v12 = vpack.c.bf16 %v6153_v14, %v6150_v27  ;;  %v6155_v51 = vpop.f32.mrb[47].mxu1 }
 0x8bd   : > { %11917 = vmatprep.mubr.msk.bf16.mxu0 %vm3359_vm0, %v6990_v12 }
 0x8c0   : > { %v6158_v7 = vpop.f32.mrb[48].mxu1 }
 0x8c1   : > { %v6160_v5 = vpop.f32.mrb[49].mxu1 }
 0x8c2   : > { %v6161_v4 = vpop.f32.mrb[50].mxu1 }
 0x8c3   : > { %v6991_v37 = vpack.c.bf16 %v6161_v4, %v6158_v7  ;;  %v6163_v61 = vpop.f32.mrb[51].mxu1 }
 0x8c5   : > { %11918 = vmatmul.mubr.msk.bf16.vlgmr.msra.gmra.mrb[16].mxu0 %vm3359_vm0, %v6991_v37 }
 0x8c8   : > { %v6166_v58 = vpop.f32.mrb[52].mxu1 }
 0x8c9   : > { %v6168_v55 = vpop.f32.mrb[53].mxu1 }
 0x8ca   : > { %v6169_v35 = vpop.f32.mrb[54].mxu1 }
 0x8cb   : > { %v6992_v30 = vpack.c.bf16 %v6169_v35, %v6166_v58  ;;  %v6171_v40 = vpop.f32.mrb[55].mxu1  ;;  %v10804_v58 = vld [vmem:[%s17523_s8] ss:$0 sm:$0xff] }
 0x8cd   : > { %11921 = vmatprep.mubr.msk.bf16.mxu0 %vm3359_vm0, %v6992_v30 }
 0x8d0   : > { %v6174_v46 = vpop.f32.mrb[56].mxu1 }
 0x8d1   : > { %v6993_v0 = vpack.c.bf16 %v6174_v46, %v6174_v46  ;;  %v6176_v63 = vpop.f32.mrb[57].mxu1 }
 0x8d2   : > { %v6177_v44 = vpop.f32.mrb[58].mxu1 }
 0x8d3   : > { %11922 = vmatmul.mubr.msk.bf16.gmra.mrb[52].mxu0 %vm3359_vm0, %v6993_v0  ;;  %v6178_v10 = vpop.f32.mrb[59].mxu1 }
 0x8d4   : > { %11933 = vmatprep.mubr.msk.bf16.mxu0 %vm7353_vm3, %v12715_v16  ;;  %v12717_v16 = vld [vmem:[%s17524_s9 + $0x10] sm:$0xff]  }
 0x8e0   : > { %v11827_v11 = vpop.f32.mrb[20].mxu0 }
 0x8e1   : > { %v6270_v22 = vpop.f32.mrb[21].mxu0 }
 0x8e2   : > { %v11828_v20 = vpop.f32.mrb[22].mxu0 }
 0x8e3   : > { %v6273_v19 = vpop.f32.mrb[23].mxu0 }
 0x8f0   : > { %v11839_v29 = vpop.f32.mrb[24].mxu0 }
 0x8f1   : > { %v6367_v26 = vadd.f32 %v11839_v29, %v11827_v11  ;;  %v6358_v52 = vpop.f32.mrb[25].mxu0 }
 0x8f2   : > { %v6359_v31 = vadd.f32 %v6358_v52, %v6270_v22  ;;  %v11840_v9 = vpop.f32.mrb[26].mxu0 }
 0x8f3   : > { %v6361_v34 = vpop.f32.mrb[27].mxu0 }
 0x8f4   : > { %v6362_v41 = vadd.f32 %v6361_v34, %v6273_v19 }
 0x900   : > { %v11851_v62 = vpop.f32.mrb[28].mxu0 }
 0x901   : > { %v6474_v25 = vadd.f32 %v11851_v62, %v6367_v26  ;;  %v6454_v21 = vpop.f32.mrb[29].mxu0 }
 0x902   : > { %v6472_v50 = vadd.f32 %v6454_v21, %v6359_v31  ;;  %v11852_v43 = vpop.f32.mrb[30].mxu0 }
 0x903   : > { %v6457_v57 = vpop.f32.mrb[31].mxu0 }
 0x904   : > { %v6473_v1 = vadd.f32 %v6457_v57, %v6362_v41 }
 0x918   : > { %v11863_v45 = vpop.f32.mrb[32].mxu0 }
 0x919   : > { %v6577_v23 = vadd.f32 %v11863_v45, %v6474_v25  ;;  %v6557_v39 = vpop.f32.mrb[33].mxu0  ;;  %v12745_v45 = vld [vmem:[%s17525_s10 + $0x20] sm:$0xff]  }
 0x91a   : > { %v6575_v47 = vadd.f32 %v6557_v39, %v6472_v50  ;;  %v11864_v13 = vpop.f32.mrb[34].mxu0  ;;  %11997 = vmatprep.subr.bf16.mxu1 %v12745_v45 }
 0x91b   : > { %v6560_v48 = vpop.f32.mrb[35].mxu0  ;;  %11998 = vmatpush3.bf16.msra.mxu1 %v12745_v45 }
 0x91c   : > { %v6576_v2 = vadd.f32 %v6560_v48, %v6473_v1 }
 0x936   : > { %v11875_v49 = vpop.f32.mrb[36].mxu0 }
 0x937   : > { %v6680_v60 = vadd.f32 %v11875_v49, %v6577_v23  ;;  %v6660_v3 = vpop.f32.mrb[37].mxu0 }
 0x938   : > { %v6678_v15 = vadd.f32 %v6660_v3, %v6575_v47  ;;  %v11876_v36 = vpop.f32.mrb[38].mxu0 }
 0x939   : > { %v6663_v18 = vpop.f32.mrb[39].mxu0  ;;  %v12716_v36 = vld [vmem:[%s17524_s9 + $0x8] sm:$0xff]  }
 0x93a   : > { %v6679_v17 = vadd.f32 %v6663_v18, %v6576_v2  ;;  %v12718_v18 = vld [vmem:[%s17524_s9 + $0x18] sm:$0xff]  }
 0x950   : > { %v11887_v42 = vpop.f32.mrb[40].mxu0 }
 0x951   : > { %v6783_v32 = vadd.f32 %v11887_v42, %v6680_v60  ;;  %v6763_v54 = vpop.f32.mrb[41].mxu0  ;;  %v12720_v42 = vld [vmem:[%s17524_s9 + $0x28] sm:$0xff]  }
 0x952   : > { %v6781_v59 = vadd.f32 %v6763_v54, %v6678_v15  ;;  %v11888_v33 = vpop.f32.mrb[42].mxu0  ;;  %v12722_v54 = vld [vmem:[%s17524_s9 + $0x38] sm:$0xff]  }
 0x953   : > { %v6766_v38 = vpop.f32.mrb[43].mxu0  ;;  %v12724_v33 = vld [vmem:[%s17524_s9 + $0x48] sm:$0xff]  }
 0x954   : > { %v6782_v56 = vadd.f32 %v6766_v38, %v6679_v17  ;;  %v12719_v17 = vld [vmem:[%s17524_s9 + $0x20] sm:$0xff]   ;;  %v12725_v38 = vld [vmem:[%s17524_s9 + $0x50] sm:$0xff]  }
 0x96e   : > { %v11899_v53 = vpop.f32.mrb[44].mxu0 }
 0x96f   : > { %v6886_v28 = vadd.f32 %v11899_v53, %v6783_v32  ;;  %v6866_v6 = vpop.f32.mrb[45].mxu0  ;;  %v12721_v32 = vld [vmem:[%s17524_s9 + $0x30] sm:$0xff]   ;;  %v12727_v53 = vld [vmem:[%s17524_s9 + $0x60] sm:$0xff]  }
 0x970   : > { %v6884_v8 = vadd.f32 %v6866_v6, %v6781_v59  ;;  %v11900_v27 = vpop.f32.mrb[46].mxu0  ;;  %v12723_v59 = vld [vmem:[%s17524_s9 + $0x40] sm:$0xff]   ;;  %v12729_v6 = vld [vmem:[%s17524_s9 + $0x70] sm:$0xff]  }
 0x971   : > { %v6869_v24 = vpop.f32.mrb[47].mxu0  ;;  %v12731_v27 = vld [vmem:[%s17524_s9 + $0x80] sm:$0xff]  }
 0x972   : > { %v6885_v14 = vadd.f32 %v6869_v24, %v6782_v56  ;;  %v12726_v56 = vld [vmem:[%s17524_s9 + $0x58] sm:$0xff]   ;;  %v12732_v24 = vld [vmem:[%s17524_s9 + $0x88] sm:$0xff]  }
 0x988   : > { %v11911_v12 = vpop.f32.mrb[48].mxu0 }
 0x989   : > { %v6989_v51 = vadd.f32 %v11911_v12, %v6886_v28  ;;  %v6969_v7 = vpop.f32.mrb[49].mxu0  ;;  %v12728_v28 = vld [vmem:[%s17524_s9 + $0x68] sm:$0xff]   ;;  %v12734_v12 = vld [vmem:[%s17524_s9 + $0x98] sm:$0xff]  }
 0x98a   : > { %v6987_v5 = vadd.f32 %v6969_v7, %v6884_v8  ;;  %v11912_v4 = vpop.f32.mrb[50].mxu0  ;;  %v12730_v8 = vld [vmem:[%s17524_s9 + $0x78] sm:$0xff]   ;;  %v12736_v7 = vld [vmem:[%s17524_s9 + $0xa8] sm:$0xff]  }
 0x98b   : > { %v6972_v37 = vpop.f32.mrb[51].mxu0  ;;  %v12738_v4 = vld [vmem:[%s17524_s9 + $0xb8] sm:$0xff]  }
 0x98c   : > { %v6988_v61 = vadd.f32 %v6972_v37, %v6885_v14  ;;  %v12733_v14 = vld [vmem:[%s17524_s9 + $0x90] sm:$0xff]   ;;  %v12739_v37 = vld [vmem:[%s17524_s9 + $0xc0] sm:$0xff]  }
 0x998   : > { %v11919_v55 = vpop.f32.mrb[16].mxu0 }
 0x999   : > { %v7102_v35 = vadd.f32 %v11919_v55, %v10804_v58  ;;  %v7056_v30 = vpop.f32.mrb[17].mxu0  ;;  %v12741_v55 = vld [vmem:[%s17524_s9 + $0xd0] sm:$0xff]  }
 0x99a   : > { %v7100_v40 = vadd.f32 %v10804_v58, %v7056_v30  ;;  %v11920_v46 = vpop.f32.mrb[18].mxu0  ;;  %v12748_v30 = vld [vmem:[%s17525_s10 + $0x38] sm:$0xff]  }
 0x99b   : > { %v7116_v0 = vmul.f32 0.2, %v7102_v35  ;;  %v7103_v63 = vadd.f32 %v11920_v46, %v10804_v58  ;;  %v7059_v44 = vpop.f32.mrb[19].mxu0  ;;  %vm7109_vm0 = vcmp.ge.f32.partialorder %v7102_v35, 0.0  ;;  %v12743_v46 = vld [vmem:[%s17524_s9 + $0xe0] sm:$0xff]  }
 0x99c   : > { %v7114_v10 = vmul.f32 0.2, %v7100_v40  ;;  %v7101_v11 = vadd.f32 %v10804_v58, %v7059_v44  ;;  %vm7107_vm14 = vcmp.ge.f32.partialorder %v7100_v40, 0.0  ;;  %v12756_v44 = vld [vmem:[%s17524_s9 + $0xf0] sm:$0xff]  }
 0x99d   : > { %vm7110_vm1 = vcmp.ge.f32.partialorder %v7103_v63, 0.0  ;;  %v7117_v22 = vmul.f32 0.2, %v7103_v63  ;;  %v7123_v19 = vsel %vm7109_vm0, %v7102_v35, %v7116_v0  ;;  %v12747_v35 = vld [vmem:[%s17525_s10 + $0x30] sm:$0xff]   ;;  %v12749_v0 = vld [vmem:[%s17525_s10] sm:$0xff]   ;;  %vm9517_vm0 = vcmask 130112  }
 0x99e   : > { %vm7108_vm2 = vcmp.ge.f32.partialorder %v7101_v11, 0.0  ;;  %v7115_v20 = vmul.f32 0.2, %v7101_v11  ;;  %v7121_v26 = vsel %vm7107_vm14, %v7100_v40, %v7114_v10  ;;  %v12742_v40 = vld [vmem:[%s17524_s9 + $0xd8] sm:$0xff]   ;;  %vm9524_vm14 = vcmask 195712  }
 0x99f   : > { %v7124_v29 = vsel %vm7110_vm1, %v7103_v63, %v7117_v22  ;;  %v12744_v63 = vld [vmem:[%s17524_s9 + $0xe8] sm:$0xff]   ;;  %v12757_v10 = vld [vmem:[%s17524_s9 + $0xf8] ss:$0 sps:$4 sm:$0xff]   ;;  %vm9531_vm1 = vcmask 261312  }
 0x9a0   : > { %v7122_v52 = vsel %vm7108_vm2, %v7101_v11, %v7115_v20  ;;  %v7192_v31 = vpack.c.bf16 %v7124_v29, %v7123_v19  ;;  %vm9538_vm2 = vcmask 326912  }
 0x9a1   : > { %v7191_v9 = vpack.c.bf16 %v7122_v52, %v7121_v26 }
 0x9a3   : > { %11925 = vmatprep.subr.bf16.mxu0 %v7191_v9 }
 0x9a4   : > { %11926 = vmatpush3.bf16.msra.mxu0 %v7191_v9 }
 0x9a5   : > { %11927 = vmatprep.subr.bf16.mxu0 %v7192_v31 }
 0x9a6   : > { %v11923_v34 = vpop.f32.mrb[52].mxu0 }
 0x9a7   : > { %v7092_v41 = vadd.f32 %v11923_v34, %v6989_v51  ;;  %v7072_v62 = vpop.f32.mrb[53].mxu0  ;;  %v12735_v51 = vld [vmem:[%s17524_s9 + $0xa0] sm:$0xff]  }
 0x9a8   : > { %v7090_v25 = vadd.f32 %v7072_v62, %v6987_v5  ;;  %v11924_v21 = vpop.f32.mrb[54].mxu0  ;;  %11928 = vmatpush3.bf16.msra.mxu0 %v7192_v31  ;;  %v12737_v5 = vld [vmem:[%s17524_s9 + $0xb0] sm:$0xff]  }
 0x9a9   : > { %v7106_v50 = vadd.f32 %v10804_v58, %v7092_v41  ;;  %v7075_v43 = vpop.f32.mrb[55].mxu0 }
 0x9aa   : > { %v7104_v57 = vadd.f32 %v10804_v58, %v7090_v25  ;;  %v7091_v1 = vadd.f32 %v7075_v43, %v6988_v61  ;;  %v12746_v61 = vld [vmem:[%s17525_s10 + $0x28] sm:$0xff]  }
 0x9ab   : > { %v7120_v23 = vmul.f32 0.2, %v7106_v50  ;;  %vm7113_vm4 = vcmp.ge.f32.partialorder %v7106_v50, 0.0  ;;  %11999 = vmatprep.subr.bf16.mxu1 %v12746_v61 }
 0x9ac   : > { %v7118_v39 = vmul.f32 0.2, %v7104_v57  ;;  %v7105_v47 = vadd.f32 %v10804_v58, %v7091_v1  ;;  %vm7111_vm5 = vcmp.ge.f32.partialorder %v7104_v57, 0.0  ;;  %12000 = vmatpush3.bf16.msra.mxu1 %v12746_v61  ;;  %v12740_v58 = vld [vmem:[%s17524_s9 + $0xc8] sm:$0xff]  }
 0x9ad   : > { %v7127_v48 = vsel %vm7113_vm4, %v7106_v50, %v7120_v23  ;;  %12001 = vmatprep.subr.bf16.mxu1 %v12747_v35  ;;  %v12750_v1 = vld [vmem:[%s17525_s10 + $0x8] sm:$0xff]   ;;  %v12751_v23 = vld [vmem:[%s17525_s10 + $0x10] sm:$0xff]   ;;  %vm9545_vm4 = vcmask 392512  }
 0x9ae   : > { %vm7112_vm6 = vcmp.ge.f32.partialorder %v7105_v47, 0.0  ;;  %v7119_v13 = vmul.f32 0.2, %v7105_v47  ;;  %v7125_v2 = vsel %vm7111_vm5, %v7104_v57, %v7118_v39  ;;  %v7194_v3 = vpack.c.bf16 %v7127_v48, %v7127_v48 }
 0x9af   : > { %vm9552_vm5 = vcmask 458112  }
 0x9b0   : > { %v7126_v49 = vsel %vm7112_vm6, %v7105_v47, %v7119_v13  ;;  %v7451_v15 = vsel %vm2373_vm15, %v7194_v3, 0  ;;  %12002 = vmatpush3.bf16.msra.mxu1 %v12747_v35  ;;  %vm10064_vm6 = vcmask 1041409  }
 0x9b1   : > { %v7193_v60 = vpack.c.bf16 %v7126_v49, %v7125_v2  ;;  %12003 = vmatprep.subr.bf16.mxu1 %v12748_v30 }
 0x9b3   : > { %11929 = vmatprep.subr.bf16.mxu0 %v7193_v60 }
 0x9b4   : > { %11930 = vmatpush3.bf16.msra.mxu0 %v7193_v60  ;;  %12004 = vmatpush3.bf16.msra.mxu1 %v12748_v30  ;;  %v12752_v60 = vld [vmem:[%s17525_s10 + $0x18] sm:$0xff]  }
 0x9b5   : > { %12231 = vmatprep.subr.msk.bf16.mxu0 %vm2373_vm15, %v7194_v3  ;;  %12013 = vmatprep.subr.bf16.mxu1 %v12749_v0  ;;  %vm7789_vm15 = vcmask 523264   ;;  %v12753_v3 = vld [vmem:[%s17525_s10 + $0x40] sm:$0xff]  }
 0x9b8   : > { %11932 = vmatpush3.bf16.msra.mxu0 %v7451_v15 }
 0x9bb   : > { %11934 = vmatmul.mubr.msk.bf16.vlgmr.msra.gmra.mrb[56].mxu0 %vm7353_vm3, %v12716_v36 }
 0x9bc   : > { %11937 = vmatprep.mubr.msk.bf16.mxu0 %vm7353_vm3, %v12717_v16 }
 0x9c3   : > { %11938 = vmatmul.mubr.msk.bf16.gmra.mrb[60].mxu0 %vm7353_vm3, %v12718_v18 }
 0x9c4   : > { %11941 = vmatprep.mubr.msk.bf16.mxu0 %vm7353_vm3, %v12719_v17 }
 0x9cb   : > { %11942 = vmatmul.mubr.msk.bf16.gmra.mrb[64].mxu0 %vm7353_vm3, %v12720_v42  ;;  %v12754_v42 = vld [vmem:[%s17525_s10 + $0x48] sm:$0xff]  }
 0x9cc   : > { %11945 = vmatprep.mubr.msk.bf16.mxu0 %vm7353_vm3, %v12721_v32 }
 0x9d3   : > { %11946 = vmatmul.mubr.msk.bf16.gmra.mrb[68].mxu0 %vm7353_vm3, %v12722_v54  ;;  %v12755_v54 = vld [vmem:[%s17525_s10 + $0x50] sm:$0xff]  }
 0x9d4   : > { %11949 = vmatprep.mubr.msk.bf16.mxu0 %vm7353_vm3, %v12723_v59 }
 0x9db   : > { %11950 = vmatmul.mubr.msk.bf16.gmra.mrb[72].mxu0 %vm7353_vm3, %v12724_v33 }
 0x9dc   : > { %11953 = vmatprep.mubr.msk.bf16.mxu0 %vm7353_vm3, %v12725_v38 }
 0x9e3   : > { %11954 = vmatmul.mubr.msk.bf16.gmra.mrb[76].mxu0 %vm7353_vm3, %v12726_v56 }
 0x9e4   : > { %11957 = vmatprep.mubr.msk.bf16.mxu0 %vm7353_vm3, %v12727_v53 }
 0x9eb   : > { %11958 = vmatmul.mubr.msk.bf16.gmra.mrb[80].mxu0 %vm7353_vm3, %v12728_v28  ;;  %v12758_v28 = vld [vmem:[%s17525_s10 + $0x58] sm:$0xff]  }
 0x9ec   : > { %11961 = vmatprep.mubr.msk.bf16.mxu0 %vm7353_vm3, %v12729_v6 }
 0x9f3   : > { %11962 = vmatmul.mubr.msk.bf16.gmra.mrb[84].mxu0 %vm7353_vm3, %v12730_v8  ;;  %v12759_v8 = vld [vmem:[%s17525_s10 + $0x60] sm:$0xff]  }
 0x9f4   : > { %11965 = vmatprep.mubr.msk.bf16.mxu0 %vm7353_vm3, %v12731_v27 }
 0x9fb   : > { %11966 = vmatmul.mubr.msk.bf16.gmra.mrb[88].mxu0 %vm7353_vm3, %v12732_v24 }
 0x9fc   : > { %11969 = vmatprep.mubr.msk.bf16.mxu0 %vm7353_vm3, %v12733_v14 }
 0xa03   : > { %11970 = vmatmul.mubr.msk.bf16.gmra.mrb[92].mxu0 %vm7353_vm3, %v12734_v12 }
 0xa04   : > { %11973 = vmatprep.mubr.msk.bf16.mxu0 %vm7353_vm3, %v12735_v51 }
 0xa0b   : > { %11974 = vmatmul.mubr.msk.bf16.gmra.mrb[96].mxu0 %vm7353_vm3, %v12736_v7  ;;  %v12760_v7 = vld [vmem:[%s17525_s10 + $0x68] sm:$0xff]  }
 0xa0c   : > { %11977 = vmatprep.mubr.msk.bf16.mxu0 %vm7353_vm3, %v12737_v5 }
 0xa13   : > { %11978 = vmatmul.mubr.msk.bf16.gmra.mrb[100].mxu0 %vm7353_vm3, %v12738_v4  ;;  %v12761_v4 = vld [vmem:[%s17525_s10 + $0x70] sm:$0xff]  }
 0xa14   : > { %11981 = vmatprep.mubr.msk.bf16.mxu0 %vm7353_vm3, %v12739_v37 }
 0xa1b   : > { %11982 = vmatmul.mubr.msk.bf16.gmra.mrb[104].mxu0 %vm7353_vm3, %v12740_v58 }
 0xa1c   : > { %11985 = vmatprep.mubr.msk.bf16.mxu0 %vm7353_vm3, %v12741_v55 }
 0xa23   : > { %11986 = vmatmul.mubr.msk.bf16.gmra.mrb[108].mxu0 %vm7353_vm3, %v12742_v40  ;;  %v12762_v40 = vld [vmem:[%s17525_s10 + $0x78] sm:$0xff]  }
 0xa24   : > { %11989 = vmatprep.mubr.msk.bf16.mxu0 %vm7353_vm3, %v12743_v46 }
 0xa2b   : > { %11990 = vmatmul.mubr.msk.bf16.gmra.mrb[112].mxu0 %vm7353_vm3, %v12744_v63 }
 0xa2c   : > { %11993 = vmatprep.mubr.msk.bf16.mxu0 %vm7353_vm3, %v12756_v44 }
 0xa33   : > { %11994 = vmatmul.mubr.msk.bf16.gmra.mrb[116].mxu0 %vm7353_vm3, %v12757_v10 }
 0xa8e   : > { %v11935_v11 = vpop.f32.mrb[56].mxu0 }
 0xa8f   : > { %v7487_v22 = vpop.f32.mrb[57].mxu0 }
 0xa90   : > { %v11936_v20 = vpop.f32.mrb[58].mxu0 }
 0xa91   : > { %v7742_v19 = vpack.c.bf16 %v11936_v20, %v11935_v11  ;;  %v7490_v29 = vpop.f32.mrb[59].mxu0 }
 0xa92   : > { %v7741_v26 = vpack.c.bf16 %v7490_v29, %v7487_v22  ;;  %v12764_v22 = vld [vmem:[%s17525_s10 + $0x88] sm:$0xff]  }
 0xa96   : > { %v11939_v52 = vpop.f32.mrb[60].mxu0 }
 0xa97   : > { %v7503_v31 = vpop.f32.mrb[61].mxu0  ;;  %v7744_v53 = vpack.c.bf16 %v11939_v52, %v11939_v52 }
 0xa98   : > { %v11940_v9 = vpop.f32.mrb[62].mxu0 }
 0xa99   : > { %v7506_v34 = vpop.f32.mrb[63].mxu0 }
 0xa9a   : > { %v7743_v41 = vpack.c.bf16 %v7506_v34, %v7503_v31 }
 0xa9e   : > { %v11943_v62 = vpop.f32.mrb[64].mxu0 }
 0xa9f   : > { %v7519_v25 = vpop.f32.mrb[65].mxu0 }
 0xaa0   : > { %v7753_v21 = vpack.c.bf16 %v7519_v25, %v11940_v9  ;;  %v11944_v50 = vpop.f32.mrb[66].mxu0  ;;  %v12767_v25 = vld [vmem:[%s17525_s10 + $0xa0] sm:$0xff]  }
 0xaa1   : > { %v7522_v43 = vpop.f32.mrb[67].mxu0 }
 0xaa2   : > { %v7754_v57 = vpack.c.bf16 %v11943_v62, %v7522_v43  ;;  %12005 = vmatprep.mubr.msk.bf16.mxu1 %vm7789_vm15, %v7753_v21 }
 0xaa4   : > { %12006 = vmatmul.mubr.msk.bf16.vlgmr.msra.gmra.mrb[60].mxu1 %vm7789_vm15, %v7754_v57 }
 0xaa5   : > { %12014 = vmatpush3.bf16.msra.mxu1 %v12749_v0  ;;  %v12763_v0 = vld [vmem:[%s17525_s10 + $0x80] sm:$0xff]  }
 0xaa6   : > { %v11947_v45 = vpop.f32.mrb[68].mxu0  ;;  %12015 = vmatprep.subr.bf16.mxu1 %v12750_v1 }
 0xaa7   : > { %v7535_v39 = vpop.f32.mrb[69].mxu0 }
 0xaa8   : > { %v7755_v47 = vpack.c.bf16 %v7535_v39, %v11944_v50  ;;  %v11948_v13 = vpop.f32.mrb[70].mxu0  ;;  %v12769_v39 = vld [vmem:[%s17525_s10 + $0xb0] sm:$0xff]  }
 0xaa9   : > { %v7966_v48 = vpack.c.bf16 %v11948_v13, %v11947_v45  ;;  %v7538_v2 = vpop.f32.mrb[71].mxu0  ;;  %12016 = vmatpush3.bf16.msra.mxu1 %v12750_v1 }
 0xaaa   : > { %v7756_v49 = vpack.c.bf16 %v7538_v2, %v7538_v2  ;;  %12009 = vmatprep.mubr.msk.bf16.mxu1 %vm7789_vm15, %v7755_v47  ;;  %12017 = vmatprep.subr.bf16.mxu1 %v12751_v23 }
 0xaac   : > { %12010 = vmatmul.mubr.msk.bf16.gmra.mrb[64].mxu1 %vm7789_vm15, %v7756_v49 }
 0xaad   : > { %12018 = vmatpush3.bf16.msra.mxu1 %v12751_v23  ;;  %12021 = vmatprep.mubr.msk.bf16.mxu1 %vm7789_vm15, %v7741_v26  ;;  %v12768_v23 = vld [vmem:[%s17525_s10 + $0xa8] sm:$0xff]  }
 0xaae   : > { %12019 = vmatprep.subr.bf16.mxu1 %v12752_v60  ;;  %v11951_v15 = vpop.f32.mrb[72].mxu0 }
 0xaaf   : > { %v7551_v36 = vpop.f32.mrb[73].mxu0 }
 0xab0   : > { %v11952_v16 = vpop.f32.mrb[74].mxu0 }
 0xab1   : > { %12020 = vmatpush3.bf16.msra.mxu1 %v12752_v60  ;;  %v7968_v18 = vpack.c.bf16 %v11952_v16, %v11951_v15  ;;  %v7554_v17 = vpop.f32.mrb[75].mxu0 }
 0xab2   : > { %12029 = vmatprep.subr.bf16.mxu1 %v12753_v3  ;;  %v7967_v32 = vpack.c.bf16 %v7554_v17, %v7551_v36  ;;  %v12771_v36 = vld [vmem:[%s17525_s10 + $0xc0] sm:$0xff]  }
 0xab4   : > { %12022 = vmatmul.mubr.msk.bf16.vlgmr.msra.gmra.mrb[60].mxu1 %vm7789_vm15, %v7742_v19  ;;  %v12765_v19 = vld [vmem:[%s17525_s10 + $0x90] sm:$0xff]  }
 0xab5   : > { %12030 = vmatpush3.bf16.msra.mxu1 %v12753_v3  ;;  %12025 = vmatprep.mubr.msk.bf16.mxu1 %vm7789_vm15, %v7743_v41  ;;  %v12766_v41 = vld [vmem:[%s17525_s10 + $0x98] sm:$0xff]  }
 0xab6   : > { %12031 = vmatprep.subr.bf16.mxu1 %v12754_v42  ;;  %v11955_v59 = vpop.f32.mrb[76].mxu0  ;;  %v12770_v3 = vld [vmem:[%s17525_s10 + $0xb8] sm:$0xff]  }
 0xab7   : > { %v7567_v33 = vpop.f32.mrb[77].mxu0 }
 0xab8   : > { %v11956_v38 = vpop.f32.mrb[78].mxu0  ;;  %v7969_v58 = vpack.c.bf16 %v7567_v33, %v7567_v33 }
 0xab9   : > { %12032 = vmatpush3.bf16.msra.mxu1 %v12754_v42  ;;  %v7570_v56 = vpop.f32.mrb[79].mxu0 }
 0xaba   : > { %12033 = vmatprep.subr.bf16.mxu1 %v12755_v54  ;;  %v8085_v6 = vpack.c.bf16 %v11955_v59, %v7570_v56  ;;  %v12773_v59 = vld [vmem:[%s17525_s10 + $0xd0] sm:$0xff]  }
 0xabc   : > { %12026 = vmatmul.mubr.msk.bf16.gmra.mrb[68].mxu1 %vm7789_vm15, %v7744_v53 }
 0xabd   : > { %12034 = vmatpush3.bf16.msra.mxu1 %v12755_v54  ;;  %12037 = vmatprep.mubr.msk.bf16.mxu1 %vm7789_vm15, %v7966_v48 }
 0xabe   : > { %12035 = vmatprep.subr.bf16.mxu1 %v12758_v28  ;;  %v11959_v27 = vpop.f32.mrb[80].mxu0 }
 0xabf   : > { %v7583_v24 = vpop.f32.mrb[81].mxu0 }
 0xac0   : > { %v8086_v14 = vpack.c.bf16 %v7583_v24, %v11956_v38  ;;  %v11960_v12 = vpop.f32.mrb[82].mxu0  ;;  %v12775_v24 = vld [vmem:[%s17525_s10 + $0xe0] sm:$0xff]  }
 0xac1   : > { %12036 = vmatpush3.bf16.msra.mxu1 %v12758_v28  ;;  %v7586_v51 = vpop.f32.mrb[83].mxu0  ;;  %v8088_v34 = vpack.c.bf16 %v11960_v12, %v11960_v12 }
 0xac2   : > { %12045 = vmatprep.subr.bf16.mxu1 %v12759_v8  ;;  %v8087_v5 = vpack.c.bf16 %v11959_v27, %v7586_v51 }
 0xac4   : > { %12038 = vmatmul.mubr.msk.bf16.vlgmr.msra.gmra.mrb[60].mxu1 %vm7789_vm15, %v7967_v32  ;;  %v12772_v32 = vld [vmem:[%s17525_s10 + $0xc8] sm:$0xff]  }
 0xac5   : > { %12046 = vmatpush3.bf16.msra.mxu1 %v12759_v8  ;;  %12041 = vmatprep.mubr.msk.bf16.mxu1 %vm7789_vm15, %v7968_v18  ;;  %v12774_v8 = vld [vmem:[%s17525_s10 + $0xd8] sm:$0xff]  }
 0xac6   : > { %12047 = vmatprep.subr.bf16.mxu1 %v12760_v7  ;;  %v11963_v37 = vpop.f32.mrb[84].mxu0 }
 0xac7   : > { %v7599_v61 = vpop.f32.mrb[85].mxu0 }
 0xac8   : > { %v11964_v55 = vpop.f32.mrb[86].mxu0 }
 0xac9   : > { %12048 = vmatpush3.bf16.msra.mxu1 %v12760_v7  ;;  %v8205_v35 = vpack.c.bf16 %v11964_v55, %v11963_v37  ;;  %v7602_v30 = vpop.f32.mrb[87].mxu0 }
 0xaca   : > { %12049 = vmatprep.subr.bf16.mxu1 %v12761_v4  ;;  %v8204_v46 = vpack.c.bf16 %v7602_v30, %v7599_v61  ;;  %v12777_v61 = vld [vmem:[%s17525_s10 + $0xf0] sm:$0xff]  }
 0xacc   : > { %12042 = vmatmul.mubr.msk.bf16.gmra.mrb[72].mxu1 %vm7789_vm15, %v7969_v58 }
 0xacd   : > { %12050 = vmatpush3.bf16.msra.mxu1 %v12761_v4  ;;  %12053 = vmatprep.mubr.msk.bf16.mxu1 %vm7789_vm15, %v8085_v6  ;;  %v12776_v4 = vld [vmem:[%s17525_s10 + $0xe8] sm:$0xff]  }
 0xace   : > { %12051 = vmatprep.subr.bf16.mxu1 %v12762_v40  ;;  %v11967_v63 = vpop.f32.mrb[88].mxu0 }
 0xacf   : > { %v7615_v44 = vpop.f32.mrb[89].mxu0  ;;  %v8207_v60 = vpack.c.bf16 %v11967_v63, %v11967_v63  ;;  %v12779_v63 = vld [vmem:[%s17525_s10 + $0x100] sm:$0xff]  }
 0xad0   : > { %v11968_v10 = vpop.f32.mrb[90].mxu0 }
 0xad1   : > { %12052 = vmatpush3.bf16.msra.mxu1 %v12762_v40  ;;  %v7618_v11 = vpop.f32.mrb[91].mxu0 }
 0xad2   : > { %12061 = vmatprep.subr.bf16.mxu1 %v12763_v0  ;;  %v8206_v20 = vpack.c.bf16 %v7618_v11, %v7615_v44  ;;  %v12780_v44 = vld [vmem:[%s17525_s10 + $0x108] sm:$0xff]  }
 0xad4   : > { %12054 = vmatmul.mubr.msk.bf16.vlgmr.msra.gmra.mrb[60].mxu1 %vm7789_vm15, %v8086_v14 }
 0xad5   : > { %12062 = vmatpush3.bf16.msra.mxu1 %v12763_v0  ;;  %12057 = vmatprep.mubr.msk.bf16.mxu1 %vm7789_vm15, %v8087_v5 }
 0xad6   : > { %12063 = vmatprep.subr.bf16.mxu1 %v12764_v22  ;;  %v11971_v29 = vpop.f32.mrb[92].mxu0 }
 0xad7   : > { %v7631_v26 = vpop.f32.mrb[93].mxu0 }
 0xad8   : > { %v8323_v52 = vpack.c.bf16 %v7631_v26, %v11968_v10  ;;  %v11972_v31 = vpop.f32.mrb[94].mxu0  ;;  %v12781_v10 = vld [vmem:[%s17525_s10 + $0x110] sm:$0xff]  }
 0xad9   : > { %12064 = vmatpush3.bf16.msra.mxu1 %v12764_v22  ;;  %v7634_v9 = vpop.f32.mrb[95].mxu0  ;;  %v12782_v22 = vld [vmem:[%s17525_s10 + $0x118] sm:$0xff]  }
 0xada   : > { %12065 = vmatprep.subr.bf16.mxu1 %v12765_v19  ;;  %v8324_v62 = vpack.c.bf16 %v11971_v29, %v7634_v9 }
 0xadc   : > { %12058 = vmatmul.mubr.msk.bf16.gmra.mrb[76].mxu1 %vm7789_vm15, %v8088_v34 }
 0xadd   : > { %12066 = vmatpush3.bf16.msra.mxu1 %v12765_v19  ;;  %12069 = vmatprep.mubr.msk.bf16.mxu1 %vm7789_vm15, %v8204_v46  ;;  %v12778_v46 = vld [vmem:[%s17525_s10 + $0xf8] sm:$0xff]  }
 0xade   : > { %12067 = vmatprep.subr.bf16.mxu1 %v12766_v41  ;;  %v11975_v21 = vpop.f32.mrb[96].mxu0 }
 0xadf   : > { %v7647_v50 = vpop.f32.mrb[97].mxu0 }
 0xae0   : > { %v8325_v43 = vpack.c.bf16 %v7647_v50, %v11972_v31  ;;  %v11976_v57 = vpop.f32.mrb[98].mxu0 }
 0xae1   : > { %12068 = vmatpush3.bf16.msra.mxu1 %v12766_v41  ;;  %v8442_v1 = vpack.c.bf16 %v11976_v57, %v11975_v21  ;;  %v7650_v45 = vpop.f32.mrb[99].mxu0 }
 0xae2   : > { %12077 = vmatprep.subr.bf16.mxu1 %v12767_v25  ;;  %v8326_v6 = vpack.c.bf16 %v7650_v45, %v7650_v45 }
 0xae4   : > { %12070 = vmatmul.mubr.msk.bf16.vlgmr.msra.gmra.mrb[60].mxu1 %vm7789_vm15, %v8205_v35 }
 0xae5   : > { %12078 = vmatpush3.bf16.msra.mxu1 %v12767_v25  ;;  %12073 = vmatprep.mubr.msk.bf16.mxu1 %vm7789_vm15, %v8206_v20 }
 0xae6   : > { %12079 = vmatprep.subr.bf16.mxu1 %v12768_v23  ;;  %v11979_v47 = vpop.f32.mrb[100].mxu0 }
 0xae7   : > { %v7663_v13 = vpop.f32.mrb[101].mxu0 }
 0xae8   : > { %v11980_v48 = vpop.f32.mrb[102].mxu0 }
 0xae9   : > { %12080 = vmatpush3.bf16.msra.mxu1 %v12768_v23  ;;  %v8444_v2 = vpack.c.bf16 %v11980_v48, %v11979_v47  ;;  %v7666_v49 = vpop.f32.mrb[103].mxu0 }
 0xaea   : > { %12081 = vmatprep.subr.bf16.mxu1 %v12769_v39  ;;  %v8443_v15 = vpack.c.bf16 %v7666_v49, %v7663_v13 }
 0xaec   : > { %12074 = vmatmul.mubr.msk.bf16.gmra.mrb[80].mxu1 %vm7789_vm15, %v8207_v60 }
 0xaed   : > { %12082 = vmatpush3.bf16.msra.mxu1 %v12769_v39  ;;  %12085 = vmatprep.mubr.msk.bf16.mxu1 %vm7789_vm15, %v8323_v52 }
 0xaee   : > { %12083 = vmatprep.subr.bf16.mxu1 %v12770_v3  ;;  %v11983_v16 = vpop.f32.mrb[104].mxu0 }
 0xaef   : > { %v7679_v18 = vpop.f32.mrb[105].mxu0 }
 0xaf0   : > { %v11984_v17 = vpop.f32.mrb[106].mxu0  ;;  %v8445_v35 = vpack.c.bf16 %v7679_v18, %v7679_v18 }
 0xaf1   : > { %12084 = vmatpush3.bf16.msra.mxu1 %v12770_v3  ;;  %v7682_v42 = vpop.f32.mrb[107].mxu0 }
 0xaf2   : > { %12093 = vmatprep.subr.bf16.mxu1 %v12771_v36  ;;  %v8561_v54 = vpack.c.bf16 %v11983_v16, %v7682_v42 }
 0xaf4   : > { %12086 = vmatmul.mubr.msk.bf16.vlgmr.msra.gmra.mrb[60].mxu1 %vm7789_vm15, %v8324_v62 }
 0xaf5   : > { %12094 = vmatpush3.bf16.msra.mxu1 %v12771_v36  ;;  %12089 = vmatprep.mubr.msk.bf16.mxu1 %vm7789_vm15, %v8325_v43 }
 0xaf6   : > { %12095 = vmatprep.subr.bf16.mxu1 %v12772_v32  ;;  %v11987_v33 = vpop.f32.mrb[108].mxu0 }
 0xaf7   : > { %v7695_v38 = vpop.f32.mrb[109].mxu0 }
 0xaf8   : > { %v8562_v56 = vpack.c.bf16 %v7695_v38, %v11984_v17  ;;  %v11988_v53 = vpop.f32.mrb[110].mxu0 }
 0xaf9   : > { %12096 = vmatpush3.bf16.msra.mxu1 %v12772_v32  ;;  %v7698_v28 = vpop.f32.mrb[111].mxu0  ;;  %v8564_v11 = vpack.c.bf16 %v11988_v53, %v11988_v53 }
 0xafa   : > { %12097 = vmatprep.subr.bf16.mxu1 %v12773_v59  ;;  %v8563_v27 = vpack.c.bf16 %v11987_v33, %v7698_v28 }
 0xafc   : > { %12090 = vmatmul.mubr.msk.bf16.gmra.mrb[84].mxu1 %vm7789_vm15, %v8326_v6 }
 0xafd   : > { %12098 = vmatpush3.bf16.msra.mxu1 %v12773_v59  ;;  %12101 = vmatprep.mubr.msk.bf16.mxu1 %vm7789_vm15, %v8442_v1 }
 0xafe   : > { %12099 = vmatprep.subr.bf16.mxu1 %v12774_v8  ;;  %v11991_v14 = vpop.f32.mrb[112].mxu0 }
 0xaff   : > { %v7711_v12 = vpop.f32.mrb[113].mxu0 }
 0xb00   : > { %v11992_v51 = vpop.f32.mrb[114].mxu0 }
 0xb01   : > { %12100 = vmatpush3.bf16.msra.mxu1 %v12774_v8  ;;  %v8681_v7 = vpack.c.bf16 %v11992_v51, %v11991_v14  ;;  %v7714_v5 = vpop.f32.mrb[115].mxu0 }
 0xb02   : > { %12109 = vmatprep.subr.bf16.mxu1 %v12775_v24  ;;  %v8680_v37 = vpack.c.bf16 %v7714_v5, %v7711_v12 }
 0xb04   : > { %12102 = vmatmul.mubr.msk.bf16.vlgmr.msra.gmra.mrb[60].mxu1 %vm7789_vm15, %v8443_v15 }
 0xb05   : > { %12110 = vmatpush3.bf16.msra.mxu1 %v12775_v24  ;;  %12105 = vmatprep.mubr.msk.bf16.mxu1 %vm7789_vm15, %v8444_v2 }
 0xb06   : > { %12111 = vmatprep.subr.bf16.mxu1 %v12776_v4  ;;  %v11995_v58 = vpop.f32.mrb[116].mxu0 }
 0xb07   : > { %v7727_v55 = vpop.f32.mrb[117].mxu0  ;;  %v8683_v20 = vpack.c.bf16 %v11995_v58, %v11995_v58 }
 0xb08   : > { %v11996_v30 = vpop.f32.mrb[118].mxu0 }
 0xb09   : > { %12112 = vmatpush3.bf16.msra.mxu1 %v12776_v4  ;;  %v7730_v40 = vpop.f32.mrb[119].mxu0 }
 0xb0a   : > { %12113 = vmatprep.subr.bf16.mxu1 %v12777_v61  ;;  %v8682_v0 = vpack.c.bf16 %v7730_v40, %v7727_v55 }
 0xb0c   : > { %12106 = vmatmul.mubr.msk.bf16.gmra.mrb[88].mxu1 %vm7789_vm15, %v8445_v35  ;;  %v16372_v35 = vld [vmem:[%s17526_s11] ss:$0 sm:$0xff] }
 0xb0d   : > { %12114 = vmatpush3.bf16.msra.mxu1 %v12777_v61  ;;  %12117 = vmatprep.mubr.msk.bf16.mxu1 %vm7789_vm15, %v8561_v54 }
 0xb0e   : > { %12115 = vmatprep.subr.bf16.mxu1 %v12778_v46 }
 0xb11   : > { %12116 = vmatpush3.bf16.msra.mxu1 %v12778_v46 }
 0xb12   : > { %12125 = vmatprep.subr.bf16.mxu1 %v12779_v63 }
 0xb14   : > { %12118 = vmatmul.mubr.msk.bf16.vlgmr.msra.gmra.mrb[60].mxu1 %vm7789_vm15, %v8562_v56 }
 0xb15   : > { %12126 = vmatpush3.bf16.msra.mxu1 %v12779_v63  ;;  %12121 = vmatprep.mubr.msk.bf16.mxu1 %vm7789_vm15, %v8563_v27 }
 0xb16   : > { %12127 = vmatprep.subr.bf16.mxu1 %v12780_v44 }
 0xb19   : > { %12128 = vmatpush3.bf16.msra.mxu1 %v12780_v44  ;;  %v8850_v44 = vld [vmem:[%s17527_s12 + $0x80] sm:$0xff] }
 0xb1a   : > { %12129 = vmatprep.subr.bf16.mxu1 %v12781_v10 }
 0xb1c   : > { %12122 = vmatmul.mubr.msk.bf16.gmra.mrb[92].mxu1 %vm7789_vm15, %v8564_v11 }
 0xb1d   : > { %12130 = vmatpush3.bf16.msra.mxu1 %v12781_v10  ;;  %12133 = vmatprep.mubr.msk.bf16.mxu1 %vm7789_vm15, %v8680_v37  ;;  %v8836_v10 = vld [vmem:[%s17527_s12 + $0x10] sm:$0xff] }
 0xb1e   : > { %12131 = vmatprep.subr.bf16.mxu1 %v12782_v22 }
 0xb21   : > { %12132 = vmatpush3.bf16.msra.mxu1 %v12782_v22 }
 0xb24   : > { %12134 = vmatmul.mubr.msk.bf16.vlgmr.msra.gmra.mrb[60].mxu1 %vm7789_vm15, %v8681_v7 }
 0xb25   : > { %12137 = vmatprep.mubr.msk.bf16.mxu1 %vm7789_vm15, %v8682_v0 }
 0xb2c   : > { %12138 = vmatmul.mubr.msk.bf16.gmra.mrb[96].mxu1 %vm7789_vm15, %v8683_v20 }
 0xb7f   : > { %v12011_v19 = vpop.f32.mrb[64].mxu1 }
 0xb80   : > { %v7852_v29 = vpop.f32.mrb[65].mxu1 }
 0xb81   : > { %v12012_v26 = vpop.f32.mrb[66].mxu1 }
 0xb82   : > { %v7855_v52 = vpop.f32.mrb[67].mxu1 }
 0xb8f   : > { %v12027_v31 = vpop.f32.mrb[68].mxu1 }
 0xb90   : > { %v7961_v9 = vadd.f32 %v12027_v31, %v12011_v19  ;;  %v7952_v34 = vpop.f32.mrb[69].mxu1  ;;  %v8864_v19 = vld [vmem:[%s17527_s12 + $0xf0] sm:$0xff] }
 0xb91   : > { %v7953_v41 = vadd.f32 %v7952_v34, %v7852_v29  ;;  %v12028_v62 = vpop.f32.mrb[70].mxu1  ;;  %v8843_v29 = vld [vmem:[%s17527_s12 + $0x48] sm:$0xff] }
 0xb92   : > { %v7955_v25 = vpop.f32.mrb[71].mxu1 }
 0xb93   : > { %v7956_v21 = vadd.f32 %v7955_v25, %v7855_v52  ;;  %v8899_v25 = vld [vmem:[%s17527_s12 + $0x208] sm:$0xff] }
 0xb9f   : > { %v12043_v50 = vpop.f32.mrb[72].mxu1 }
 0xba0   : > { %v8084_v43 = vadd.f32 %v12043_v50, %v7961_v9  ;;  %v8064_v57 = vpop.f32.mrb[73].mxu1 }
 0xba1   : > { %v8082_v1 = vadd.f32 %v8064_v57, %v7953_v41  ;;  %v12044_v45 = vpop.f32.mrb[74].mxu1 }
 0xba2   : > { %v8067_v23 = vpop.f32.mrb[75].mxu1 }
 0xba3   : > { %v8083_v39 = vadd.f32 %v8067_v23, %v7956_v21  ;;  %v8857_v21 = vld [vmem:[%s17527_s12 + $0xb8] sm:$0xff] }
 0xbaf   : > { %v12059_v47 = vpop.f32.mrb[76].mxu1 }
 0xbb0   : > { %v8203_v13 = vadd.f32 %v12059_v47, %v8084_v43  ;;  %v8183_v48 = vpop.f32.mrb[77].mxu1  ;;  %v8920_v47 = vld [vmem:[%s17527_s12 + $0x2b0] sm:$0xff] }
 0xbb1   : > { %v8201_v2 = vadd.f32 %v8183_v48, %v8082_v1  ;;  %v12060_v49 = vpop.f32.mrb[78].mxu1 }
 0xbb2   : > { %v8186_v60 = vpop.f32.mrb[79].mxu1 }
 0xbb3   : > { %v8202_v3 = vadd.f32 %v8186_v60, %v8083_v39 }
 0xbbf   : > { %v12075_v15 = vpop.f32.mrb[80].mxu1 }
 0xbc0   : > { %v8322_v36 = vadd.f32 %v12075_v15, %v8203_v13  ;;  %v8302_v16 = vpop.f32.mrb[81].mxu1  ;;  %v8892_v13 = vld [vmem:[%s17527_s12 + $0x1d0] sm:$0xff]  ;;  %v8934_v15 = vld [vmem:[%s17527_s12 + $0x320] sm:$0xff] }
 0xbc1   : > { %v8320_v18 = vadd.f32 %v8302_v16, %v8201_v2  ;;  %v12076_v17 = vpop.f32.mrb[82].mxu1 }
 0xbc2   : > { %v8305_v42 = vpop.f32.mrb[83].mxu1 }
 0xbc3   : > { %v8321_v32 = vadd.f32 %v8305_v42, %v8202_v3 }
 0xbcf   : > { %v12091_v54 = vpop.f32.mrb[84].mxu1 }
 0xbd0   : > { %v8441_v59 = vadd.f32 %v12091_v54, %v8322_v36  ;;  %v8421_v33 = vpop.f32.mrb[85].mxu1  ;;  %v8906_v36 = vld [vmem:[%s17527_s12 + $0x240] sm:$0xff]  ;;  %v8885_v54 = vld [vmem:[%s17527_s12 + $0x198] sm:$0xff] }
 0xbd1   : > { %v8439_v38 = vadd.f32 %v8421_v33, %v8320_v18  ;;  %v12092_v56 = vpop.f32.mrb[86].mxu1 }
 0xbd2   : > { %v8424_v53 = vpop.f32.mrb[87].mxu1 }
 0xbd3   : > { %v8440_v28 = vadd.f32 %v8424_v53, %v8321_v32 }
 0xbdf   : > { %v12107_v6 = vpop.f32.mrb[88].mxu1 }
 0xbe0   : > { %v8560_v8 = vadd.f32 %v12107_v6, %v8441_v59  ;;  %v8540_v27 = vpop.f32.mrb[89].mxu1  ;;  %v8913_v59 = vld [vmem:[%s17527_s12 + $0x278] sm:$0xff]  ;;  %v8871_v6 = vld [vmem:[%s17527_s12 + $0x128] sm:$0xff] }
 0xbe1   : > { %v8558_v24 = vadd.f32 %v8540_v27, %v8439_v38  ;;  %v12108_v14 = vpop.f32.mrb[90].mxu1 }
 0xbe2   : > { %v8543_v12 = vpop.f32.mrb[91].mxu1 }
 0xbe3   : > { %v8559_v51 = vadd.f32 %v8543_v12, %v8440_v28 }
 0xbef   : > { %v12123_v7 = vpop.f32.mrb[92].mxu1 }
 0xbf0   : > { %v16363_v5 = vadd.f32 %v12123_v7, %v8560_v8  ;;  %v8659_v4 = vpop.f32.mrb[93].mxu1  ;;  %v8834_v8 = vld [vmem:[%s17527_s12] sm:$0xff]  ;;  %v8848_v7 = vld [vmem:[%s17527_s12 + $0x70] sm:$0xff] }
 0xbf1   : > { %v16365_v37 = vadd.f32 %v8659_v4, %v8558_v24  ;;  %v12124_v61 = vpop.f32.mrb[94].mxu1 }
 0xbf2   : > { %v8662_v58 = vpop.f32.mrb[95].mxu1 }
 0xbf3   : > { %v16367_v55 = vadd.f32 %v8662_v58, %v8559_v51  ;;  %v8927_v51 = vld [vmem:[%s17527_s12 + $0x2e8] sm:$0xff] }
 0xbf7   : > { %v12135_v30 = vpop.f32.mrb[60].mxu1 }
 0xbf8   : > { %v8808_v40 = vadd.f32 %v12135_v30, %v16372_v35  ;;  %v8762_v46 = vpop.f32.mrb[61].mxu1 }
 0xbf9   : > { %v16375_v0 = vpop.f32.mrb[62].mxu1  ;;  %v8806_v3 = vadd.f32 %v16372_v35, %v8762_v46  ;;  %v8862_v46 = vld [vmem:[%s17527_s12 + $0xe0] sm:$0xff] }
 0xbfa   : > { %vm8815_vm7 = vcmp.ge.f32.partialorder %v8808_v40, 0.0  ;;  %v8822_v63 = vmul.f32 0.2, %v8808_v40  ;;  %v8765_v11 = vpop.f32.mrb[63].mxu1 }
 0xbfb   : > { %v16384_v22 = vadd.f32 %v16372_v35, %v8765_v11  ;;  %v8820_v32 = vmul.f32 0.2, %v8806_v3  ;;  %vm8813_vm8 = vcmp.ge.f32.partialorder %v8806_v3, 0.0 }
 0xbfc   : > { %v16386_v20 = vsel %vm8815_vm7, %v8808_v40, %v8822_v63  ;;  %v8878_v40 = vld [vmem:[%s17527_s12 + $0x160] sm:$0xff]  ;;  %vm10068_vm7 = vcmask 1043459  }
 0xbfd   : > { %v8962_v26 = vmul.f32 %v8850_v44, %v16386_v20  ;;  %v8948_v52 = vmul.f32 %v8836_v10, %v16386_v20  ;;  %v8976_v34 = vmul.f32 %v8864_v19, %v16386_v20  ;;  %v8955_v41 = vmul.f32 %v8843_v29, %v16386_v20  ;;  %v8941_v29 = vld [vmem:[%s17527_s12 + $0x358] sm:$0xff] }
 0xbfe   : > { %v9011_v23 = vmul.f32 %v8899_v25, %v16386_v20  ;;  %v8969_v39 = vmul.f32 %v8857_v21, %v16386_v20  ;;  %v9032_v49 = vmul.f32 %v8920_v47, %v16386_v20  ;;  %v9004_v60 = vmul.f32 %v8892_v13, %v16386_v20  ;;  %v8841_v25 = vld [vmem:[%s17527_s12 + $0x38] sm:$0xff]  ;;  %v8890_v13 = vld [vmem:[%s17527_s12 + $0x1c0] sm:$0xff] }
 0xbff   : > { %v9106_v31 = vsel %vm7789_vm15, %v8962_v26, 0.0  ;;  %v9064_v9 = vsel %vm7789_vm15, %v8948_v52, 0.0  ;;  %v12139_v62 = vpop.f32.mrb[96].mxu1  ;;  %v9148_v1 = vsel %vm7789_vm15, %v8976_v34, 0.0  ;;  %v9085_v45 = vsel %vm7789_vm15, %v8955_v41, 0.0  ;;  %v8911_v26 = vld [vmem:[%s17527_s12 + $0x268] sm:$0xff] }
 0xc00   : > { %9107 = vadd.xlane.f32.xlu0 %v9106_v31  ;;  %9065 = vadd.xlane.f32.xlu1 %v9064_v9  ;;  %v16406_v50 = vpop.f32.mrb[97].mxu1  ;;  %v9253_v48 = vsel %vm7789_vm15, %v9011_v23, 0.0  ;;  %v9127_v2 = vsel %vm7789_vm15, %v8969_v39, 0.0  ;;  %v9316_v16 = vsel %vm7789_vm15, %v9032_v49, 0.0  ;;  %v9232_v18 = vsel %vm7789_vm15, %v9004_v60, 0.0 }
 0xc01   : > { %v12140_v43 = vpop.f32.mrb[98].mxu1  ;;  %v9046_v17 = vmul.f32 %v8934_v15, %v16386_v20  ;;  %v9018_v42 = vmul.f32 %v8906_v36, %v16386_v20  ;;  %v8997_v56 = vmul.f32 %v8885_v54, %v16386_v20  ;;  %v9025_v53 = vmul.f32 %v8913_v59, %v16386_v20 }
 0xc02   : > { %v16408_v57 = vpop.f32.mrb[99].mxu1  ;;  %v16445_v28 = vsel %vm8813_vm8, %v8806_v3, %v8820_v32  ;;  %v8983_v14 = vmul.f32 %v8871_v6, %v16386_v20  ;;  %v9039_v4 = vmul.f32 %v8927_v51, %v16386_v20  ;;  %v8798_v63 = vadd.f32 %v12139_v62, %v16363_v5 }
 0xc03   : > { %v9358_v33 = vsel %vm7789_vm15, %v9046_v17, 0.0  ;;  %v9274_v38 = vsel %vm7789_vm15, %v9018_v42, 0.0  ;;  %v9211_v27 = vsel %vm7789_vm15, %v8997_v56, 0.0  ;;  %v9295_v24 = vsel %vm7789_vm15, %v9025_v53, 0.0 }
 0xc04   : > { %9149 = vadd.xlane.f32.xlu0 %v9148_v1  ;;  %9086 = vadd.xlane.f32.xlu1 %v9085_v45  ;;  %v8946_v12 = vmul.f32 %v8834_v8, %v16445_v28  ;;  %v9169_v61 = vsel %vm7789_vm15, %v8983_v14, 0.0  ;;  %v8960_v30 = vmul.f32 %v8848_v7, %v16445_v28  ;;  %v9337_v44 = vsel %vm7789_vm15, %v9039_v4, 0.0  ;;  %v8925_v8 = vld [vmem:[%s17527_s12 + $0x2d8] sm:$0xff]  ;;  %v8939_v7 = vld [vmem:[%s17527_s12 + $0x348] sm:$0xff]  ;;  %v8858_v4 = vld [vmem:[%s17527_s12 + $0xc0] sm:$0xff] }
 0xc05   : > { %v8990_v11 = vmul.f32 %v8878_v40, %v16386_v20  ;;  %v8974_v19 = vmul.f32 %v8862_v46, %v16445_v28  ;;  %v16485_v52 = vadd.f32 %v16372_v35, %v8798_v63  ;;  %v9053_v5 = vmul.f32 %v8941_v29, %v16386_v20  ;;  %v8918_v20 = vld [vmem:[%s17527_s12 + $0x2a0] sm:$0xff]  ;;  %v8900_v46 = vld [vmem:[%s17527_s12 + $0x210] sm:$0xff]  ;;  %v8837_v63 = vld [vmem:[%s17527_s12 + $0x18] sm:$0xff] }
 0xc06   : > { %v9058_v58 = vsel %vm7789_vm15, %v8946_v12, 0.0  ;;  %v9100_v10 = vsel %vm7789_vm15, %v8960_v30, 0.0  ;;  %v9023_v31 = vmul.f32 %v8911_v26, %v16445_v28  ;;  %v8796_v41 = vadd.f32 %v16406_v50, %v16365_v37  ;;  %v8869_v50 = vld [vmem:[%s17527_s12 + $0x118] sm:$0xff]  ;;  %v8851_v29 = vld [vmem:[%s17527_s12 + $0x88] sm:$0xff] }
 0xc07   : > { %v9190_v9 = vsel %vm7789_vm15, %v8990_v11, 0.0  ;;  %v9142_v34 = vsel %vm7789_vm15, %v8974_v19, 0.0  ;;  %v8797_v62 = vadd.f32 %v16408_v57, %v16367_v55  ;;  %v9379_v21 = vsel %vm7789_vm15, %v9053_v5, 0.0  ;;  %v8855_v55 = vld [vmem:[%s17527_s12 + $0xa8] sm:$0xff] }
 0xc08   : > { %9254 = vadd.xlane.f32.xlu0 %v9253_v48  ;;  %9128 = vadd.xlane.f32.xlu1 %v9127_v2  ;;  %v9289_v43 = vsel %vm7789_vm15, %v9023_v31, 0.0  ;;  %v8953_v1 = vmul.f32 %v8841_v25, %v16445_v28  ;;  %v9030_v37 = vmul.f32 %v8918_v20, %v16445_v28  ;;  %v16512_v57 = vadd.f32 %v16372_v35, %v8796_v41  ;;  %v8876_v48 = vld [vmem:[%s17527_s12 + $0x150] sm:$0xff]  ;;  %v8907_v19 = vld [vmem:[%s17527_s12 + $0x248] sm:$0xff]  ;;  %v8865_v41 = vld [vmem:[%s17527_s12 + $0xf8] sm:$0xff] }
 0xc09   : > { %v8967_v39 = vmul.f32 %v8855_v55, %v16445_v28  ;;  %v8981_v47 = vmul.f32 %v8869_v50, %v16445_v28  ;;  %v16525_v2 = vadd.f32 %v16372_v35, %v8797_v62  ;;  %v9002_v3 = vmul.f32 %v8890_v13, %v16445_v28 }
 0xc0a   : > { %v9079_v45 = vsel %vm7789_vm15, %v8953_v1, 0.0  ;;  %v9310_v23 = vsel %vm7789_vm15, %v9030_v37, 0.0  ;;  %v8988_v15 = vmul.f32 %v8876_v48, %v16445_v28  ;;  %v8809_v36 = vadd.f32 %v16375_v0, %v16372_v35  ;;  %v8904_v35 = vld [vmem:[%s17527_s12 + $0x230] sm:$0xff]  ;;  %v8883_v0 = vld [vmem:[%s17527_s12 + $0x188] sm:$0xff]  ;;  %v8893_v1 = vld [vmem:[%s17527_s12 + $0x1d8] sm:$0xff] }
 0xc0b   : > { %v9121_v49 = vsel %vm7789_vm15, %v8967_v39, 0.0  ;;  %v9163_v60 = vsel %vm7789_vm15, %v8981_v47, 0.0  ;;  %v9226_v17 = vsel %vm7789_vm15, %v9002_v3, 0.0  ;;  %v9016_v56 = vmul.f32 %v8904_v35, %v16445_v28  ;;  %v8935_v39 = vld [vmem:[%s17527_s12 + $0x328] sm:$0xff]  ;;  %v8914_v47 = vld [vmem:[%s17527_s12 + $0x280] sm:$0xff] }
 0xc0c   : > { %9317 = vadd.xlane.f32.xlu0 %v9316_v16  ;;  %9233 = vadd.xlane.f32.xlu1 %v9232_v18  ;;  %v8897_v16 = vld [vmem:[%s17527_s12 + $0x1f8] sm:$0xff]  ;;  %v8932_v18 = vld [vmem:[%s17527_s12 + $0x310] sm:$0xff]  ;;  %v9184_v42 = vsel %vm7789_vm15, %v8988_v15, 0.0  ;;  %v8823_v59 = vmul.f32 0.2, %v8809_v36  ;;  %vm8816_vm9 = vcmp.ge.f32.partialorder %v8809_v36, 0.0  ;;  %v8995_v53 = vmul.f32 %v8883_v0, %v16445_v28 }
 0xc0d   : > { %v9009_v32 = vmul.f32 %v8897_v16, %v16445_v28  ;;  %v9044_v54 = vmul.f32 %v8932_v18, %v16445_v28  ;;  %v9037_v12 = vmul.f32 %v8925_v8, %v16445_v28  ;;  %v9051_v30 = vmul.f32 %v8939_v7, %v16445_v28  ;;  %v8928_v15 = vld [vmem:[%s17527_s12 + $0x2f0] sm:$0xff] }
 0xc0e   : > { %v16553_v6 = vsel %vm8816_vm9, %v8809_v36, %v8823_v59  ;;  %v9205_v14 = vsel %vm7789_vm15, %v8995_v53, 0.0  ;;  %vm8814_vm10 = vcmp.ge.f32.partialorder %v16384_v22, 0.0  ;;  %v8835_v36 = vld [vmem:[%s17527_s12 + $0x8] sm:$0xff]  ;;  %vm8819_vm11 = vcmp.ge.f32.partialorder %v16485_v52, 0.0 }
 0xc0f   : > { %v8970_v40 = vmul.f32 %v8858_v4, %v16553_v6  ;;  %v9012_v11 = vmul.f32 %v8900_v46, %v16553_v6  ;;  %v8949_v28 = vmul.f32 %v8837_v63, %v16553_v6  ;;  %v9019_v31 = vmul.f32 %v8907_v19, %v16553_v6  ;;  %v8863_v63 = vld [vmem:[%s17527_s12 + $0xe8] sm:$0xff] }
 0xc10   : > { %9359 = vadd.xlane.f32.xlu0 %v9358_v33  ;;  %9275 = vadd.xlane.f32.xlu1 %v9274_v38  ;;  %v9247_v33 = vsel %vm7789_vm15, %v9009_v32, 0.0  ;;  %v9352_v38 = vsel %vm7789_vm15, %v9044_v54, 0.0  ;;  %v8842_v32 = vld [vmem:[%s17527_s12 + $0x40] sm:$0xff]  ;;  %vm8817_vm12 = vcmp.ge.f32.partialorder %v16512_v57, 0.0  ;;  %vm8818_vm13 = vcmp.ge.f32.partialorder %v16525_v2, 0.0 }
 0xc11   : > { %v9256_v26 = vsel %vm7789_vm15, %v9012_v11, 0.0  ;;  %v9067_v5 = vsel %vm7789_vm15, %v8949_v28, 0.0  ;;  %v9277_v62 = vsel %vm7789_vm15, %v9019_v31, 0.0  ;;  %vm10070_vm8 = vcmask 1044484  }
 0xc12   : > { %vm10072_vm9 = vcmask 1045509  }
 0xc14   : > { %9212 = vadd.xlane.f32.xlu0 %v9211_v27  ;;  %9296 = vadd.xlane.f32.xlu1 %v9295_v24  ;;  %v8844_v27 = vld [vmem:[%s17527_s12 + $0x50] sm:$0xff]  ;;  %v9268_v24 = vsel %vm7789_vm15, %v9016_v56, 0.0 }
 0xc15   : > { %v8956_v51 = vmul.f32 %v8844_v27, %v16553_v6 }
 0xc18   : > { %9170 = vadd.xlane.f32.xlu1 %v9169_v61  ;;  %9059 = vadd.xlane.f32.xlu0 %v9058_v58  ;;  %v9331_v61 = vsel %vm7789_vm15, %v9037_v12, 0.0  ;;  %v9088_v58 = vsel %vm7789_vm15, %v8956_v51, 0.0 }
 0xc1c   : > { %9338 = vadd.xlane.f32.xlu1 %v9337_v44  ;;  %9101 = vadd.xlane.f32.xlu0 %v9100_v10  ;;  %v9373_v44 = vsel %vm7789_vm15, %v9051_v30, 0.0  ;;  %v9130_v10 = vsel %vm7789_vm15, %v8970_v40, 0.0 }
 0xc20   : > { %9191 = vadd.xlane.f32.xlu1 %v9190_v9  ;;  %9143 = vadd.xlane.f32.xlu0 %v9142_v34  ;;  %v8963_v9 = vmul.f32 %v8851_v29, %v16553_v6  ;;  %v8921_v34 = vld [vmem:[%s17527_s12 + $0x2b8] sm:$0xff]  ;;  %v8912_v29 = vld [vmem:[%s17527_s12 + $0x270] sm:$0xff] }
 0xc21   : > { %v9033_v20 = vmul.f32 %v8921_v34, %v16553_v6 }
 0xc22   : > { %v9109_v25 = vsel %vm7789_vm15, %v8963_v9, 0.0 }
 0xc23   : > { %v9319_v37 = vsel %vm7789_vm15, %v9033_v20, 0.0 }
 0xc24   : > { %9380 = vadd.xlane.f32.xlu1 %v9379_v21  ;;  %9290 = vadd.xlane.f32.xlu0 %v9289_v43  ;;  %v8977_v21 = vmul.f32 %v8865_v41, %v16553_v6  ;;  %v8872_v43 = vld [vmem:[%s17527_s12 + $0x130] sm:$0xff]  ;;  %v8826_v41 = vmul.f32 0.2, %v16485_v52 }
 0xc25   : > { %v8984_v50 = vmul.f32 %v8872_v43, %v16553_v6 }
 0xc26   : > { %v9151_v55 = vsel %vm7789_vm15, %v8977_v21, 0.0 }
 0xc27   : > { %v9172_v13 = vsel %vm7789_vm15, %v8984_v50, 0.0  ;;  %v8840_v50 = vld [vmem:[%s17527_s12 + $0x30] sm:$0xff] }
 0xc28   : > { %9080 = vadd.xlane.f32.xlu1 %v9079_v45  ;;  %9311 = vadd.xlane.f32.xlu0 %v9310_v23  ;;  %v9005_v45 = vmul.f32 %v8893_v1, %v16553_v6  ;;  %v8821_v23 = vmul.f32 0.2, %v16384_v22 }
 0xc2a   : > { %v9235_v48 = vsel %vm7789_vm15, %v9005_v45, 0.0  ;;  %v16628_v3 = vsel %vm8814_vm10, %v16384_v22, %v8821_v23  ;;  %v8879_v22 = vld [vmem:[%s17527_s12 + $0x168] sm:$0xff]  ;;  %vm10074_vm10 = vcmask 1046534  }
 0xc2b   : > { %v8991_v35 = vmul.f32 %v8879_v22, %v16553_v6  ;;  %v8954_v0 = vmul.f32 %v8842_v32, %v16628_v3  ;;  %v8975_v28 = vmul.f32 %v8863_v63, %v16628_v3  ;;  %v9024_v9 = vmul.f32 %v8912_v29, %v16628_v3  ;;  %v8884_v32 = vld [vmem:[%s17527_s12 + $0x190] sm:$0xff]  ;;  %v8917_v63 = vld [vmem:[%s17527_s12 + $0x298] sm:$0xff] }
 0xc2c   : > { %9122 = vadd.xlane.f32.xlu1 %v9121_v49  ;;  %9164 = vadd.xlane.f32.xlu0 %v9163_v60  ;;  %v9047_v49 = vmul.f32 %v8935_v39, %v16553_v6  ;;  %v9026_v60 = vmul.f32 %v8914_v47, %v16553_v6 }
 0xc2d   : > { %v9193_v56 = vsel %vm7789_vm15, %v8991_v35, 0.0  ;;  %v9082_v53 = vsel %vm7789_vm15, %v8954_v0, 0.0  ;;  %v9292_v20 = vsel %vm7789_vm15, %v9024_v9, 0.0  ;;  %v8996_v0 = vmul.f32 %v8884_v32, %v16628_v3  ;;  %v8938_v9 = vld [vmem:[%s17527_s12 + $0x340] sm:$0xff] }
 0xc2e   : > { %v9361_v16 = vsel %vm7789_vm15, %v9047_v49, 0.0  ;;  %v9298_v18 = vsel %vm7789_vm15, %v9026_v60, 0.0 }
 0xc30   : > { %9227 = vadd.xlane.f32.xlu1 %v9226_v17  ;;  %9185 = vadd.xlane.f32.xlu0 %v9184_v42  ;;  %v9040_v17 = vmul.f32 %v8928_v15, %v16553_v6  ;;  %v8947_v42 = vmul.f32 %v8835_v36, %v16628_v3  ;;  %v8933_v36 = vld [vmem:[%s17527_s12 + $0x318] sm:$0xff] }
 0xc32   : > { %v9340_v54 = vsel %vm7789_vm15, %v9040_v17, 0.0  ;;  %v9061_v59 = vsel %vm7789_vm15, %v8947_v42, 0.0  ;;  %v9045_v42 = vmul.f32 %v8933_v36, %v16628_v3 }
 0xc34   : > { %9248 = vadd.xlane.f32.xlu1 %v9247_v33  ;;  %9353 = vadd.xlane.f32.xlu0 %v9352_v38  ;;  %v8886_v33 = vld [vmem:[%s17527_s12 + $0x1a0] sm:$0xff]  ;;  %v8856_v38 = vld [vmem:[%s17527_s12 + $0xb0] sm:$0xff] }
 0xc35   : > { %v8998_v8 = vmul.f32 %v8886_v33, %v16553_v6  ;;  %v8968_v27 = vmul.f32 %v8856_v38, %v16628_v3  ;;  %v8847_v38 = vld [vmem:[%s17527_s12 + $0x68] sm:$0xff] }
 0xc37   : > { %v9214_v12 = vsel %vm7789_vm15, %v8998_v8, 0.0  ;;  %v9124_v51 = vsel %vm7789_vm15, %v8968_v27, 0.0 }
 0xc38   : > { %9269 = vadd.xlane.f32.xlu1 %v9268_v24  ;;  %9206 = vadd.xlane.f32.xlu0 %v9205_v14  ;;  %v8942_v24 = vld [vmem:[%s17527_s12 + $0x360] sm:$0xff]  ;;  %v8891_v14 = vld [vmem:[%s17527_s12 + $0x1c8] sm:$0xff] }
 0xc39   : > { %v9054_v7 = vmul.f32 %v8942_v24, %v16553_v6  ;;  %v9003_v4 = vmul.f32 %v8891_v14, %v16628_v3  ;;  %v8861_v24 = vld [vmem:[%s17527_s12 + $0xd8] sm:$0xff]  ;;  %v8924_v14 = vld [vmem:[%s17527_s12 + $0x2d0] sm:$0xff] }
 0xc3b   : > { %v9382_v30 = vsel %vm7789_vm15, %v9054_v7, 0.0  ;;  %v9229_v40 = vsel %vm7789_vm15, %v9003_v4, 0.0 }
 0xc3c   : > { %9332 = vadd.xlane.f32.xlu1 %v9331_v61  ;;  %9089 = vadd.xlane.f32.xlu0 %v9088_v58  ;;  %v8849_v61 = vld [vmem:[%s17527_s12 + $0x78] sm:$0xff]  ;;  %v8898_v58 = vld [vmem:[%s17527_s12 + $0x200] sm:$0xff] }
 0xc3d   : > { %v8961_v46 = vmul.f32 %v8849_v61, %v16628_v3  ;;  %v9010_v6 = vmul.f32 %v8898_v58, %v16628_v3  ;;  %v8903_v61 = vld [vmem:[%s17527_s12 + $0x228] sm:$0xff] }
 0xc3e   : > { %v8875_v58 = vld [vmem:[%s17527_s12 + $0x148] sm:$0xff] }
 0xc3f   : > { %v9250_v11 = vsel %vm7789_vm15, %v9010_v6, 0.0 }
 0xc40   : > { %9374 = vadd.xlane.f32.xlu1 %v9373_v44  ;;  %9131 = vadd.xlane.f32.xlu0 %v9130_v10  ;;  %v8905_v44 = vld [vmem:[%s17527_s12 + $0x238] sm:$0xff]  ;;  %v9103_v10 = vsel %vm7789_vm15, %v8961_v46, 0.0 }
 0xc41   : > { %v9017_v19 = vmul.f32 %v8905_v44, %v16628_v3  ;;  %v8882_v44 = vld [vmem:[%s17527_s12 + $0x180] sm:$0xff] }
 0xc43   : > { %v9271_v31 = vsel %vm7789_vm15, %v9017_v19, 0.0 }
 0xc44   : > { %9257 = vadd.xlane.f32.xlu0 %v9256_v26  ;;  %9068 = vadd.xlane.f32.xlu1 %v9067_v5  ;;  %v8926_v26 = vld [vmem:[%s17527_s12 + $0x2e0] sm:$0xff]  ;;  %v9145_v5 = vsel %vm7789_vm15, %v8975_v28, 0.0 }
 0xc45   : > { %v9038_v34 = vmul.f32 %v8926_v26, %v16628_v3 }
 0xc47   : > { %v9334_v21 = vsel %vm7789_vm15, %v9038_v34, 0.0 }
 0xc48   : > { %9278 = vadd.xlane.f32.xlu0 %v9277_v62  ;;  %9110 = vadd.xlane.f32.xlu1 %v9109_v25  ;;  %v8919_v62 = vld [vmem:[%s17527_s12 + $0x2a8] sm:$0xff]  ;;  %v8940_v25 = vld [vmem:[%s17527_s12 + $0x350] sm:$0xff] }
 0xc49   : > { %v9031_v43 = vmul.f32 %v8919_v62, %v16628_v3  ;;  %v9052_v1 = vmul.f32 %v8940_v25, %v16628_v3 }
 0xc4b   : > { %v9313_v45 = vsel %vm7789_vm15, %v9031_v43, 0.0  ;;  %v9376_v23 = vsel %vm7789_vm15, %v9052_v1, 0.0  ;;  %v8845_v1 = vld [vmem:[%s17527_s12 + $0x58] sm:$0xff] }
 0xc4c   : > { %9320 = vadd.xlane.f32.xlu0 %v9319_v37  ;;  %9152 = vadd.xlane.f32.xlu1 %v9151_v55  ;;  %v16713_v37 = vsel %vm8819_vm11, %v16485_v52, %v8826_v41  ;;  %v8870_v55 = vld [vmem:[%s17527_s12 + $0x120] sm:$0xff]  ;;  %v8877_v52 = vld [vmem:[%s17527_s12 + $0x158] sm:$0xff]  ;;  %vm10076_vm11 = vcmask 1047559  }
 0xc4d   : > { %v8982_v39 = vmul.f32 %v8870_v55, %v16628_v3  ;;  %v8952_v47 = vmul.f32 %v8840_v50, %v16713_v37  ;;  %v8989_v60 = vmul.f32 %v8877_v52, %v16628_v3  ;;  %v8959_v27 = vmul.f32 %v8847_v38, %v16713_v37  ;;  %v8838_v55 = vld [vmem:[%s17527_s12 + $0x20] sm:$0xff]  ;;  %v8859_v52 = vld [vmem:[%s17527_s12 + $0xc8] sm:$0xff] }
 0xc4e   : > { %v8973_v7 = vmul.f32 %v8861_v24, %v16713_v37  ;;  %v9036_v4 = vmul.f32 %v8924_v14, %v16713_v37  ;;  %v9015_v46 = vmul.f32 %v8903_v61, %v16713_v37  ;;  %v8987_v6 = vmul.f32 %v8875_v58, %v16713_v37  ;;  %v8929_v24 = vld [vmem:[%s17527_s12 + $0x2f8] sm:$0xff]  ;;  %v8908_v14 = vld [vmem:[%s17527_s12 + $0x250] sm:$0xff] }
 0xc4f   : > { %v9076_v49 = vsel %vm7789_vm15, %v8952_v47, 0.0  ;;  %v9029_v29 = vmul.f32 %v8917_v63, %v16713_v37  ;;  %v8994_v26 = vmul.f32 %v8882_v44, %v16713_v37 }
 0xc50   : > { %9173 = vadd.xlane.f32.xlu0 %v9172_v13  ;;  %9236 = vadd.xlane.f32.xlu1 %v9235_v48  ;;  %v8854_v13 = vld [vmem:[%s17527_s12 + $0xa0] sm:$0xff]  ;;  %v9166_v48 = vsel %vm7789_vm15, %v8982_v39, 0.0  ;;  %v9265_v28 = vsel %vm7789_vm15, %v9015_v46, 0.0  ;;  %v9181_v19 = vsel %vm7789_vm15, %v8987_v6, 0.0 }
 0xc51   : > { %v8966_v15 = vmul.f32 %v8854_v13, %v16713_v37  ;;  %v9307_v62 = vsel %vm7789_vm15, %v9029_v29, 0.0  ;;  %v9202_v25 = vsel %vm7789_vm15, %v8994_v26, 0.0  ;;  %v8852_v13 = vld [vmem:[%s17527_s12 + $0x90] sm:$0xff]  ;;  %v8922_v46 = vld [vmem:[%s17527_s12 + $0x2c0] sm:$0xff] }
 0xc53   : > { %v9118_v17 = vsel %vm7789_vm15, %v8966_v15, 0.0 }
 0xc54   : > { %9362 = vadd.xlane.f32.xlu0 %v9361_v16  ;;  %9299 = vadd.xlane.f32.xlu1 %v9298_v18  ;;  %v8896_v16 = vld [vmem:[%s17527_s12 + $0x1f0] sm:$0xff]  ;;  %v9187_v18 = vsel %vm7789_vm15, %v8989_v60, 0.0 }
 0xc55   : > { %v9008_v22 = vmul.f32 %v8896_v16, %v16713_v37 }
 0xc57   : > { %v9244_v35 = vsel %vm7789_vm15, %v9008_v22, 0.0 }
 0xc58   : > { %9341 = vadd.xlane.f32.xlu1 %v9340_v54  ;;  %9062 = vadd.xlane.f32.xlu0 %v9061_v59  ;;  %v8910_v54 = vld [vmem:[%s17527_s12 + $0x260] sm:$0xff]  ;;  %v9355_v59 = vsel %vm7789_vm15, %v9045_v42, 0.0 }
 0xc59   : > { %v9022_v33 = vmul.f32 %v8910_v54, %v16713_v37 }
 0xc5b   : > { %v9286_v8 = vsel %vm7789_vm15, %v9022_v33, 0.0  ;;  %v8894_v33 = vld [vmem:[%s17527_s12 + $0x1e0] sm:$0xff] }
 0xc5c   : > { %9194 = vadd.xlane.f32.xlu1 %v9193_v56  ;;  %9083 = vadd.xlane.f32.xlu0 %v9082_v53  ;;  %v8868_v56 = vld [vmem:[%s17527_s12 + $0x110] sm:$0xff]  ;;  %v9208_v53 = vsel %vm7789_vm15, %v8996_v0, 0.0  ;;  %v8915_v0 = vld [vmem:[%s17527_s12 + $0x288] sm:$0xff] }
 0xc5d   : > { %v8980_v3 = vmul.f32 %v8868_v56, %v16713_v37 }
 0xc60   : > { %9215 = vadd.xlane.f32.xlu1 %v9214_v12  ;;  %9125 = vadd.xlane.f32.xlu0 %v9124_v51  ;;  %v9097_v12 = vsel %vm7789_vm15, %v8959_v27, 0.0  ;;  %v9160_v51 = vsel %vm7789_vm15, %v8980_v3, 0.0 }
 0xc64   : > { %9383 = vadd.xlane.f32.xlu1 %v9382_v30  ;;  %9230 = vadd.xlane.f32.xlu0 %v9229_v40  ;;  %v9139_v30 = vsel %vm7789_vm15, %v8973_v7, 0.0  ;;  %v9328_v40 = vsel %vm7789_vm15, %v9036_v4, 0.0 }
 0xc68   : > { %9104 = vadd.xlane.f32.xlu1 %v9103_v10  ;;  %9251 = vadd.xlane.f32.xlu0 %v9250_v11 }
 0xc6c   : > { %9146 = vadd.xlane.f32.xlu1 %v9145_v5  ;;  %9272 = vadd.xlane.f32.xlu0 %v9271_v31  ;;  %v8824_v5 = vmul.f32 0.2, %v16512_v57  ;;  %v8931_v31 = vld [vmem:[%s17527_s12 + $0x308] sm:$0xff] }
 0xc6e   : > { %v16816_v43 = vsel %vm8817_vm12, %v16512_v57, %v8824_v5  ;;  %v8873_v5 = vld [vmem:[%s17527_s12 + $0x138] sm:$0xff]  ;;  %vm10097_vm12 = vcmask 7168  }
 0xc6f   : > { %v8957_v57 = vmul.f32 %v8845_v1, %v16816_v43  ;;  %v8950_v47 = vmul.f32 %v8838_v55, %v16816_v43  ;;  %v8971_v36 = vmul.f32 %v8859_v52, %v16816_v43  ;;  %v8964_v16 = vmul.f32 %v8852_v13, %v16816_v43  ;;  %v8880_v1 = vld [vmem:[%s17527_s12 + $0x170] sm:$0xff]  ;;  %v8853_v55 = vld [vmem:[%s17527_s12 + $0x98] sm:$0xff] }
 0xc70   : > { %9293 = vadd.xlane.f32.xlu1 %v9292_v20  ;;  %9335 = vadd.xlane.f32.xlu0 %v9334_v21  ;;  %v9043_v20 = vmul.f32 %v8931_v31, %v16713_v37  ;;  %v9050_v21 = vmul.f32 %v8938_v9, %v16713_v37  ;;  %v9027_v27 = vmul.f32 %v8915_v0, %v16816_v43  ;;  %v8839_v31 = vld [vmem:[%s17527_s12 + $0x28] sm:$0xff] }
 0xc71   : > { %v9091_v60 = vsel %vm7789_vm15, %v8957_v57, 0.0  ;;  %v9070_v15 = vsel %vm7789_vm15, %v8950_v47, 0.0  ;;  %v9133_v32 = vsel %vm7789_vm15, %v8971_v36, 0.0  ;;  %v9112_v54 = vsel %vm7789_vm15, %v8964_v16, 0.0 }
 0xc72   : > { %v9370_v39 = vsel %vm7789_vm15, %v9050_v21, 0.0  ;;  %v9006_v3 = vmul.f32 %v8894_v33, %v16816_v43  ;;  %v9301_v7 = vsel %vm7789_vm15, %v9027_v27, 0.0  ;;  %v9041_v61 = vmul.f32 %v8929_v24, %v16816_v43  ;;  %v8846_v24 = vld [vmem:[%s17527_s12 + $0x60] sm:$0xff] }
 0xc73   : > { %v9020_v58 = vmul.f32 %v8908_v14, %v16816_v43  ;;  %v9034_v29 = vmul.f32 %v8922_v46, %v16816_v43  ;;  %v8992_v52 = vmul.f32 %v8880_v1, %v16816_v43  ;;  %v8867_v14 = vld [vmem:[%s17527_s12 + $0x108] sm:$0xff]  ;;  %v8874_v46 = vld [vmem:[%s17527_s12 + $0x140] sm:$0xff] }
 0xc74   : > { %9314 = vadd.xlane.f32.xlu1 %v9313_v45  ;;  %9377 = vadd.xlane.f32.xlu0 %v9376_v23  ;;  %v9349_v23 = vsel %vm7789_vm15, %v9043_v20, 0.0  ;;  %v9238_v4 = vsel %vm7789_vm15, %v9006_v3, 0.0  ;;  %v9343_v44 = vsel %vm7789_vm15, %v9041_v61, 0.0 }
 0xc75   : > { %v9322_v20 = vsel %vm7789_vm15, %v9034_v29, 0.0 }
 0xc78   : > { %9167 = vadd.xlane.f32.xlu1 %v9166_v48  ;;  %9077 = vadd.xlane.f32.xlu0 %v9076_v49 }
 0xc7c   : > { %9188 = vadd.xlane.f32.xlu1 %v9187_v18  ;;  %9119 = vadd.xlane.f32.xlu0 %v9118_v17  ;;  %v8901_v18 = vld [vmem:[%s17527_s12 + $0x218] sm:$0xff]  ;;  %v8866_v17 = vld [vmem:[%s17527_s12 + $0x100] sm:$0xff] }
 0xc80   : > { %9356 = vadd.xlane.f32.xlu1 %v9355_v59  ;;  %9245 = vadd.xlane.f32.xlu0 %v9244_v35  ;;  %v9013_v59 = vmul.f32 %v8901_v18, %v16816_v43  ;;  %v8978_v35 = vmul.f32 %v8866_v17, %v16816_v43  ;;  %v9196_v18 = vsel %vm7789_vm15, %v8992_v52, 0.0  ;;  %v8909_v52 = vld [vmem:[%s17527_s12 + $0x258] sm:$0xff] }
 0xc84   : > { %9209 = vadd.xlane.f32.xlu1 %v9208_v53  ;;  %9287 = vadd.xlane.f32.xlu0 %v9286_v8  ;;  %v9259_v53 = vsel %vm7789_vm15, %v9013_v59, 0.0  ;;  %v9154_v8 = vsel %vm7789_vm15, %v8978_v35, 0.0  ;;  %v8887_v59 = vld [vmem:[%s17527_s12 + $0x1a8] sm:$0xff]  ;;  %v8916_v35 = vld [vmem:[%s17527_s12 + $0x290] sm:$0xff] }
 0xc85   : > { %v8999_v27 = vmul.f32 %v8887_v59, %v16816_v43  ;;  %v8923_v59 = vld [vmem:[%s17527_s12 + $0x2c8] sm:$0xff] }
 0xc87   : > { %v9217_v61 = vsel %vm7789_vm15, %v8999_v27, 0.0 }
 0xc88   : > { %9098 = vadd.xlane.f32.xlu1 %v9097_v12  ;;  %9161 = vadd.xlane.f32.xlu0 %v9160_v51 }
 0xc8c   : > { %9140 = vadd.xlane.f32.xlu1 %v9139_v30  ;;  %9329 = vadd.xlane.f32.xlu0 %v9328_v40  ;;  %v8825_v30 = vmul.f32 0.2, %v16525_v2  ;;  %v8943_v40 = vld [vmem:[%s17527_s12 + $0x368] sm:$0xff] }
 0xc8d   : > { %v16791_v10 = vpop.xlane.xlu0 %9107  ;;  %v16793_v11 = vpop.xlane.xlu1 %9065 }
 0xc8e   : > { %v16905_v26 = vsel %vm8818_vm13, %v16525_v2, %v8825_v30  ;;  %v8985_v2 = vmul.f32 %v8873_v5, %v16816_v43 }
 0xc8f   : > { %v8951_v21 = vmul.f32 %v8839_v31, %v16905_v26  ;;  %v8965_v13 = vmul.f32 %v8853_v55, %v16905_v26  ;;  %v9028_v3 = vmul.f32 %v8916_v35, %v16905_v26  ;;  %v8979_v30 = vmul.f32 %v8867_v14, %v16905_v26  ;;  %v8888_v35 = vld [vmem:[%s17527_s12 + $0x1b0] sm:$0xff] }
 0xc90   : > { %9266 = vadd.xlane.f32.xlu1 %v9265_v28  ;;  %9182 = vadd.xlane.f32.xlu0 %v9181_v19  ;;  %v9280_v28 = vsel %vm7789_vm15, %v9020_v58, 0.0  ;;  %v9055_v19 = vmul.f32 %v8943_v40, %v16816_v43  ;;  %v9175_v57 = vsel %vm7789_vm15, %v8985_v2, 0.0  ;;  %v8958_v58 = vmul.f32 %v8846_v24, %v16905_v26  ;;  %v8860_v40 = vld [vmem:[%s17527_s12 + $0xd0] sm:$0xff] }
 0xc91   : > { %v16806_v34 = vpop.xlane.xlu0 %9149  ;;  %v16808_v41 = vpop.xlane.xlu1 %9086  ;;  %v9073_v47 = vsel %vm7789_vm15, %v8951_v21, 0.0  ;;  %v9115_v17 = vsel %vm7789_vm15, %v8965_v13, 0.0  ;;  %v9157_v29 = vsel %vm7789_vm15, %v8979_v30, 0.0  ;;  %v8972_v5 = vmul.f32 %v8860_v40, %v16905_v26  ;;  %v8881_v13 = vld [vmem:[%s17527_s12 + $0x178] sm:$0xff] }
 0xc92   : > { %v8986_v31 = vmul.f32 %v8874_v46, %v16905_v26  ;;  %v9035_v24 = vmul.f32 %v8923_v59, %v16905_v26  ;;  %v9000_v14 = vmul.f32 %v8888_v35, %v16905_v26 }
 0xc93   : > { %v9136_v1 = vsel %vm7789_vm15, %v8972_v5, 0.0  ;;  %v8889_v5 = vld [vmem:[%s17527_s12 + $0x1b8] sm:$0xff] }
 0xc94   : > { %9308 = vadd.xlane.f32.xlu1 %v9307_v62  ;;  %9203 = vadd.xlane.f32.xlu0 %v9202_v25  ;;  %v9385_v25 = vsel %vm7789_vm15, %v9055_v19, 0.0  ;;  %v9094_v19 = vsel %vm7789_vm15, %v8958_v58, 0.0  ;;  %v9178_v55 = vsel %vm7789_vm15, %v8986_v31, 0.0  ;;  %v9325_v40 = vsel %vm7789_vm15, %v9035_v24, 0.0  ;;  %v8945_v31 = vld [vmem:[%s17527_s12 + $0x378] sm:$0xff] }
 0xc95   : > { %v16824_v50 = vpop.xlane.xlu0 %9254  ;;  %v16826_v45 = vpop.xlane.xlu1 %9128  ;;  %v9220_v46 = vsel %vm7789_vm15, %v9000_v14, 0.0 }
 0xc98   : > { %9350 = vadd.xlane.f32.xlu1 %v9349_v23  ;;  %9371 = vadd.xlane.f32.xlu0 %v9370_v39 }
 0xc99   : > { %v16838_v48 = vpop.xlane.xlu0 %9317  ;;  %v16840_v49 = vpop.xlane.xlu1 %9233 }
 0xc9c   : > { %9092 = vadd.xlane.f32.xlu1 %v9091_v60  ;;  %9071 = vadd.xlane.f32.xlu0 %v9070_v15  ;;  %v8936_v60 = vld [vmem:[%s17527_s12 + $0x330] sm:$0xff]  ;;  %v8902_v15 = vld [vmem:[%s17527_s12 + $0x220] sm:$0xff] }
 0xc9d   : > { %v16852_v42 = vpop.xlane.xlu0 %9359  ;;  %v16854_v22 = vpop.xlane.xlu1 %9275 }
 0xca0   : > { %9134 = vadd.xlane.f32.xlu1 %v9133_v32  ;;  %9113 = vadd.xlane.f32.xlu0 %v9112_v54  ;;  %v9048_v32 = vmul.f32 %v8936_v60, %v16816_v43  ;;  %v9014_v54 = vmul.f32 %v8902_v15, %v16905_v26  ;;  %v9304_v43 = vsel %vm7789_vm15, %v9028_v3, 0.0 }
 0xca1   : > { %v16866_v38 = vpop.xlane.xlu0 %9212  ;;  %v16868_v56 = vpop.xlane.xlu1 %9296 }
 0xca4   : > { %9260 = vadd.xlane.f32.xlu1 %v9259_v53  ;;  %9155 = vadd.xlane.f32.xlu0 %v9154_v8  ;;  %v9364_v53 = vsel %vm7789_vm15, %v9048_v32, 0.0  ;;  %v9262_v8 = vsel %vm7789_vm15, %v9014_v54, 0.0  ;;  %v9021_v32 = vmul.f32 %v8909_v52, %v16905_v26  ;;  %v8993_v54 = vmul.f32 %v8881_v13, %v16905_v26 }
 0xca5   : > { %v16880_v12 = vpop.xlane.xlu1 %9170  ;;  %v16882_v51 = vpop.xlane.xlu0 %9059 }
 0xca6   : > { %v9283_v27 = vsel %vm7789_vm15, %v9021_v32, 0.0  ;;  %v9199_v3 = vsel %vm7789_vm15, %v8993_v54, 0.0 }
 0xca8   : > { %9302 = vadd.xlane.f32.xlu1 %v9301_v7  ;;  %9239 = vadd.xlane.f32.xlu0 %v9238_v4 }
 0xca9   : > { %v16895_v6 = vpop.xlane.xlu1 %9338  ;;  %v16897_v63 = vpop.xlane.xlu0 %9101 }
 0xcac   : > { %9344 = vadd.xlane.f32.xlu1 %v9343_v44  ;;  %9281 = vadd.xlane.f32.xlu0 %v9280_v28 }
 0xcad   : > { %v16913_v9 = vpop.xlane.xlu1 %9191  ;;  %v16915_v62 = vpop.xlane.xlu0 %9143 }
 0xcb0   : > { %9386 = vadd.xlane.f32.xlu1 %v9385_v25  ;;  %9323 = vadd.xlane.f32.xlu0 %v9322_v20  ;;  %v8895_v25 = vld [vmem:[%s17527_s12 + $0x1e8] sm:$0xff]  ;;  %v8930_v20 = vld [vmem:[%s17527_s12 + $0x300] sm:$0xff] }
 0xcb1   : > { %v16927_v23 = vpop.xlane.xlu1 %9380  ;;  %v16929_v39 = vpop.xlane.xlu0 %9290 }
 0xcb4   : > { %9176 = vadd.xlane.f32.xlu0 %v9175_v57  ;;  %9074 = vadd.xlane.f32.xlu1 %v9073_v47  ;;  %v9007_v57 = vmul.f32 %v8895_v25, %v16905_v26  ;;  %v9042_v47 = vmul.f32 %v8930_v20, %v16905_v26 }
 0xcb5   : > { %v16941_v36 = vpop.xlane.xlu1 %9080  ;;  %v16943_v16 = vpop.xlane.xlu0 %9311 }
 0xcb8   : > { %9197 = vadd.xlane.f32.xlu0 %v9196_v18  ;;  %9116 = vadd.xlane.f32.xlu1 %v9115_v17  ;;  %v9241_v18 = vsel %vm7789_vm15, %v9007_v57, 0.0  ;;  %v9346_v17 = vsel %vm7789_vm15, %v9042_v47, 0.0  ;;  %v9057_v47 = vmul.f32 %v8945_v31, %v16713_v37 }
 0xcb9   : > { %v16955_v0 = vpop.xlane.xlu1 %9122  ;;  %v16957_v33 = vpop.xlane.xlu0 %9164 }
 0xcba   : > { %v9391_v32 = vsel %vm7789_vm15, %v9057_v47, 0.0 }
 0xcbc   : > { %9365 = vadd.xlane.f32.xlu0 %v9364_v53  ;;  %9263 = vadd.xlane.f32.xlu1 %v9262_v8 }
 0xcbd   : > { %v16969_v7 = vpop.xlane.xlu1 %9227  ;;  %v16971_v4 = vpop.xlane.xlu0 %9185 }
 0xcc0   : > { %9218 = vadd.xlane.f32.xlu0 %v9217_v61  ;;  %9305 = vadd.xlane.f32.xlu1 %v9304_v43  ;;  %v8937_v61 = vld [vmem:[%s17527_s12 + $0x338] sm:$0xff]  ;;  %v8944_v43 = vld [vmem:[%s17527_s12 + $0x370] sm:$0xff] }
 0xcc1   : > { %v16983_v44 = vpop.xlane.xlu1 %9248  ;;  %v16985_v28 = vpop.xlane.xlu0 %9353 }
 0xcc4   : > { %9095 = vadd.xlane.f32.xlu0 %v9094_v19  ;;  %9158 = vadd.xlane.f32.xlu1 %v9157_v29  ;;  %v9049_v19 = vmul.f32 %v8937_v61, %v16905_v26  ;;  %v9056_v29 = vmul.f32 %v8944_v43, %v16905_v26  ;;  %v9001_v26 = vmul.f32 %v8889_v5, %v16713_v37 }
 0xcc5   : > { %v16997_v2 = vpop.xlane.xlu1 %9269  ;;  %v16999_v21 = vpop.xlane.xlu0 %9206 }
 0xcc6   : > { %v9388_v57 = vsel %vm7789_vm15, %v9056_v29, 0.0 }
 0xcc8   : > { %9137 = vadd.xlane.f32.xlu0 %v9136_v1  ;;  %9179 = vadd.xlane.f32.xlu1 %v9178_v55  ;;  %v9506_v1 = vlaneseq  ;;  %v9367_v55 = vsel %vm7789_vm15, %v9049_v19, 0.0 }
 0xcc9   : > { %v17011_v60 = vpop.xlane.xlu1 %9332  ;;  %v17013_v15 = vpop.xlane.xlu0 %9089 }
 0xcca   : > { %v17070_v37 = vshrl.u32 %v9506_v1, 7 }
 0xccc   : > { %9242 = vadd.xlane.f32.xlu0 %v9241_v18  ;;  %9347 = vadd.xlane.f32.xlu1 %v9346_v17  ;;  %v17063_v18 = vand.u32 127, %v9506_v1  ;;  %v9223_v17 = vsel %vm7789_vm15, %v9001_v26, 0.0  ;;  %vm10066_vm15 = vcmask 1042434  }
 0xccd   : > { %v17025_v53 = vpop.xlane.xlu1 %9374  ;;  %v17027_v8 = vpop.xlane.xlu0 %9131 }
 0xcce   : > { %v9512_v35 = vadd.s32 4294967288, %v17063_v18  ;;  %v17079_v14 = vsub.s32 %v17063_v18, %v17070_v37  ;;  %v9526_v61 = vadd.s32 4294967272, %v17063_v18 }
 0xcd0   : > { %9284 = vadd.xlane.f32.xlu0 %v9283_v27  ;;  %9200 = vadd.xlane.f32.xlu1 %v9199_v3  ;;  %v9519_v27 = vadd.s32 4294967280, %v17063_v18  ;;  %v17083_v43 = vsub.s32 %v9512_v35, %v17070_v37  ;;  %v9511_v29 = vrot.slane %v16882_v51, %v17079_v14  ;;  %v17093_v5 = vsub.s32 %v9526_v61, %v17070_v37 }
 0xcd1   : > { %v17039_v58 = vpop.xlane.xlu0 %9257  ;;  %v9069_v30 = vpop.xlane.xlu1 %9068  ;;  %v9557_v51 = vrot.slane %v16941_v36, %v17079_v14  ;;  %v9625_v36 = vrot.slane %v16955_v0, %v17079_v14  ;;  %v9795_v0 = vrot.slane %v16969_v7, %v17079_v14  ;;  %v9829_v7 = vrot.slane %v16983_v44, %v17079_v14 }
 0xcd4   : > { %9326 = vadd.xlane.f32.xlu0 %v9325_v40  ;;  %9221 = vadd.xlane.f32.xlu1 %v9220_v46  ;;  %v17086_v40 = vsub.s32 %v9519_v27, %v17070_v37 }
 0xcd5   : > { %v17051_v25 = vpop.xlane.xlu0 %9278  ;;  %v17053_v20 = vpop.xlane.xlu1 %9110 }
 0xcd6   : > { %v9523_v1 = vrot.slane %v16793_v11, %v17086_v40  ;;  %v9566_v11 = vrot.slane %v16808_v41, %v17086_v40  ;;  %v9634_v41 = vrot.slane %v16826_v45, %v17086_v40  ;;  %v9804_v45 = vrot.slane %v16840_v49, %v17086_v40 }
 0xcd8   : > { %9368 = vadd.xlane.f32.xlu0 %v9367_v55  ;;  %9389 = vadd.xlane.f32.xlu1 %v9388_v57  ;;  %v9530_v55 = vrot.slane %v9069_v30, %v17093_v5  ;;  %v9571_v30 = vrot.slane %v17013_v15, %v17093_v5  ;;  %v9639_v15 = vrot.slane %v17027_v8, %v17093_v5 }
 0xcd9   : > { %v17059_v52 = vpop.xlane.xlu0 %9320  ;;  %v17061_v13 = vpop.xlane.xlu1 %9152 }
 0xcdc   : > { %9224 = vadd.xlane.f32.xlu0 %v9223_v17  ;;  %9392 = vadd.xlane.f32.xlu1 %v9391_v32 }
 0xcdd   : > { %v17067_v54 = vpop.xlane.xlu0 %9173  ;;  %v9237_v59 = vpop.xlane.xlu1 %9236 }
 0xcde   : > { %v9809_v8 = vrot.slane %v9237_v59, %v17093_v5  ;;  %v9600_v59 = vrot.slane %v16791_v10, %v17086_v40 }
 0xce1   : > { %v17073_v3 = vpop.xlane.xlu0 %9362  ;;  %v17075_v24 = vpop.xlane.xlu1 %9299 }
 0xce5   : > { %v17088_v46 = vpop.xlane.xlu1 %9341  ;;  %v9063_v19 = vpop.xlane.xlu0 %9062 }
 0xce6   : > { %v9516_v31 = vrot.slane %v9063_v19, %v17083_v43 }
 0xce8   : > { %v9518_v57 = vsel %vm9517_vm0, %v9516_v31, %v9511_v29 }
 0xce9   : > { %v9525_v26 = vsel %vm9524_vm14, %v9523_v1, %v9518_v57  ;;  %v17101_v47 = vpop.xlane.xlu1 %9194  ;;  %v9084_v17 = vpop.xlane.xlu0 %9083 }
 0xcea   : > { %v9561_v32 = vrot.slane %v9084_v17, %v17083_v43  ;;  %v17107_v35 = vsel %vm9531_vm1, %v9530_v55, %v9525_v26 }
 0xcec   : > { %v9562_v27 = vsel %vm9517_vm0, %v9561_v32, %v9557_v51 }
 0xced   : > { %v9567_v61 = vsel %vm9524_vm14, %v9566_v11, %v9562_v27  ;;  %v17115_v19 = vpop.xlane.xlu1 %9215  ;;  %v9126_v29 = vpop.xlane.xlu0 %9125 }
 0xcee   : > { %v9629_v31 = vrot.slane %v9126_v29, %v17083_v43  ;;  %v17121_v1 = vsel %vm9531_vm1, %v9571_v30, %v9567_v61  ;;  %v9591_v30 = vrot.slane %v16897_v63, %v17079_v14  ;;  %v9838_v63 = vrot.slane %v16824_v50, %v17086_v40 }
 0xcf0   : > { %v9630_v55 = vsel %vm9517_vm0, %v9629_v31, %v9625_v36 }
 0xcf1   : > { %v9635_v57 = vsel %vm9524_vm14, %v9634_v41, %v9630_v55  ;;  %v17129_v26 = vpop.xlane.xlu1 %9383  ;;  %v9231_v17 = vpop.xlane.xlu0 %9230  ;;  %v9843_v41 = vrot.slane %v17039_v58, %v17093_v5 }
 0xcf2   : > { %v9799_v51 = vrot.slane %v9231_v17, %v17083_v43  ;;  %v17135_v32 = vsel %vm9531_vm1, %v9639_v15, %v9635_v57  ;;  %v9605_v15 = vrot.slane %v17053_v20, %v17093_v5  ;;  %v9659_v57 = vrot.slane %v16915_v62, %v17079_v14 }
 0xcf3   : > { %v9863_v17 = vrot.slane %v16997_v2, %v17079_v14  ;;  %v9668_v62 = vrot.slane %v16806_v34, %v17086_v40  ;;  %v9872_v2 = vrot.slane %v16854_v22, %v17086_v40 }
 0xcf4   : > { %v9800_v11 = vsel %vm9517_vm0, %v9799_v51, %v9795_v0 }
 0xcf5   : > { %v9805_v27 = vsel %vm9524_vm14, %v9804_v45, %v9800_v11  ;;  %v9105_v61 = vpop.xlane.xlu1 %9104  ;;  %v9252_v29 = vpop.xlane.xlu0 %9251  ;;  %v9877_v11 = vrot.slane %v17051_v25, %v17093_v5 }
 0xcf6   : > { %v9595_v36 = vrot.slane %v9105_v61, %v17083_v43  ;;  %v9833_v31 = vrot.slane %v9252_v29, %v17083_v43  ;;  %v17149_v49 = vsel %vm9531_vm1, %v9809_v8, %v9805_v27  ;;  %v9897_v29 = vrot.slane %v16929_v39, %v17079_v14 }
 0xcf7   : > { %v9906_v39 = vrot.slane %v16868_v56, %v17086_v40 }
 0xcf8   : > { %v9596_v44 = vsel %vm9517_vm0, %v9595_v36, %v9591_v30  ;;  %v9834_v55 = vsel %vm9517_vm0, %v9833_v31, %v9829_v7  ;;  %v9673_v30 = vrot.slane %v17061_v13, %v17093_v5  ;;  %v9965_v7 = vrot.slane %v17011_v60, %v17079_v14 }
 0xcf9   : > { %v9601_v10 = vsel %vm9524_vm14, %v9600_v59, %v9596_v44  ;;  %v9839_v50 = vsel %vm9524_vm14, %v9838_v63, %v9834_v55  ;;  %v9147_v0 = vpop.xlane.xlu1 %9146  ;;  %v9273_v51 = vpop.xlane.xlu0 %9272  ;;  %v9974_v60 = vrot.slane %v16895_v6, %v17086_v40 }
 0xcfa   : > { %v9663_v58 = vrot.slane %v9147_v0, %v17083_v43  ;;  %v9867_v20 = vrot.slane %v9273_v51, %v17083_v43  ;;  %v17170_v45 = vsel %vm9531_vm1, %v9605_v15, %v9601_v10  ;;  %v17173_v8 = vsel %vm9531_vm1, %v9843_v41, %v9839_v50 }
 0xcfb   : > { %v9911_v41 = vrot.slane %v17075_v24, %v17093_v5  ;;  %v9979_v15 = vrot.slane %v17088_v46, %v17093_v5 }
 0xcfc   : > { %v9664_v27 = vsel %vm9517_vm0, %v9663_v58, %v9659_v57  ;;  %v9868_v61 = vsel %vm9517_vm0, %v9867_v20, %v9863_v17  ;;  %v9931_v57 = vrot.slane %v16943_v16, %v17079_v14  ;;  %v10033_v17 = vrot.slane %v17025_v53, %v17079_v14 }
 0xcfd   : > { %v9669_v34 = vsel %vm9524_vm14, %v9668_v62, %v9664_v27  ;;  %v9873_v22 = vsel %vm9524_vm14, %v9872_v2, %v9868_v61  ;;  %v9294_v36 = vpop.xlane.xlu1 %9293  ;;  %v9336_v31 = vpop.xlane.xlu0 %9335  ;;  %v9940_v16 = vrot.slane %v16838_v48, %v17086_v40  ;;  %v10042_v53 = vrot.slane %v16927_v23, %v17086_v40 }
 0xcfe   : > { %v9901_v25 = vrot.slane %v9294_v36, %v17083_v43  ;;  %v9969_v13 = vrot.slane %v9336_v31, %v17083_v43  ;;  %v17194_v59 = vsel %vm9531_vm1, %v9673_v30, %v9669_v34  ;;  %v17197_v63 = vsel %vm9531_vm1, %v9877_v11, %v9873_v22 }
 0xcff   : > { %v9945_v58 = vrot.slane %v17059_v52, %v17093_v5  ;;  %v10047_v20 = vrot.slane %v17129_v26, %v17093_v5  ;;  %v9693_v48 = vrot.slane %v16957_v33, %v17079_v14  ;;  %v9727_v31 = vrot.slane %v16971_v4, %v17079_v14 }
 0xd00   : > { %v9902_v44 = vsel %vm9517_vm0, %v9901_v25, %v9897_v29  ;;  %v9970_v55 = vsel %vm9517_vm0, %v9969_v13, %v9965_v7  ;;  %v9702_v29 = vrot.slane %v16880_v12, %v17086_v40  ;;  %v9707_v7 = vrot.slane %v17067_v54, %v17093_v5 }
 0xd01   : > { %v9907_v56 = vsel %vm9524_vm14, %v9906_v39, %v9902_v44  ;;  %v9975_v6 = vsel %vm9524_vm14, %v9974_v60, %v9970_v55  ;;  %v9315_v10 = vpop.xlane.xlu1 %9314  ;;  %v9378_v50 = vpop.xlane.xlu0 %9377  ;;  %v9736_v12 = vrot.slane %v16913_v9, %v17086_v40  ;;  %v9741_v54 = vrot.slane %v17101_v47, %v17093_v5 }
 0xd02   : > { %v9935_v24 = vrot.slane %v9315_v10, %v17083_v43  ;;  %v10037_v46 = vrot.slane %v9378_v50, %v17083_v43  ;;  %v17218_v0 = vsel %vm9531_vm1, %v9911_v41, %v9907_v56  ;;  %v17221_v51 = vsel %vm9531_vm1, %v9979_v15, %v9975_v6 }
 0xd03   : > { %v9999_v4 = vrot.slane %v16985_v28, %v17079_v14  ;;  %v10008_v9 = vrot.slane %v16852_v42, %v17086_v40  ;;  %v10013_v47 = vrot.slane %v17073_v3, %v17093_v5  ;;  %v9761_v28 = vrot.slane %v16999_v21, %v17079_v14 }
 0xd04   : > { %v9936_v62 = vsel %vm9517_vm0, %v9935_v24, %v9931_v57  ;;  %v10038_v2 = vsel %vm9517_vm0, %v10037_v46, %v10033_v17  ;;  %v9770_v42 = vrot.slane %v16866_v38, %v17086_v40  ;;  %v9775_v3 = vrot.slane %v17115_v19, %v17093_v5 }
 0xd05   : > { %v9941_v11 = vsel %vm9524_vm14, %v9940_v16, %v9936_v62  ;;  %v10043_v30 = vsel %vm9524_vm14, %v10042_v53, %v10038_v2  ;;  %v9168_v27 = vpop.xlane.xlu1 %9167  ;;  %v17235_v61 = vpop.xlane.xlu0 %9077 }
 0xd06   : > { %v9697_v23 = vrot.slane %v9168_v27, %v17083_v43  ;;  %v17241_v52 = vsel %vm9531_vm1, %v10047_v20, %v10043_v30  ;;  %v17244_v26 = vsel %vm9531_vm1, %v9945_v58, %v9941_v11 }
 0xd08   : > { %v9698_v34 = vsel %vm9517_vm0, %v9697_v23, %v9693_v48 }
 0xd09   : > { %v9703_v22 = vsel %vm9524_vm14, %v9702_v29, %v9698_v34  ;;  %v9189_v36 = vpop.xlane.xlu1 %9188  ;;  %v17252_v33 = vpop.xlane.xlu0 %9119 }
 0xd0a   : > { %v9731_v25 = vrot.slane %v9189_v36, %v17083_v43  ;;  %v17258_v13 = vsel %vm9531_vm1, %v9707_v7, %v9703_v22  ;;  %v9533_v7 = vadd.s32 4294967264, %v17063_v18  ;;  %v9540_v36 = vadd.s32 4294967256, %v17063_v18 }
 0xd0c   : > { %v9732_v39 = vsel %vm9517_vm0, %v9731_v25, %v9727_v31  ;;  %v9547_v31 = vadd.s32 4294967248, %v17063_v18  ;;  %v17327_v25 = vsub.s32 %v9533_v7, %v17070_v37 }
 0xd0d   : > { %v9737_v60 = vsel %vm9524_vm14, %v9736_v12, %v9732_v39  ;;  %v9357_v41 = vpop.xlane.xlu1 %9356  ;;  %v17266_v15 = vpop.xlane.xlu0 %9245  ;;  %v17334_v39 = vsub.s32 %v9540_v36, %v17070_v37 }
 0xd0e   : > { %v10003_v44 = vrot.slane %v9357_v41, %v17083_v43  ;;  %v17272_v55 = vsel %vm9531_vm1, %v9741_v54, %v9737_v60  ;;  %v17337_v60 = vsub.s32 %v9547_v31, %v17070_v37 }
 0xd10   : > { %v10004_v57 = vsel %vm9517_vm0, %v10003_v44, %v9999_v4 }
 0xd11   : > { %v10009_v17 = vsel %vm9524_vm14, %v10008_v9, %v10004_v57  ;;  %v9210_v56 = vpop.xlane.xlu1 %9209  ;;  %v17280_v6 = vpop.xlane.xlu0 %9287  ;;  %v9551_v9 = vrot.slane %v17235_v61, %v17337_v60 }
 0xd12   : > { %v9765_v10 = vrot.slane %v9210_v56, %v17083_v43  ;;  %v17286_v50 = vsel %vm9531_vm1, %v10013_v47, %v10009_v17 }
 0xd14   : > { %v9766_v24 = vsel %vm9517_vm0, %v9765_v10, %v9761_v28 }
 0xd15   : > { %v9771_v46 = vsel %vm9524_vm14, %v9770_v42, %v9766_v24  ;;  %v17294_v16 = vpop.xlane.xlu1 %9098  ;;  %v17296_v53 = vpop.xlane.xlu0 %9161  ;;  %v9620_v42 = vrot.slane %v17252_v33, %v17337_v60 }
 0xd16   : > { %v17299_v21 = vsel %vm9531_vm1, %v9775_v3, %v9771_v46 }
 0xd19   : > { %v17301_v14 = vpop.xlane.xlu1 %9140  ;;  %v17303_v43 = vpop.xlane.xlu0 %9329 }
 0xd1d   : > { %v9267_v58 = vpop.xlane.xlu1 %9266  ;;  %v17305_v38 = vpop.xlane.xlu0 %9182 }
 0xd1e   : > { %v9858_v7 = vrot.slane %v9267_v58, %v17337_v60 }
 0xd21   : > { %v9309_v40 = vpop.xlane.xlu1 %9308  ;;  %v17307_v5 = vpop.xlane.xlu0 %9203 }
 0xd25   : > { %v17309_v19 = vpop.xlane.xlu1 %9350  ;;  %v17311_v20 = vpop.xlane.xlu0 %9371 }
 0xd29   : > { %v17313_v62 = vpop.xlane.xlu1 %9092  ;;  %v9072_v2 = vpop.xlane.xlu0 %9071 }
 0xd2a   : > { %v9537_v41 = vrot.slane %v9072_v2, %v17327_v25  ;;  %v9576_v58 = vrot.slane %v17313_v62, %v17327_v25 }
 0xd2c   : > { %v9539_v47 = vsel %vm9538_vm2, %v9537_v41, %v17107_v35 }
 0xd2d   : > { %v17315_v11 = vpop.xlane.xlu1 %9134  ;;  %v9114_v30 = vpop.xlane.xlu0 %9113 }
 0xd2e   : > { %v9610_v57 = vrot.slane %v9114_v30, %v17327_v25 }
 0xd30   : > { %v9611_v61 = vsel %vm9538_vm2, %v9610_v57, %v17170_v45 }
 0xd31   : > { %v9261_v27 = vpop.xlane.xlu1 %9260  ;;  %v9156_v48 = vpop.xlane.xlu0 %9155 }
 0xd32   : > { %v9848_v3 = vrot.slane %v9261_v27, %v17327_v25 }
 0xd34   : > { %v9849_v36 = vsel %vm9538_vm2, %v9848_v3, %v17173_v8  ;;  %v9654_v3 = vrot.slane %v17301_v14, %v17337_v60 }
 0xd35   : > { %v9303_v23 = vpop.xlane.xlu1 %9302  ;;  %v17317_v29 = vpop.xlane.xlu0 %9239 }
 0xd36   : > { %v9916_v33 = vrot.slane %v9303_v23, %v17327_v25 }
 0xd38   : > { %v9917_v8 = vsel %vm9538_vm2, %v9916_v33, %v17218_v0  ;;  %v9577_v0 = vsel %vm9538_vm2, %v9576_v58, %v17121_v1  ;;  %v9722_v1 = vrot.slane %v17305_v38, %v17337_v60 }
 0xd39   : > { %v17320_v34 = vpop.xlane.xlu1 %9344  ;;  %v17322_v22 = vpop.xlane.xlu0 %9281 }
 0xd3a   : > { %v9984_v38 = vrot.slane %v17320_v34, %v17327_v25 }
 0xd3d   : > { %v17329_v12 = vpop.xlane.xlu1 %9386  ;;  %v17331_v54 = vpop.xlane.xlu0 %9323 }
 0xd41   : > { %v17340_v4 = vpop.xlane.xlu0 %9176  ;;  %v9075_v18 = vpop.xlane.xlu1 %9074 }
 0xd42   : > { %v9544_v44 = vrot.slane %v9075_v18, %v17334_v39 }
 0xd44   : > { %v9546_v37 = vsel %vm9545_vm4, %v9544_v44, %v9539_v47  ;;  %v9926_v44 = vrot.slane %v9309_v40, %v17337_v60  ;;  %v9688_v40 = vrot.slane %v17296_v53, %v17337_v60 }
 0xd45   : > { %v9553_v17 = vsel %vm9552_vm5, %v9551_v9, %v9546_v37  ;;  %v17350_v56 = vpop.xlane.xlu0 %9197  ;;  %v9117_v28 = vpop.xlane.xlu1 %9116  ;;  %v9678_v9 = vrot.slane %v9156_v48, %v17327_v25 }
 0xd46   : > { %v9615_v10 = vrot.slane %v9117_v28, %v17334_v39  ;;  %v9586_v28 = vrot.slane %v17294_v16, %v17337_v60 }
 0xd48   : > { %v9616_v35 = vsel %vm9545_vm4, %v9615_v10, %v9611_v61  ;;  %v9644_v10 = vrot.slane %v17315_v11, %v17327_v25  ;;  %v9712_v61 = vrot.slane %v17340_v4, %v17327_v25  ;;  %v9814_v4 = vrot.slane %v17317_v29, %v17327_v25 }
 0xd49   : > { %v9621_v24 = vsel %vm9552_vm5, %v9620_v42, %v9616_v35  ;;  %v17360_v46 = vpop.xlane.xlu0 %9365  ;;  %v9264_v2 = vpop.xlane.xlu1 %9263  ;;  %v9679_v42 = vsel %vm9538_vm2, %v9678_v9, %v17194_v59 }
 0xd4a   : > { %v9853_v30 = vrot.slane %v9264_v2, %v17334_v39  ;;  %v9645_v14 = vsel %vm9538_vm2, %v9644_v10, %v17135_v32  ;;  %v9713_v33 = vsel %vm9538_vm2, %v9712_v61, %v17258_v13  ;;  %v9994_v32 = vrot.slane %v17309_v19, %v17337_v60 }
 0xd4b   : > { %v9882_v19 = vrot.slane %v17322_v22, %v17327_v25  ;;  %v9892_v22 = vrot.slane %v17280_v6, %v17337_v60 }
 0xd4c   : > { %v9854_v45 = vsel %vm9545_vm4, %v9853_v30, %v9849_v36 }
 0xd4d   : > { %v17369_v27 = vsel %vm9552_vm5, %v9858_v7, %v9854_v45  ;;  %v17371_v31 = vpop.xlane.xlu0 %9218  ;;  %v9306_v41 = vpop.xlane.xlu1 %9305  ;;  %v9883_v61 = vsel %vm9538_vm2, %v9882_v19, %v17197_v63 }
 0xd4e   : > { %v9921_v18 = vrot.slane %v9306_v41, %v17334_v39 }
 0xd50   : > { %v9922_v23 = vsel %vm9545_vm4, %v9921_v18, %v9917_v8 }
 0xd51   : > { %v17382_v47 = vsel %vm9552_vm5, %v9926_v44, %v9922_v23  ;;  %v9096_v57 = vpop.xlane.xlu0 %9095  ;;  %v9159_v37 = vpop.xlane.xlu1 %9158  ;;  %v9746_v23 = vrot.slane %v17350_v56, %v17327_v25 }
 0xd52   : > { %v9581_v62 = vrot.slane %v9096_v57, %v17334_v39  ;;  %v9683_v48 = vrot.slane %v9159_v37, %v17334_v39 }
 0xd54   : > { %v9582_v16 = vsel %vm9545_vm4, %v9581_v62, %v9577_v0  ;;  %v9684_v53 = vsel %vm9545_vm4, %v9683_v48, %v9679_v42  ;;  %v9756_v42 = vrot.slane %v17307_v5, %v17337_v60 }
 0xd55   : > { %v9587_v11 = vsel %vm9552_vm5, %v9586_v28, %v9582_v16  ;;  %v9689_v35 = vsel %vm9552_vm5, %v9688_v40, %v9684_v53  ;;  %v9138_v59 = vpop.xlane.xlu0 %9137  ;;  %v9180_v2 = vpop.xlane.xlu1 %9179  ;;  %v9950_v16 = vrot.slane %v17331_v54, %v17327_v25  ;;  %v9747_v53 = vsel %vm9538_vm2, %v9746_v23, %v17272_v55 }
 0xd56   : > { %v10065_v30 = vsel %vm10064_vm6, %v9587_v11, %v9553_v17  ;;  %v9649_v7 = vrot.slane %v9138_v59, %v17334_v39  ;;  %v9717_v36 = vrot.slane %v9180_v2, %v17334_v39  ;;  %v9824_v17 = vrot.slane %v17266_v15, %v17337_v60 }
 0xd57   : > { %v10067_v45 = vsel %vm10066_vm15, %v9621_v24, %v10065_v30  ;;  %v9815_v24 = vsel %vm9538_vm2, %v9814_v4, %v17149_v49  ;;  %v9985_v15 = vsel %vm9538_vm2, %v9984_v38, %v17221_v51  ;;  %v9960_v54 = vrot.slane %v17303_v43, %v17337_v60 }
 0xd58   : > { %v9650_v41 = vsel %vm9545_vm4, %v9649_v7, %v9645_v14  ;;  %v9718_v29 = vsel %vm9545_vm4, %v9717_v36, %v9713_v33  ;;  %v9951_v55 = vsel %vm9538_vm2, %v9950_v16, %v17244_v26  ;;  %v10018_v2 = vrot.slane %v17360_v46, %v17327_v25 }
 0xd59   : > { %v9655_v18 = vsel %vm9552_vm5, %v9654_v3, %v9650_v41  ;;  %v9723_v34 = vsel %vm9552_vm5, %v9722_v1, %v9718_v29  ;;  %v9243_v44 = vpop.xlane.xlu0 %9242  ;;  %v9348_v13 = vpop.xlane.xlu1 %9347  ;;  %v10052_v7 = vrot.slane %v17329_v12, %v17327_v25  ;;  %v10028_v43 = vrot.slane %v17311_v20, %v17337_v60 }
 0xd5a   : > { %v10069_v58 = vsel %vm10068_vm7, %v9655_v18, %v10067_v45  ;;  %v9819_v9 = vrot.slane %v9243_v44, %v17334_v39  ;;  %v9989_v8 = vrot.slane %v9348_v13, %v17334_v39  ;;  %v9780_v26 = vrot.slane %v17371_v31, %v17327_v25 }
 0xd5b   : > { %v10071_v57 = vsel %vm10070_vm8, %v9689_v35, %v10069_v58  ;;  %v10053_v20 = vsel %vm9538_vm2, %v10052_v7, %v17241_v52 }
 0xd5c   : > { %v9820_v37 = vsel %vm9545_vm4, %v9819_v9, %v9815_v24  ;;  %v9990_v49 = vsel %vm9545_vm4, %v9989_v8, %v9985_v15  ;;  %v10073_v28 = vsel %vm10072_vm9, %v9723_v34, %v10071_v57  ;;  %v10094_v8 = vld [vmem:[%s17528_s13 + $0x8] sm:$0xff] }
 0xd5d   : > { %v9825_v40 = vsel %vm9552_vm5, %v9824_v17, %v9820_v37  ;;  %v9995_v62 = vsel %vm9552_vm5, %v9994_v32, %v9990_v49  ;;  %v9285_v48 = vpop.xlane.xlu0 %9284  ;;  %v9201_v51 = vpop.xlane.xlu1 %9200 }
 0xd5e   : > { %v10078_v56 = vsel %vm10064_vm6, %v17369_v27, %v9825_v40  ;;  %v9887_v0 = vrot.slane %v9285_v48, %v17334_v39  ;;  %v9751_v10 = vrot.slane %v9201_v51, %v17334_v39 }
 0xd60   : > { %v9888_v6 = vsel %vm9545_vm4, %v9887_v0, %v9883_v61  ;;  %v9752_v27 = vsel %vm9545_vm4, %v9751_v10, %v9747_v53 }
 0xd61   : > { %v9893_v3 = vsel %vm9552_vm5, %v9892_v22, %v9888_v6  ;;  %v9327_v1 = vpop.xlane.xlu0 %9326  ;;  %v9222_v11 = vpop.xlane.xlu1 %9221  ;;  %v9757_v35 = vsel %vm9552_vm5, %v9756_v42, %v9752_v27 }
 0xd62   : > { %v10079_v5 = vsel %vm10066_vm15, %v9893_v3, %v10078_v56  ;;  %v9955_v63 = vrot.slane %v9327_v1, %v17334_v39  ;;  %v10075_v59 = vsel %vm10074_vm10, %v9757_v35, %v10073_v28  ;;  %v9785_v45 = vrot.slane %v9222_v11, %v17334_v39 }
 0xd63   : > { %v10080_v4 = vsel %vm10068_vm7, %v17382_v47, %v10079_v5  ;;  %v10019_v47 = vsel %vm9538_vm2, %v10018_v2, %v17286_v50  ;;  %v9781_v50 = vsel %vm9538_vm2, %v9780_v26, %v17299_v21 }
 0xd64   : > { %v9956_v30 = vsel %vm9545_vm4, %v9955_v63, %v9951_v55  ;;  %v9786_v34 = vsel %vm9545_vm4, %v9785_v45, %v9781_v50 }
 0xd65   : > { %v9961_v36 = vsel %vm9552_vm5, %v9960_v54, %v9956_v30  ;;  %v9369_v14 = vpop.xlane.xlu0 %9368  ;;  %v9390_v38 = vpop.xlane.xlu1 %9389 }
 0xd66   : > { %v10023_v46 = vrot.slane %v9369_v14, %v17334_v39  ;;  %v10081_v33 = vsel %vm10070_vm8, %v9961_v36, %v10080_v4  ;;  %v10057_v12 = vrot.slane %v9390_v38, %v17334_v39 }
 0xd67   : > { %v10082_v41 = vsel %vm10072_vm9, %v9995_v62, %v10081_v33 }
 0xd68   : > { %v10024_v29 = vsel %vm9545_vm4, %v10023_v46, %v10019_v47  ;;  %v10058_v44 = vsel %vm9545_vm4, %v10057_v12, %v10053_v20 }
 0xd69   : > { %v9225_v17 = vpop.xlane.xlu0 %9224  ;;  %v9393_v25 = vpop.xlane.xlu1 %9392  ;;  %v10029_v31 = vsel %vm9552_vm5, %v10028_v43, %v10024_v29 }
 0xd6a   : > { %v9790_v32 = vrot.slane %v9225_v17, %v17337_v60  ;;  %v10062_v39 = vrot.slane %v9393_v25, %v17337_v60  ;;  %v10083_v18 = vsel %vm10074_vm10, %v10029_v31, %v10082_v41  ;;  %v10093_v60 = vld [vmem:[%s17528_s13] sm:$0xff] }
 0xd6c   : > { %v9791_v52 = vsel %vm9552_vm5, %v9790_v32, %v9786_v34  ;;  %v10063_v13 = vsel %vm9552_vm5, %v10062_v39, %v10058_v44 }
 0xd6d   : > { %v10077_v24 = vsel %vm10076_vm11, %v9791_v52, %v10075_v59  ;;  %v10084_v58 = vsel %vm10076_vm11, %v10063_v13, %v10083_v18 }
 0xd6e   : > { %v10087_v9 = vsel %vm7353_vm3, %v10077_v24, 0.0  ;;  %v10090_v21 = vsel %vm7353_vm3, %v10084_v58, 0.0 }
 0xd6f   : > { %10088 = vadd.xlane.f32.xlu0 %v10087_v9  ;;  %10091 = vadd.xlane.f32.xlu1 %v10090_v21 }
 0xdfc   : > { %v10089_v15 = vpop.xlane.xlu0 %10088  ;;  %v10092_v19 = vpop.xlane.xlu1 %10091 }
 0xdfd   : > { %v10095_v23 = vadd.f32 %v10093_v60, %v10089_v15  ;;  %v10096_v57 = vadd.f32 %v10094_v8, %v10092_v19 }
 0xdff   : > { %10098 = vst.msk [vmem:[%s467_s24] sm:$0xff] %vm10097_vm12, %v10095_v23  ;;  %10099 = vst.msk [vmem:[%s467_s24 + $0x8] sm:$0xff] %vm10097_vm12, %v10096_v57 }
 0xe00 PF: > { %s24_s29 = sadd.s32 1, %s12789_s29  }
 0xe01   : > { %p21_p4 = scmp.ge.s32.totalorder %s24_s29, 4  }
 0xe03   :  { %23 = sbr.rel (!%p21_p4) target bundleno = 1 (0x1), region = 106 }

</bundles_post_ra>
